<compile_context>
chip_gen: v6e
topology: v6e:2x2x1
jax: 0.10.0
libtpu: 0.0.40
codegen_flags: <defaults>
</compile_context>

<pallas_src>
import functools

import numpy as np
import jax
import jax.numpy as jnp
from jax import lax
from jax.experimental import pallas as pl
from jax.experimental.pallas import tpu as pltpu


def _upsample_kernel(x_ref, xt_ref, xb_ref, w_ref, b_ref, o_ref, *,
                     cin, cout, r, tile_h, width, cdtype):
    """One (batch, row-tile) step of Conv3x3(s=1, p=1) + PixelShuffle(r).

    x_ref : (Cin, TH, W)        rows [i*TH, i*TH+TH) of one image
    xt_ref: (Cin, 8, W)         8-row block containing the row above the tile
    xb_ref: (Cin, 8, W)         8-row block containing the row below the tile
    w_ref : (3, K, 3*Cin)       per-ky weight matrices, K = Cout*r*r, col = kx*Cin + c
    b_ref : (K, 1)              f32 bias
    o_ref : (Cout, TH*r, W*r)   pixel-shuffled NCHW output tile (dense block)
    """
    th, w = tile_h, width
    k = cout * r * r
    i_h = pl.program_id(1)
    nh = pl.num_programs(1)

    # --- vertical halo rows, zeroed at the image border (== conv zero padding) ---
    # Only the matmul operands are cast to the compute dtype (bf16 path): the cast
    # happens here on MXU-bound data, not as a separate wrapper HBM pass.
    mid = x_ref[...].astype(cdtype)
    top = (xt_ref[:, 7:8, :]
           * jnp.where(i_h == 0, 0, 1).astype(xt_ref.dtype)).astype(cdtype)
    bot = (xb_ref[:, 0:1, :]
           * jnp.where(i_h == nh - 1, 0, 1).astype(xb_ref.dtype)).astype(cdtype)

    # --- three horizontal (kx) variants of the (TH+2)-row column -----------------
    colv = jnp.concatenate([top, mid, bot], axis=1)              # (Cin, TH+2, W)
    zc = jnp.zeros((cin, th + 2, 1), cdtype)
    left = jnp.concatenate([zc, colv[:, :, :w - 1]], axis=2)     # holds col x-1 (kx=0)
    right = jnp.concatenate([colv[:, :, 1:], zc], axis=2)        # holds col x+1 (kx=2)
    big = jnp.concatenate([left, colv, right], axis=0)           # (3*Cin, TH+2, W)

    # --- 3 accumulating MXU matmuls (one per ky), contraction = 3*Cin, f32 acc ---
    acc = jnp.zeros((k, th, w), jnp.float32)
    for dy in range(3):
        acc += jnp.einsum('kt,tab->kab', w_ref[dy], big[:, dy:dy + th, :],
                          preferred_element_type=jnp.float32)
    acc += b_ref[...][:, :, None]                                # bias, f32

    # --- fused PixelShuffle(r): k = c*r*r + i*r + j -> out[c, t*r+i, x*r+j] -------
    ocr = acc.reshape(cout, r, r, th, w)                         # (C, r, r, TH, W)
    for i in range(r):
        # interleave the r sub-pixel columns j into the lane dim: (Cout, TH, W*r)
        lane = jnp.stack([ocr[:, i, j] for j in range(r)], axis=-1)
        lane = lane.reshape(cout, th, w * r)
        # sublane-strided store of sub-pixel row i straight into the dense
        # (Cout, TH*r, W*r) output block -- no r-sized (<8) block dim anywhere.
        o_ref[:, pl.ds(i, th, stride=r), :] = lane.astype(o_ref.dtype)


def _pick_tile_h(h, w, cin, k, n, in_bytes, cmp_bytes, out_bytes,
                 vmem_budget_bytes):
    """Largest row-tile TH (multiple of 8, dividing H) whose per-step VMEM footprint
    (double-buffered I/O blocks + in-kernel temporaries) fits the budget.  When
    N == 1, prefer >= 2 row tiles so both TensorCores (v7x) get work."""
    cands = [t for t in range(8, h + 1, 8) if h % t == 0]
    if not cands:
        return h

    def footprint(th):
        main_in = 2 * cin * th * w * in_bytes              # main tile, double-buffered
        halo_in = 2 * 2 * cin * 8 * w * in_bytes           # two 8-row halos, dbl-buffered
        out_blk = 2 * k * th * w * out_bytes               # (Cout, TH*r, W*r), dbl-buffered
        im2col = 2 * 3 * cin * (th + 2) * w * cmp_bytes    # colv/left/right + axis-0 concat
        acc_f32 = k * th * w * 4                           # f32 accumulator
        shuffle = 2 * k * th * w * 4                       # pixel-shuffle temporaries headroom
        return main_in + halo_in + out_blk + im2col + acc_f32 + shuffle

    fit = [t for t in cands if footprint(t) <= vmem_budget_bytes]
    th = max(fit) if fit else min(cands)
    if n == 1 and th == h:
        smaller = [t for t in cands if t < h]
        if smaller:                      # guarantee >=2 parallel grid steps for N == 1
            th = max(smaller)
    return th


def upsample_forward(x_nchw, weight_oihw, bias, stride, *,
                     compute_dtype=None, tile_h=None,
                     vmem_budget_bytes=40 * 1024 * 1024):
    """Conv2d(Cin, Cout*stride^2, 3, 1, 1) + PixelShuffle(stride); NCHW in / NCHW out.

    compute_dtype=jnp.bfloat16 casts only the MXU matmul operands inside the kernel
    (f32 accumulation, f32 bias/shuffle); the output keeps x's dtype.  The default
    VMEM budget (40 MiB) is v7x-safe; raise it (bigger TH) on v5e/v6e (128 MiB VMEM).
    """
    n, cin, h, w = x_nchw.shape
    kk, ci, kh, kw = weight_oihw.shape
    r = int(stride)
    cout = kk // (r * r)
    assert (ci, kh, kw) == (cin, 3, 3)
    assert cout * r * r == kk
    assert h % 8 == 0, "H must be a multiple of 8 (sublane tiling of the halo blocks)"
    assert w >= 2

    cdtype = np.dtype(compute_dtype) if compute_dtype is not None else np.dtype(x_nchw.dtype)
    out_dtype = x_nchw.dtype
    in_bytes = np.dtype(x_nchw.dtype).itemsize
    cmp_bytes = cdtype.itemsize
    out_bytes = np.dtype(out_dtype).itemsize

    th = tile_h if tile_h is not None else _pick_tile_h(
        h, w, cin, kk, n, in_bytes, cmp_bytes, out_bytes, vmem_budget_bytes)
    assert h % th == 0 and th % 8 == 0
    nh = h // th
    hb = h // 8          # number of 8-row blocks along H (halo specs)
    thb = th // 8

    # (K, Cin, 3, 3) -> (ky, K, kx, Cin) -> (3, K, 3*Cin): column = kx*Cin + c,
    # matching the kernel's [left | center | right] channel stacking.  Tiny array.
    wmat = jnp.transpose(weight_oihw, (2, 0, 3, 1)).reshape(3, kk, 3 * cin).astype(cdtype)
    b2 = bias.reshape(kk, 1).astype(jnp.float32)

    kernel = functools.partial(_upsample_kernel, cin=cin, cout=cout, r=r,
                               tile_h=th, width=w, cdtype=cdtype)

    flops = 2 * n * h * w * kk * 9 * cin
    bytes_accessed = (n * cin * h * w * in_bytes          # input (halo re-reads add ~16/TH)
                      + wmat.size * cmp_bytes + kk * 4    # weights + bias
                      + n * kk * h * w * out_bytes)       # output
    vmem_limit = max(48 * 1024 * 1024, int(vmem_budget_bytes * 1.2))

    return pl.pallas_call(
        kernel,
        out_shape=jax.ShapeDtypeStruct((n, cout, h * r, w * r), out_dtype),
        grid=(n, nh),
        in_specs=[
            pl.BlockSpec((None, cin, th, w), lambda b, i: (b, 0, i, 0)),
            pl.BlockSpec((None, cin, 8, w),
                         lambda b, i: (b, 0, jnp.maximum(i * thb - 1, 0), 0)),
            pl.BlockSpec((None, cin, 8, w),
                         lambda b, i: (b, 0, jnp.minimum((i + 1) * thb, hb - 1), 0)),
            pl.BlockSpec((3, kk, 3 * cin), lambda b, i: (0, 0, 0)),
            pl.BlockSpec((kk, 1), lambda b, i: (0, 0)),
        ],
        out_specs=pl.BlockSpec((None, cout, th * r, w * r),
                               lambda b, i: (b, 0, i, 0)),
        compiler_params=pltpu.CompilerParams(
            dimension_semantics=("parallel", "parallel"),
            vmem_limit_bytes=vmem_limit),
        cost_estimate=pl.CostEstimate(flops=flops, transcendentals=0,
                                      bytes_accessed=bytes_accessed),
    )(x_nchw, x_nchw, x_nchw, wmat, b2)


def reference_forward(x_nchw, weight_oihw, bias, stride):
    """Pure-JAX reference (lax conv + manual pixel shuffle), f32."""
    y = lax.conv_general_dilated(
        x_nchw.astype(jnp.float32), weight_oihw.astype(jnp.float32),
        window_strides=(1, 1), padding=((1, 1), (1, 1)),
        dimension_numbers=('NCHW', 'OIHW', 'NCHW'))
    y = y + bias[None, :, None, None].astype(jnp.float32)
    n, k, h, w = y.shape
    r = stride
    c = k // (r * r)
    y = y.reshape(n, c, r, r, h, w)
    y = jnp.transpose(y, (0, 1, 4, 2, 5, 3))       # (N, C, H, r, W, r)
    return y.reshape(n, c, h * r, w * r)


if __name__ == "__main__":
    # Module config (small, deterministic)
    in_channels, out_channels, stride, use_bias = 4, 4, 2, True
    k_total = out_channels * stride ** 2            # 16

    key = jax.random.PRNGKey(0)
    kx, kwt, kb = jax.random.split(key, 3)

    n, h, w = 2, 16, 16
    x = jax.random.normal(kx, (n, in_channels, h, w), dtype=jnp.float32)

    # Deterministic parameter init (kaiming-uniform-like bounds, like nn.Conv2d)
    fan_in = in_channels * 3 * 3
    wbound = (6.0 / fan_in) ** 0.5
    weight = jax.random.uniform(kwt, (k_total, in_channels, 3, 3),
                                minval=-wbound, maxval=wbound, dtype=jnp.float32)
    bbound = 1.0 / fan_in ** 0.5
    bias = (jax.random.uniform(kb, (k_total,), minval=-bbound, maxval=bbound,
                               dtype=jnp.float32)
            if use_bias else jnp.zeros((k_total,), jnp.float32))

    ref = reference_forward(x, weight, bias, stride)

    # f32 path (tight correctness check); output dtype == input dtype (f32)
    out = jax.block_until_ready(upsample_forward(x, weight, bias, stride))
    assert out.shape == (n, out_channels, h * stride, w * stride), out.shape
    assert out.dtype == x.dtype
    err = float(jnp.max(jnp.abs(out - ref)))
    assert err < 1e-4, err

    # bf16 MXU-operand path (v6e/v5e recommendation); accumulation + output stay f32
    out_bf16 = jax.block_until_ready(
        upsample_forward(x, weight, bias, stride, compute_dtype=jnp.bfloat16))
    assert out_bf16.dtype == x.dtype
    err_bf16 = float(jnp.max(jnp.abs(out_bf16 - ref)))
    assert err_bf16 < 6e-2, err_bf16

    print("KERNEL_OK")
</pallas_src>

<mosaic_0001>
module attributes {stable_mosaic.version = 11 : i64} {
  func.func @_upsample_kernel(%arg0: i32, %arg1: i32, %arg2: memref<1x4x16x16xf32, #tpu.memory_space<vmem>>, %arg3: memref<1x4x8x16xf32, #tpu.memory_space<vmem>>, %arg4: memref<1x4x8x16xf32, #tpu.memory_space<vmem>>, %arg5: memref<3x16x12xf32, #tpu.memory_space<vmem>>, %arg6: memref<16x1xf32, #tpu.memory_space<vmem>>, %arg7: memref<1x4x32x32xf32, #tpu.memory_space<vmem>>) attributes {dimension_semantics = [#tpu.dimension_semantics<parallel>, #tpu.dimension_semantics<parallel>], iteration_bounds = array<i64: 2, 1>, scalar_prefetch = 0 : i64, scratch_operands = 0 : i64, tpu.core_type = #tpu.core_type<tc>, window_params = [{transform_indices = @transform_0, window_bounds = array<i64: 1, 4, 16, 16>}, {transform_indices = @transform_1, window_bounds = array<i64: 1, 4, 8, 16>}, {transform_indices = @transform_2, window_bounds = array<i64: 1, 4, 8, 16>}, {pipeline_mode = #tpu.pipeline_mode<synchronous>, transform_indices = @transform_3, window_bounds = array<i64: 3, 16, 12>}, {pipeline_mode = #tpu.pipeline_mode<synchronous>, transform_indices = @transform_4, window_bounds = array<i64: 16, 1>}, {transform_indices = @transform_5, window_bounds = array<i64: 1, 4, 32, 32>}]} {
    %c0 = arith.constant 0 : index
    %c0_0 = arith.constant 0 : index
    %c0_1 = arith.constant 0 : index
    %c0_2 = arith.constant 0 : index
    %0 = vector.load %arg2[%c0, %c0_0, %c0_1, %c0_2] : memref<1x4x16x16xf32, #tpu.memory_space<vmem>>, vector<1x4x16x16xf32>
    %1 = vector.shape_cast %0 : vector<1x4x16x16xf32> to vector<4x16x16xf32>
    %c0_3 = arith.constant 0 : index
    %c0_4 = arith.constant 0 : index
    %c7 = arith.constant 7 : index
    %c0_5 = arith.constant 0 : index
    %2 = vector.load %arg3[%c0_3, %c0_4, %c7, %c0_5] : memref<1x4x8x16xf32, #tpu.memory_space<vmem>>, vector<1x4x1x16xf32>
    %3 = vector.shape_cast %2 : vector<1x4x1x16xf32> to vector<4x1x16xf32>
    %c0_i32 = arith.constant 0 : i32
    %4 = arith.cmpi eq, %arg1, %c0_i32 : i32
    %c0_i32_6 = arith.constant 0 : i32
    %c1_i32 = arith.constant 1 : i32
    %5 = arith.select %4, %c0_i32_6, %c1_i32 : i32
    %6 = arith.sitofp %5 : i32 to f32
    %7 = vector.broadcast %6 : f32 to vector<4x1x16xf32>
    %8 = arith.mulf %3, %7 : vector<4x1x16xf32>
    %c0_7 = arith.constant 0 : index
    %c0_8 = arith.constant 0 : index
    %c0_9 = arith.constant 0 : index
    %c0_10 = arith.constant 0 : index
    %9 = vector.load %arg4[%c0_7, %c0_8, %c0_9, %c0_10] : memref<1x4x8x16xf32, #tpu.memory_space<vmem>>, vector<1x4x1x16xf32>
    %10 = vector.shape_cast %9 : vector<1x4x1x16xf32> to vector<4x1x16xf32>
    %c0_i32_11 = arith.constant 0 : i32
    %11 = arith.cmpi eq, %arg1, %c0_i32_11 : i32
    %c0_i32_12 = arith.constant 0 : i32
    %c1_i32_13 = arith.constant 1 : i32
    %12 = arith.select %11, %c0_i32_12, %c1_i32_13 : i32
    %13 = arith.sitofp %12 : i32 to f32
    %14 = vector.broadcast %13 : f32 to vector<4x1x16xf32>
    %15 = arith.mulf %10, %14 : vector<4x1x16xf32>
    %16 = tpu.concatenate %8, %1, %15 in 1 : vector<4x1x16xf32>, vector<4x16x16xf32>, vector<4x1x16xf32> -> vector<4x18x16xf32>
    %cst = arith.constant 0.000000e+00 : f32
    %17 = vector.broadcast %cst : f32 to vector<4x18x1xf32>
    %18 = vector.extract_strided_slice %16 {offsets = [0, 0, 0], sizes = [4, 18, 15], strides = [1, 1, 1]} : vector<4x18x16xf32> to vector<4x18x15xf32>
    %19 = tpu.concatenate %17, %18 in 2 : vector<4x18x1xf32>, vector<4x18x15xf32> -> vector<4x18x16xf32>
    %20 = vector.extract_strided_slice %16 {offsets = [0, 0, 1], sizes = [4, 18, 15], strides = [1, 1, 1]} : vector<4x18x16xf32> to vector<4x18x15xf32>
    %21 = tpu.concatenate %20, %17 in 2 : vector<4x18x15xf32>, vector<4x18x1xf32> -> vector<4x18x16xf32>
    %22 = tpu.concatenate %19, %16, %21 in 0 : vector<4x18x16xf32>, vector<4x18x16xf32>, vector<4x18x16xf32> -> vector<12x18x16xf32>
    %cst_14 = arith.constant 0.000000e+00 : f32
    %23 = vector.broadcast %cst_14 : f32 to vector<16x16x16xf32>
    %c0_15 = arith.constant 0 : index
    %c0_16 = arith.constant 0 : index
    %c0_17 = arith.constant 0 : index
    %24 = vector.load %arg5[%c0_15, %c0_16, %c0_17] : memref<3x16x12xf32, #tpu.memory_space<vmem>>, vector<1x16x12xf32>
    %25 = vector.shape_cast %24 : vector<1x16x12xf32> to vector<16x12xf32>
    %26 = vector.extract_strided_slice %22 {offsets = [0, 0, 0], sizes = [12, 16, 16], strides = [1, 1, 1]} : vector<12x18x16xf32> to vector<12x16x16xf32>
    "tpu.trace_start"() <{level = 10 : i32, message = "kt,tab->kab"}> : () -> ()
    %cst_18 = arith.constant dense<0.000000e+00> : vector<16x16x16xf32>
    %27 = tpu.matmul %25, %26, %cst_18 {dimension_numbers = #tpu.dot_dimension_numbers<[1], [0], [0], [1, 2], [0, 0, 1, 1, 1, 2], [], []>} : vector<16x12xf32>, vector<12x16x16xf32>, vector<16x16x16xf32> -> vector<16x16x16xf32>
    "tpu.trace_stop"() : () -> ()
    %28 = arith.addf %23, %27 : vector<16x16x16xf32>
    %c1 = arith.constant 1 : index
    %c0_19 = arith.constant 0 : index
    %c0_20 = arith.constant 0 : index
    %29 = vector.load %arg5[%c1, %c0_19, %c0_20] : memref<3x16x12xf32, #tpu.memory_space<vmem>>, vector<1x16x12xf32>
    %30 = vector.shape_cast %29 : vector<1x16x12xf32> to vector<16x12xf32>
    %31 = vector.extract_strided_slice %22 {offsets = [0, 1, 0], sizes = [12, 16, 16], strides = [1, 1, 1]} : vector<12x18x16xf32> to vector<12x16x16xf32>
    "tpu.trace_start"() <{level = 10 : i32, message = "kt,tab->kab"}> : () -> ()
    %cst_21 = arith.constant dense<0.000000e+00> : vector<16x16x16xf32>
    %32 = tpu.matmul %30, %31, %cst_21 {dimension_numbers = #tpu.dot_dimension_numbers<[1], [0], [0], [1, 2], [0, 0, 1, 1, 1, 2], [], []>} : vector<16x12xf32>, vector<12x16x16xf32>, vector<16x16x16xf32> -> vector<16x16x16xf32>
    "tpu.trace_stop"() : () -> ()
    %33 = arith.addf %28, %32 : vector<16x16x16xf32>
    %c2 = arith.constant 2 : index
    %c0_22 = arith.constant 0 : index
    %c0_23 = arith.constant 0 : index
    %34 = vector.load %arg5[%c2, %c0_22, %c0_23] : memref<3x16x12xf32, #tpu.memory_space<vmem>>, vector<1x16x12xf32>
    %35 = vector.shape_cast %34 : vector<1x16x12xf32> to vector<16x12xf32>
    %36 = vector.extract_strided_slice %22 {offsets = [0, 2, 0], sizes = [12, 16, 16], strides = [1, 1, 1]} : vector<12x18x16xf32> to vector<12x16x16xf32>
    "tpu.trace_start"() <{level = 10 : i32, message = "kt,tab->kab"}> : () -> ()
    %cst_24 = arith.constant dense<0.000000e+00> : vector<16x16x16xf32>
    %37 = tpu.matmul %35, %36, %cst_24 {dimension_numbers = #tpu.dot_dimension_numbers<[1], [0], [0], [1, 2], [0, 0, 1, 1, 1, 2], [], []>} : vector<16x12xf32>, vector<12x16x16xf32>, vector<16x16x16xf32> -> vector<16x16x16xf32>
    "tpu.trace_stop"() : () -> ()
    %38 = arith.addf %33, %37 : vector<16x16x16xf32>
    %c0_25 = arith.constant 0 : index
    %c0_26 = arith.constant 0 : index
    %39 = vector.load %arg6[%c0_25, %c0_26] : memref<16x1xf32, #tpu.memory_space<vmem>>, vector<16x1xf32>
    %40 = vector.shape_cast %39 : vector<16x1xf32> to vector<16x1x1xf32>
    %41 = vector.broadcast %40 : vector<16x1x1xf32> to vector<16x16x16xf32>
    %42 = arith.addf %38, %41 : vector<16x16x16xf32>
    %43 = vector.shape_cast %42 : vector<16x16x16xf32> to vector<4x2x2x16x16xf32>
    %44 = vector.extract_strided_slice %43 {offsets = [0, 0, 0, 0, 0], sizes = [4, 1, 1, 16, 16], strides = [1, 1, 1, 1, 1]} : vector<4x2x2x16x16xf32> to vector<4x1x1x16x16xf32>
    %45 = vector.shape_cast %44 : vector<4x1x1x16x16xf32> to vector<4x16x16xf32>
    %46 = vector.extract_strided_slice %43 {offsets = [0, 0, 1, 0, 0], sizes = [4, 1, 1, 16, 16], strides = [1, 1, 1, 1, 1]} : vector<4x2x2x16x16xf32> to vector<4x1x1x16x16xf32>
    %47 = vector.shape_cast %46 : vector<4x1x1x16x16xf32> to vector<4x16x16xf32>
    %48 = vector.shape_cast %45 : vector<4x16x16xf32> to vector<4x16x16x1xf32>
    %49 = vector.shape_cast %47 : vector<4x16x16xf32> to vector<4x16x16x1xf32>
    %50 = tpu.concatenate %48, %49 in 3 : vector<4x16x16x1xf32>, vector<4x16x16x1xf32> -> vector<4x16x16x2xf32>
    %51 = vector.shape_cast %50 : vector<4x16x16x2xf32> to vector<4x16x32xf32>
    %c0_27 = arith.constant 0 : index
    %c0_28 = arith.constant 0 : index
    %c0_29 = arith.constant 0 : index
    %c0_30 = arith.constant 0 : index
    %52 = tpu.strided_load %arg7[%c0_27, %c0_28, %c0_29, %c0_30] {strides = array<i32: 1, 1, 2, 1>} : memref<1x4x32x32xf32, #tpu.memory_space<vmem>>, vector<1x4x16x32xf32>
    %53 = vector.shape_cast %52 : vector<1x4x16x32xf32> to vector<4x16x32xf32>
    %54 = vector.shape_cast %51 : vector<4x16x32xf32> to vector<1x4x16x32xf32>
    tpu.strided_store %arg7[%c0_27, %c0_28, %c0_29, %c0_30], %54 {strides = array<i32: 1, 1, 2, 1>} : memref<1x4x32x32xf32, #tpu.memory_space<vmem>>, vector<1x4x16x32xf32>
    %55 = vector.extract_strided_slice %43 {offsets = [0, 1, 0, 0, 0], sizes = [4, 1, 1, 16, 16], strides = [1, 1, 1, 1, 1]} : vector<4x2x2x16x16xf32> to vector<4x1x1x16x16xf32>
    %56 = vector.shape_cast %55 : vector<4x1x1x16x16xf32> to vector<4x16x16xf32>
    %57 = vector.extract_strided_slice %43 {offsets = [0, 1, 1, 0, 0], sizes = [4, 1, 1, 16, 16], strides = [1, 1, 1, 1, 1]} : vector<4x2x2x16x16xf32> to vector<4x1x1x16x16xf32>
    %58 = vector.shape_cast %57 : vector<4x1x1x16x16xf32> to vector<4x16x16xf32>
    %59 = vector.shape_cast %56 : vector<4x16x16xf32> to vector<4x16x16x1xf32>
    %60 = vector.shape_cast %58 : vector<4x16x16xf32> to vector<4x16x16x1xf32>
    %61 = tpu.concatenate %59, %60 in 3 : vector<4x16x16x1xf32>, vector<4x16x16x1xf32> -> vector<4x16x16x2xf32>
    %62 = vector.shape_cast %61 : vector<4x16x16x2xf32> to vector<4x16x32xf32>
    %c0_31 = arith.constant 0 : index
    %c0_32 = arith.constant 0 : index
    %c1_33 = arith.constant 1 : index
    %c0_34 = arith.constant 0 : index
    %63 = tpu.strided_load %arg7[%c0_31, %c0_32, %c1_33, %c0_34] {strides = array<i32: 1, 1, 2, 1>} : memref<1x4x32x32xf32, #tpu.memory_space<vmem>>, vector<1x4x16x32xf32>
    %64 = vector.shape_cast %63 : vector<1x4x16x32xf32> to vector<4x16x32xf32>
    %65 = vector.shape_cast %62 : vector<4x16x32xf32> to vector<1x4x16x32xf32>
    tpu.strided_store %arg7[%c0_31, %c0_32, %c1_33, %c0_34], %65 {strides = array<i32: 1, 1, 2, 1>} : memref<1x4x32x32xf32, #tpu.memory_space<vmem>>, vector<1x4x16x32xf32>
    return
  }
  func.func @transform_0(%arg0: i32, %arg1: i32) -> (i32, i32, i32, i32) {
    %c0_i32 = arith.constant 0 : i32
    %c0_i32_0 = arith.constant 0 : i32
    %c0_i32_1 = arith.constant 0 : i32
    return %arg0, %c0_i32, %arg1, %c0_i32_0 : i32, i32, i32, i32
  }
  func.func @transform_1(%arg0: i32, %arg1: i32) -> (i32, i32, i32, i32) {
    %c2_i32 = arith.constant 2 : i32
    %0 = arith.muli %arg1, %c2_i32 : i32
    %c1_i32 = arith.constant 1 : i32
    %1 = arith.subi %0, %c1_i32 : i32
    %c0_i32 = arith.constant 0 : i32
    %2 = arith.maxsi %1, %c0_i32 : i32
    %c0_i32_0 = arith.constant 0 : i32
    %c0_i32_1 = arith.constant 0 : i32
    %c0_i32_2 = arith.constant 0 : i32
    return %arg0, %c0_i32_0, %2, %c0_i32_1 : i32, i32, i32, i32
  }
  func.func @transform_2(%arg0: i32, %arg1: i32) -> (i32, i32, i32, i32) {
    %c1_i32 = arith.constant 1 : i32
    %0 = arith.addi %arg1, %c1_i32 : i32
    %c2_i32 = arith.constant 2 : i32
    %1 = arith.muli %0, %c2_i32 : i32
    %c1_i32_0 = arith.constant 1 : i32
    %2 = arith.minsi %1, %c1_i32_0 : i32
    %c0_i32 = arith.constant 0 : i32
    %c0_i32_1 = arith.constant 0 : i32
    %c0_i32_2 = arith.constant 0 : i32
    return %arg0, %c0_i32, %2, %c0_i32_1 : i32, i32, i32, i32
  }
  func.func @transform_3(%arg0: i32, %arg1: i32) -> (i32, i32, i32) {
    %c0_i32 = arith.constant 0 : i32
    %c0_i32_0 = arith.constant 0 : i32
    %c0_i32_1 = arith.constant 0 : i32
    %c0_i32_2 = arith.constant 0 : i32
    return %c0_i32, %c0_i32_0, %c0_i32_1 : i32, i32, i32
  }
  func.func @transform_4(%arg0: i32, %arg1: i32) -> (i32, i32) {
    %c0_i32 = arith.constant 0 : i32
    %c0_i32_0 = arith.constant 0 : i32
    %c0_i32_1 = arith.constant 0 : i32
    return %c0_i32, %c0_i32_0 : i32, i32
  }
  func.func @transform_5(%arg0: i32, %arg1: i32) -> (i32, i32, i32, i32) {
    %c0_i32 = arith.constant 0 : i32
    %c0_i32_0 = arith.constant 0 : i32
    %c0_i32_1 = arith.constant 0 : i32
    return %arg0, %c0_i32, %arg1, %c0_i32_0 : i32, i32, i32, i32
  }
}

</mosaic_0001>

<bundles_post_ra>
// kernel: tpu_custom_call.1
= control target key start
LH: loop header
LB: loop body
LE: loop exit
PB: predicated region body
PF: predicated region fallthrough
CT: control target
= control target key end

     0   :  { %s23518_s0 = inlined_call_operand.hbm [shape: f32[2,4,16,16], index: 0, kind: input, shape index: {}]   ;;  %s23519_s1 = inlined_call_operand.hbm [shape: f32[2,4,16,16], index: 1, kind: input, shape index: {}]   ;;  %s23520_s2 = inlined_call_operand.hbm [shape: f32[2,4,16,16], index: 2, kind: input, shape index: {}]   ;;  %s23521_s3 = inlined_call_operand.hbm [shape: f32[3,16,12], index: 3, kind: input, shape index: {}]   ;;  %s23522_s4 = inlined_call_operand.vmem [shape: f32[16,1], index: 4, kind: input, shape index: {}]   ;;  %s23523_s5 = inlined_call_operand.hbm [shape: f32[2,4,32,32], index: 5, kind: output, shape index: {}]  }
   0x1   :  { %23961 = sst [smem:[#allocation186_spill]] %s23519_s1 }
   0x2   :  { %10 = vsyncpa [#allocation3], 0 }
   0x3   :  { %12 = vsyncpa [#allocation3 + $0x1], 0 }
   0x4   :  { %13 = vsyncpa [#allocation6], 0 }
   0x5   :  { %15 = vsyncpa [#allocation6 + $0x1], 0 }
   0x6   :  { %16 = vsyncpa [#allocation9], 0 }
   0x7   :  { %17 = vsyncpa [#allocation4], 0 }
   0x8   :  { %19 = vsyncpa [#allocation4 + $0x1], 0  ;;  %s14975_s18 = smov 0   ;;  %s14977_s19 = smov 0  }
   0x9   :  { %s14979_s20 = smov 0   ;;  %s14981_s21 = smov 0  }
   0xa   :  { %s14983_s22 = smov 0   ;;  %s14985_s23 = smov 0  }
   0xb LB: > { %23962 = sst [smem:[#allocation15_spill]] %s14894_s20  ;;  %s37_s24 = sadd.s32 1, %s14902_s22  ;;  %s14906_s23 = sphi %s14985_s23, %s25_s23   ;;  %s14902_s22 = sphi %s14983_s22, %s25377_s22   ;;  %s14898_s21 = sphi %s14981_s21, %s25376_s21   ;;  %s14894_s20 = sphi %s14979_s20, %s25375_s20   ;;  %s14890_s19 = sphi %s14977_s19, %s25379_s19   ;;  %s14886_s18 = sphi %s14975_s18, %s25378_s18  }
   0xc   : > { %23963 = sst [smem:[#allocation16_spill]] %s14902_s22  ;;  %s46_s25 = sadd.s32 1, %s14894_s20 }
   0xd   : > { %p39_p0 = scmp.ge.s32.totalorder %s37_s24, 2  ;;  %p53_p1 = scmp.ne.s32.totalorder %s14894_s20, %s14890_s19 }
   0xe   : > { %p54_p2 = scmp.eq.s32.totalorder %s14906_s23, 0  ;;  %p14620_p6 = scmp.lt.s32.totalorder %s14906_s23, 2 }
   0xf   : > { %s25381_s24 = smov (%p39_p0, %s37_s24), 0  ;;  %s15020_s27 = sand.u32 1, %s14894_s20  }
  0x10   : > { %23964 = sst [smem:[#allocation17_spill]] %s25381_s24  ;;  %p55_p3 = por %p54_p2, %p53_p1 }
  0x11   : > { %s41_s26 = ssub.s32 %s14902_s22, %s25381_s24  ;;  %s15023_s28 = sshll.u32 %s14902_s22, 10 }
  0x12   : > { %p44_p5 = scmp.eq.s32.totalorder %s41_s26, 0  ;;  %p15028_p7 = pnand %p14620_p6, %p55_p3 }
  0x13   : > { %s264_s6 = sand.u32 1, %s14906_s23   ;;  %s14503_s7 = sshll.u32 %s15020_s27, 5 }
  0x14   : > { %s15026_s29 = scalar_select %p44_p5, %s14894_s20, %s46_s25  }
  0x15   : > { %s23967_s1 = sld [smem:[#allocation186_spill]]  ;;  %s268_s11 = scalar_lea.vmem [#allocation5], %s14503_s7 }
  0x16   : > { %23965 = sst [smem:[#allocation18_spill]] %s15026_s29  ;;  %s280_s12 = sshll.u32 %s268_s11, 4  ;;  %s281_s12 = int_to_ptr.vmem [resolvable:$true] %s280_s12 }
  0x17   : > { %s15038_s13 = scalar_lea.sflag [#allocation6], %s264_s6  ;;  %p23533_p8 = pneg %p15028_p7 }
  0x18   : > { %s14721_s14 = scalar_lea.vmem %s281_s12, 512  ;;  %s14908_s15 = smov [#allocation5]  }
  0x19   : > { %p14722_p9 = scmp.ne.s32.totalorder %s281_s12, %s14721_s14  ;;  %s14726_s16 = sshll.u32 %s14908_s15, 4  ;;  %s14727_s16 = int_to_ptr.vmem [resolvable:$false] %s14726_s16 }
  0x1a   : > { %s14728_s17 = scalar_lea.vmem %s14727_s16, 1024  ;;  %p14729_p12 = scmp.lt.s32.totalorder %s281_s12, %s14727_s16 }
  0x1b   : > { %s279_s10 = scalar_lea.hbm %s23967_s1, %s15023_s28  ;;  %p14724_p10 = pnand %p14722_p9, %p23533_p8 }
  0x1c   : > { %p14730_p13 = scmp.lt.s32.totalorder %s14728_s17, %s14721_s14 }
  0x1d   : > { %p14725_p11 = pneg %p14724_p10 }
  0x1e   : > { %p14731_p0 = por %p14730_p13, %p14729_p12 }
  0x20   : > { %p14732_p2 = pnand %p14731_p0, %p14725_p11 }
  0x22   : > { %14735 = shalt.err (!%p14732_p2)
}
  0x23   : > { %s23524_s25 = smov 256   ;;  %s23525_s26 = smov 128  }
  0x24   : > { %s23527_s6 = smov 8   ;;  %s294_s8 = scalar_lea.vmem [#allocation7], %s14503_s7 }
  0x25   : > { %14611 = dma.hbm_to_vmem [thread:$0]  (!%p15028_p7), %s279_s10, 512, %s281_s12, %s15038_s13, %s23524_s25, %s23525_s26, %s23527_s6  }
  0x26   : > { %s306_s9 = sshll.u32 %s294_s8, 4  ;;  %s15054_s11 = sadd.s32 4294967295, %s14906_s23   ;;  %s15051_s9 = int_to_ptr.vmem [resolvable:$true] %s306_s9 }
  0x27   : > { %s14496_s14 = sadd.s32 4294967294, %s14906_s23   ;;  %p59_p3 = scmp.ne.s32.totalorder %s14890_s19, %s14886_s18 }
  0x28   : > { %p23532_p5 = scmp.eq.s32.totalorder %s15054_s11, 0  ;;  %p199_p6 = scmp.eq.s32.totalorder %s15054_s11, 1 }
  0x29   : > { %p205_p9 = scmp.eq.s32.totalorder %s14496_s14, 1  ;;  %p14497_p10 = scmp.ge.s32.totalorder %s14906_s23, 1 }
  0x2a   : > { %p15064_p11 = por %p23532_p5, %p59_p3  ;;  %p15071_p12 = por %p199_p6, %p53_p1 }
  0x2b   : > { %p15075_p13 = por %p205_p9, %p59_p3  ;;  %p212_p0 = scmp.lt.s32.totalorder %s14906_s23, 3 }
  0x2c   : > { %s14912_s16 = smov [#allocation8]   ;;  %s14500_s8 = sshll.u32 %s15020_s27, 6 }
  0x2d   : > { %p15080_p2 = pnand %p14497_p10, %p212_p0  ;;  %s224_s17 = sshll.u32 %s14912_s16, 4  ;;  %s225_s17 = int_to_ptr.vmem [resolvable:$true] %s224_s17 }
  0x2e   : > { %s245_s1 = scalar_lea.vmem [#allocation2], %s14500_s8  ;;  %s14582_s22 = sadd.s32 128, %s15023_s28 }
  0x2f   : > { %p14601_p4 = pneg %p15080_p2  ;;  %s254_s24 = sshll.u32 %s245_s1, 4  ;;  %s15097_s24 = int_to_ptr.vmem [resolvable:$true] %s254_s24 }
  0x30   : > { %s15103_s20 = scalar_lea.hbm %s23520_s2, %s14582_s22  ;;  %s14747_s25 = scalar_lea.vmem %s225_s17, 768 }
  0x31   : > { %p15093_p1 = pnand %p14601_p4, %p23532_p5  ;;  %p14748_p6 = scmp.ne.s32.totalorder %s225_s17, %s14747_s25 }
  0x32   : > { %p14755_p10 = scmp.lt.s32.totalorder %s225_s17, %s225_s17  ;;  %p14756_p0 = scmp.lt.s32.totalorder %s14747_s25, %s14747_s25 }
  0x33   : > { %p14738_p3 = pneg %p15093_p1 }
  0x34   : > { %p14757_p5 = por %p14756_p0, %p14755_p10 }
  0x35   : > { %p14750_p9 = pnand %p14748_p6, %p14738_p3 }
  0x37   : > { %p14751_p4 = pneg %p14750_p9 }
  0x39   : > { %p14758_p8 = pnand %p14757_p5, %p14751_p4 }
  0x3b   : > { %14761 = shalt.err (!%p14758_p8)
}
  0x3c   : > { %s23973_s1 = smov 8   ;;  %s23974_s8 = smov 128  }
  0x3d   : > { %14604 = dma.hbm_to_vmem [thread:$0]  (!%p15093_p1), %s23521_s3, 768, %s225_s17, [#allocation9], %s23974_s8, %s23974_s8, %s23973_s1  }
  0x3e   : > { %s242_s22 = scalar_lea.sflag [#allocation3], %s15020_s27  ;;  %s14775_s16 = scalar_lea.vmem %s15097_s24, 1024 }
  0x3f   : > { %p14776_p3 = scmp.ne.s32.totalorder %s15097_s24, %s14775_s16  ;;  %p23975_p5 = pneg %p15028_p7 }
  0x40   : > { %s14913_s6 = smov [#allocation2]  }
  0x41   : > { %p14778_p8 = pnand %p14776_p3, %p23975_p5  ;;  %s14780_s25 = sshll.u32 %s14913_s6, 4  ;;  %s14781_s25 = int_to_ptr.vmem [resolvable:$false] %s14780_s25 }
  0x42   : > { %s14782_s26 = scalar_lea.vmem %s14781_s25, 2048  ;;  %p14783_p9 = scmp.lt.s32.totalorder %s15097_s24, %s14781_s25 }
  0x43   : > { %p14779_p6 = pneg %p14778_p8  ;;  %p14784_p4 = scmp.lt.s32.totalorder %s14782_s26, %s14775_s16 }
  0x45   : > { %p14785_p10 = por %p14784_p4, %p14783_p9 }
  0x47   : > { %p14786_p0 = pnand %p14785_p10, %p14779_p6 }
  0x49   : > { %14789 = shalt.err (!%p14786_p0)
}
  0x4a   : > { %s23976_s14 = scalar_lea.hbm %s23518_s0, %s15023_s28  ;;  %s14803_s26 = scalar_lea.vmem %s15051_s9, 512 }
  0x4b   : > { %14608 = dma.hbm_to_vmem [thread:$0]  (!%p15028_p7), %s23976_s14, 1024, %s15097_s24, %s242_s22, %s23974_s8, %s23974_s8, %s23973_s1  }
  0x4c   : > { %p14804_p1 = scmp.ne.s32.totalorder %s15051_s9, %s14803_s26  ;;  %p23977_p3 = pmov %p23975_p5 }
  0x4d   : > { %s14914_s29 = smov [#allocation7]  }
  0x4e   : > { %p14806_p5 = pnand %p14804_p1, %p23977_p3  ;;  %s14808_s16 = sshll.u32 %s14914_s29, 4  ;;  %s14809_s16 = int_to_ptr.vmem [resolvable:$false] %s14808_s16 }
  0x4f   : > { %s14810_s6 = scalar_lea.vmem %s14809_s16, 1024  ;;  %p14811_p6 = scmp.lt.s32.totalorder %s15051_s9, %s14809_s16 }
  0x50   : > { %p14807_p8 = pneg %p14806_p5  ;;  %p14812_p9 = scmp.lt.s32.totalorder %s14810_s6, %s14803_s26 }
  0x52   : > { %p14813_p4 = por %p14812_p9, %p14811_p6 }
  0x54   : > { %p14814_p10 = pnand %p14813_p4, %p14807_p8 }
  0x56   : > { %14817 = shalt.err (!%p14814_p10)
}
  0x57   : > { %s23978_s24 = smov 256   ;;  %318 = sbr.rel (%p15080_p2) target bundleno = 2954 (0xb8a), region = 40 }
  0x58   : > { %14614 = dma.hbm_to_vmem [thread:$0]  (!%p15028_p7), %s15103_s20, 512, %s15051_s9, %s15038_s13, %s23978_s24, %s23974_s8, %s23973_s1  }
  0x5c   : > { %s15150_s28 = sand.u32 1, %s14890_s19  }
  0x5d   : > { %s14510_s22 = sshll.u32 %s15150_s28, 6  ;;  %s321_s25 = scalar_lea.sflag [#allocation3], %s15150_s28 }
  0x5e   : > { %s15154_s27 = scalar_lea.vmem [#allocation2], %s14510_s22 }
  0x5f   : > { %14869 = dma.done.wait (%p15064_p11), %s321_s25, 1024  }
  0x60   : > { %14871 = vsyncadd (%p15064_p11), %s321_s25, 4294966272  ;;  %s329_s20 = sand.u32 1, %s15054_s11   ;;  %s14511_s30 = sshll.u32 %s15150_s28, 5 }
  0x61   : > { %s330_s13 = scalar_lea.sflag [#allocation6], %s329_s20  ;;  %s15162_s9 = scalar_lea.vmem [#allocation5], %s14511_s30 }
  0x62   : > { %14873 = dma.done.wait (%p15064_p11), %s330_s13, 1024  }
  0x63   : > { %14875 = vsyncadd (%p15064_p11), %s330_s13, 4294966272  ;;  %s15168_s15 = scalar_lea.vmem [#allocation7], %s14511_s30  ;;  %p23979_p7 = scmp.eq.s32.totalorder %s15054_s11, 0 }
  0x65   : > { %14877 = dma.done.wait (%p23979_p7), [#allocation9], 768   ;;  %p23980_p2 = pmov %p23979_p7 }
  0x66   : > { %v23534_v0 = vmov 0.0   ;;  %vm429_vm0 = vcmask 1040384   ;;  %v395_v1 = vld [vmem:[%s15154_s27 + $0x10] sm:$0xff]  ;;  %v402_v2 = vld [vmem:[%s15162_s9 + $0xf] sm:$0x1]  ;;  %v393_v3 = vld [vmem:[%s15154_s27] sm:$0xff]  ;;  %v699_v24 = vlaneseq }
  0x67   : > { %14879 = vsyncadd (%p23980_p2), [#allocation9], 4294966528  ;;  %1418 = vmatprep.mubr.f32.mxu0 %v23534_v0  ;;  %1424 = vmatprep.mubr.f32.mxu1 %v23534_v0  ;;  %v410_v4 = vmul.f32 0.0, %v402_v2  ;;  %v433_v5 = vrot.slane %v395_v1, 7  ;;  %v401_v6 = vld [vmem:[%s15162_s9 + $0x7] sm:$0x1] }
  0x68   : > { %v430_v7 = vrot.slane %v393_v3, 7  ;;  %v397_v8 = vld [vmem:[%s15154_s27 + $0x20] sm:$0xff]  ;;  %vm609_vm1 = vcmask 1046528   ;;  %vm4019_vm2 = vcmask 1045504   ;;  %v409_v9 = vmul.f32 0.0, %v401_v6  ;;  %v398_v10 = vld [vmem:[%s15154_s27 + $0x28] sm:$0xff] }
  0x69   : > { %v436_v11 = vrot.slane %v397_v8, 7  ;;  %v394_v12 = vld [vmem:[%s15154_s27 + $0x8] sm:$0xff]  ;;  %v413_v13 = vld [vmem:[%s15168_s15] sm:$0x1]  ;;  %v15185_v14 = vsel %vm429_vm0, %v410_v4, %v433_v5  ;;  %v437_v15 = vrot.slane %v398_v10, 7  ;;  %v396_v18 = vld [vmem:[%s15154_s27 + $0x18] sm:$0xff] }
  0x6a   : > { %v431_v16 = vrot.slane %v394_v12, 7  ;;  %v417_v17 = vmul.f32 0.0, %v413_v13  ;;  %v414_v19 = vld [vmem:[%s15168_s15 + $0x8] sm:$0x1]  ;;  %s14916_s11 = smov 1   ;;  %v15192_v20 = vsel %vm429_vm0, %v409_v9, %v430_v7  ;;  %v434_v21 = vrot.slane %v396_v18, 7 }
  0x6b   : > { %488 = vrot.lane.b32.xlu1 %v15185_v14, %s14916_s11  ;;  %v418_v22 = vmul.f32 0.0, %v414_v19  ;;  %v403_v23 = vld [vmem:[%s15162_s9 + $0x17] sm:$0x1]  ;;  %482 = vrot.lane.b32.xlu0 %v15192_v20, %s14916_s11  ;;  %v15198_v25 = vsel %vm429_vm0, %v436_v11, %v437_v15  ;;  %v404_v28 = vld [vmem:[%s15162_s9 + $0x1f] sm:$0x1]  ;;  %v15238_v53 = vshrl.u32 %v699_v24, 7 }
  0x6c   : > { %v15201_v26 = vsel %vm429_vm0, %v430_v7, %v431_v16  ;;  %v458_v27 = vrot.slane %v417_v17, 7  ;;  %v14917_v29 = vmov 1983009808   ;;  %v15207_v33 = vsel %vm429_vm0, %v433_v5, %v434_v21  ;;  %v399_v35 = vld [vmem:[%s15154_s27 + $0x30] sm:$0xff]  ;;  %v416_v49 = vld [vmem:[%s15168_s15 + $0x18] sm:$0x1] }
  0x6d   : > { %v697_v30 = vunpack.c.l.s4 %v14917_v29  ;;  %v631_v31 = vrot.slane %v15201_v26, 1  ;;  %v4041_v32 = vrot.slane %v15201_v26, 2  ;;  %v459_v34 = vrot.slane %v418_v22, 7  ;;  %v415_v36 = vld [vmem:[%s15168_s15 + $0x10] sm:$0x1]  ;;  %23981 = vst [vmem:[#allocation19_spill] sm:$0xff] %v15238_v53 }
  0x6e   : > { %v15212_v37 = vsel %vm429_vm0, %v431_v16, %v458_v27  ;;  %v636_v38 = vrot.slane %v15207_v33, 1  ;;  %v4046_v39 = vrot.slane %v15207_v33, 2  ;;  %v411_v40 = vmul.f32 0.0, %v403_v23  ;;  %v400_v63 = vld [vmem:[%s15154_s27 + $0x38] sm:$0xff]  ;;  %s14918_s7 = smov 127   ;;  %s14920_s1 = smov 32  }
  0x6f   : > { %496 = vrot.lane.b32.xlu1 %v15198_v25, %s14916_s11  ;;  %v633_v41 = vrot.slane %v15212_v37, 1  ;;  %v4043_v42 = vrot.slane %v15212_v37, 2  ;;  %v15221_v43 = vsel %vm429_vm0, %v434_v21, %v459_v34  ;;  %v412_v44 = vmul.f32 0.0, %v404_v28  ;;  %484 = vrot.lane.b32.xlu0 %v15201_v26, %s14916_s11  ;;  %s14921_s8 = smov 16   ;;  %s14922_s17 = smov 64  }
  0x70   : > { %v638_v45 = vrot.slane %v15221_v43, 1  ;;  %v4048_v46 = vrot.slane %v15221_v43, 2  ;;  %v439_v47 = vrot.slane %v399_v35, 7  ;;  %v419_v48 = vmul.f32 0.0, %v415_v36  ;;  %s14923_s14 = smov 48   ;;  %s14924_s26 = smov 96  }
  0x71   : > { %v15231_v50 = vsel %vm609_vm1, %v631_v31, %v633_v41  ;;  %v15236_v51 = vsel %vm4019_vm2, %v4041_v32, %v4043_v42  ;;  %v698_v52 = vunpack.c.0.s8 %v697_v30  ;;  %v15251_v56 = vsel %vm429_vm0, %v411_v40, %v436_v11  ;;  %s14925_s29 = smov 80   ;;  %s14926_s16 = smov 112  }
  0x72   : > { %v15243_v54 = vsel %vm609_vm1, %v636_v38, %v638_v45  ;;  %v15248_v55 = vsel %vm4019_vm2, %v4046_v39, %v4048_v46  ;;  %v460_v57 = vrot.slane %v419_v48, 7  ;;  %v15256_v58 = vsel %vm429_vm0, %v412_v44, %v439_v47  ;;  %s14929_s27 = smov 2   ;;  %s14930_s20 = smov 4  }
  0x73   : > { %486 = vrot.lane.b32.xlu1 %v15212_v37, %s14916_s11  ;;  %v641_v59 = vrot.slane %v15198_v25, 1  ;;  %v4051_v60 = vrot.slane %v15198_v25, 2  ;;  %v420_v61 = vmul.f32 0.0, %v416_v49  ;;  %490 = vrot.lane.b32.xlu0 %v15207_v33, %s14916_s11  ;;  %v2095_v1 = vcombine.low %v15192_v20, %v15251_v56  ;;  %s14931_s30 = smov 6   ;;  %s14932_s13 = smov 8  }
  0x74   : > { %v472_v62 = vsel %vm429_vm0, %v437_v15, %v460_v57  ;;  %v2111_v2 = vcombine.low %v15185_v14, %v15256_v58  ;;  %v15269_v5 = vsub.s32 %v698_v52, %v15238_v53  ;;  %v440_v8 = vrot.slane %v400_v63, 7  ;;  %s14933_s9 = smov 10   ;;  %s14934_s15 = smov 12  }
  0x75   : > { %v643_v3 = vrot.slane %v472_v62, 1  ;;  %v4053_v4 = vrot.slane %v472_v62, 2  ;;  %v461_v9 = vrot.slane %v420_v61, 7  ;;  %v2096_v18 = vcombine.high %v15192_v20, %v15251_v56  ;;  %s14514_s6 = sshll.u32 %s15150_s28, 7 }
  0x76   : > { %23982 = vst [vmem:[#allocation20_spill] sm:$0xff] %v15269_v5  ;;  %v15288_v12 = vrot.slane %v2095_v1, %v15269_v5  ;;  %v15291_v13 = vrot.slane %v2111_v2, %v15269_v5  ;;  %v15302_v17 = vsel %vm429_vm0, %v439_v47, %v440_v8  ;;  %v2112_v19 = vcombine.high %v15185_v14, %v15256_v58  ;;  %s20613_s24 = scalar_lea.vmem [#allocation10], %s14514_s6 }
  0x77   : > { %492 = vrot.lane.b32.xlu1 %v15221_v43, %s14916_s11  ;;  %v15274_v6 = vsel %vm609_vm1, %v641_v59, %v643_v3  ;;  %v15279_v7 = vsel %vm4019_vm2, %v4051_v60, %v4053_v4  ;;  %494 = vrot.lane.b32.xlu0 %v15251_v56, %s14916_s11  ;;  %v15297_v15 = vsel %vm429_vm0, %v440_v8, %v461_v9  ;;  %v14919_v27 = vmov 1934713408   ;;  %s14351_s22 = sshll.u32 %s20613_s24, 4  ;;  %s23467_s22 = int_to_ptr.vmem [resolvable:$true] %s14351_s22 }
  0x78   : > { %v4340_v10 = vcombine.low %v15236_v51, %v15279_v7  ;;  %v4341_v11 = vcombine.high %v15236_v51, %v15279_v7  ;;  %v15313_v22 = vrot.slane %v2096_v18, %v15269_v5  ;;  %v15316_v23 = vrot.slane %v2112_v19, %v15269_v5 }
  0x79   : > { %v761_v28 = vunpack.c.l.s4 %v14919_v27  ;;  %v1249_v29 = vcombine.low %v23534_v0, %v23534_v0  ;;  %v1250_v36 = vcombine.high %v23534_v0, %v23534_v0  ;;  %v630_v40 = vrot.slane %v15192_v20, 1 }
  0x7a   : > { %v635_v41 = vrot.slane %v15185_v14, 1  ;;  %v645_v42 = vrot.slane %v15256_v58, 1  ;;  %vm518_vm3 = vcmask 7168   ;;  %vm567_vm4 = vcmask 121856  }
  0x7b   : > { %500 = vrot.lane.b32.xlu1 %v15256_v58, %s14916_s11  ;;  %498 = vrot.lane.b32.xlu0 %v472_v62, %s14916_s11  ;;  %v762_v30 = vunpack.c.0.s8 %v761_v28  ;;  %v1257_v34 = vrot.slane %v1249_v29, %v15269_v5  ;;  %v1264_v46 = vrot.slane %v1250_v36, %v15269_v5  ;;  %v632_v47 = vsel %vm609_vm1, %v630_v40, %v631_v31 }
  0x7c   : > { %v637_v48 = vsel %vm609_vm1, %v635_v41, %v636_v38  ;;  %v648_v38 = vrot.slane %v15297_v15, 1  ;;  %vm1214_vm5 = vcmask 130048   ;;  %vm1217_vm6 = vcmask 261120  }
  0x7d   : > { %v15346_v44 = vsub.s32 %v762_v30, %v15238_v53  ;;  %v1266_v45 = vcombine.high %v1257_v34, %v1257_v34  ;;  %v1265_v52 = vcombine.low %v1257_v34, %v1257_v34  ;;  %v1281_v63 = vcombine.low %v1264_v46, %v1264_v46 }
  0x7e   : > { %v1282_v4 = vcombine.high %v1264_v46, %v1264_v46  ;;  %v2315_v46 = vcombine.low %v15207_v33, %v15302_v17  ;;  %vm1220_vm7 = vcmask 392192   ;;  %vm1223_vm8 = vcmask 523264  }
  0x7f   : > { %504 = vrot.lane.b32.xlu1 %v15297_v15, %s14916_s11  ;;  %502 = vrot.lane.b32.xlu0 %v15302_v17, %s14916_s11  ;;  %23983 = vst [vmem:[#allocation21_spill] sm:$0xff] %v15346_v44  ;;  %v1280_v61 = vrot.slane %v1266_v45, %v15346_v44  ;;  %v15367_v31 = vrot.slane %v1265_v52, %v15346_v44  ;;  %vm1226_vm9 = vcmask 654336   ;;  %vm1229_vm10 = vcmask 785408   ;;  %s14935_s11 = smov 14  }
  0x80   : > { %v1289_v3 = vrot.slane %v1281_v63, %v15346_v44  ;;  %v1296_v34 = vrot.slane %v1282_v4, %v15346_v44  ;;  %v930_v52 = vcombine.low %v15231_v50, %v15274_v6  ;;  %v4045_v4 = vrot.slane %v15185_v14, 2 }
  0x81   : > { %23984 = vst [vmem:[#allocation22_spill] sm:$0xff] %v15367_v31  ;;  %v1299_v2 = vcombine.low %v1280_v61, %v1280_v61  ;;  %v1300_v41 = vcombine.high %v1280_v61, %v1280_v61  ;;  %vm1347_vm11 = vcmask 1043456   ;;  %vm1232_vm12 = vcmask 916480  }
  0x82   : > { %v1301_v30 = vcombine.low %v1289_v3, %v1289_v3  ;;  %v1304_v61 = vcombine.high %v1296_v34, %v1296_v34  ;;  %v15419_v63 = vrot.slane %v930_v52, %v15269_v5  ;;  %vm1340_vm13 = vcmask 97280  }
  0x83   : > { %533 = vrot.lane.b32.xlu1 %v15201_v26, %s14918_s7  ;;  %531 = vrot.lane.b32.xlu0 %v15192_v20, %s14918_s7  ;;  %vm9859_vm14 = vcmask 15360   ;;  %vm9868_vm15 = vcmask 31744   ;;  %vm9877_vm0 = vcmask 48128  }
  0x87   : > { %537 = vrot.lane.b32.xlu1 %v15185_v14, %s14918_s7  ;;  %535 = vrot.lane.b32.xlu0 %v15212_v37, %s14918_s7  ;;  %v640_v37 = vrot.slane %v15251_v56, 1 }
  0x89   : > { %v642_v49 = vsel %vm609_vm1, %v640_v37, %v641_v59 }
  0x8a   : > { %v726_v59 = vcombine.low %v632_v47, %v642_v49  ;;  %v727_v18 = vcombine.high %v632_v47, %v642_v49  ;;  %v1302_v47 = vcombine.high %v1289_v3, %v1289_v3  ;;  %v15411_v49 = vrot.slane %v2315_v46, %v15269_v5 }
  0x8b   : > { %541 = vrot.lane.b32.xlu1 %v15221_v43, %s14918_s7  ;;  %539 = vrot.lane.b32.xlu0 %v15207_v33, %s14918_s7  ;;  %v646_v43 = vrot.slane %v15302_v17, 1  ;;  %v4040_v3 = vrot.slane %v15192_v20, 2 }
  0x8c   : > { %v15378_v8 = vrot.slane %v726_v59, %v15269_v5  ;;  %v15391_v36 = vrot.slane %v727_v18, %v15269_v5  ;;  %23986 = vst [vmem:[#allocation24_spill] sm:$0xff] %v15411_v49 }
  0x8d   : > { %v647_v57 = vsel %vm609_vm1, %v645_v42, %v646_v43  ;;  %v649_v29 = vsel %vm609_vm1, %v646_v43, %v648_v38  ;;  %v1303_v42 = vcombine.low %v1296_v34, %v1296_v34  ;;  %v2299_v43 = vcombine.low %v15201_v26, %v15198_v25 }
  0x8e   : > { %v742_v1 = vcombine.low %v637_v48, %v647_v57  ;;  %v743_v19 = vcombine.high %v637_v48, %v647_v57  ;;  %v946_v57 = vcombine.low %v15243_v54, %v649_v29  ;;  %v931_v34 = vcombine.high %v15231_v50, %v15274_v6 }
  0x8f   : > { %545 = vrot.lane.b32.xlu1 %v15198_v25, %s14918_s7  ;;  %543 = vrot.lane.b32.xlu0 %v15251_v56, %s14918_s7  ;;  %v15408_v48 = vrot.slane %v2299_v43, %v15269_v5  ;;  %v4042_v14 = vsel %vm4019_vm2, %v4040_v3, %v4041_v32 }
  0x90   : > { %v15381_v9 = vrot.slane %v742_v1, %v15269_v5  ;;  %v15394_v40 = vrot.slane %v743_v19, %v15269_v5  ;;  %v15422_v38 = vrot.slane %v946_v57, %v15269_v5  ;;  %v2300_v1 = vcombine.high %v15201_v26, %v15198_v25 }
  0x91   : > { %23985 = vst [vmem:[#allocation23_spill] sm:$0xff] %v15408_v48  ;;  %v15456_v50 = vrot.slane %v931_v34, %v15269_v5  ;;  %v15499_v34 = vrot.slane %v4340_v10, %v15269_v5 }
  0x92   : > { %v15437_v19 = vrot.slane %v2300_v1, %v15269_v5 }
  0x93   : > { %549 = vrot.lane.b32.xlu1 %v15256_v58, %s14918_s7  ;;  %547 = vrot.lane.b32.xlu0 %v472_v62, %s14918_s7  ;;  %v1298_v62 = vcombine.high %v15367_v31, %v15367_v31  ;;  %23989 = vst [vmem:[#allocation27_spill] sm:$0xff] %v15456_v50 }
  0x94   : > { %23987 = vst [vmem:[#allocation25_spill] sm:$0xff] %v15437_v19 }
  0x97   : > { %553 = vrot.lane.b32.xlu1 %v15297_v15, %s14918_s7  ;;  %551 = vrot.lane.b32.xlu0 %v15302_v17, %s14918_s7  ;;  %s14936_s7 = smov 18  }
  0x9b   : > { %1310 = vrot.lane.b32.xlu1 %v1299_v2, %s14920_s1  ;;  %1306 = vrot.lane.b32.xlu0 %v1298_v62, %s14921_s8  ;;  %v2316_v2 = vcombine.high %v15207_v33, %v15302_v17  ;;  %v4055_v33 = vrot.slane %v15256_v58, 2 }
  0x9d   : > { %v15444_v20 = vrot.slane %v2316_v2, %v15269_v5 }
  0x9f   : > { %1318 = vrot.lane.b32.xlu1 %v1301_v30, %s14922_s17  ;;  %1314 = vrot.lane.b32.xlu0 %v1300_v41, %s14923_s14  ;;  %v4050_v30 = vrot.slane %v15251_v56, 2  ;;  %v947_v41 = vcombine.high %v15243_v54, %v649_v29  ;;  %23988 = vst [vmem:[#allocation26_spill] sm:$0xff] %v15444_v20  ;;  %v4047_v56 = vsel %vm4019_vm2, %v4045_v4, %v4046_v39  ;;  %v4056_v39 = vrot.slane %v15302_v17, 2 }
  0xa1   : > { %v15459_v54 = vrot.slane %v947_v41, %v15269_v5  ;;  %v4052_v6 = vsel %vm4019_vm2, %v4050_v30, %v4051_v60  ;;  %v4057_v46 = vsel %vm4019_vm2, %v4055_v33, %v4056_v39 }
  0xa2   : > { %v4136_v52 = vcombine.low %v4042_v14, %v4052_v6  ;;  %v4152_v57 = vcombine.low %v4047_v56, %v4057_v46  ;;  %v4137_v1 = vcombine.high %v4042_v14, %v4052_v6  ;;  %v4153_v2 = vcombine.high %v4047_v56, %v4057_v46 }
  0xa3   : > { %1326 = vrot.lane.b32.xlu1 %v1303_v42, %s14924_s26  ;;  %1322 = vrot.lane.b32.xlu0 %v1302_v47, %s14925_s29  ;;  %23990 = vst [vmem:[#allocation28_spill] sm:$0xff] %v15459_v54  ;;  %v4058_v47 = vrot.slane %v15297_v15, 2 }
  0xa4   : > { %v15477_v25 = vrot.slane %v4136_v52, %v15269_v5  ;;  %v15480_v60 = vrot.slane %v4152_v57, %v15269_v5  ;;  %v15490_v4 = vrot.slane %v4137_v1, %v15269_v5  ;;  %v15493_v30 = vrot.slane %v4153_v2, %v15269_v5 }
  0xa7   : > { %1330 = vrot.lane.b32.xlu0 %v1304_v61, %s14926_s16  ;;  %v4059_v61 = vsel %vm4019_vm2, %v4056_v39, %v4058_v47 }
  0xa8   : > { %v4356_v15 = vcombine.low %v15248_v55, %v4059_v61  ;;  %v4357_v3 = vcombine.high %v15248_v55, %v4059_v61  ;;  %v15508_v55 = vrot.slane %v4341_v11, %v15269_v5 }
  0xaa   : > { %v15502_v41 = vrot.slane %v4356_v15, %v15269_v5  ;;  %v15511_v14 = vrot.slane %v4357_v3, %v15269_v5 }
  0xdd   : > { %v489_v11 = vpop.permute.xlu1 %488  ;;  %v483_v39 = vpop.permute.xlu0 %482 }
  0xde   : > { %v15526_v46 = vsel %vm518_vm3, 0.0, %v483_v39  ;;  %v15534_v2 = vsel %vm518_vm3, 0.0, %v489_v11 }
  0xdf   : > { %v4020_v52 = vrot.slane %v15526_v46, 2  ;;  %v4025_v43 = vrot.slane %v15534_v2, 2 }
  0xe1   : > { %v497_v47 = vpop.permute.xlu1 %496  ;;  %v485_v57 = vpop.permute.xlu0 %484 }
  0xe2   : > { %v15530_v61 = vsel %vm518_vm3, 0.0, %v485_v57  ;;  %v15549_v11 = vsel %vm518_vm3, 0.0, %v497_v47 }
  0xe3   : > { %23991 = vst [vmem:[#allocation29_spill] sm:$0xff] %v15530_v61  ;;  %v4021_v1 = vrot.slane %v15530_v61, 2  ;;  %23994 = vst [vmem:[#allocation32_spill] sm:$0xff] %v15549_v11  ;;  %v4031_v51 = vrot.slane %v15549_v11, 2 }
  0xe5   : > { %v487_v15 = vpop.permute.xlu1 %486  ;;  %v15537_v3 = vsel %vm4019_vm2, %v4020_v52, %v4021_v1  ;;  %v491_v32 = vpop.permute.xlu0 %490 }
  0xe6   : > { %23992 = vst [vmem:[#allocation30_spill] sm:$0xff] %v15537_v3  ;;  %v15540_v39 = vsel %vm518_vm3, 0.0, %v487_v15  ;;  %v15543_v26 = vsel %vm518_vm3, 0.0, %v491_v32 }
  0xe7   : > { %23993 = vst [vmem:[#allocation31_spill] sm:$0xff] %v15543_v26  ;;  %v4023_v57 = vrot.slane %v15540_v39, 2  ;;  %v4026_v42 = vrot.slane %v15543_v26, 2 }
  0xe9   : > { %v493_v29 = vpop.permute.xlu1 %492  ;;  %v15552_v52 = vsel %vm4019_vm2, %v4021_v1, %v4023_v57  ;;  %v15555_v18 = vsel %vm4019_vm2, %v4025_v43, %v4026_v42  ;;  %v495_v15 = vpop.permute.xlu0 %494 }
  0xea   : > { %23995 = vst [vmem:[#allocation33_spill] sm:$0xff] %v15555_v18  ;;  %v15558_v32 = vsel %vm518_vm3, 0.0, %v493_v29  ;;  %v15561_v0 = vsel %vm518_vm3, 0.0, %v495_v15 }
  0xeb   : > { %v4028_v7 = vrot.slane %v15558_v32, 2  ;;  %v4030_v47 = vrot.slane %v15561_v0, 2  ;;  %v2064_v24 = vcombine.high %v15526_v46, %v15561_v0 }
  0xed   : > { %v501_v33 = vpop.permute.xlu1 %500  ;;  %v15567_v1 = vsel %vm4019_vm2, %v4026_v42, %v4028_v7  ;;  %v499_v57 = vpop.permute.xlu0 %498  ;;  %v15570_v43 = vsel %vm4019_vm2, %v4030_v47, %v4031_v51 }
  0xee   : > { %23996 = vst [vmem:[#allocation34_spill] sm:$0xff] %v15570_v43  ;;  %v15577_v10 = vsel %vm518_vm3, 0.0, %v499_v57  ;;  %v15580_v6 = vsel %vm518_vm3, 0.0, %v501_v33  ;;  %v2063_v33 = vcombine.low %v15526_v46, %v15561_v0 }
  0xef   : > { %v4033_v42 = vrot.slane %v15577_v10, 2  ;;  %v2079_v47 = vcombine.low %v15534_v2, %v15580_v6  ;;  %v4035_v45 = vrot.slane %v15580_v6, 2 }
  0xf0   : > { %v2071_v37 = vrot.slane %v2063_v33, %v15269_v5  ;;  %v24001_v33 = vcombine.high %v15288_v12, %v15291_v13 }
  0xf1   : > { %v505_v56 = vpop.permute.xlu1 %504  ;;  %v503_v7 = vpop.permute.xlu0 %502  ;;  %v15589_v29 = vsel %vm4019_vm2, %v4031_v51, %v4033_v42 }
  0xf2   : > { %v15584_v17 = vsel %vm518_vm3, 0.0, %v505_v56  ;;  %v15592_v15 = vsel %vm518_vm3, 0.0, %v503_v7  ;;  %v2087_v7 = vrot.slane %v2079_v47, %v15269_v5  ;;  %v2080_v56 = vcombine.high %v15534_v2, %v15580_v6 }
  0xf3   : > { %23997 = vst [vmem:[#allocation35_spill] sm:$0xff] %v15592_v15  ;;  %v4038_v62 = vrot.slane %v15584_v17, 2  ;;  %v4036_v59 = vrot.slane %v15592_v15, 2 }
  0xf4   : > { %v2127_v16 = vcombine.low %v2071_v37, %v2087_v7  ;;  %v15642_v21 = vrot.slane %v2080_v56, %v15269_v5 }
  0xf5   : > { %v534_v58 = vpop.permute.xlu1 %533  ;;  %v532_v51 = vpop.permute.xlu0 %531  ;;  %v15614_v27 = vsel %vm4019_vm2, %v4035_v45, %v4036_v59  ;;  %v15617_v35 = vsel %vm4019_vm2, %v4036_v59, %v4038_v62  ;;  %v23999_v59 = vcombine.low %v15288_v12, %v15291_v13  ;;  %v2128_v13 = vcombine.high %v2071_v37, %v2087_v7 }
  0xf6   : > { %v15603_v42 = vsel %vm567_vm4, %v534_v58, 0.0  ;;  %v15609_v57 = vsel %vm567_vm4, %v532_v51, 0.0  ;;  %23998 = vst [vmem:[#allocation36_spill] sm:$0xff] %v15614_v27  ;;  %v2174_v51 = vrot.slane %v24001_v33, %v15346_v44  ;;  %v15648_v20 = vrot.slane %v2127_v16, %v15346_v44 }
  0xf7   : > { %v4061_v58 = vrot.slane %v15603_v42, 2  ;;  %v4060_v45 = vrot.slane %v15609_v57, 2  ;;  %v15633_v62 = vrot.slane %v23999_v59, %v15346_v44 }
  0xf8   : > { %24003 = vst [vmem:[#allocation39_spill] sm:$0xff] %v15648_v20 }
  0xf9   : > { %v538_v28 = vpop.permute.xlu1 %537  ;;  %v536_v47 = vpop.permute.xlu0 %535  ;;  %24000 = vst [vmem:[#allocation37_spill] sm:$0xff] %v15633_v62  ;;  %v15645_v53 = vsel %vm4019_vm2, %v4060_v45, %v4061_v58  ;;  %v2192_v56 = vcombine.high %v15648_v20, %v15633_v62  ;;  %v2142_v45 = vrot.slane %v2128_v13, %v15346_v44 }
  0xfa   : > { %24002 = vst [vmem:[#allocation38_spill] sm:$0xff] %v15645_v53  ;;  %v15651_v59 = vsel %vm567_vm4, %v536_v47, 0.0  ;;  %v15654_v54 = vsel %vm567_vm4, %v538_v28, 0.0  ;;  %v15667_v47 = vrot.slane %v2064_v24, %v15269_v5  ;;  %v24021_v53 = vrot.slane %v15603_v42, 1 }
  0xfb   : > { %v4063_v50 = vrot.slane %v15651_v59, 2  ;;  %2473 = vrot.lane.b32.xlu1 %v2192_v56, %s14921_s8  ;;  %v2193_v20 = vcombine.low %v2142_v45, %v2174_v51 }
  0xfc   : > { %v2143_v24 = vcombine.low %v15667_v47, %v15642_v21 }
  0xfd   : > { %v542_v31 = vpop.permute.xlu1 %541  ;;  %v540_v19 = vpop.permute.xlu0 %539  ;;  %v15670_v28 = vsel %vm4019_vm2, %v4061_v58, %v4063_v50  ;;  %v24004_v50 = vcombine.low %v15313_v22, %v15316_v23 }
  0xfe   : > { %v15658_v12 = vsel %vm567_vm4, %v542_v31, 0.0  ;;  %v15664_v16 = vsel %vm567_vm4, %v540_v19, 0.0  ;;  %v4065_v31 = vrot.slane %v15654_v54, 2 }
  0xff   : > { %v4068_v33 = vrot.slane %v15658_v12, 2  ;;  %v4066_v37 = vrot.slane %v15664_v16, 2  ;;  %v15685_v58 = vrot.slane %v24004_v50, %v15346_v44  ;;  %v24006_v50 = vcombine.high %v15313_v22, %v15316_v23  ;;  %2481 = vrot.lane.b32.xlu1 %v2193_v20, %s14920_s1 }
 0x100   : > { %v24011_v22 = vcombine.low %v15391_v36, %v15394_v40  ;;  %v24015_v20 = vcombine.low %v15408_v48, %v15411_v49  ;;  %v2144_v48 = vcombine.high %v15667_v47, %v15642_v21 }
 0x101   : > { %v546_v27 = vpop.permute.xlu1 %545  ;;  %v544_v19 = vpop.permute.xlu0 %543  ;;  %v15688_v13 = vsel %vm4019_vm2, %v4065_v31, %v4066_v37  ;;  %v15691_v56 = vsel %vm4019_vm2, %v4066_v37, %v4068_v33  ;;  %v15703_v31 = vrot.slane %v24006_v50, %v15346_v44  ;;  %v24007_v33 = vcombine.low %v15378_v8, %v15381_v9 }
 0x102   : > { %v15677_v7 = vsel %vm567_vm4, %v546_v27, 0.0  ;;  %24005 = vst [vmem:[#allocation40_spill] sm:$0xff] %v15688_v13  ;;  %v574_v43 = vsel %vm567_vm4, %v544_v19, 0.0  ;;  %v24009_v19 = vcombine.high %v15378_v8, %v15381_v9  ;;  %v15722_v23 = vrot.slane %v24011_v22, %v15346_v44 }
 0x103   : > { %v4071_v18 = vrot.slane %v15677_v7, 2  ;;  %v15709_v37 = vrot.slane %v24007_v33, %v15346_v44  ;;  %v24013_v50 = vcombine.high %v15391_v36, %v15394_v40  ;;  %v650_v9 = vrot.slane %v15609_v57, 1 }
 0x104   : > { %v15716_v27 = vrot.slane %v24009_v19, %v15346_v44  ;;  %24012 = vst [vmem:[#allocation43_spill] sm:$0xff] %v15722_v23  ;;  %v4070_v19 = vrot.slane %v574_v43, 2  ;;  %v655_v23 = vrot.slane %v15654_v54, 1  ;;  %v2151_v40 = vrot.slane %v2143_v24, %v15346_v44 }
 0x105   : > { %v550_v3 = vpop.permute.xlu1 %549  ;;  %24008 = vst [vmem:[#allocation41_spill] sm:$0xff] %v15709_v37  ;;  %v548_v62 = vpop.permute.xlu0 %547  ;;  %v15728_v33 = vrot.slane %v24013_v50, %v15346_v44  ;;  %v15734_v37 = vrot.slane %v24015_v20, %v15346_v44 }
 0x106   : > { %24010 = vst [vmem:[#allocation42_spill] sm:$0xff] %v15716_v27  ;;  %v577_v22 = vsel %vm567_vm4, %v550_v3, 0.0  ;;  %v2194_v27 = vcombine.high %v2142_v45, %v2174_v51  ;;  %v15744_v49 = vsel %vm4019_vm2, %v4070_v19, %v4071_v18  ;;  %v660_v51 = vrot.slane %v574_v43, 1 }
 0x107   : > { %24014 = vst [vmem:[#allocation44_spill] sm:$0xff] %v15728_v33  ;;  %24016 = vst [vmem:[#allocation45_spill] sm:$0xff] %v15734_v37  ;;  %v2215_v36 = vcombine.low %v15654_v54, %v577_v22  ;;  %v2216_v20 = vcombine.high %v15654_v54, %v577_v22  ;;  %v15754_v24 = vsel %vm567_vm4, %v548_v62, 0.0  ;;  %v2199_v19 = vcombine.low %v15609_v57, %v574_v43 }
 0x108   : > { %24017 = vst [vmem:[#allocation46_spill] sm:$0xff] %v15744_v49  ;;  %2489 = vrot.lane.b32.xlu1 %v2194_v27, %s14923_s14  ;;  %v2200_v54 = vcombine.high %v15609_v57, %v574_v43  ;;  %v4073_v33 = vrot.slane %v15754_v24, 2  ;;  %v665_v47 = vrot.slane %v577_v22, 1  ;;  %v2195_v3 = vcombine.low %v2151_v40, %v15685_v58 }
 0x109   : > { %v554_v8 = vpop.permute.xlu1 %553  ;;  %v552_v50 = vpop.permute.xlu0 %551  ;;  %v15763_v27 = vrot.slane %v2215_v36, %v15269_v5  ;;  %v15770_v62 = vrot.slane %v2216_v20, %v15269_v5  ;;  %v2158_v20 = vrot.slane %v2144_v48, %v15346_v44 }
 0x10a   : > { %v15760_v21 = vsel %vm567_vm4, %v554_v8, 0.0  ;;  %v15767_v45 = vsel %vm567_vm4, %v552_v50, 0.0  ;;  %v15773_v37 = vsel %vm4019_vm2, %v4071_v18, %v4073_v33  ;;  %v24019_v8 = vrot.slane %v15677_v7, 1 }
 0x10b   : > { %24018 = vst [vmem:[#allocation47_spill] sm:$0xff] %v15773_v37  ;;  %v4078_v18 = vrot.slane %v15760_v21, 2  ;;  %v2207_v33 = vrot.slane %v2199_v19, %v15269_v5  ;;  %v2214_v43 = vrot.slane %v2200_v54, %v15269_v5  ;;  %v24020_v57 = vrot.slane %v15767_v45, 1 }
 0x10c   : > { %v662_v36 = vsel %vm609_vm1, %v660_v51, %v24019_v8  ;;  %2497 = vrot.lane.b32.xlu1 %v2195_v3, %s14922_s17  ;;  %v4075_v3 = vrot.slane %v577_v22, 2  ;;  %v2196_v8 = vcombine.high %v2151_v40, %v15685_v58  ;;  %v4076_v50 = vrot.slane %v15767_v45, 2 }
 0x10d   : > { %v667_v49 = vsel %vm609_vm1, %v665_v47, %v24020_v57  ;;  %v652_v19 = vsel %vm609_vm1, %v650_v9, %v24021_v53  ;;  %v24022_v54 = vrot.slane %v15664_v16, 1  ;;  %v2232_v47 = vcombine.high %v2207_v33, %v15763_v27 }
 0x10e   : > { %v2247_v57 = vcombine.low %v2214_v43, %v15770_v62  ;;  %v15807_v58 = vsel %vm4019_vm2, %v4075_v3, %v4076_v50  ;;  %v15810_v22 = vsel %vm4019_vm2, %v4076_v50, %v4078_v18  ;;  %v830_v48 = vcombine.low %v652_v19, %v662_v36 }
 0x10f   : > { %v657_v37 = vsel %vm609_vm1, %v655_v23, %v24022_v54  ;;  %24023 = vst [vmem:[#allocation48_spill] sm:$0xff] %v15807_v58  ;;  %v15819_v54 = vrot.slane %v2232_v47, %v15346_v44  ;;  %v615_v53 = vrot.slane %v15534_v2, 1  ;;  %v610_v23 = vrot.slane %v15526_v46, 1 }
 0x110   : > { %2505 = vrot.lane.b32.xlu1 %v2196_v8, %s14925_s29  ;;  %v846_v40 = vcombine.low %v657_v37, %v667_v49  ;;  %v2197_v8 = vcombine.low %v2158_v20, %v15703_v31  ;;  %v15824_v50 = vrot.slane %v830_v48, %v15269_v5  ;;  %v616_v51 = vrot.slane %v15543_v26, 1 }
 0x111   : > { %2483 = vrot.lane.b32.xlu0 %v15819_v54, %s14920_s1  ;;  %v847_v47 = vcombine.high %v657_v37, %v667_v49  ;;  %v620_v9 = vrot.slane %v15561_v0, 1  ;;  %v625_v3 = vrot.slane %v15580_v6, 1  ;;  %v621_v2 = vrot.slane %v15549_v11, 1 }
 0x112   : > { %v15827_v18 = vrot.slane %v846_v40, %v15269_v5  ;;  %v831_v40 = vcombine.high %v652_v19, %v662_v36  ;;  %v15841_v46 = vrot.slane %v2247_v57, %v15346_v44  ;;  %v2248_v58 = vcombine.high %v2214_v43, %v15770_v62 }
 0x113   : > { %v2231_v13 = vcombine.low %v2207_v33, %v15763_v27  ;;  %v611_v49 = vrot.slane %v15530_v61, 1  ;;  %v24024_v0 = vrot.slane %v15592_v15, 1  ;;  %v2198_v37 = vcombine.high %v2158_v20, %v15703_v31 }
 0x114   : > { %2513 = vrot.lane.b32.xlu1 %v2197_v8, %s14924_s26  ;;  %v863_v48 = vcombine.high %v15824_v50, %v15827_v18  ;;  %v861_v36 = vrot.slane %v847_v47, %v15269_v5  ;;  %v24025_v62 = vcombine.low %v15419_v63, %v15422_v38  ;;  %v24026_v27 = vcombine.low %v15477_v25, %v15480_v60 }
 0x115   : > { %v15849_v6 = vsel %vm609_vm1, %v625_v3, %v24024_v0  ;;  %2499 = vrot.lane.b32.xlu0 %v15841_v46, %s14922_s17  ;;  %v24027_v31 = vcombine.high %v15477_v25, %v15480_v60  ;;  %v24028_v19 = vcombine.low %v15490_v4, %v15493_v30  ;;  %v15880_v3 = vsel %vm609_vm1, %v615_v53, %v616_v51 }
 0x116   : > { %v15859_v43 = vrot.slane %v24025_v62, %v15346_v44  ;;  %v15865_v33 = vrot.slane %v24026_v27, %v15346_v44  ;;  %v622_v8 = vsel %vm609_vm1, %v620_v9, %v621_v2  ;;  %v15885_v47 = vrot.slane %v863_v48, %v15346_v44 }
 0x117   : > { %v15871_v20 = vrot.slane %v24027_v31, %v15346_v44  ;;  %v15877_v57 = vrot.slane %v24028_v19, %v15346_v44  ;;  %v845_v25 = vrot.slane %v831_v40, %v15269_v5  ;;  %v2267_v60 = vcombine.low %v15530_v61, %v15549_v11 }
 0x118   : > { %2521 = vrot.lane.b32.xlu1 %v2198_v37, %s14926_s16  ;;  %v710_v0 = vcombine.low %v15880_v3, %v15849_v6  ;;  %v15893_v62 = vrot.slane %v2248_v58, %v15346_v44  ;;  %v15896_v53 = vrot.slane %v2231_v13, %v15346_v44  ;;  %v612_v9 = vsel %vm609_vm1, %v610_v23, %v611_v49 }
 0x119   : > { %v878_v37 = vcombine.low %v845_v25, %v861_v36  ;;  %v24031_v48 = vcombine.high %v15490_v4, %v15493_v30  ;;  %v24032_v27 = vcombine.low %v15499_v34, %v15502_v41  ;;  %v613_v58 = vrot.slane %v15540_v39, 1 }
 0x11a   : > { %24029 = vst [vmem:[#allocation49_spill] sm:$0xff] %v15893_v62  ;;  %24030 = vst [vmem:[#allocation50_spill] sm:$0xff] %v15896_v53  ;;  %v694_v19 = vcombine.low %v612_v9, %v622_v8  ;;  %2515 = vrot.lane.b32.xlu0 %v15893_v62, %s14924_s26  ;;  %v24033_v13 = vcombine.high %v15499_v34, %v15502_v41  ;;  %v24034_v4 = vcombine.low %v15508_v55, %v15511_v14  ;;  %v24036_v62 = vmov 0.0  }
 0x11b   : > { %v15903_v40 = vrot.slane %v24031_v48, %v15346_v44  ;;  %v15909_v31 = vrot.slane %v24032_v27, %v15346_v44  ;;  %v618_v48 = vrot.slane %v15558_v32, 1  ;;  %v623_v39 = vrot.slane %v15577_v10, 1 }
 0x11c   : > { %v15918_v23 = vrot.slane %v24033_v13, %v15346_v44  ;;  %v15924_v30 = vrot.slane %v24034_v4, %v15346_v44  ;;  %v668_v27 = vrot.slane %v15760_v21, 1  ;;  %1114 = vrot.lane.b32.xlu1 %v15885_v47, %s14920_s1  ;;  %v24035_v34 = vcombine.high %v15508_v55, %v15511_v14 }
 0x11d   : > { %v15938_v13 = vrot.slane %v2267_v60, %v15269_v5  ;;  %v663_v4 = vrot.slane %v15754_v24, 1  ;;  %v2263_v32 = vcombine.high %v15896_v53, %v24036_v62  ;;  %v718_v10 = vrot.slane %v710_v0, %v15269_v5 }
 0x11e   : > { %v15935_v41 = vrot.slane %v24035_v34, %v15346_v44  ;;  %v658_v21 = vrot.slane %v15658_v12, 1  ;;  %v15946_v61 = vrot.slane %v878_v37, %v15346_v44  ;;  %v879_v11 = vcombine.high %v845_v25, %v861_v36 }
 0x11f   : > { %v862_v55 = vcombine.low %v15824_v50, %v15827_v18  ;;  %v15951_v14 = vsel %vm609_vm1, %v611_v49, %v613_v58  ;;  %v695_v60 = vcombine.high %v612_v9, %v622_v8  ;;  %v653_v24 = vrot.slane %v15651_v59, 1  ;;  %2475 = vrot.lane.b32.xlu0 %v2263_v32, %s14921_s8 }
 0x120   : > { %v702_v34 = vrot.slane %v694_v19, %v15269_v5  ;;  %v15957_v0 = vsel %vm609_vm1, %v616_v51, %v618_v48  ;;  %v15960_v12 = vsel %vm609_vm1, %v621_v2, %v623_v39  ;;  %v628_v36 = vrot.slane %v15584_v17, 1  ;;  %1130 = vrot.lane.b32.xlu1 %v15946_v61, %s14922_s17 }
 0x121   : > { %v24037_v50 = vrot.slane %v15767_v45, 1  ;;  %v711_v59 = vcombine.high %v15880_v3, %v15849_v6  ;;  %v24038_v49 = vrot.slane %v15677_v7, 1  ;;  %v2264_v2 = vcombine.high %v15819_v54, %v24036_v62 }
 0x122   : > { %v758_v8 = vcombine.low %v702_v34, %v718_v10  ;;  %v2283_v17 = vcombine.low %v15543_v26, %v15592_v15  ;;  %v24039_v25 = vrot.slane %v15664_v16, 1  ;;  %v893_v37 = vrot.slane %v879_v11, %v15346_v44 }
 0x123   : > { %v669_v18 = vsel %vm609_vm1, %v24037_v50, %v668_v27  ;;  %v664_v51 = vsel %vm609_vm1, %v24038_v49, %v663_v4  ;;  %v15982_v58 = vrot.slane %v862_v55, %v15346_v44  ;;  %v24041_v6 = vrot.slane %v15603_v42, 1  ;;  %2491 = vrot.lane.b32.xlu0 %v2264_v2, %s14923_s14 }
 0x124   : > { %v659_v9 = vsel %vm609_vm1, %v24039_v25, %v658_v21  ;;  %v24042_v54 = vcombine.low %v15664_v16, %v15767_v45  ;;  %v15995_v39 = vrot.slane %v695_v60, %v15269_v5  ;;  %v898_v11 = vcombine.low %v15951_v14, %v15960_v12  ;;  %1146 = vrot.lane.b32.xlu1 %v893_v37, %s14924_s26 }
 0x125   : > { %24040 = vst [vmem:[#allocation51_spill] sm:$0xff] %v15982_v58  ;;  %v654_v3 = vsel %vm609_vm1, %v24041_v6, %v653_v24  ;;  %v1050_v48 = vcombine.low %v659_v9, %v669_v18  ;;  %v24044_v27 = vrot.slane %v15592_v15, 1  ;;  %v24045_v32 = vcombine.low %v15603_v42, %v15677_v7 }
 0x126   : > { %v15991_v19 = vrot.slane %v24042_v54, %v15269_v5  ;;  %v1034_v55 = vcombine.low %v654_v3, %v664_v51  ;;  %v2265_v60 = vcombine.high %v15841_v46, %v24036_v62  ;;  %v16014_v24 = vrot.slane %v758_v8, %v15346_v44 }
 0x127   : > { %v16002_v4 = vsel %vm609_vm1, %v24044_v27, %v628_v36  ;;  %v16008_v21 = vrot.slane %v24045_v32, %v15269_v5  ;;  %v759_v50 = vcombine.high %v702_v34, %v718_v10  ;;  %v16017_v49 = vrot.slane %v711_v59, %v15269_v5 }
 0x128   : > { %24043 = vst [vmem:[#allocation52_spill] sm:$0xff] %v15991_v19  ;;  %v24047_v36 = vcombine.low %v15552_v52, %v15589_v29  ;;  %v24048_v25 = vcombine.high %v15552_v52, %v15589_v29  ;;  %v16032_v46 = vrot.slane %v2283_v17, %v15269_v5  ;;  %v894_v10 = vcombine.high %v15982_v58, %v24036_v62 }
 0x129   : > { %24046 = vst [vmem:[#allocation53_spill] sm:$0xff] %v16008_v21  ;;  %v914_v34 = vcombine.low %v15957_v0, %v16002_v4  ;;  %v1035_v59 = vcombine.high %v654_v3, %v664_v51  ;;  %2507 = vrot.lane.b32.xlu0 %v2265_v60, %s14925_s29  ;;  %v16040_v8 = vrot.slane %v1050_v48, %v15269_v5  ;;  %v24051_v48 = vld [vmem:[#allocation41_spill] sm:$0xff]  ;;  %vm9886_vm1 = vcmask 64512  }
 0x12a   : > { %v16023_v2 = vrot.slane %v24047_v36, %v15269_v5  ;;  %v16029_v6 = vrot.slane %v24048_v25, %v15269_v5  ;;  %v24049_v29 = vcombine.low %v15567_v1, %v15617_v35  ;;  %v24050_v54 = vcombine.high %v15664_v16, %v15767_v45  ;;  %1106 = vrot.lane.b32.xlu1 %v894_v10, %s14921_s8 }
 0x12b   : > { %v16058_v51 = vrot.slane %v1034_v55, %v15269_v5  ;;  %v1051_v3 = vcombine.high %v659_v9, %v669_v18  ;;  %v823_v32 = vcombine.high %v16014_v24, %v24051_v48  ;;  %v773_v60 = vrot.slane %v759_v50, %v15346_v44  ;;  %v24054_v55 = vld [vmem:[#allocation47_spill] sm:$0xff] }
 0x12c   : > { %v16048_v17 = vrot.slane %v24049_v29, %v15269_v5  ;;  %v16054_v27 = vrot.slane %v24050_v54, %v15269_v5  ;;  %v774_v36 = vcombine.low %v15995_v39, %v16017_v49  ;;  %v24052_v16 = vcombine.high %v15567_v1, %v15617_v35 }
 0x12d   : > { %v24053_v18 = vcombine.high %v15603_v42, %v15677_v7  ;;  %v24055_v50 = vcombine.low %v15670_v28, %v24054_v55  ;;  %v895_v29 = vcombine.high %v15885_v47, %v24036_v62  ;;  %v24056_v35 = vcombine.high %v15670_v28, %v24054_v55  ;;  %1104 = vrot.lane.b32.xlu0 %v823_v32, %s14921_s8  ;;  %v24058_v47 = vld [vmem:[#allocation30_spill] sm:$0xff] }
 0x12e   : > { %v16071_v45 = vrot.slane %v24052_v16, %v15269_v5  ;;  %v24057_v42 = vcombine.low %v15691_v56, %v15810_v22  ;;  %v1067_v54 = vcombine.high %v16058_v51, %v16040_v8  ;;  %v16103_v16 = vrot.slane %v1035_v59, %v15269_v5 }
 0x12f   : > { %v16077_v9 = vrot.slane %v24053_v18, %v15269_v5  ;;  %v16083_v10 = vrot.slane %v24055_v50, %v15269_v5  ;;  %v16091_v1 = vrot.slane %v24056_v35, %v15269_v5  ;;  %1122 = vrot.lane.b32.xlu1 %v895_v29, %s14923_s14  ;;  %v16107_v28 = vrot.slane %v1051_v3, %v15269_v5  ;;  %v24059_v18 = vld [vmem:[#allocation34_spill] sm:$0xff]  ;;  %v24061_v35 = vld [vmem:[#allocation33_spill] sm:$0xff] }
 0x130   : > { %v16097_v7 = vrot.slane %v24057_v42, %v15269_v5  ;;  %v24060_v55 = vcombine.low %v24058_v47, %v24059_v18  ;;  %v24062_v42 = vld [vmem:[#allocation36_spill] sm:$0xff]  ;;  %v896_v59 = vcombine.high %v15946_v61, %v24036_v62  ;;  %v24066_v29 = vld [vmem:[#allocation42_spill] sm:$0xff]  ;;  %v782_v3 = vrot.slane %v774_v36, %v15346_v44 }
 0x131   : > { %v24063_v32 = vcombine.low %v24061_v35, %v24062_v42  ;;  %v824_v19 = vcombine.low %v773_v60, %v24066_v29  ;;  %v16127_v26 = vrot.slane %v914_v34, %v15269_v5  ;;  %v825_v58 = vcombine.high %v773_v60, %v24066_v29  ;;  %v24071_v29 = vld [vmem:[#allocation46_spill] sm:$0xff] }
 0x132   : > { %v4112_v50 = vrot.slane %v24060_v55, %v15269_v5  ;;  %v897_v55 = vcombine.high %v893_v37, %v24036_v62  ;;  %v16132_v61 = vrot.slane %v1067_v54, %v15346_v44  ;;  %v775_v36 = vcombine.high %v15995_v39, %v16017_v49 }
 0x133   : > { %v4128_v25 = vrot.slane %v24063_v32, %v15269_v5  ;;  %1112 = vrot.lane.b32.xlu0 %v824_v19, %s14920_s1  ;;  %v1066_v21 = vcombine.low %v16058_v51, %v16040_v8  ;;  %1138 = vrot.lane.b32.xlu1 %v896_v59, %s14925_s29  ;;  %v1082_v37 = vcombine.low %v16103_v16, %v16107_v28  ;;  %vm9895_vm2 = vcmask 80896  }
 0x134   : > { %v16142_v34 = vrot.slane %v898_v11, %v15269_v5  ;;  %v1083_v39 = vcombine.high %v16103_v16, %v16107_v28  ;;  %v24068_v49 = vcombine.high %v24058_v47, %v24059_v18  ;;  %v24069_v11 = vcombine.high %v24061_v35, %v24062_v42  ;;  %v24070_v42 = vld [vmem:[#allocation38_spill] sm:$0xff]  ;;  %v24074_v16 = vld [vmem:[#allocation48_spill] sm:$0xff] }
 0x135   : > { %v4168_v15 = vcombine.low %v4112_v50, %v4128_v25  ;;  %v4169_v32 = vcombine.high %v4112_v50, %v4128_v25  ;;  %v24067_v25 = vld [vmem:[#allocation43_spill] sm:$0xff]  ;;  %v2331_v28 = vcombine.low %v15938_v13, %v16032_v46  ;;  %v4372_v50 = vcombine.low %v16023_v2, %v16048_v17 }
 0x136   : > { %v826_v54 = vcombine.low %v782_v3, %v24067_v25  ;;  %v4119_v8 = vrot.slane %v24068_v49, %v15269_v5  ;;  %v4135_v51 = vrot.slane %v24069_v11, %v15269_v5  ;;  %v24073_v11 = vld [vmem:[#allocation40_spill] sm:$0xff]  ;;  %v4241_v18 = vcombine.high %v24070_v42, %v24071_v29 }
 0x137   : > { %v16145_v19 = vrot.slane %v4168_v15, %v15346_v44  ;;  %v16148_v60 = vrot.slane %v4169_v32, %v15346_v44  ;;  %v962_v15 = vcombine.low %v16142_v34, %v16127_v26  ;;  %1120 = vrot.lane.b32.xlu0 %v825_v58, %s14923_s14  ;;  %1154 = vrot.lane.b32.xlu1 %v897_v55, %s14926_s16  ;;  %vm9912_vm4 = vcmask 113664  }
 0x138   : > { %v4184_v47 = vcombine.low %v4119_v8, %v4135_v51  ;;  %v4185_v35 = vcombine.high %v4119_v8, %v4135_v51  ;;  %v24072_v32 = vcombine.low %v24070_v42, %v24071_v29  ;;  %v24075_v58 = vcombine.low %v24073_v11, %v24074_v16 }
 0x139   : > { %v4373_v8 = vcombine.high %v16023_v2, %v16048_v17  ;;  %v827_v55 = vcombine.high %v782_v3, %v24067_v25  ;;  %v16205_v53 = vrot.slane %v4372_v50, %v15346_v44  ;;  %v789_v17 = vrot.slane %v775_v36, %v15346_v44 }
 0x13a   : > { %v16179_v49 = vrot.slane %v24072_v32, %v15269_v5  ;;  %v16185_v59 = vrot.slane %v24075_v58, %v15269_v5  ;;  %v16193_v51 = vrot.slane %v4184_v47, %v15346_v44  ;;  %v16196_v32 = vrot.slane %v4185_v35, %v15346_v44 }
 0x13b   : > { %v16208_v2 = vrot.slane %v4373_v8, %v15346_v44  ;;  %1128 = vrot.lane.b32.xlu0 %v826_v54, %s14922_s17  ;;  %1170 = vrot.lane.b32.xlu1 %v16132_v61, %s14920_s1  ;;  %v16221_v50 = vrot.slane %v962_v15, %v15346_v44  ;;  %v16224_v35 = vrot.slane %v2331_v28, %v15346_v44 }
 0x13c   : > { %v4272_v58 = vcombine.low %v16179_v49, %v16185_v59  ;;  %v4236_v3 = vcombine.low %v16193_v51, %v15877_v57  ;;  %v4237_v25 = vcombine.high %v16193_v51, %v15877_v57  ;;  %v4238_v47 = vcombine.low %v16196_v32, %v15903_v40 }
 0x13d   : > { %v16231_v42 = vrot.slane %v1066_v21, %v15346_v44  ;;  %v4257_v8 = vcombine.high %v24073_v11, %v24074_v16  ;;  %v1090_v28 = vrot.slane %v1082_v37, %v15346_v44  ;;  %v16241_v52 = vrot.slane %v4241_v18, %v15269_v5  ;;  %v24078_v37 = vld [vmem:[#allocation44_spill] sm:$0xff] }
 0x13e   : > { %v4388_v54 = vcombine.low %v16029_v6, %v16071_v45  ;;  %v4389_v16 = vcombine.high %v16029_v6, %v16071_v45  ;;  %v24077_v45 = vld [vmem:[#allocation45_spill] sm:$0xff]  ;;  %v828_v15 = vcombine.low %v789_v17, %v24078_v37  ;;  %v963_v21 = vcombine.high %v16142_v34, %v16127_v26 }
 0x13f   : > { %1136 = vrot.lane.b32.xlu0 %v827_v55, %s14925_s29  ;;  %v16249_v29 = vrot.slane %v4257_v8, %v15269_v5  ;;  %1186 = vrot.lane.b32.xlu1 %v1090_v28, %s14922_s17  ;;  %v24076_v55 = vcombine.high %v15691_v56, %v15810_v22  ;;  %v1097_v56 = vrot.slane %v1083_v39, %v15346_v44 }
 0x140   : > { %v16259_v11 = vrot.slane %v4388_v54, %v15346_v44  ;;  %v16277_v36 = vrot.slane %v4389_v16, %v15346_v44  ;;  %v915_v16 = vcombine.high %v15957_v0, %v16002_v4  ;;  %v1098_v0 = vcombine.high %v16231_v42, %v24036_v62 }
 0x141   : > { %v16265_v8 = vrot.slane %v24076_v55, %v15269_v5  ;;  %v4288_v18 = vcombine.low %v16241_v52, %v16249_v29  ;;  %v4289_v54 = vcombine.high %v16241_v52, %v16249_v29  ;;  %v829_v55 = vcombine.high %v789_v17, %v24078_v37 }
 0x142   : > { %v899_v4 = vcombine.high %v15951_v14, %v15960_v12  ;;  %v1027_v17 = vcombine.high %v16221_v50, %v15859_v43  ;;  %v977_v26 = vrot.slane %v963_v21, %v15346_v44  ;;  %v24079_v34 = vcombine.high %v15419_v63, %v15422_v38 }
 0x143   : > { %1144 = vrot.lane.b32.xlu0 %v828_v15, %s14924_s26  ;;  %1202 = vrot.lane.b32.xlu1 %v1097_v56, %s14924_s26  ;;  %v929_v15 = vrot.slane %v915_v16, %v15269_v5  ;;  %v1099_v6 = vcombine.high %v16132_v61, %v24036_v62  ;;  %v1100_v21 = vcombine.high %v1090_v28, %v24036_v62  ;;  %v24080_v16 = vld [vmem:[#allocation27_spill] sm:$0xff]  ;;  %v24081_v61 = vld [vmem:[#allocation28_spill] sm:$0xff] }
 0x144   : > { %v1009_v37 = vrot.slane %v24079_v34, %v15346_v44  ;;  %v913_v14 = vrot.slane %v899_v4, %v15269_v5  ;;  %v24083_v34 = vld [vmem:[#allocation35_spill] sm:$0xff]  ;;  %v2332_v28 = vcombine.high %v15938_v13, %v16032_v46  ;;  %v24109_v57 = vcombine.high %v16179_v49, %v16185_v59 }
 0x145   : > { %v24084_v4 = vld [vmem:[#allocation31_spill] sm:$0xff]  ;;  %v24111_v59 = vcombine.high %v16205_v53, %v15909_v31  ;;  %v24116_v29 = vcombine.high %v16259_v11, %v15924_v30 }
 0x146   : > { %v1028_v12 = vcombine.low %v977_v26, %v1009_v37  ;;  %v1029_v63 = vcombine.high %v977_v26, %v1009_v37  ;;  %v2284_v22 = vcombine.high %v24084_v4, %v24083_v34  ;;  %v2346_v34 = vrot.slane %v2332_v28, %v15346_v44  ;;  %v24088_v4 = vld [vmem:[#allocation24_spill] sm:$0xff] }
 0x147   : > { %1152 = vrot.lane.b32.xlu0 %v829_v55, %s14926_s16  ;;  %1162 = vrot.lane.b32.xlu1 %v1098_v0, %s14921_s8  ;;  %v978_v55 = vcombine.low %v913_v14, %v929_v15  ;;  %v24082_v0 = vcombine.low %v24080_v16, %v24081_v61  ;;  %v4287_v51 = vrot.slane %v24109_v57, %v15346_v44 }
 0x148   : > { %v2298_v39 = vrot.slane %v2284_v22, %v15269_v5  ;;  %v24090_v22 = vcombine.high %v24080_v16, %v24081_v61 }
 0x149   : > { %v986_v38 = vrot.slane %v978_v55, %v15346_v44  ;;  %v979_v55 = vcombine.high %v913_v14, %v929_v15 }
 0x14a   : > { %v1025_v14 = vrot.slane %v24090_v22, %v15346_v44 }
 0x14b   : > { %1160 = vrot.lane.b32.xlu0 %v1027_v17, %s14921_s8  ;;  %1178 = vrot.lane.b32.xlu1 %v1099_v6, %s14923_s14  ;;  %v1018_v17 = vrot.slane %v24082_v0, %v15346_v44  ;;  %v1101_v6 = vcombine.high %v1097_v56, %v24036_v62  ;;  %v2396_v0 = vcombine.high %v16224_v35, %v24077_v45  ;;  %v24087_v56 = vld [vmem:[#allocation23_spill] sm:$0xff] }
 0x14c   : > { %v24089_v13 = vcombine.high %v24087_v56, %v24088_v4  ;;  %v993_v15 = vrot.slane %v979_v55, %v15346_v44  ;;  %v16366_v4 = vpop.permute.xlu1 %1310 }
 0x14d   : > { %v1030_v37 = vcombine.low %v986_v38, %v1018_v17 }
 0x14e   : > { %v2378_v46 = vrot.slane %v24089_v13, %v15346_v44  ;;  %v1033_v16 = vcombine.high %v993_v15, %v1025_v14 }
 0x14f   : > { %1168 = vrot.lane.b32.xlu0 %v1028_v12, %s14920_s1  ;;  %1194 = vrot.lane.b32.xlu1 %v1100_v21, %s14925_s29  ;;  %v24085_v12 = vld [vmem:[#allocation32_spill] sm:$0xff]  ;;  %v24086_v21 = vld [vmem:[#allocation29_spill] sm:$0xff] }
 0x150   : > { %v2268_v26 = vcombine.high %v24086_v21, %v24085_v12  ;;  %v2397_v28 = vcombine.low %v2346_v34, %v2378_v46  ;;  %v1032_v21 = vcombine.low %v993_v15, %v1025_v14 }
 0x153   : > { %1176 = vrot.lane.b32.xlu0 %v1029_v63, %s14923_s14  ;;  %1210 = vrot.lane.b32.xlu1 %v1101_v6, %s14926_s16  ;;  %v2282_v63 = vrot.slane %v2268_v26, %v15269_v5  ;;  %v1031_v6 = vcombine.high %v986_v38, %v1018_v17  ;;  %v24092_v38 = vld [vmem:[#allocation26_spill] sm:$0xff] }
 0x155   : > { %v2347_v12 = vcombine.low %v2282_v63, %v2298_v39  ;;  %v2348_v56 = vcombine.high %v2282_v63, %v2298_v39 }
 0x157   : > { %1184 = vrot.lane.b32.xlu0 %v1030_v37, %s14922_s17  ;;  %2529 = vrot.lane.b32.xlu1 %v2396_v0, %s14921_s8  ;;  %v2398_v37 = vcombine.high %v2346_v34, %v2378_v46  ;;  %v2355_v26 = vrot.slane %v2347_v12, %v15346_v44  ;;  %v24091_v0 = vld [vmem:[#allocation25_spill] sm:$0xff]  ;;  %v2362_v15 = vrot.slane %v2348_v56, %v15346_v44 }
 0x158   : > { %v24093_v17 = vcombine.low %v24091_v0, %v24092_v38  ;;  %v24094_v34 = vld [vmem:[#allocation49_spill] sm:$0xff]  ;;  %v24098_v39 = vcombine.high %v24091_v0, %v24092_v38  ;;  %v24103_v56 = vcombine.low %v16077_v9, %v16054_v27 }
 0x159   : > { %v2266_v13 = vcombine.high %v24094_v34, %v24036_v62  ;;  %v24095_v46 = vld [vmem:[#allocation53_spill] sm:$0xff] }
 0x15a   : > { %v2387_v55 = vrot.slane %v24093_v17, %v15346_v44  ;;  %v2394_v63 = vrot.slane %v24098_v39, %v15346_v44  ;;  %v2459_v34 = vrot.slane %v24103_v56, %v15346_v44  ;;  %v24106_v39 = vcombine.high %v16077_v9, %v16054_v27 }
 0x15b   : > { %1192 = vrot.lane.b32.xlu0 %v1031_v6, %s14925_s29  ;;  %2537 = vrot.lane.b32.xlu1 %v2397_v28, %s14920_s1  ;;  %v24096_v6 = vld [vmem:[#allocation52_spill] sm:$0xff] }
 0x15c   : > { %v2399_v61 = vcombine.low %v2355_v26, %v2387_v55  ;;  %v24097_v22 = vcombine.low %v24095_v46, %v24096_v6  ;;  %v2400_v12 = vcombine.high %v2355_v26, %v2387_v55  ;;  %v24100_v26 = vcombine.high %v24095_v46, %v24096_v6 }
 0x15d   : > { %v2402_v38 = vcombine.high %v2362_v15, %v2394_v63  ;;  %v24104_v46 = vcombine.low %v16148_v60, %v15871_v20 }
 0x15e   : > { %v16374_v28 = vrot.slane %v24097_v22, %v15346_v44  ;;  %v2450_v0 = vrot.slane %v24100_v26, %v15346_v44  ;;  %v2469_v22 = vcombine.high %v2459_v34, %v24036_v62 }
 0x15f   : > { %1200 = vrot.lane.b32.xlu0 %v1032_v21, %s14924_s26  ;;  %2545 = vrot.lane.b32.xlu1 %v2398_v37, %s14923_s14  ;;  %v2401_v21 = vcombine.low %v2362_v15, %v2394_v63  ;;  %v16385_v37 = vpop.permute.xlu1 %1318  ;;  %v24105_v15 = vcombine.high %v16148_v60, %v15871_v20  ;;  %v2466_v63 = vrot.slane %v24106_v39, %v15346_v44 }
 0x160   : > { %v2467_v14 = vcombine.high %v16374_v28, %v24036_v62  ;;  %24099 = vst [vmem:[#allocation41_spill] sm:$0xff] %v16385_v37  ;;  %v2468_v55 = vcombine.high %v2450_v0, %v24036_v62  ;;  %v16444_v20 = vrot.slane %v4272_v58, %v15346_v44 }
 0x161   : > { %v2470_v26 = vcombine.high %v2466_v63, %v24036_v62 }
 0x162   : > { %v4304_v60 = vcombine.high %v16444_v20, %v24036_v62 }
 0x163   : > { %1208 = vrot.lane.b32.xlu0 %v1033_v16, %s14926_s16  ;;  %2553 = vrot.lane.b32.xlu1 %v2399_v61, %s14922_s17  ;;  %v16395_v17 = vpop.permute.xlu1 %1326  ;;  %v16398_v16 = vpop.permute.xlu0 %1306  ;;  %v24102_v61 = vcombine.high %v16145_v19, %v15865_v33 }
 0x164   : > { %24101 = vst [vmem:[#allocation47_spill] sm:$0xff] %v16395_v17 }
 0x167   : > { %2523 = vrot.lane.b32.xlu0 %v2266_v13, %s14926_s16  ;;  %2561 = vrot.lane.b32.xlu1 %v2400_v12, %s14925_s29  ;;  %v16416_v6 = vpop.permute.xlu0 %1314 }
 0x16b   : > { %2531 = vrot.lane.b32.xlu0 %v2467_v14, %s14921_s8  ;;  %2569 = vrot.lane.b32.xlu1 %v2401_v21, %s14924_s26  ;;  %v16432_v21 = vpop.permute.xlu0 %1322 }
 0x16c   : > { %24107 = vst [vmem:[#allocation30_spill] sm:$0xff] %v16432_v21 }
 0x16d   : > { %v16409_v13 = vpop.permute.xlu1 %2473 }
 0x16f   : > { %2539 = vrot.lane.b32.xlu0 %v2450_v0, %s14920_s1  ;;  %2577 = vrot.lane.b32.xlu1 %v2402_v38, %s14926_s16  ;;  %v16453_v9 = vpop.permute.xlu0 %1330  ;;  %v24110_v0 = vcombine.high %v16196_v32, %v15903_v40  ;;  %v4296_v40 = vrot.slane %v4288_v18, %v15346_v44  ;;  %v24113_v18 = vcombine.high %v16208_v2, %v15918_v23 }
 0x170   : > { %24108 = vst [vmem:[#allocation34_spill] sm:$0xff] %v16453_v9 }
 0x171   : > { %v16419_v12 = vpop.permute.xlu1 %2481 }
 0x173   : > { %2547 = vrot.lane.b32.xlu0 %v2468_v55, %s14923_s14  ;;  %4514 = vrot.lane.b32.xlu1 %v24102_v61, %s14921_s8  ;;  %v24112_v61 = vcombine.low %v16208_v2, %v15918_v23  ;;  %v24115_v2 = vcombine.low %v16083_v10, %v16097_v7 }
 0x177   : > { %2555 = vrot.lane.b32.xlu0 %v2459_v34, %s14922_s17  ;;  %4522 = vrot.lane.b32.xlu1 %v24104_v46, %s14920_s1  ;;  %v4306_v34 = vcombine.high %v4296_v40, %v24036_v62 }
 0x17a   : > { %v16430_v14 = vpop.permute.xlu1 %2489 }
 0x17b   : > { %2563 = vrot.lane.b32.xlu0 %v2469_v22, %s14925_s29  ;;  %4530 = vrot.lane.b32.xlu1 %v24105_v15, %s14923_s14  ;;  %v4303_v15 = vrot.slane %v4289_v54, %v15346_v44 }
 0x17d   : > { %v4307_v23 = vcombine.high %v4303_v15, %v24036_v62 }
 0x17e   : > { %v16446_v27 = vpop.permute.xlu1 %2497 }
 0x17f   : > { %2571 = vrot.lane.b32.xlu0 %v2466_v63, %s14924_s26  ;;  %4538 = vrot.lane.b32.xlu1 %v4236_v3, %s14922_s17  ;;  %v24114_v63 = vcombine.low %v16259_v11, %v15924_v30  ;;  %v24118_v30 = vcombine.high %v16083_v10, %v16097_v7  ;;  %v24120_v10 = vcombine.low %v16091_v1, %v16265_v8 }
 0x181   : > { %v4491_v11 = vrot.slane %v24118_v30, %v15346_v44  ;;  %v4500_v7 = vrot.slane %v24120_v10, %v15346_v44  ;;  %v14927_v30 = vmov 0  }
 0x182   : > { %v16457_v3 = vpop.permute.xlu1 %2505  ;;  %14704 = vset.pattern.permute.xlu1 %v14927_v30  ;;  %14705 = vset.pattern.permute.xlu0 %v14927_v30  ;;  %v24123_v30 = vld [vmem:[#allocation19_spill] sm:$0xff] }
 0x183   : > { %2579 = vrot.lane.b32.xlu0 %v2470_v26, %s14926_s16  ;;  %4546 = vrot.lane.b32.xlu1 %v4237_v25, %s14925_s29  ;;  %v16464_v58 = vpop.permute.xlu0 %2483 }
 0x186   : > { %v16470_v25 = vpop.permute.xlu1 %2513 }
 0x187   : > { %4516 = vrot.lane.b32.xlu0 %v4304_v60, %s14921_s8  ;;  %4554 = vrot.lane.b32.xlu1 %v4238_v47, %s14924_s26  ;;  %v16477_v38 = vpop.permute.xlu0 %2499  ;;  %v4305_v47 = vcombine.high %v4287_v51, %v24036_v62  ;;  %v16530_v60 = vrot.slane %v24115_v2, %v15346_v44 }
 0x189   : > { %v4508_v57 = vcombine.high %v16530_v60, %v24036_v62 }
 0x18a   : > { %v16480_v55 = vpop.permute.xlu1 %2521 }
 0x18b   : > { %4524 = vrot.lane.b32.xlu0 %v4287_v51, %s14920_s1  ;;  %4562 = vrot.lane.b32.xlu1 %v24110_v0, %s14926_s16  ;;  %v24117_v0 = vcombine.low %v16277_v36, %v15935_v41 }
 0x18c   : > { %v16487_v49 = vpop.permute.xlu0 %2515 }
 0x18e   : > { %v16493_v32 = vpop.permute.xlu1 %1114 }
 0x18f   : > { %4532 = vrot.lane.b32.xlu0 %v4305_v47, %s14923_s14  ;;  %4570 = vrot.lane.b32.xlu1 %v24111_v59, %s14921_s8 }
 0x191   : > { %v16500_v56 = vpop.permute.xlu0 %2475 }
 0x192   : > { %v16503_v46 = vpop.permute.xlu1 %1130 }
 0x193   : > { %4540 = vrot.lane.b32.xlu0 %v4296_v40, %s14922_s17  ;;  %4578 = vrot.lane.b32.xlu1 %v24112_v61, %s14920_s1  ;;  %v24119_v40 = vcombine.high %v16277_v36, %v15935_v41  ;;  %v4510_v36 = vcombine.high %v4500_v7, %v24036_v62 }
 0x195   : > { %v16510_v22 = vpop.permute.xlu0 %2491 }
 0x196   : > { %v16516_v39 = vpop.permute.xlu1 %1146 }
 0x197   : > { %4548 = vrot.lane.b32.xlu0 %v4306_v34, %s14925_s29  ;;  %4586 = vrot.lane.b32.xlu1 %v24113_v18, %s14923_s14  ;;  %v4509_v34 = vcombine.high %v4491_v11, %v24036_v62 }
 0x19b   : > { %4556 = vrot.lane.b32.xlu0 %v4303_v15, %s14924_s26  ;;  %4594 = vrot.lane.b32.xlu1 %v24114_v63, %s14922_s17  ;;  %v16523_v26 = vpop.permute.xlu0 %2507 }
 0x19c   : > { %v1107_v52 = vpop.permute.xlu1 %1106 }
 0x19f   : > { %4564 = vrot.lane.b32.xlu0 %v4307_v23, %s14926_s16  ;;  %4602 = vrot.lane.b32.xlu1 %v24116_v29, %s14925_s29  ;;  %v16537_v54 = vpop.permute.xlu0 %1104  ;;  %v24121_v29 = vcombine.high %v16091_v1, %v16265_v8  ;;  %v5405_v1 = vld [vmem:[%s23522_s4] sm:$0xff]  ;;  %v24122_v8 = vld [vmem:[#allocation51_spill] sm:$0xff] }
 0x1a1   : > { %v1123_v51 = vpop.permute.xlu1 %1122 }
 0x1a3   : > { %4572 = vrot.lane.b32.xlu0 %v4508_v57, %s14921_s8  ;;  %4610 = vrot.lane.b32.xlu1 %v24117_v0, %s14924_s26  ;;  %v4507_v57 = vrot.slane %v24121_v29, %v15346_v44  ;;  %v1216_v29 = vsel %vm1214_vm5, %v24122_v8, %v1107_v52  ;;  %v5409_v44 = vcombine.high %v5405_v1, %v5405_v1 }
 0x1a4   : > { %v1219_v9 = vsel %vm1217_vm6, %v1216_v29, %v16493_v32 }
 0x1a5   : > { %v16546_v47 = vpop.permute.xlu0 %1112  ;;  %v1139_v59 = vpop.permute.xlu1 %1138  ;;  %v4511_v10 = vcombine.high %v4507_v57, %v24036_v62 }
 0x1a7   : > { %4580 = vrot.lane.b32.xlu0 %v4491_v11, %s14920_s1  ;;  %4618 = vrot.lane.b32.xlu1 %v24119_v40, %s14926_s16  ;;  %v14928_v11 = vmov 1966171168  }
 0x1a8   : > { %v5411_v40 = vunpack.c.l.s4 %v14928_v11 }
 0x1a9   : > { %v16557_v61 = vpop.permute.xlu0 %1120  ;;  %v16560_v18 = vpop.permute.xlu1 %1154 }
 0x1ab   : > { %4588 = vrot.lane.b32.xlu0 %v4509_v34, %s14923_s14 }
 0x1ad   : > { %v16563_v15 = vpop.permute.xlu0 %1128  ;;  %v1171_v63 = vpop.permute.xlu1 %1170 }
 0x1af   : > { %4596 = vrot.lane.b32.xlu0 %v4500_v7, %s14922_s17 }
 0x1b1   : > { %v16570_v41 = vpop.permute.xlu0 %1136  ;;  %v1187_v23 = vpop.permute.xlu1 %1186 }
 0x1b3   : > { %4604 = vrot.lane.b32.xlu0 %v4510_v36, %s14925_s29  ;;  %v5412_v36 = vunpack.c.0.s8 %v5411_v40 }
 0x1b5   : > { %v16574_v2 = vpop.permute.xlu0 %1144  ;;  %v1203_v0 = vpop.permute.xlu1 %1202  ;;  %v16593_v11 = vsub.s32 %v5412_v36, %v24123_v30  ;;  %v1222_v36 = vsel %vm1220_vm7, %v1219_v9, %v1123_v51 }
 0x1b6   : > { %v1225_v29 = vsel %vm1223_vm8, %v1222_v36, %v16503_v46 }
 0x1b7   : > { %4612 = vrot.lane.b32.xlu0 %v4507_v57, %s14924_s26 }
 0x1b9   : > { %v16581_v34 = vpop.permute.xlu0 %1152  ;;  %v1163_v7 = vpop.permute.xlu1 %1162 }
 0x1ba   : > { %v1236_v5 = vsel %vm1214_vm5, %v16231_v42, %v1163_v7  ;;  %v16600_v7 = vsub.s32 0, %v24123_v30 }
 0x1bb   : > { %4620 = vrot.lane.b32.xlu0 %v4511_v10, %s14926_s16  ;;  %v1238_v40 = vsel %vm1217_vm6, %v1236_v5, %v1171_v63  ;;  %v5416_v10 = vrot.slane %v5405_v1, %v16593_v11  ;;  %v5423_v5 = vrot.slane %v5409_v44, %v16593_v11 }
 0x1bc   : > { %24124 = vst [vmem:[#allocation33_spill] sm:$0xff] %v16600_v7 }
 0x1bd   : > { %v16595_v57 = vpop.permute.xlu0 %1160  ;;  %v1179_v42 = vpop.permute.xlu1 %1178  ;;  %v5432_v8 = vrot.slane %v5416_v10, %v16593_v11  ;;  %v5424_v17 = vcombine.high %v5416_v10, %v5416_v10  ;;  %v5439_v51 = vrot.slane %v5423_v5, %v16593_v11 }
 0x1be   : > { %v1240_v52 = vsel %vm1220_vm7, %v1238_v40, %v1179_v42  ;;  %v1228_v40 = vsel %vm1226_vm9, %v1225_v29, %v1139_v59  ;;  %v5425_v42 = vcombine.high %v5423_v5, %v5423_v5 }
 0x1bf   : > { %v1242_v63 = vsel %vm1223_vm8, %v1240_v52, %v1187_v23  ;;  %v5510_v30 = vrot.slane %v5432_v8, %v16600_v7  ;;  %v5454_v37 = vcombine.high %v5432_v8, %v5432_v8  ;;  %v5446_v32 = vrot.slane %v5424_v17, %v16593_v11  ;;  %v5406_v17 = vld [vmem:[%s23522_s4 + $0x8] sm:$0xff] }
 0x1c0   : > { %v5526_v8 = vrot.slane %v5439_v51, %v16600_v7 }
 0x1c1   : > { %v1169_v21 = vpop.permute.xlu0 %1168  ;;  %v1195_v1 = vpop.permute.xlu1 %1194  ;;  %5572 = vperm.xlu1 %14704, %v5510_v30   ;;  %v5514_v44 = vrot.slane %v5446_v32, %v16600_v7  ;;  %v5518_v52 = vrot.slane %v5454_v37, %v16600_v7  ;;  %v5456_v36 = vcombine.high %v5446_v32, %v5446_v32  ;;  %v1231_v30 = vsel %vm1229_vm10, %v1228_v40, %v16516_v39 }
 0x1c2   : > { %v1244_v9 = vsel %vm1226_vm9, %v1242_v63, %v1195_v1  ;;  %v1234_v5 = vsel %vm1232_vm12, %v1231_v30, %v16560_v18  ;;  %v5455_v63 = vcombine.high %v5439_v51, %v5439_v51  ;;  %v5453_v1 = vrot.slane %v5425_v42, %v16593_v11 }
 0x1c3   : > { %v1246_v46 = vsel %vm1229_vm10, %v1244_v9, %v1203_v0  ;;  %5576 = vperm.xlu0 %14705, %v5514_v44   ;;  %v5465_v0 = vrot.slane %v5406_v17, %v16593_v11  ;;  %v5522_v32 = vrot.slane %v5456_v36, %v16600_v7  ;;  %v5458_v44 = vcombine.high %v5406_v17, %v5406_v17 }
 0x1c4   : > { %v5534_v29 = vrot.slane %v5455_v63, %v16600_v7  ;;  %v5530_v51 = vrot.slane %v5453_v1, %v16600_v7  ;;  %v24125_v36 = vcombine.low %v16014_v24, %v24051_v48  ;;  %v24126_v17 = vcombine.low %v16221_v50, %v15859_v43 }
 0x1c5   : > { %v1177_v23 = vpop.permute.xlu0 %1176  ;;  %v1211_v10 = vpop.permute.xlu1 %1210  ;;  %5580 = vperm.xlu1 %14704, %v5518_v52   ;;  %v5481_v18 = vrot.slane %v5465_v0, %v16593_v11  ;;  %v5473_v40 = vcombine.high %v5465_v0, %v5465_v0  ;;  %v5472_v24 = vrot.slane %v5458_v44, %v16593_v11  ;;  %v583_v44 = vld [vmem:[#allocation8 + $0x10] sm:$0xff] }
 0x1c6   : > { %v1248_v59 = vsel %vm1232_vm12, %v1246_v46, %v1211_v10  ;;  %v5457_v46 = vcombine.high %v5453_v1, %v5453_v1 }
 0x1c7   : > { %14515 = vmatprep.subr.msk.mxu0 %vm1347_vm11, %v1248_v59  ;;  %14585 = vmatprep.subr.msk.mxu1 %vm1347_vm11, %v1248_v59  ;;  %v5542_v42 = vrot.slane %v5481_v18, %v16600_v7  ;;  %v5503_v52 = vcombine.high %v5481_v18, %v5481_v18  ;;  %v1215_v59 = vsel %vm1214_vm5, %v24125_v36, %v16537_v54 }
 0x1c8   : > { %14516 = vmatpush1.msk.msra.mxu0 %vm1347_vm11, %v1234_v5  ;;  %14587 = vmatpush1.msk.msra.mxu1 %vm1347_vm11, %v1234_v5  ;;  %v1218_v30 = vsel %vm1217_vm6, %v1215_v59, %v16546_v47  ;;  %v5495_v1 = vrot.slane %v5473_v40, %v16593_v11  ;;  %v5538_v47 = vrot.slane %v5457_v46, %v16600_v7 }
 0x1c9   : > { %v1185_v37 = vpop.permute.xlu0 %1184  ;;  %v16634_v39 = vpop.permute.xlu1 %2529  ;;  %5588 = vperm.xlu0 %14705, %v5526_v8   ;;  %5584 = vperm.xlu1 %14704, %v5522_v32   ;;  %v1235_v8 = vsel %vm1214_vm5, %v24126_v17, %v16595_v57  ;;  %v1221_v5 = vsel %vm1220_vm7, %v1218_v30, %v16557_v61  ;;  %v5550_v43 = vrot.slane %v5503_v52, %v16600_v7 }
 0x1ca   : > { %v1237_v0 = vsel %vm1217_vm6, %v1235_v8, %v1169_v21  ;;  %v1224_v50 = vsel %vm1223_vm8, %v1221_v5, %v16563_v15  ;;  %v5488_v61 = vrot.slane %v5472_v24, %v16593_v11  ;;  %v5546_v46 = vrot.slane %v5495_v1, %v16600_v7 }
 0x1cb   : > { %v1239_v48 = vsel %vm1220_vm7, %v1237_v0, %v1177_v23  ;;  %v1227_v57 = vsel %vm1226_vm9, %v1224_v50, %v16570_v41  ;;  %v5505_v41 = vcombine.high %v5495_v1, %v5495_v1  ;;  %v24127_v50 = vld [vmem:[#allocation50_spill] sm:$0xff] }
 0x1cc   : > { %v1241_v21 = vsel %vm1223_vm8, %v1239_v48, %v1185_v37  ;;  %v1230_v32 = vsel %vm1229_vm10, %v1227_v57, %v16574_v2  ;;  %v584_v37 = vld [vmem:[#allocation8 + $0x18] sm:$0xff] }
 0x1cd   : > { %v1193_v9 = vpop.permute.xlu0 %1192  ;;  %v16640_v10 = vpop.permute.xlu1 %2537  ;;  %5596 = vperm.xlu0 %14705, %v5534_v29   ;;  %5592 = vperm.xlu1 %14704, %v5530_v51   ;;  %v5474_v51 = vcombine.high %v5472_v24, %v5472_v24  ;;  %v1233_v2 = vsel %vm1232_vm12, %v1230_v32, %v16581_v34  ;;  %v5554_v59 = vrot.slane %v5505_v41, %v16600_v7 }
 0x1ce   : > { %v1243_v23 = vsel %vm1226_vm9, %v1241_v21, %v1193_v9  ;;  %v5558_v9 = vrot.slane %v5488_v61, %v16600_v7  ;;  %v2584_v21 = vsel %vm1214_vm5, %v24127_v50, %v16500_v56  ;;  %v24128_v56 = vcombine.low %v16224_v35, %v24077_v45 }
 0x1cf   : > { %v5502_v30 = vrot.slane %v5474_v51, %v16593_v11  ;;  %v2586_v57 = vsel %vm1217_vm6, %v2584_v21, %v16464_v58 }
 0x1d0   : > { %v2588_v32 = vsel %vm1220_vm7, %v2586_v57, %v16510_v22  ;;  %v2597_v58 = vsel %vm1214_vm5, %v24128_v56, %v16634_v39  ;;  %v24129_v22 = vld [vmem:[#allocation39_spill] sm:$0xff] }
 0x1d1   : > { %v1201_v63 = vpop.permute.xlu0 %1200  ;;  %v16661_v54 = vpop.permute.xlu1 %2545  ;;  %5604 = vperm.xlu0 %14705, %v5542_v42   ;;  %5600 = vperm.xlu1 %14704, %v5538_v47   ;;  %v5504_v42 = vcombine.high %v5488_v61, %v5488_v61  ;;  %v5562_v5 = vrot.slane %v5502_v30, %v16600_v7  ;;  %v5506_v0 = vcombine.high %v5502_v30, %v5502_v30 }
 0x1d2   : > { %v1245_v29 = vsel %vm1229_vm10, %v1243_v23, %v1201_v63 }
 0x1d3   : > { %v5566_v34 = vrot.slane %v5504_v42, %v16600_v7  ;;  %v5570_v24 = vrot.slane %v5506_v0, %v16600_v7 }
 0x1d5   : > { %v1209_v18 = vpop.permute.xlu0 %1208  ;;  %v16675_v40 = vpop.permute.xlu1 %2553  ;;  %5612 = vperm.xlu0 %14705, %v5550_v43   ;;  %5608 = vperm.xlu1 %14704, %v5546_v46   ;;  %v24130_v46 = vld [vmem:[#allocation37_spill] sm:$0xff] }
 0x1d6   : > { %v1247_v15 = vsel %vm1232_vm12, %v1245_v29, %v1209_v18 }
 0x1d7   : > { %1384 = vmatprep.subr.mxu0 %v1247_v15  ;;  %14586 = vmatprep.subr.mxu1 %v1247_v15  ;;  %v2590_v15 = vsel %vm1223_vm8, %v2588_v32, %v16477_v38  ;;  %v2599_v38 = vsel %vm1217_vm6, %v2597_v58, %v16640_v10 }
 0x1d8   : > { %1385 = vmatpush1.msra.mxu0 %v1233_v2  ;;  %14588 = vmatpush1.msra.mxu1 %v1233_v2  ;;  %v2592_v2 = vsel %vm1226_vm9, %v2590_v15, %v16523_v26  ;;  %v2601_v39 = vsel %vm1220_vm7, %v2599_v38, %v16661_v54 }
 0x1d9   : > { %v2524_v52 = vpop.permute.xlu0 %2523  ;;  %14517 = vmatmul.mubr.msk.f32.vlgmr.msra.gmra.mxu0 %vm1340_vm13, %v583_v44  ;;  %14518 = vmatmul.mubr.msk.f32.vlgmr.msra.gmra.mxu1 %vm1340_vm13, %v584_v37  ;;  %v2562_v36 = vpop.permute.xlu1 %2561 }
 0x1da   : > { %4728 = vmatprep.mubr.f32.mxu0 %v24036_v62  ;;  %5620 = vperm.xlu0 %14705, %v5558_v9  }
 0x1db   : > { %3371 = vmatprep.mubr.f32.mxu1 %v24036_v62  ;;  %5616 = vperm.xlu1 %14704, %v5554_v59  }
 0x1dd   : > { %v2532_v17 = vpop.permute.xlu0 %2531  ;;  %v2570_v8 = vpop.permute.xlu1 %2569 }
 0x1de   : > { %5628 = vperm.xlu0 %14705, %v5566_v34   ;;  %v2598_v29 = vsel %vm1214_vm5, %v16374_v28, %v2532_v17  ;;  %v24131_v28 = vcombine.low %v24129_v22, %v24130_v46  ;;  %v24132_v46 = vcombine.low %v16205_v53, %v15909_v31 }
 0x1df   : > { %5624 = vperm.xlu1 %14704, %v5562_v5  }
 0x1e0   : > { %v2583_v41 = vsel %vm1214_vm5, %v24131_v28, %v16409_v13  ;;  %v2603_v13 = vsel %vm1223_vm8, %v2601_v39, %v16675_v40 }
 0x1e1   : > { %v2540_v63 = vpop.permute.xlu0 %2539  ;;  %v2578_v1 = vpop.permute.xlu1 %2577  ;;  %v2585_v45 = vsel %vm1217_vm6, %v2583_v41, %v16419_v12  ;;  %v2605_v30 = vsel %vm1226_vm9, %v2603_v13, %v2562_v36  ;;  %v2594_v12 = vsel %vm1229_vm10, %v2592_v2, %v16487_v49  ;;  %v24133_v2 = vcombine.low %v16145_v19, %v15865_v33 }
 0x1e2   : > { %v2600_v18 = vsel %vm1217_vm6, %v2598_v29, %v2540_v63  ;;  %v2587_v42 = vsel %vm1220_vm7, %v2585_v45, %v16430_v14  ;;  %v2596_v14 = vsel %vm1232_vm12, %v2594_v12, %v2524_v52  ;;  %v2607_v40 = vsel %vm1229_vm10, %v2605_v30, %v2570_v8 }
 0x1e3   : > { %5632 = vperm.xlu1 %14704, %v5570_v24   ;;  %v2589_v10 = vsel %vm1223_vm8, %v2587_v42, %v16446_v27  ;;  %v2609_v36 = vsel %vm1232_vm12, %v2607_v40, %v2578_v1  ;;  %v4018_v40 = vld [vmem:[#allocation8 + $0x28] sm:$0xff] }
 0x1e4   : > { %v2591_v34 = vsel %vm1226_vm9, %v2589_v10, %v16457_v3 }
 0x1e5   : > { %v2548_v48 = vpop.permute.xlu0 %2547  ;;  %v16691_v47 = vpop.permute.xlu1 %4514  ;;  %v2593_v27 = vsel %vm1229_vm10, %v2591_v34, %v16470_v25  ;;  %v4017_v34 = vld [vmem:[#allocation8 + $0x20] sm:$0xff] }
 0x1e6   : > { %v2602_v44 = vsel %vm1220_vm7, %v2600_v18, %v2548_v48  ;;  %v2595_v49 = vsel %vm1232_vm12, %v2593_v27, %v16480_v55  ;;  %v581_v27 = vld [vmem:[#allocation8 + $0x8] sm:$0xff] }
 0x1e9   : > { %v2556_v11 = vpop.permute.xlu0 %2555  ;;  %v16693_v43 = vpop.permute.xlu1 %4522 }
 0x1ea   : > { %v2604_v35 = vsel %vm1223_vm8, %v2602_v44, %v2556_v11 }
 0x1ed   : > { %v2564_v61 = vpop.permute.xlu0 %2563  ;;  %v16700_v23 = vpop.permute.xlu1 %4530 }
 0x1ee   : > { %v2606_v9 = vsel %vm1226_vm9, %v2604_v35, %v2564_v61 }
 0x1f1   : > { %v2572_v51 = vpop.permute.xlu0 %2571  ;;  %v16715_v37 = vpop.permute.xlu1 %4538 }
 0x1f2   : > { %v2608_v26 = vsel %vm1229_vm10, %v2606_v9, %v2572_v51 }
 0x1f5   : > { %v2580_v59 = vpop.permute.xlu0 %2579  ;;  %v4547_v17 = vpop.permute.xlu1 %4546 }
 0x1f6   : > { %v2610_v54 = vsel %vm1232_vm12, %v2608_v26, %v2580_v59 }
 0x1f7   : > { %14551 = vmatprep.subr.msk.mxu1 %vm1347_vm11, %v2610_v54 }
 0x1f8   : > { %14552 = vmatpush1.msk.msra.mxu1 %vm1347_vm11, %v2596_v14 }
 0x1f9   : > { %v4517_v5 = vpop.permute.xlu0 %4516  ;;  %3337 = vmatprep.subr.mxu1 %v2609_v36  ;;  %v4555_v3 = vpop.permute.xlu1 %4554  ;;  %v24134_v36 = vld [vmem:[#allocation22_spill] sm:$0xff] }
 0x1fa   : > { %3338 = vmatpush1.msra.mxu1 %v2595_v49  ;;  %v4625_v56 = vsel %vm1214_vm5, %v16444_v20, %v4517_v5  ;;  %v1297_v49 = vcombine.low %v24134_v36, %v24134_v36 }
 0x1fc   : > { %v1333_v5 = vsel %vm1214_vm5, %v1297_v49, %v16398_v16 }
 0x1fd   : > { %v4525_v52 = vpop.permute.xlu0 %4524  ;;  %v4563_v8 = vpop.permute.xlu1 %4562 }
 0x1fe   : > { %v4627_v22 = vsel %vm1217_vm6, %v4625_v56, %v4525_v52 }
 0x201   : > { %v4533_v0 = vpop.permute.xlu0 %4532  ;;  %v4571_v24 = vpop.permute.xlu1 %4570 }
 0x202   : > { %v4638_v28 = vsel %vm1214_vm5, %v24132_v46, %v4571_v24  ;;  %v4629_v20 = vsel %vm1220_vm7, %v4627_v22, %v4533_v0  ;;  %v24135_v0 = vld [vmem:[#allocation41_spill] sm:$0xff]  ;;  %v24137_v24 = vld [vmem:[#allocation47_spill] sm:$0xff] }
 0x205   : > { %v4541_v63 = vpop.permute.xlu0 %4540  ;;  %v4579_v50 = vpop.permute.xlu1 %4578 }
 0x206   : > { %v4640_v38 = vsel %vm1217_vm6, %v4638_v28, %v4579_v50  ;;  %v4631_v53 = vsel %vm1223_vm8, %v4629_v20, %v4541_v63  ;;  %v24136_v63 = vld [vmem:[#allocation30_spill] sm:$0xff] }
 0x209   : > { %v4549_v48 = vpop.permute.xlu0 %4548  ;;  %v4587_v21 = vpop.permute.xlu1 %4586 }
 0x20a   : > { %v4642_v31 = vsel %vm1220_vm7, %v4640_v38, %v4587_v21  ;;  %v4633_v19 = vsel %vm1226_vm9, %v4631_v53, %v4549_v48 }
 0x20d   : > { %v4557_v11 = vpop.permute.xlu0 %4556  ;;  %v4595_v1 = vpop.permute.xlu1 %4594 }
 0x20e   : > { %v4635_v26 = vsel %vm1229_vm10, %v4633_v19, %v4557_v11  ;;  %v24138_v11 = vld [vmem:[#allocation34_spill] sm:$0xff] }
 0x211   : > { %v4565_v25 = vpop.permute.xlu0 %4564  ;;  %v4603_v29 = vpop.permute.xlu1 %4602 }
 0x215   : > { %v4573_v61 = vpop.permute.xlu0 %4572  ;;  %v4611_v51 = vpop.permute.xlu1 %4610 }
 0x216   : > { %v4639_v15 = vsel %vm1214_vm5, %v16530_v60, %v4573_v61  ;;  %v4624_v60 = vsel %vm1214_vm5, %v24133_v2, %v16691_v47  ;;  %v4644_v47 = vsel %vm1223_vm8, %v4642_v31, %v4595_v1 }
 0x217   : > { %v4626_v45 = vsel %vm1217_vm6, %v4624_v60, %v16693_v43  ;;  %v4646_v59 = vsel %vm1226_vm9, %v4644_v47, %v4603_v29 }
 0x218   : > { %v4628_v33 = vsel %vm1220_vm7, %v4626_v45, %v16700_v23  ;;  %v4637_v23 = vsel %vm1232_vm12, %v4635_v26, %v4565_v25  ;;  %v4648_v12 = vsel %vm1229_vm10, %v4646_v59, %v4611_v51 }
 0x219   : > { %v4581_v57 = vpop.permute.xlu0 %4580  ;;  %v4619_v9 = vpop.permute.xlu1 %4618  ;;  %v4630_v43 = vsel %vm1223_vm8, %v4628_v33, %v16715_v37 }
 0x21a   : > { %v4641_v58 = vsel %vm1217_vm6, %v4639_v15, %v4581_v57  ;;  %v4632_v30 = vsel %vm1226_vm9, %v4630_v43, %v4547_v17  ;;  %v4650_v37 = vsel %vm1232_vm12, %v4648_v12, %v4619_v9  ;;  %v580_v17 = vld [vmem:[#allocation8] sm:$0xff] }
 0x21b   : > { %v4634_v54 = vsel %vm1229_vm10, %v4632_v30, %v4555_v3  ;;  %14553 = vmatmul.mubr.msk.f32.vlgmr.msra.gmra.mxu1 %vm1340_vm13, %v580_v17  ;;  %v1334_v3 = vsel %vm1217_vm6, %v1333_v5, %v16366_v4 }
 0x21c   : > { %v4636_v14 = vsel %vm1232_vm12, %v4634_v54, %v4563_v8  ;;  %3377 = vmatprep.mubr.f32.mxu1 %v24036_v62  ;;  %v1335_v52 = vsel %vm1220_vm7, %v1334_v3, %v16416_v6 }
 0x21d   : > { %v4589_v32 = vpop.permute.xlu0 %4588  ;;  %v1336_v8 = vsel %vm1223_vm8, %v1335_v52, %v24135_v0 }
 0x21e   : > { %v4643_v41 = vsel %vm1220_vm7, %v4641_v58, %v4589_v32 }
 0x21f   : > { %14554 = vmatmul.mubr.msk.f32.gmra.mxu1 %vm1340_vm13, %v581_v27 }
 0x221   : > { %v4597_v55 = vpop.permute.xlu0 %4596 }
 0x222   : > { %v4645_v35 = vsel %vm1223_vm8, %v4643_v41, %v4597_v55 }
 0x225   : > { %v4605_v18 = vpop.permute.xlu0 %4604 }
 0x226   : > { %v4647_v39 = vsel %vm1226_vm9, %v4645_v35, %v4605_v18 }
 0x229   : > { %v4613_v44 = vpop.permute.xlu0 %4612 }
 0x22a   : > { %v4649_v42 = vsel %vm1229_vm10, %v4647_v39, %v4613_v44 }
 0x22d   : > { %v4621_v13 = vpop.permute.xlu0 %4620 }
 0x22e   : > { %v4651_v10 = vsel %vm1232_vm12, %v4649_v42, %v4621_v13 }
 0x22f   : > { %14555 = vmatprep.subr.msk.mxu0 %vm1347_vm11, %v4651_v10 }
 0x230   : > { %14556 = vmatpush1.msk.msra.mxu0 %vm1347_vm11, %v4637_v23  ;;  %vm9974_vm11 = vcmask 228352  }
 0x231   : > { %4694 = vmatprep.subr.mxu0 %v4650_v37 }
 0x232   : > { %4695 = vmatpush1.msra.mxu0 %v4636_v14  ;;  %v24155_v14 = vld [vmem:[#allocation20_spill] sm:$0xff] }
 0x233   : > { %14557 = vmatmul.mubr.msk.f32.vlgmr.msra.gmra.mxu0 %vm1340_vm13, %v4017_v34 }
 0x234   : > { %4734 = vmatprep.mubr.f32.mxu0 %v24036_v62  ;;  %v1337_v62 = vsel %vm1226_vm9, %v1336_v8, %v24136_v63 }
 0x235   : > { %v1338_v48 = vsel %vm1229_vm10, %v1337_v62, %v24137_v24 }
 0x236   : > { %v16818_v50 = vsel %vm1232_vm12, %v1338_v48, %v24138_v11 }
 0x237   : > { %14558 = vmatmul.mubr.msk.f32.gmra.mxu0 %vm1340_vm13, %v4018_v40 }
 0x23c   : > { %v16888_v32 = vpop.permute.xlu1 %5572 }
 0x23d   : > { %24139 = vst [vmem:[#allocation36_spill] sm:$0xff] %v16888_v32 }
 0x23e   : > { %v16892_v55 = vpop.permute.xlu0 %5576 }
 0x23f   : > { %24141 = vst [vmem:[#allocation43_spill] sm:$0xff] %v16892_v55 }
 0x240   : > { %v16890_v29 = vpop.permute.xlu1 %5580 }
 0x241   : > { %24140 = vst [vmem:[#allocation42_spill] sm:$0xff] %v16890_v29 }
 0x244   : > { %v16894_v18 = vpop.permute.xlu1 %5584  ;;  %v16896_v51 = vpop.permute.xlu0 %5588 }
 0x245   : > { %24142 = vst [vmem:[#allocation38_spill] sm:$0xff] %v16894_v18  ;;  %24143 = vst [vmem:[#allocation46_spill] sm:$0xff] %v16896_v51 }
 0x248   : > { %v16898_v15 = vpop.permute.xlu1 %5592  ;;  %v16900_v56 = vpop.permute.xlu0 %5596 }
 0x249   : > { %24144 = vst [vmem:[#allocation40_spill] sm:$0xff] %v16898_v15  ;;  %24145 = vst [vmem:[#allocation48_spill] sm:$0xff] %v16900_v56 }
 0x24c   : > { %v16902_v58 = vpop.permute.xlu1 %5600  ;;  %v16909_v28 = vpop.permute.xlu0 %5604 }
 0x24d   : > { %24146 = vst [vmem:[#allocation45_spill] sm:$0xff] %v16902_v58  ;;  %24147 = vst [vmem:[#allocation44_spill] sm:$0xff] %v16909_v28 }
 0x250   : > { %v16911_v2 = vpop.permute.xlu1 %5608  ;;  %v16920_v20 = vpop.permute.xlu0 %5612 }
 0x251   : > { %24148 = vst [vmem:[#allocation27_spill] sm:$0xff] %v16911_v2  ;;  %24149 = vst [vmem:[#allocation28_spill] sm:$0xff] %v16920_v20 }
 0x255   : > { %v16932_v35 = vpop.permute.xlu0 %5620 }
 0x256   : > { %v16922_v38 = vpop.permute.xlu1 %5616  ;;  %24151 = vst [vmem:[#allocation31_spill] sm:$0xff] %v16932_v35 }
 0x257   : > { %24150 = vst [vmem:[#allocation35_spill] sm:$0xff] %v16922_v38 }
 0x259   : > { %v16940_v53 = vpop.permute.xlu0 %5628 }
 0x25a   : > { %v16934_v45 = vpop.permute.xlu1 %5624  ;;  %24153 = vst [vmem:[#allocation29_spill] sm:$0xff] %v16940_v53 }
 0x25b   : > { %24152 = vst [vmem:[#allocation32_spill] sm:$0xff] %v16934_v45 }
 0x25e   : > { %v16942_v31 = vpop.permute.xlu1 %5632 }
 0x25f   : > { %24154 = vst [vmem:[#allocation23_spill] sm:$0xff] %v16942_v31 }
 0x299   : > { %v1420_v16 = vpop.f32.mrf.mxu0  ;;  %v1426_v25 = vpop.f32.mrf.mxu1 }
 0x29a   : > { %v16821_v4 = vadd.f32 %v1420_v16, %v16818_v50  ;;  %v16824_v6 = vadd.f32 %v1426_v25, %v16818_v50 }
 0x29b   : > { %v1422_v21 = vpop.f32.mrf.mxu0  ;;  %v1428_v61 = vpop.f32.mrf.mxu1 }
 0x29c   : > { %1435 = vrot.lane.b32.xlu0 %v16824_v6, %s14926_s16  ;;  %1433 = vrot.lane.b32.xlu1 %v16821_v4, %s14926_s16  ;;  %v16855_v57 = vadd.f32 %v1422_v21, %v16818_v50  ;;  %v16858_v1 = vadd.f32 %v1428_v61, %v16818_v50 }
 0x2a0   : > { %1441 = vrot.lane.b32.xlu0 %v16824_v6, %s14924_s26  ;;  %1439 = vrot.lane.b32.xlu1 %v16821_v4, %s14924_s26 }
 0x2a4   : > { %1447 = vrot.lane.b32.xlu0 %v16824_v6, %s14925_s29  ;;  %1445 = vrot.lane.b32.xlu1 %v16821_v4, %s14925_s29 }
 0x2a8   : > { %1453 = vrot.lane.b32.xlu0 %v16824_v6, %s14922_s17  ;;  %1451 = vrot.lane.b32.xlu1 %v16821_v4, %s14922_s17 }
 0x2ac   : > { %1459 = vrot.lane.b32.xlu0 %v16824_v6, %s14923_s14  ;;  %1457 = vrot.lane.b32.xlu1 %v16821_v4, %s14923_s14 }
 0x2b0   : > { %1465 = vrot.lane.b32.xlu0 %v16824_v6, %s14920_s1  ;;  %1463 = vrot.lane.b32.xlu1 %v16821_v4, %s14920_s1 }
 0x2b4   : > { %1471 = vrot.lane.b32.xlu0 %v16824_v6, %s14921_s8  ;;  %1469 = vrot.lane.b32.xlu1 %v16821_v4, %s14921_s8 }
 0x2b8   : > { %1479 = vrot.lane.b32.xlu0 %v16858_v1, %s14926_s16  ;;  %1477 = vrot.lane.b32.xlu1 %v16855_v57, %s14926_s16 }
 0x2bc   : > { %1485 = vrot.lane.b32.xlu0 %v16858_v1, %s14924_s26  ;;  %1483 = vrot.lane.b32.xlu1 %v16855_v57, %s14924_s26 }
 0x2c0   : > { %1491 = vrot.lane.b32.xlu0 %v16858_v1, %s14925_s29  ;;  %1489 = vrot.lane.b32.xlu1 %v16855_v57, %s14925_s29 }
 0x2c4   : > { %1497 = vrot.lane.b32.xlu0 %v16858_v1, %s14922_s17  ;;  %1495 = vrot.lane.b32.xlu1 %v16855_v57, %s14922_s17 }
 0x2c8   : > { %1503 = vrot.lane.b32.xlu0 %v16858_v1, %s14923_s14  ;;  %1501 = vrot.lane.b32.xlu1 %v16855_v57, %s14923_s14 }
 0x2cc   : > { %1509 = vrot.lane.b32.xlu0 %v16858_v1, %s14920_s1  ;;  %1507 = vrot.lane.b32.xlu1 %v16855_v57, %s14920_s1 }
 0x2d0   : > { %1515 = vrot.lane.b32.xlu0 %v16858_v1, %s14921_s8  ;;  %1513 = vrot.lane.b32.xlu1 %v16855_v57, %s14921_s8 }
 0x2db   : > { %v3373_v35 = vpop.f32.mrf.mxu1 }
 0x2f3   : > { %v4730_v44 = vpop.f32.mrf.mxu0 }
 0x2f4   : > { %v16905_v22 = vadd.f32 %v4730_v44, %v16818_v50 }
 0x2f5   : > { %v4732_v46 = vpop.f32.mrf.mxu0 }
 0x2f6   : > { %4743 = vrot.lane.b32.xlu1 %v16905_v22, %s14926_s16  ;;  %v16953_v19 = vadd.f32 %v4732_v46, %v16818_v50 }
 0x2f7   : > { %v4736_v41 = vpop.f32.mrf.mxu0 }
 0x2f8   : > { %v16914_v60 = vadd.f32 %v4736_v41, %v16818_v50 }
 0x2f9   : > { %v4738_v47 = vpop.f32.mrf.mxu0 }
 0x2fa   : > { %4745 = vrot.lane.b32.xlu0 %v16914_v60, %s14926_s16  ;;  %4749 = vrot.lane.b32.xlu1 %v16905_v22, %s14924_s26  ;;  %v16960_v13 = vadd.f32 %v4738_v47, %v16818_v50 }
 0x2fe   : > { %4751 = vrot.lane.b32.xlu0 %v16914_v60, %s14924_s26  ;;  %4755 = vrot.lane.b32.xlu1 %v16905_v22, %s14925_s29 }
 0x302   : > { %4757 = vrot.lane.b32.xlu0 %v16914_v60, %s14925_s29  ;;  %4761 = vrot.lane.b32.xlu1 %v16905_v22, %s14922_s17 }
 0x306   : > { %4763 = vrot.lane.b32.xlu0 %v16914_v60, %s14922_s17  ;;  %4767 = vrot.lane.b32.xlu1 %v16905_v22, %s14923_s14 }
 0x30a   : > { %4769 = vrot.lane.b32.xlu0 %v16914_v60, %s14923_s14  ;;  %4773 = vrot.lane.b32.xlu1 %v16905_v22, %s14920_s1 }
 0x30e   : > { %v1436_v39 = vpop.permute.xlu0 %1435  ;;  %4775 = vrot.lane.b32.xlu0 %v16914_v60, %s14920_s1  ;;  %4779 = vrot.lane.b32.xlu1 %v16905_v22, %s14921_s8  ;;  %v1434_v33 = vpop.permute.xlu1 %1433 }
 0x312   : > { %v1442_v9 = vpop.permute.xlu0 %1441  ;;  %4781 = vrot.lane.b32.xlu0 %v16914_v60, %s14921_s8  ;;  %4787 = vrot.lane.b32.xlu1 %v16953_v19, %s14926_s16  ;;  %v1440_v42 = vpop.permute.xlu1 %1439 }
 0x313   : > { %v1791_v43 = vcombine.low %v16824_v6, %v1442_v9  ;;  %v1792_v26 = vcombine.high %v16824_v6, %v1442_v9  ;;  %v1519_v59 = vcombine.low %v16821_v4, %v1440_v42  ;;  %v1520_v10 = vcombine.high %v16821_v4, %v1440_v42  ;;  %v24156_v4 = vld [vmem:[#allocation21_spill] sm:$0xff] }
 0x315   : > { %v1799_v40 = vrot.slane %v1791_v43, %v24155_v14  ;;  %v1806_v17 = vrot.slane %v1792_v26, %v24155_v14  ;;  %v1527_v3 = vrot.slane %v1519_v59, %v24155_v14  ;;  %v1534_v52 = vrot.slane %v1520_v10, %v24155_v14 }
 0x316   : > { %v1448_v30 = vpop.permute.xlu0 %1447  ;;  %4789 = vrot.lane.b32.xlu0 %v16960_v13, %s14926_s16  ;;  %4793 = vrot.lane.b32.xlu1 %v16953_v19, %s14924_s26  ;;  %v1446_v23 = vpop.permute.xlu1 %1445 }
 0x317   : > { %v1807_v12 = vcombine.low %v1436_v39, %v1448_v30  ;;  %v1808_v54 = vcombine.high %v1436_v39, %v1448_v30  ;;  %v1535_v37 = vcombine.low %v1434_v33, %v1446_v23  ;;  %v1536_v34 = vcombine.high %v1434_v33, %v1446_v23 }
 0x319   : > { %v1815_v27 = vrot.slane %v1807_v12, %v24155_v14  ;;  %v1822_v36 = vrot.slane %v1808_v54, %v24155_v14  ;;  %v1543_v49 = vrot.slane %v1535_v37, %v24155_v14  ;;  %v1550_v5 = vrot.slane %v1536_v34, %v24155_v14 }
 0x31a   : > { %v1454_v0 = vpop.permute.xlu0 %1453  ;;  %4795 = vrot.lane.b32.xlu0 %v16960_v13, %s14924_s26  ;;  %4799 = vrot.lane.b32.xlu1 %v16953_v19, %s14925_s29  ;;  %v1452_v8 = vpop.permute.xlu1 %1451 }
 0x31b   : > { %v1855_v63 = vcombine.low %v1799_v40, %v1815_v27  ;;  %v1856_v62 = vcombine.high %v1799_v40, %v1815_v27  ;;  %v1871_v24 = vcombine.low %v1806_v17, %v1822_v36  ;;  %v1872_v48 = vcombine.high %v1806_v17, %v1822_v36 }
 0x31c   : > { %v1583_v11 = vcombine.low %v1527_v3, %v1543_v49  ;;  %v1584_v50 = vcombine.high %v1527_v3, %v1543_v49  ;;  %v1599_v16 = vcombine.low %v1534_v52, %v1550_v5  ;;  %v1600_v25 = vcombine.high %v1534_v52, %v1550_v5 }
 0x31d   : > { %v1863_v6 = vrot.slane %v1855_v63, %v24156_v4  ;;  %v1870_v21 = vrot.slane %v1856_v62, %v24156_v4  ;;  %v1879_v61 = vrot.slane %v1871_v24, %v24156_v4  ;;  %v1886_v44 = vrot.slane %v1872_v48, %v24156_v4 }
 0x31e   : > { %v1591_v46 = vrot.slane %v1583_v11, %v24156_v4  ;;  %v1598_v41 = vrot.slane %v1584_v50, %v24156_v4  ;;  %v1607_v39 = vrot.slane %v1599_v16, %v24156_v4  ;;  %v1614_v33 = vrot.slane %v1600_v25, %v24156_v4  ;;  %v1460_v47 = vpop.permute.xlu0 %1459  ;;  %4801 = vrot.lane.b32.xlu0 %v16960_v13, %s14925_s29  ;;  %v1458_v9 = vpop.permute.xlu1 %1457 }
 0x31f   : > { %v14527_v42 = vcombine.low %v1863_v6, %v1870_v21  ;;  %v14529_v43 = vcombine.high %v1863_v6, %v1870_v21  ;;  %v14531_v26 = vcombine.low %v1879_v61, %v1886_v44  ;;  %v14533_v59 = vcombine.high %v1879_v61, %v1886_v44  ;;  %4805 = vrot.lane.b32.xlu1 %v16953_v19, %s14922_s17 }
 0x320   : > { %v14519_v10 = vcombine.low %v1591_v46, %v1598_v41  ;;  %v14521_v30 = vcombine.high %v1591_v46, %v1598_v41  ;;  %v14523_v23 = vcombine.low %v1607_v39, %v1614_v33  ;;  %v14525_v12 = vcombine.high %v1607_v39, %v1614_v33 }
 0x321   : > { %v16995_v54 = vrot.slane %v14527_v42, %v24155_v14  ;;  %v16998_v37 = vrot.slane %v14529_v43, %v24155_v14  ;;  %v17001_v34 = vrot.slane %v14531_v26, %v24155_v14  ;;  %v17004_v40 = vrot.slane %v14533_v59, %v24155_v14 }
 0x322   : > { %v1466_v17 = vpop.permute.xlu0 %1465  ;;  %4807 = vrot.lane.b32.xlu0 %v16960_v13, %s14922_s17  ;;  %v1464_v27 = vpop.permute.xlu1 %1463  ;;  %v2619_v36 = vrot.slane %v14519_v10, %v24155_v14  ;;  %v2635_v49 = vrot.slane %v14521_v30, %v24155_v14  ;;  %v2651_v5 = vrot.slane %v14523_v23, %v24155_v14  ;;  %v2667_v3 = vrot.slane %v14525_v12, %v24155_v14 }
 0x323   : > { %v1823_v52 = vcombine.low %v1454_v0, %v1466_v17  ;;  %v1824_v63 = vcombine.high %v1454_v0, %v1466_v17  ;;  %4811 = vrot.lane.b32.xlu1 %v16953_v19, %s14923_s14  ;;  %v1551_v62 = vcombine.low %v1452_v8, %v1464_v27  ;;  %v1552_v24 = vcombine.high %v1452_v8, %v1464_v27 }
 0x324   : > { %v2675_v48 = vcombine.low %v2619_v36, %v2635_v49  ;;  %v2707_v11 = vcombine.low %v2651_v5, %v2667_v3  ;;  %v2811_v50 = vcombine.low %v16995_v54, %v16998_v37  ;;  %v2843_v16 = vcombine.low %v17001_v34, %v17004_v40 }
 0x325   : > { %v1831_v25 = vrot.slane %v1823_v52, %v24155_v14  ;;  %v1838_v6 = vrot.slane %v1824_v63, %v24155_v14  ;;  %v1559_v21 = vrot.slane %v1551_v62, %v24155_v14  ;;  %v1566_v0 = vrot.slane %v1552_v24, %v24155_v14 }
 0x326   : > { %v1472_v61 = vpop.permute.xlu0 %1471  ;;  %4813 = vrot.lane.b32.xlu0 %v16960_v13, %s14923_s14  ;;  %v1470_v8 = vpop.permute.xlu1 %1469  ;;  %v17025_v44 = vrot.slane %v2675_v48, %v24156_v4  ;;  %v17028_v46 = vrot.slane %v2707_v11, %v24156_v4  ;;  %v17031_v41 = vrot.slane %v2811_v50, %v24156_v4  ;;  %v17038_v59 = vrot.slane %v2843_v16, %v24156_v4 }
 0x327   : > { %v1839_v39 = vcombine.low %v1460_v47, %v1472_v61  ;;  %v1840_v33 = vcombine.high %v1460_v47, %v1472_v61  ;;  %4817 = vrot.lane.b32.xlu1 %v16953_v19, %s14920_s1  ;;  %v1567_v42 = vcombine.low %v1458_v9, %v1470_v8  ;;  %v1568_v43 = vcombine.high %v1458_v9, %v1470_v8 }
 0x328   : > { %v2740_v26 = vcombine.high %v17025_v44, %v17028_v46  ;;  %v2676_v10 = vcombine.high %v2619_v36, %v2635_v49  ;;  %v2708_v30 = vcombine.high %v2651_v5, %v2667_v3  ;;  %v2812_v36 = vcombine.high %v16995_v54, %v16998_v37 }
 0x329   : > { %v1847_v23 = vrot.slane %v1839_v39, %v24155_v14  ;;  %v1854_v12 = vrot.slane %v1840_v33, %v24155_v14  ;;  %v1575_v17 = vrot.slane %v1567_v42, %v24155_v14  ;;  %v1582_v47 = vrot.slane %v1568_v43, %v24155_v14 }
 0x32a   : > { %v1480_v27 = vpop.permute.xlu0 %1479  ;;  %4819 = vrot.lane.b32.xlu0 %v16960_v13, %s14920_s1  ;;  %v1478_v9 = vpop.permute.xlu1 %1477  ;;  %v17047_v52 = vrot.slane %v2676_v10, %v24156_v4  ;;  %v17050_v63 = vrot.slane %v2708_v30, %v24156_v4  ;;  %v2844_v49 = vcombine.high %v17001_v34, %v17004_v40  ;;  %v2876_v43 = vcombine.high %v17031_v41, %v17038_v59 }
 0x32b   : > { %v1887_v5 = vcombine.low %v1831_v25, %v1847_v23  ;;  %v1888_v3 = vcombine.high %v1831_v25, %v1847_v23  ;;  %v1903_v62 = vcombine.low %v1838_v6, %v1854_v12  ;;  %v1904_v24 = vcombine.high %v1838_v6, %v1854_v12  ;;  %4823 = vrot.lane.b32.xlu1 %v16953_v19, %s14921_s8 }
 0x32c   : > { %v1615_v48 = vcombine.low %v1559_v21, %v1575_v17  ;;  %v1616_v11 = vcombine.high %v1559_v21, %v1575_v17  ;;  %v1631_v50 = vcombine.low %v1566_v0, %v1582_v47  ;;  %v1632_v16 = vcombine.high %v1566_v0, %v1582_v47 }
 0x32d   : > { %v17059_v61 = vrot.slane %v1887_v5, %v24156_v4  ;;  %v17062_v8 = vrot.slane %v1888_v3, %v24156_v4  ;;  %v17065_v54 = vrot.slane %v1903_v62, %v24156_v4  ;;  %v17068_v37 = vrot.slane %v1904_v24, %v24156_v4 }
 0x32e   : > { %v1623_v34 = vrot.slane %v1615_v48, %v24156_v4  ;;  %v1630_v40 = vrot.slane %v1616_v11, %v24156_v4  ;;  %v1639_v25 = vrot.slane %v1631_v50, %v24156_v4  ;;  %v1646_v6 = vrot.slane %v1632_v16, %v24156_v4  ;;  %v1486_v21 = vpop.permute.xlu0 %1485  ;;  %4825 = vrot.lane.b32.xlu0 %v16960_v13, %s14921_s8  ;;  %v1484_v0 = vpop.permute.xlu1 %1483 }
 0x32f   : > { %v14528_v39 = vcombine.low %v17059_v61, %v17062_v8  ;;  %v14530_v33 = vcombine.high %v17059_v61, %v17062_v8  ;;  %v14532_v42 = vcombine.low %v17065_v54, %v17068_v37  ;;  %3157 = vrot.lane.b32.xlu1 %v2740_v26, %s14921_s8  ;;  %v14534_v10 = vcombine.high %v17065_v54, %v17068_v37 }
 0x330   : > { %v14520_v30 = vcombine.low %v1623_v34, %v1630_v40  ;;  %v14522_v23 = vcombine.high %v1623_v34, %v1630_v40  ;;  %v14524_v12 = vcombine.low %v1639_v25, %v1646_v6  ;;  %v1927_v17 = vcombine.low %v16858_v1, %v1486_v21 }
 0x331   : > { %v1928_v47 = vcombine.high %v16858_v1, %v1486_v21  ;;  %v1655_v5 = vcombine.low %v16855_v57, %v1484_v0  ;;  %v1656_v3 = vcombine.high %v16855_v57, %v1484_v0  ;;  %v14526_v62 = vcombine.high %v1639_v25, %v1646_v6 }
 0x332   : > { %v1492_v24 = vpop.permute.xlu0 %1491  ;;  %3159 = vrot.lane.b32.xlu0 %v2876_v43, %s14921_s8  ;;  %v2741_v26 = vcombine.low %v17047_v52, %v17050_v63  ;;  %v1490_v48 = vpop.permute.xlu1 %1489  ;;  %v2826_v11 = vrot.slane %v2812_v36, %v24156_v4  ;;  %v2858_v50 = vrot.slane %v2844_v49, %v24156_v4  ;;  %v1935_v16 = vrot.slane %v1927_v17, %v24155_v14 }
 0x333   : > { %v1942_v1 = vrot.slane %v1928_v47, %v24155_v14  ;;  %v1663_v34 = vrot.slane %v1655_v5, %v24155_v14  ;;  %v2742_v57 = vcombine.high %v17047_v52, %v17050_v63  ;;  %v1943_v40 = vcombine.low %v1480_v27, %v1492_v24 }
 0x334   : > { %v1944_v25 = vcombine.high %v1480_v27, %v1492_v24  ;;  %3165 = vrot.lane.b32.xlu1 %v2741_v26, %s14920_s1  ;;  %v1671_v6 = vcombine.low %v1478_v9, %v1490_v48  ;;  %v1672_v21 = vcombine.high %v1478_v9, %v1490_v48  ;;  %v1670_v0 = vrot.slane %v1656_v3, %v24155_v14 }
 0x335   : > { %v2877_v36 = vcombine.low %v2826_v11, %v2858_v50  ;;  %v17104_v49 = vrot.slane %v14520_v30, %v24155_v14  ;;  %v17107_v43 = vrot.slane %v14522_v23, %v24155_v14  ;;  %v1951_v17 = vrot.slane %v1943_v40, %v24155_v14 }
 0x336   : > { %v1958_v47 = vrot.slane %v1944_v25, %v24155_v14  ;;  %v1679_v52 = vrot.slane %v1671_v6, %v24155_v14  ;;  %v1686_v27 = vrot.slane %v1672_v21, %v24155_v14  ;;  %v1498_v63 = vpop.permute.xlu0 %1497  ;;  %v1496_v5 = vpop.permute.xlu1 %1495  ;;  %v2878_v9 = vcombine.high %v2826_v11, %v2858_v50 }
 0x337   : > { %3167 = vrot.lane.b32.xlu0 %v2877_v36, %s14920_s1  ;;  %v17115_v3 = vrot.slane %v14524_v12, %v24155_v14  ;;  %v17118_v30 = vrot.slane %v14526_v62, %v24155_v14  ;;  %v2691_v23 = vcombine.low %v17104_v49, %v17107_v43  ;;  %v1991_v24 = vcombine.low %v1935_v16, %v1951_v17 }
 0x338   : > { %v1992_v26 = vcombine.high %v1935_v16, %v1951_v17  ;;  %v2007_v48 = vcombine.low %v1942_v1, %v1958_v47  ;;  %v2008_v40 = vcombine.high %v1942_v1, %v1958_v47  ;;  %3173 = vrot.lane.b32.xlu1 %v2742_v57, %s14923_s14  ;;  %v1719_v25 = vcombine.low %v1663_v34, %v1679_v52 }
 0x339   : > { %v1720_v6 = vcombine.high %v1663_v34, %v1679_v52  ;;  %v1735_v21 = vcombine.low %v1670_v0, %v1686_v27  ;;  %v1736_v36 = vcombine.high %v1670_v0, %v1686_v27  ;;  %v17124_v11 = vrot.slane %v1991_v24, %v24156_v4 }
 0x33a   : > { %v17127_v12 = vrot.slane %v1992_v26, %v24156_v4  ;;  %v17130_v62 = vrot.slane %v2007_v48, %v24156_v4  ;;  %v17133_v50 = vrot.slane %v2008_v40, %v24156_v4  ;;  %v1504_v16 = vpop.permute.xlu0 %1503  ;;  %v1502_v1 = vpop.permute.xlu1 %1501  ;;  %v17136_v57 = vrot.slane %v1719_v25, %v24156_v4 }
 0x33b   : > { %v17139_v34 = vrot.slane %v1720_v6, %v24156_v4  ;;  %v17142_v0 = vrot.slane %v1735_v21, %v24156_v4  ;;  %v17145_v17 = vrot.slane %v1736_v36, %v24156_v4  ;;  %3175 = vrot.lane.b32.xlu0 %v2878_v9, %s14923_s14  ;;  %v17156_v27 = vrot.slane %v14528_v39, %v24155_v14 }
 0x33c   : > { %v2699_v40 = vrot.slane %v2691_v23, %v24156_v4  ;;  %v2723_v25 = vcombine.low %v17115_v3, %v17118_v30  ;;  %v2778_v39 = vrot.slane %v14530_v33, %v24155_v14  ;;  %v17177_v21 = vrot.slane %v14532_v42, %v24155_v14 }
 0x33d   : > { %v17183_v23 = vrot.slane %v14534_v10, %v24155_v14  ;;  %v2692_v33 = vcombine.high %v17104_v49, %v17107_v43  ;;  %v14541_v42 = vcombine.high %v17142_v0, %v17145_v17 }
 0x33e   : > { %v1510_v6 = vpop.permute.xlu0 %1509  ;;  %v1508_v36 = vpop.permute.xlu1 %1507  ;;  %v2731_v48 = vrot.slane %v2723_v25, %v24156_v4  ;;  %v2827_v61 = vcombine.low %v17156_v27, %v2778_v39 }
 0x33f   : > { %v1959_v24 = vcombine.low %v1498_v63, %v1510_v6  ;;  %v1960_v52 = vcombine.high %v1498_v63, %v1510_v6  ;;  %v1687_v47 = vcombine.low %v1496_v5, %v1508_v36  ;;  %v1688_v8 = vcombine.high %v1496_v5, %v1508_v36 }
 0x340   : > { %v2859_v54 = vcombine.low %v17177_v21, %v17183_v23  ;;  %v2743_v37 = vcombine.low %v2699_v40, %v2731_v48  ;;  %v2835_v10 = vrot.slane %v2827_v61, %v24156_v4  ;;  %v2744_v25 = vcombine.high %v2699_v40, %v2731_v48 }
 0x341   : > { %v1967_v63 = vrot.slane %v1959_v24, %v24155_v14  ;;  %v1974_v6 = vrot.slane %v1960_v52, %v24155_v14  ;;  %v1695_v9 = vrot.slane %v1687_v47, %v24155_v14  ;;  %v1702_v43 = vrot.slane %v1688_v8, %v24155_v14 }
 0x342   : > { %v1516_v5 = vpop.permute.xlu0 %1515  ;;  %v1514_v36 = vpop.permute.xlu1 %1513  ;;  %v2867_v49 = vrot.slane %v2859_v54, %v24156_v4  ;;  %3181 = vrot.lane.b32.xlu1 %v2743_v37, %s14922_s17  ;;  %v2706_v52 = vrot.slane %v2692_v33, %v24156_v4  ;;  %v2724_v24 = vcombine.high %v17115_v3, %v17118_v30  ;;  %v2828_v54 = vcombine.high %v17156_v27, %v2778_v39 }
 0x343   : > { %v1975_v26 = vcombine.low %v1504_v16, %v1516_v5  ;;  %v1976_v31 = vcombine.high %v1504_v16, %v1516_v5  ;;  %v1703_v38 = vcombine.low %v1502_v1, %v1514_v36  ;;  %v1704_v61 = vcombine.high %v1502_v1, %v1514_v36 }
 0x344   : > { %v2879_v48 = vcombine.low %v2835_v10, %v2867_v49  ;;  %v2880_v58 = vcombine.high %v2835_v10, %v2867_v49  ;;  %v2738_v8 = vrot.slane %v2724_v24, %v24156_v4  ;;  %v14549_v49 = vcombine.high %v17130_v62, %v17133_v50 }
 0x345   : > { %v1983_v47 = vrot.slane %v1975_v26, %v24155_v14  ;;  %v1990_v40 = vrot.slane %v1976_v31, %v24155_v14  ;;  %v1711_v16 = vrot.slane %v1703_v38, %v24155_v14  ;;  %v1718_v37 = vrot.slane %v1704_v61, %v24155_v14 }
 0x346   : > { %3183 = vrot.lane.b32.xlu0 %v2879_v48, %s14922_s17  ;;  %3189 = vrot.lane.b32.xlu1 %v2744_v25, %s14925_s29  ;;  %v2745_v26 = vcombine.low %v2706_v52, %v2738_v8  ;;  %v2842_v48 = vrot.slane %v2828_v54, %v24156_v4 }
 0x347   : > { %v2023_v33 = vcombine.low %v1967_v63, %v1983_v47  ;;  %v2024_v3 = vcombine.high %v1967_v63, %v1983_v47  ;;  %v2039_v30 = vcombine.low %v1974_v6, %v1990_v40  ;;  %v2040_v1 = vcombine.high %v1974_v6, %v1990_v40 }
 0x348   : > { %v1751_v5 = vcombine.low %v1695_v9, %v1711_v16  ;;  %v1752_v31 = vcombine.high %v1695_v9, %v1711_v16  ;;  %v1767_v36 = vcombine.low %v1702_v43, %v1718_v37  ;;  %v1768_v25 = vcombine.high %v1702_v43, %v1718_v37 }
 0x349   : > { %v17212_v27 = vrot.slane %v2023_v33, %v24156_v4  ;;  %v17215_v39 = vrot.slane %v2024_v3, %v24156_v4  ;;  %v17218_v38 = vrot.slane %v2039_v30, %v24156_v4  ;;  %v17221_v10 = vrot.slane %v2040_v1, %v24156_v4 }
 0x34a   : > { %v1759_v63 = vrot.slane %v1751_v5, %v24156_v4  ;;  %v1766_v6 = vrot.slane %v1752_v31, %v24156_v4  ;;  %v1775_v9 = vrot.slane %v1767_v36, %v24156_v4  ;;  %3191 = vrot.lane.b32.xlu0 %v2880_v58, %s14925_s29  ;;  %3197 = vrot.lane.b32.xlu1 %v2745_v26, %s14924_s26 }
 0x34b   : > { %v14544_v24 = vcombine.low %v17212_v27, %v17215_v39  ;;  %v14546_v61 = vcombine.high %v17212_v27, %v17215_v39  ;;  %v14548_v47 = vcombine.low %v17218_v38, %v17221_v10  ;;  %v1782_v43 = vrot.slane %v1768_v25, %v24156_v4 }
 0x34c   : > { %v14536_v40 = vcombine.low %v1759_v63, %v1766_v6  ;;  %v2860_v16 = vcombine.high %v17177_v21, %v17183_v23  ;;  %v14538_v37 = vcombine.high %v1759_v63, %v1766_v6  ;;  %v24157_v33 = vcombine.low %v17136_v57, %v17139_v34 }
 0x34d   : > { %v24158_v58 = vcombine.high %v17136_v57, %v17139_v34  ;;  %v24159_v30 = vcombine.low %v17142_v0, %v17145_v17  ;;  %v14540_v26 = vcombine.low %v1775_v9, %v1782_v43  ;;  %v2746_v21 = vcombine.high %v2706_v52, %v2738_v8 }
 0x34e   : > { %v2891_v3 = vrot.slane %v24157_v33, %v24155_v14  ;;  %v2874_v5 = vrot.slane %v2860_v16, %v24156_v4  ;;  %v2939_v23 = vrot.slane %v14541_v42, %v24155_v14  ;;  %v24160_v36 = vcombine.low %v17124_v11, %v17127_v12 }
 0x34f   : > { %v2907_v54 = vrot.slane %v24158_v58, %v24155_v14  ;;  %v2923_v1 = vrot.slane %v24159_v30, %v24155_v14  ;;  %v24161_v57 = vcombine.high %v17124_v11, %v17127_v12  ;;  %v24162_v0 = vcombine.low %v17130_v62, %v17133_v50  ;;  %3205 = vrot.lane.b32.xlu1 %v2746_v21, %s14926_s16 }
 0x350   : > { %v3027_v27 = vrot.slane %v24160_v36, %v24155_v14  ;;  %v14542_v39 = vcombine.high %v1775_v9, %v1782_v43  ;;  %v2881_v52 = vcombine.low %v2842_v48, %v2874_v5  ;;  %v3075_v8 = vrot.slane %v14549_v49, %v24155_v14 }
 0x351   : > { %v2947_v31 = vcombine.low %v2891_v3, %v2907_v54  ;;  %v3043_v34 = vrot.slane %v24161_v57, %v24155_v14  ;;  %v3059_v17 = vrot.slane %v24162_v0, %v24155_v14  ;;  %v2979_v42 = vcombine.low %v2923_v1, %v2939_v23 }
 0x352   : > { %v2948_v25 = vcombine.high %v2891_v3, %v2907_v54  ;;  %v2980_v16 = vcombine.high %v2923_v1, %v2939_v23  ;;  %3199 = vrot.lane.b32.xlu0 %v2881_v52, %s14924_s26  ;;  %v2898_v33 = vrot.slane %v14536_v40, %v24155_v14  ;;  %v14550_v3 = vcombine.high %v17218_v38, %v17221_v10 }
 0x353   : > { %v17269_v63 = vrot.slane %v2947_v31, %v24156_v4  ;;  %v3083_v6 = vcombine.low %v3027_v27, %v3043_v34  ;;  %v17273_v11 = vrot.slane %v2979_v42, %v24156_v4  ;;  %v3115_v12 = vcombine.low %v3059_v17, %v3075_v8 }
 0x354   : > { %v3084_v62 = vcombine.high %v3027_v27, %v3043_v34  ;;  %v3116_v50 = vcombine.high %v3059_v17, %v3075_v8  ;;  %v2962_v43 = vrot.slane %v2948_v25, %v24156_v4  ;;  %v2994_v49 = vrot.slane %v2980_v16, %v24156_v4 }
 0x355   : > { %v17276_v9 = vrot.slane %v3083_v6, %v24156_v4  ;;  %v2882_v58 = vcombine.high %v2842_v48, %v2874_v5  ;;  %v3012_v54 = vcombine.high %v17269_v63, %v17273_v11  ;;  %v17286_v30 = vrot.slane %v3115_v12, %v24156_v4 }
 0x356   : > { %v2914_v1 = vrot.slane %v14538_v37, %v24155_v14  ;;  %v2930_v21 = vrot.slane %v14540_v26, %v24155_v14  ;;  %v3013_v23 = vcombine.low %v2962_v43, %v2994_v49  ;;  %v3098_v40 = vrot.slane %v3084_v62, %v24156_v4 }
 0x357   : > { %3207 = vrot.lane.b32.xlu0 %v2882_v58, %s14926_s16  ;;  %3213 = vrot.lane.b32.xlu1 %v3012_v54, %s14921_s8  ;;  %v3130_v38 = vrot.slane %v3116_v50, %v24156_v4  ;;  %v3148_v10 = vcombine.high %v17276_v9, %v17286_v30  ;;  %v2946_v48 = vrot.slane %v14542_v39, %v24155_v14 }
 0x358   : > { %v2963_v5 = vcombine.low %v2898_v33, %v2914_v1  ;;  %v3034_v31 = vrot.slane %v14544_v24, %v24155_v14  ;;  %v3050_v37 = vrot.slane %v14546_v61, %v24155_v14  ;;  %v3066_v26 = vrot.slane %v14548_v47, %v24155_v14 }
 0x359   : > { %v3082_v36 = vrot.slane %v14550_v3, %v24155_v14  ;;  %v2995_v57 = vcombine.low %v2930_v21, %v2946_v48  ;;  %v3149_v0 = vcombine.low %v3098_v40, %v3130_v38  ;;  %v3014_v17 = vcombine.high %v2962_v43, %v2994_v49 }
 0x35a   : > { %v2971_v34 = vrot.slane %v2963_v5, %v24156_v4  ;;  %v3099_v39 = vcombine.low %v3034_v31, %v3050_v37  ;;  %v2964_v8 = vcombine.high %v2898_v33, %v2914_v1  ;;  %v3150_v25 = vcombine.high %v3098_v40, %v3130_v38 }
 0x35b   : > { %3215 = vrot.lane.b32.xlu0 %v3148_v10, %s14921_s8  ;;  %3221 = vrot.lane.b32.xlu1 %v3013_v23, %s14920_s1  ;;  %v3003_v24 = vrot.slane %v2995_v57, %v24156_v4  ;;  %v3131_v61 = vcombine.low %v3066_v26, %v3082_v36  ;;  %v2996_v62 = vcombine.high %v2930_v21, %v2946_v48 }
 0x35c   : > { %v3107_v16 = vrot.slane %v3099_v39, %v24156_v4  ;;  %v2978_v50 = vrot.slane %v2964_v8, %v24156_v4  ;;  %v3100_v43 = vcombine.high %v3034_v31, %v3050_v37  ;;  %v3132_v58 = vcombine.high %v3066_v26, %v3082_v36 }
 0x35d   : > { %v3015_v42 = vcombine.low %v2971_v34, %v3003_v24  ;;  %v3139_v12 = vrot.slane %v3131_v61, %v24156_v4  ;;  %v3016_v3 = vcombine.high %v2971_v34, %v3003_v24  ;;  %v3010_v33 = vrot.slane %v2996_v62, %v24156_v4 }
 0x35e   : > { %v3114_v21 = vrot.slane %v3100_v43, %v24156_v4  ;;  %v3146_v23 = vrot.slane %v3132_v58, %v24156_v4 }
 0x35f   : > { %3223 = vrot.lane.b32.xlu0 %v3149_v0, %s14920_s1  ;;  %3229 = vrot.lane.b32.xlu1 %v3014_v17, %s14923_s14  ;;  %v3151_v49 = vcombine.low %v3107_v16, %v3139_v12  ;;  %v3152_v54 = vcombine.high %v3107_v16, %v3139_v12  ;;  %v3017_v1 = vcombine.low %v2978_v50, %v3010_v33 }
 0x360   : > { %v3153_v38 = vcombine.low %v3114_v21, %v3146_v23  ;;  %v3018_v10 = vcombine.high %v2978_v50, %v3010_v33  ;;  %v3154_v26 = vcombine.high %v3114_v21, %v3146_v23 }
 0x363   : > { %3231 = vrot.lane.b32.xlu0 %v3150_v25, %s14923_s14  ;;  %3237 = vrot.lane.b32.xlu1 %v3015_v42, %s14922_s17 }
 0x367   : > { %3239 = vrot.lane.b32.xlu0 %v3151_v49, %s14922_s17  ;;  %3245 = vrot.lane.b32.xlu1 %v3016_v3, %s14925_s29 }
 0x368   : > { %v4744_v40 = vpop.permute.xlu1 %4743 }
 0x36b   : > { %3247 = vrot.lane.b32.xlu0 %v3152_v54, %s14925_s29  ;;  %3253 = vrot.lane.b32.xlu1 %v3017_v1, %s14924_s26 }
 0x36c   : > { %v4746_v48 = vpop.permute.xlu0 %4745  ;;  %v4750_v5 = vpop.permute.xlu1 %4749 }
 0x36d   : > { %v4829_v31 = vcombine.low %v16905_v22, %v4750_v5  ;;  %v4830_v37 = vcombine.high %v16905_v22, %v4750_v5 }
 0x36f   : > { %3255 = vrot.lane.b32.xlu0 %v3153_v38, %s14924_s26  ;;  %3261 = vrot.lane.b32.xlu1 %v3018_v10, %s14926_s16  ;;  %v4837_v17 = vrot.slane %v4829_v31, %v24155_v14  ;;  %v4844_v24 = vrot.slane %v4830_v37, %v24155_v14 }
 0x370   : > { %v4752_v36 = vpop.permute.xlu0 %4751  ;;  %v4756_v57 = vpop.permute.xlu1 %4755 }
 0x371   : > { %v4845_v34 = vcombine.low %v4744_v40, %v4756_v57  ;;  %v4846_v0 = vcombine.high %v4744_v40, %v4756_v57  ;;  %v5101_v42 = vcombine.low %v16914_v60, %v4752_v36  ;;  %v5102_v8 = vcombine.high %v16914_v60, %v4752_v36 }
 0x373   : > { %3263 = vrot.lane.b32.xlu0 %v3154_v26, %s14926_s16  ;;  %v4853_v39 = vrot.slane %v4845_v34, %v24155_v14  ;;  %v4860_v61 = vrot.slane %v4846_v0, %v24155_v14  ;;  %v5109_v43 = vrot.slane %v5101_v42, %v24155_v14  ;;  %v17340_v49 = vrot.slane %v5102_v8, %v24155_v14 }
 0x374   : > { %v4758_v22 = vpop.permute.xlu0 %4757  ;;  %v4762_v25 = vpop.permute.xlu1 %4761 }
 0x375   : > { %v4894_v16 = vcombine.high %v4837_v17, %v4853_v39  ;;  %v4910_v12 = vcombine.high %v4844_v24, %v4860_v61  ;;  %v5117_v62 = vcombine.low %v4746_v48, %v4758_v22  ;;  %v5118_v50 = vcombine.high %v4746_v48, %v4758_v22 }
 0x376   : > { %v4893_v10 = vcombine.low %v4837_v17, %v4853_v39  ;;  %v4909_v26 = vcombine.low %v4844_v24, %v4860_v61 }
 0x377   : > { %v5125_v3 = vrot.slane %v5117_v62, %v24155_v14  ;;  %v17344_v33 = vrot.slane %v5118_v50, %v24155_v14  ;;  %v17356_v8 = vrot.slane %v4894_v16, %v24156_v4 }
 0x378   : > { %v4764_v58 = vpop.permute.xlu0 %4763  ;;  %v4768_v54 = vpop.permute.xlu1 %4767  ;;  %v17353_v42 = vrot.slane %v4893_v10, %v24156_v4 }
 0x379   : > { %v5166_v1 = vcombine.high %v5109_v43, %v5125_v3  ;;  %v5182_v60 = vcombine.high %v17340_v49, %v17344_v33 }
 0x37c   : > { %v4770_v21 = vpop.permute.xlu0 %4769  ;;  %v4774_v23 = vpop.permute.xlu1 %4773 }
 0x37d   : > { %v4861_v40 = vcombine.low %v4762_v25, %v4774_v23  ;;  %v4862_v38 = vcombine.high %v4762_v25, %v4774_v23  ;;  %v17362_v23 = vrot.slane %v4910_v12, %v24156_v4 }
 0x37f   : > { %v4869_v36 = vrot.slane %v4861_v40, %v24155_v14  ;;  %v4876_v57 = vrot.slane %v4862_v38, %v24155_v14 }
 0x380   : > { %v4776_v48 = vpop.permute.xlu0 %4775  ;;  %v4780_v5 = vpop.permute.xlu1 %4779 }
 0x381   : > { %v4877_v31 = vcombine.low %v4768_v54, %v4780_v5  ;;  %v4878_v37 = vcombine.high %v4768_v54, %v4780_v5  ;;  %v5133_v17 = vcombine.low %v4764_v58, %v4776_v48  ;;  %v5134_v39 = vcombine.high %v4764_v58, %v4776_v48 }
 0x382   : > { %v17359_v54 = vrot.slane %v4909_v26, %v24156_v4  ;;  %v5165_v5 = vcombine.low %v5109_v43, %v5125_v3  ;;  %v5181_v43 = vcombine.low %v17340_v49, %v17344_v33 }
 0x383   : > { %v4885_v34 = vrot.slane %v4877_v31, %v24155_v14  ;;  %v4892_v0 = vrot.slane %v4878_v37, %v24155_v14  ;;  %v5141_v31 = vrot.slane %v5133_v17, %v24155_v14 }
 0x384   : > { %v4782_v22 = vpop.permute.xlu0 %4781  ;;  %v4788_v25 = vpop.permute.xlu1 %4787 }
 0x385   : > { %v4925_v62 = vcombine.low %v4869_v36, %v4885_v34  ;;  %v4926_v24 = vcombine.high %v4869_v36, %v4885_v34  ;;  %v4941_v61 = vcombine.low %v4876_v57, %v4892_v0  ;;  %v4942_v50 = vcombine.high %v4876_v57, %v4892_v0 }
 0x386   : > { %v5149_v40 = vcombine.low %v4770_v21, %v4782_v22  ;;  %v5150_v38 = vcombine.high %v4770_v21, %v4782_v22  ;;  %v5148_v36 = vrot.slane %v5134_v39, %v24155_v14 }
 0x387   : > { %v17365_v10 = vrot.slane %v4925_v62, %v24156_v4  ;;  %v17368_v16 = vrot.slane %v4926_v24, %v24156_v4  ;;  %v17371_v58 = vrot.slane %v4941_v61, %v24156_v4  ;;  %v17374_v48 = vrot.slane %v4942_v50, %v24156_v4 }
 0x388   : > { %v5157_v12 = vrot.slane %v5149_v40, %v24155_v14  ;;  %v5164_v37 = vrot.slane %v5150_v38, %v24155_v14  ;;  %v4790_v21 = vpop.permute.xlu0 %4789  ;;  %v4794_v26 = vpop.permute.xlu1 %4793  ;;  %v17395_v50 = vrot.slane %v5165_v5, %v24156_v4  ;;  %v17398_v40 = vrot.slane %v5166_v1, %v24156_v4 }
 0x389   : > { %v17413_v5 = vrot.slane %v5181_v43, %v24156_v4  ;;  %v17416_v1 = vrot.slane %v5182_v60, %v24156_v4 }
 0x38a   : > { %v5197_v22 = vcombine.low %v5141_v31, %v5157_v12  ;;  %v5198_v62 = vcombine.high %v5141_v31, %v5157_v12  ;;  %v5213_v24 = vcombine.low %v5148_v36, %v5164_v37  ;;  %v5214_v61 = vcombine.high %v5148_v36, %v5164_v37 }
 0x38b   : > { %v4965_v12 = vcombine.low %v16953_v19, %v4794_v26  ;;  %v4966_v37 = vcombine.high %v16953_v19, %v4794_v26 }
 0x38c   : > { %v4796_v49 = vpop.permute.xlu0 %4795  ;;  %v4800_v33 = vpop.permute.xlu1 %4799  ;;  %v17401_v38 = vrot.slane %v5197_v22, %v24156_v4  ;;  %v17404_v17 = vrot.slane %v5198_v62, %v24156_v4  ;;  %v17407_v39 = vrot.slane %v5213_v24, %v24156_v4  ;;  %v17410_v31 = vrot.slane %v5214_v61, %v24156_v4 }
 0x38d   : > { %v5237_v24 = vcombine.low %v16960_v13, %v4796_v49  ;;  %v5238_v26 = vcombine.high %v16960_v13, %v4796_v49  ;;  %v4981_v36 = vcombine.low %v4788_v25, %v4800_v33  ;;  %v4982_v3 = vcombine.high %v4788_v25, %v4800_v33 }
 0x38e   : > { %v4973_v62 = vrot.slane %v4965_v12, %v24155_v14  ;;  %v4980_v57 = vrot.slane %v4966_v37, %v24155_v14 }
 0x38f   : > { %v4989_v43 = vrot.slane %v4981_v36, %v24155_v14  ;;  %v4996_v6 = vrot.slane %v4982_v3, %v24155_v14  ;;  %v5245_v60 = vrot.slane %v5237_v24, %v24155_v14  ;;  %v17440_v19 = vrot.slane %v5238_v26, %v24155_v14 }
 0x390   : > { %v4802_v61 = vpop.permute.xlu0 %4801 }
 0x391   : > { %v4806_v22 = vpop.permute.xlu1 %4805  ;;  %v5253_v0 = vcombine.low %v4790_v21, %v4802_v61  ;;  %v5254_v34 = vcombine.high %v4790_v21, %v4802_v61  ;;  %v5030_v21 = vcombine.high %v4973_v62, %v4989_v43  ;;  %v5046_v33 = vcombine.high %v4980_v57, %v4996_v6 }
 0x392   : > { %v5029_v52 = vcombine.low %v4973_v62, %v4989_v43  ;;  %v5045_v27 = vcombine.low %v4980_v57, %v4996_v6 }
 0x393   : > { %v5261_v13 = vrot.slane %v5253_v0, %v24155_v14  ;;  %v17444_v25 = vrot.slane %v5254_v34, %v24155_v14  ;;  %v17454_v29 = vrot.slane %v5030_v21, %v24156_v4 }
 0x394   : > { %v4808_v49 = vpop.permute.xlu0 %4807  ;;  %v17451_v56 = vrot.slane %v5029_v52, %v24156_v4 }
 0x395   : > { %v4812_v12 = vpop.permute.xlu1 %4811  ;;  %v5302_v61 = vcombine.high %v5245_v60, %v5261_v13  ;;  %v5318_v37 = vcombine.high %v17440_v19, %v17444_v25  ;;  %v5301_v0 = vcombine.low %v5245_v60, %v5261_v13  ;;  %v5317_v34 = vcombine.low %v17440_v19, %v17444_v25 }
 0x396   : > { %v17461_v60 = vrot.slane %v5045_v27, %v24156_v4 }
 0x398   : > { %v4814_v36 = vpop.permute.xlu0 %4813 }
 0x399   : > { %v4818_v3 = vpop.permute.xlu1 %4817 }
 0x39a   : > { %v4997_v24 = vcombine.low %v4806_v22, %v4818_v3  ;;  %v4998_v47 = vcombine.high %v4806_v22, %v4818_v3 }
 0x39c   : > { %v4820_v26 = vpop.permute.xlu0 %4819  ;;  %v5005_v62 = vrot.slane %v4997_v24, %v24155_v14  ;;  %v5012_v22 = vrot.slane %v4998_v47, %v24155_v14 }
 0x39d   : > { %v4824_v18 = vpop.permute.xlu1 %4823  ;;  %v5269_v45 = vcombine.low %v4808_v49, %v4820_v26  ;;  %v5270_v2 = vcombine.high %v4808_v49, %v4820_v26 }
 0x39e   : > { %v5013_v53 = vcombine.low %v4812_v12, %v4824_v18  ;;  %v5014_v20 = vcombine.high %v4812_v12, %v4824_v18  ;;  %v17464_v18 = vrot.slane %v5046_v33, %v24156_v4 }
 0x39f   : > { %v5277_v12 = vrot.slane %v5269_v45, %v24155_v14  ;;  %v5284_v47 = vrot.slane %v5270_v2, %v24155_v14 }
 0x3a0   : > { %v5021_v6 = vrot.slane %v5013_v53, %v24155_v14  ;;  %v5028_v57 = vrot.slane %v5014_v20, %v24155_v14  ;;  %v4826_v43 = vpop.permute.xlu0 %4825 }
 0x3a1   : > { %v5285_v52 = vcombine.low %v4814_v36, %v4826_v43  ;;  %v5286_v19 = vcombine.high %v4814_v36, %v4826_v43  ;;  %v3158_v24 = vpop.permute.xlu1 %3157 }
 0x3a2   : > { %v5061_v13 = vcombine.low %v5005_v62, %v5021_v6  ;;  %v5062_v25 = vcombine.high %v5005_v62, %v5021_v6  ;;  %v5077_v49 = vcombine.low %v5012_v22, %v5028_v57  ;;  %v5078_v21 = vcombine.high %v5012_v22, %v5028_v57 }
 0x3a3   : > { %v5293_v53 = vrot.slane %v5285_v52, %v24155_v14  ;;  %v5300_v20 = vrot.slane %v5286_v19, %v24155_v14  ;;  %v17483_v22 = vrot.slane %v5301_v0, %v24156_v4  ;;  %v17492_v52 = vrot.slane %v5302_v61, %v24156_v4 }
 0x3a4   : > { %v17471_v27 = vrot.slane %v5061_v13, %v24156_v4  ;;  %v17474_v33 = vrot.slane %v5062_v25, %v24156_v4  ;;  %v17477_v36 = vrot.slane %v5077_v49, %v24156_v4  ;;  %v17480_v3 = vrot.slane %v5078_v21, %v24156_v4  ;;  %v3160_v25 = vpop.permute.xlu0 %3159 }
 0x3a5   : > { %v5333_v45 = vcombine.low %v5277_v12, %v5293_v53  ;;  %v5334_v26 = vcombine.high %v5277_v12, %v5293_v53  ;;  %v5349_v2 = vcombine.low %v5284_v47, %v5300_v20  ;;  %v5350_v62 = vcombine.high %v5284_v47, %v5300_v20  ;;  %24163 = vst [vmem:[#allocation24_spill] sm:$0xff] %v17492_v52 }
 0x3a6   : > { %v17513_v47 = vrot.slane %v5317_v34, %v24156_v4  ;;  %v17516_v53 = vrot.slane %v5318_v37, %v24156_v4 }
 0x3a7   : > { %v17501_v49 = vrot.slane %v5333_v45, %v24156_v4  ;;  %v17504_v21 = vrot.slane %v5334_v26, %v24156_v4  ;;  %v17507_v12 = vrot.slane %v5349_v2, %v24156_v4  ;;  %v17510_v61 = vrot.slane %v5350_v62, %v24156_v4  ;;  %v3166_v2 = vpop.permute.xlu1 %3165 }
 0x3a8   : > { %24168 = vst [vmem:[#allocation52_spill] sm:$0xff] %v17513_v47  ;;  %24169 = vst [vmem:[#allocation51_spill] sm:$0xff] %v17516_v53  ;;  %v24170_v45 = vcombine.low %v17025_v44, %v17028_v46 }
 0x3a9   : > { %24164 = vst [vmem:[#allocation25_spill] sm:$0xff] %v17501_v49  ;;  %24165 = vst [vmem:[#allocation26_spill] sm:$0xff] %v17504_v21  ;;  %v3168_v0 = vpop.permute.xlu0 %3167 }
 0x3aa   : > { %24166 = vst [vmem:[#allocation49_spill] sm:$0xff] %v17507_v12  ;;  %24167 = vst [vmem:[#allocation53_spill] sm:$0xff] %v17510_v61  ;;  %v3267_v26 = vsel %vm1214_vm5, %v24170_v45, %v3158_v24  ;;  %v24171_v61 = vcombine.low %v17031_v41, %v17038_v59 }
 0x3ab   : > { %v3174_v13 = vpop.permute.xlu1 %3173  ;;  %v3269_v6 = vsel %vm1217_vm6, %v3267_v26, %v3166_v2 }
 0x3ac   : > { %v3271_v34 = vsel %vm1220_vm7, %v3269_v6, %v3174_v13  ;;  %v3268_v44 = vsel %vm1214_vm5, %v24171_v61, %v3160_v25  ;;  %v3375_v13 = vpop.f32.mrf.mxu1 }
 0x3ad   : > { %v3176_v19 = vpop.permute.xlu0 %3175  ;;  %v3270_v24 = vsel %vm1217_vm6, %v3268_v44, %v3168_v0 }
 0x3ae   : > { %v3272_v6 = vsel %vm1220_vm7, %v3270_v24, %v3176_v19  ;;  %v3379_v41 = vpop.f32.mrf.mxu1 }
 0x3b4   : > { %v3182_v20 = vpop.permute.xlu1 %3181 }
 0x3b5   : > { %v3273_v55 = vsel %vm1223_vm8, %v3271_v34, %v3182_v20  ;;  %v24172_v34 = vcombine.low %v17269_v63, %v17273_v11 }
 0x3b8   : > { %v3184_v43 = vpop.permute.xlu0 %3183  ;;  %v3190_v57 = vpop.permute.xlu1 %3189 }
 0x3b9   : > { %v3275_v37 = vsel %vm1226_vm9, %v3273_v55, %v3190_v57  ;;  %v3274_v55 = vsel %vm1223_vm8, %v3272_v6, %v3184_v43 }
 0x3bc   : > { %v3192_v62 = vpop.permute.xlu0 %3191  ;;  %v3198_v15 = vpop.permute.xlu1 %3197 }
 0x3bd   : > { %v3277_v28 = vsel %vm1229_vm10, %v3275_v37, %v3198_v15  ;;  %v3276_v15 = vsel %vm1226_vm9, %v3274_v55, %v3192_v62  ;;  %v24173_v55 = vcombine.low %v17276_v9, %v17286_v30 }
 0x3c1   : > { %v3206_v51 = vpop.permute.xlu1 %3205 }
 0x3c2   : > { %v3279_v46 = vsel %vm1232_vm12, %v3277_v28, %v3206_v51 }
 0x3c3   : > { %v17545_v26 = vadd.f32 %v3373_v35, %v3279_v46 }
 0x3c4   : > { %v3200_v45 = vpop.permute.xlu0 %3199 }
 0x3c5   : > { %3386 = vrot.lane.b32.xlu1 %v17545_v26, %s14926_s16  ;;  %v3278_v59 = vsel %vm1229_vm10, %v3276_v15, %v3200_v45 }
 0x3c9   : > { %v3208_v57 = vpop.permute.xlu0 %3207  ;;  %v3214_v51 = vpop.permute.xlu1 %3213  ;;  %3392 = vrot.lane.b32.xlu1 %v17545_v26, %s14924_s26 }
 0x3ca   : > { %v3280_v28 = vsel %vm1232_vm12, %v3278_v59, %v3208_v57  ;;  %v3281_v37 = vsel %vm1214_vm5, %v24172_v34, %v3214_v51 }
 0x3cb   : > { %v17554_v0 = vadd.f32 %v3379_v41, %v3280_v28 }
 0x3cd   : > { %3388 = vrot.lane.b32.xlu0 %v17554_v0, %s14926_s16  ;;  %v3216_v35 = vpop.permute.xlu0 %3215  ;;  %v3222_v43 = vpop.permute.xlu1 %3221  ;;  %3398 = vrot.lane.b32.xlu1 %v17545_v26, %s14925_s29 }
 0x3ce   : > { %v3283_v44 = vsel %vm1217_vm6, %v3281_v37, %v3222_v43  ;;  %v3282_v63 = vsel %vm1214_vm5, %v24173_v55, %v3216_v35  ;;  %v3381_v35 = vpop.f32.mrf.mxu1 }
 0x3d1   : > { %3394 = vrot.lane.b32.xlu0 %v17554_v0, %s14924_s26  ;;  %v3224_v19 = vpop.permute.xlu0 %3223  ;;  %v3230_v25 = vpop.permute.xlu1 %3229  ;;  %3404 = vrot.lane.b32.xlu1 %v17545_v26, %s14922_s17 }
 0x3d2   : > { %v3285_v45 = vsel %vm1220_vm7, %v3283_v44, %v3230_v25  ;;  %v3284_v15 = vsel %vm1217_vm6, %v3282_v63, %v3224_v19  ;;  %vm9929_vm6 = vcmask 146432  }
 0x3d5   : > { %3400 = vrot.lane.b32.xlu0 %v17554_v0, %s14925_s29  ;;  %v3232_v61 = vpop.permute.xlu0 %3231  ;;  %v3238_v20 = vpop.permute.xlu1 %3237  ;;  %3410 = vrot.lane.b32.xlu1 %v17545_v26, %s14923_s14 }
 0x3d6   : > { %v3287_v6 = vsel %vm1223_vm8, %v3285_v45, %v3238_v20  ;;  %v3286_v51 = vsel %vm1220_vm7, %v3284_v15, %v3232_v61  ;;  %vm9938_vm7 = vcmask 162816  }
 0x3d9   : > { %3406 = vrot.lane.b32.xlu0 %v17554_v0, %s14922_s17  ;;  %v3240_v2 = vpop.permute.xlu0 %3239  ;;  %v3246_v62 = vpop.permute.xlu1 %3245  ;;  %3416 = vrot.lane.b32.xlu1 %v17545_v26, %s14920_s1 }
 0x3da   : > { %v3289_v11 = vsel %vm1226_vm9, %v3287_v6, %v3246_v62  ;;  %v3288_v43 = vsel %vm1223_vm8, %v3286_v51, %v3240_v2  ;;  %vm9947_vm8 = vcmask 179200  }
 0x3dd   : > { %3412 = vrot.lane.b32.xlu0 %v17554_v0, %s14923_s14  ;;  %v3248_v46 = vpop.permute.xlu0 %3247  ;;  %v3254_v24 = vpop.permute.xlu1 %3253  ;;  %3422 = vrot.lane.b32.xlu1 %v17545_v26, %s14921_s8 }
 0x3de   : > { %v3291_v41 = vsel %vm1229_vm10, %v3289_v11, %v3254_v24  ;;  %v3290_v30 = vsel %vm1226_vm9, %v3288_v43, %v3248_v46  ;;  %vm9956_vm9 = vcmask 195584  }
 0x3e1   : > { %3418 = vrot.lane.b32.xlu0 %v17554_v0, %s14920_s1  ;;  %v3256_v59 = vpop.permute.xlu0 %3255  ;;  %v3262_v57 = vpop.permute.xlu1 %3261 }
 0x3e2   : > { %v3293_v28 = vsel %vm1232_vm12, %v3291_v41, %v3262_v57  ;;  %v3292_v19 = vsel %vm1229_vm10, %v3290_v30, %v3256_v59  ;;  %vm9965_vm10 = vcmask 211968  }
 0x3e3   : > { %v17597_v9 = vadd.f32 %v3375_v13, %v3293_v28 }
 0x3e5   : > { %3424 = vrot.lane.b32.xlu0 %v17554_v0, %s14921_s8  ;;  %v3264_v25 = vpop.permute.xlu0 %3263  ;;  %3430 = vrot.lane.b32.xlu1 %v17597_v9, %s14926_s16 }
 0x3e6   : > { %v3294_v61 = vsel %vm1232_vm12, %v3292_v19, %v3264_v25  ;;  %vm9983_vm12 = vcmask 244736  }
 0x3e7   : > { %v17606_v20 = vadd.f32 %v3381_v35, %v3294_v61 }
 0x3e9   : > { %3432 = vrot.lane.b32.xlu0 %v17606_v20, %s14926_s16  ;;  %3436 = vrot.lane.b32.xlu1 %v17597_v9, %s14924_s26  ;;  %s14942_s16 = smov 30  }
 0x3ed   : > { %3438 = vrot.lane.b32.xlu0 %v17606_v20, %s14924_s26  ;;  %3442 = vrot.lane.b32.xlu1 %v17597_v9, %s14925_s29  ;;  %s14940_s26 = smov 26  }
 0x3f1   : > { %3444 = vrot.lane.b32.xlu0 %v17606_v20, %s14925_s29  ;;  %3448 = vrot.lane.b32.xlu1 %v17597_v9, %s14922_s17  ;;  %s14941_s29 = smov 28  }
 0x3f5   : > { %3450 = vrot.lane.b32.xlu0 %v17606_v20, %s14922_s17  ;;  %3454 = vrot.lane.b32.xlu1 %v17597_v9, %s14923_s14  ;;  %s14938_s17 = smov 22  }
 0x3f9   : > { %3456 = vrot.lane.b32.xlu0 %v17606_v20, %s14923_s14  ;;  %3460 = vrot.lane.b32.xlu1 %v17597_v9, %s14920_s1  ;;  %s14939_s14 = smov 24  }
 0x3fd   : > { %3462 = vrot.lane.b32.xlu0 %v17606_v20, %s14920_s1  ;;  %3466 = vrot.lane.b32.xlu1 %v17597_v9, %s14921_s8  ;;  %s14937_s1 = smov 20  }
 0x401   : > { %3468 = vrot.lane.b32.xlu0 %v17606_v20, %s14921_s8 }
 0x437   : > { %v3387_v13 = vpop.permute.xlu1 %3386 }
 0x43b   : > { %v3393_v2 = vpop.permute.xlu1 %3392 }
 0x43c   : > { %v3472_v34 = vcombine.low %v17545_v26, %v3393_v2  ;;  %v3473_v37 = vcombine.high %v17545_v26, %v3393_v2  ;;  %v4957_v2 = vcombine.low %v17353_v42, %v17365_v10 }
 0x43e   : > { %v3480_v6 = vrot.slane %v3472_v34, %v24155_v14  ;;  %v3487_v11 = vrot.slane %v3473_v37, %v24155_v14 }
 0x43f   : > { %v3389_v62 = vpop.permute.xlu0 %3388  ;;  %v3399_v44 = vpop.permute.xlu1 %3398 }
 0x440   : > { %v3488_v46 = vcombine.low %v3387_v13, %v3399_v44  ;;  %v3489_v24 = vcombine.high %v3387_v13, %v3399_v44 }
 0x442   : > { %v3496_v55 = vrot.slane %v3488_v46, %v24155_v14  ;;  %v3503_v63 = vrot.slane %v3489_v24, %v24155_v14 }
 0x443   : > { %v3395_v45 = vpop.permute.xlu0 %3394  ;;  %v3405_v15 = vpop.permute.xlu1 %3404 }
 0x444   : > { %v3744_v41 = vcombine.low %v17554_v0, %v3395_v45  ;;  %v3745_v59 = vcombine.high %v17554_v0, %v3395_v45  ;;  %v3537_v57 = vcombine.high %v3480_v6, %v3496_v55  ;;  %v3553_v51 = vcombine.high %v3487_v11, %v3503_v63 }
 0x446   : > { %v17643_v35 = vrot.slane %v3744_v41, %v24155_v14  ;;  %v17646_v19 = vrot.slane %v3745_v59, %v24155_v14  ;;  %v3536_v41 = vcombine.low %v3480_v6, %v3496_v55 }
 0x447   : > { %v3401_v26 = vpop.permute.xlu0 %3400  ;;  %v3411_v30 = vpop.permute.xlu1 %3410 }
 0x448   : > { %v3760_v28 = vcombine.low %v3389_v62, %v3401_v26  ;;  %v3761_v43 = vcombine.high %v3389_v62, %v3401_v26  ;;  %v3552_v26 = vcombine.low %v3487_v11, %v3503_v63 }
 0x44a   : > { %v17649_v25 = vrot.slane %v3760_v28, %v24155_v14  ;;  %v17652_v61 = vrot.slane %v3761_v43, %v24155_v14 }
 0x44b   : > { %v3407_v13 = vpop.permute.xlu0 %3406  ;;  %v3417_v62 = vpop.permute.xlu1 %3416 }
 0x44c   : > { %v3809_v0 = vcombine.high %v17643_v35, %v17649_v25  ;;  %v3504_v37 = vcombine.low %v3405_v15, %v3417_v62  ;;  %v3505_v44 = vcombine.high %v3405_v15, %v3417_v62  ;;  %v3544_v15 = vrot.slane %v3536_v41, %v24156_v4 }
 0x44d   : > { %v17669_v62 = vrot.slane %v3552_v26, %v24156_v4 }
 0x44e   : > { %v3512_v28 = vrot.slane %v3504_v37, %v24155_v14  ;;  %v3519_v12 = vrot.slane %v3505_v44, %v24155_v14  ;;  %v3567_v37 = vrot.slane %v3553_v51, %v24156_v4 }
 0x44f   : > { %v3413_v34 = vpop.permute.xlu0 %3412  ;;  %v3423_v46 = vpop.permute.xlu1 %3422 }
 0x450   : > { %v3520_v24 = vcombine.low %v3411_v30, %v3423_v46  ;;  %v3521_v45 = vcombine.high %v3411_v30, %v3423_v46  ;;  %v3551_v30 = vrot.slane %v3537_v57, %v24156_v4 }
 0x452   : > { %v3528_v43 = vrot.slane %v3520_v24, %v24155_v14  ;;  %v3535_v53 = vrot.slane %v3521_v45, %v24155_v14 }
 0x453   : > { %v3419_v59 = vpop.permute.xlu0 %3418 }
 0x454   : > { %v3568_v47 = vcombine.low %v3512_v28, %v3528_v43  ;;  %v3569_v21 = vcombine.high %v3512_v28, %v3528_v43  ;;  %v3584_v6 = vcombine.low %v3519_v12, %v3535_v53  ;;  %v3585_v55 = vcombine.high %v3519_v12, %v3535_v53 }
 0x455   : > { %v3776_v24 = vcombine.low %v3407_v13, %v3419_v59  ;;  %v3777_v45 = vcombine.high %v3407_v13, %v3419_v59  ;;  %v24174_v13 = vcombine.high %v17353_v42, %v17365_v10  ;;  %v24180_v10 = vcombine.low %v17362_v23, %v17374_v48 }
 0x456   : > { %v3576_v44 = vrot.slane %v3568_v47, %v24156_v4  ;;  %v3583_v46 = vrot.slane %v3569_v21, %v24156_v4  ;;  %v17675_v41 = vrot.slane %v3584_v6, %v24156_v4  ;;  %v3599_v57 = vrot.slane %v3585_v55, %v24156_v4 }
 0x457   : > { %v3425_v63 = vpop.permute.xlu0 %3424  ;;  %v17666_v11 = vpop.permute.xlu1 %3430  ;;  %v24175_v6 = vcombine.low %v17356_v8, %v17368_v16 }
 0x458   : > { %v3601_v12 = vcombine.high %v3544_v15, %v3576_v44  ;;  %v3602_v53 = vcombine.low %v3551_v30, %v3583_v46  ;;  %v3603_v28 = vcombine.high %v3551_v30, %v3583_v46  ;;  %v3792_v43 = vcombine.low %v3413_v34, %v3425_v63 }
 0x459   : > { %v3600_v52 = vcombine.low %v3544_v15, %v3576_v44  ;;  %v3605_v26 = vcombine.high %v17669_v62, %v17675_v41  ;;  %v3606_v51 = vcombine.low %v3567_v37, %v3599_v57  ;;  %v3607_v49 = vcombine.high %v3567_v37, %v3599_v57 }
 0x45a   : > { %v17685_v59 = vadd.f32 %v24174_v13, %v3601_v12  ;;  %v17690_v55 = vadd.f32 %v24175_v6, %v3602_v53  ;;  %v24177_v15 = vcombine.high %v17356_v8, %v17368_v16  ;;  %v3793_v44 = vcombine.high %v3413_v34, %v3425_v63 }
 0x45b   : > { %v17680_v47 = vpop.permute.xlu0 %3432  ;;  %v3437_v21 = vpop.permute.xlu1 %3436  ;;  %v3808_v37 = vcombine.low %v17643_v35, %v17649_v25  ;;  %v24179_v46 = vcombine.high %v17359_v54, %v17371_v58  ;;  %v17707_v57 = vadd.f32 %v24180_v10, %v3606_v51  ;;  %v24182_v12 = vcombine.high %v17362_v23, %v17374_v48 }
 0x45c   : > { %24176 = vst [vmem:[#allocation50_spill] sm:$0xff] %v17690_v55  ;;  %v17695_v30 = vadd.f32 %v24177_v15, %v3603_v28  ;;  %v3824_v16 = vcombine.low %v17646_v19, %v17652_v61  ;;  %v5373_v34 = vadd.f32 %v4957_v2, %v3600_v52  ;;  %v3784_v63 = vrot.slane %v3776_v24, %v24155_v14 }
 0x45d   : > { %v17702_v42 = vadd.f32 %v24179_v46, %v3605_v26  ;;  %24181 = vst [vmem:[#allocation37_spill] sm:$0xff] %v17707_v57  ;;  %v17712_v8 = vadd.f32 %v24182_v12, %v3607_v49  ;;  %v3791_v53 = vrot.slane %v3777_v45, %v24155_v14  ;;  %v3800_v28 = vrot.slane %v3792_v43, %v24155_v14 }
 0x45e   : > { %24178 = vst [vmem:[#allocation39_spill] sm:$0xff] %v17695_v30  ;;  %v3807_v26 = vrot.slane %v3793_v44, %v24155_v14  ;;  %v17721_v51 = vrot.slane %v3808_v37, %v24156_v4  ;;  %v3823_v23 = vrot.slane %v3809_v0, %v24156_v4  ;;  %v17726_v6 = vrot.slane %v3824_v16, %v24156_v4 }
 0x45f   : > { %24183 = vst [vmem:[#allocation22_spill] sm:$0xff] %v17712_v8  ;;  %v3439_v35 = vpop.permute.xlu0 %3438  ;;  %v3443_v25 = vpop.permute.xlu1 %3442  ;;  %v3840_v49 = vcombine.low %v3784_v63, %v3800_v28  ;;  %v3841_v13 = vcombine.high %v3784_v63, %v3800_v28  ;;  %v24184_v24 = vcombine.high %v17646_v19, %v17652_v61  ;;  %v17733_v43 = vadd.f32 %v16888_v32, %v5373_v34 }
 0x460   : > { %v3624_v48 = vcombine.low %v17666_v11, %v3443_v25  ;;  %v3856_v52 = vcombine.low %v3791_v53, %v3807_v26  ;;  %v3857_v2 = vcombine.high %v3791_v53, %v3807_v26  ;;  %v3625_v15 = vcombine.high %v17666_v11, %v3443_v25 }
 0x461   : > { %v3839_v45 = vrot.slane %v24184_v24, %v24156_v4  ;;  %v17739_v37 = vrot.slane %v3840_v49, %v24156_v4  ;;  %v3855_v46 = vrot.slane %v3841_v13, %v24156_v4  ;;  %v3608_v19 = vcombine.low %v17597_v9, %v3437_v21 }
 0x462   : > { %v17743_v10 = vrot.slane %v3856_v52, %v24156_v4  ;;  %v3871_v12 = vrot.slane %v3857_v2, %v24156_v4  ;;  %v3609_v61 = vcombine.high %v17597_v9, %v3437_v21  ;;  %v3880_v16 = vcombine.low %v17606_v20, %v3439_v35 }
 0x463   : > { %v3445_v0 = vpop.permute.xlu0 %3444  ;;  %v17736_v44 = vpop.permute.xlu1 %3448  ;;  %v3881_v11 = vcombine.high %v17606_v20, %v3439_v35  ;;  %v3873_v34 = vcombine.high %v17721_v51, %v17739_v37  ;;  %v3874_v25 = vcombine.low %v3823_v23, %v3855_v46  ;;  %v3875_v63 = vcombine.high %v3823_v23, %v3855_v46 }
 0x464   : > { %v3632_v53 = vrot.slane %v3624_v48, %v24155_v14  ;;  %v3877_v28 = vcombine.high %v17726_v6, %v17743_v10  ;;  %v3878_v26 = vcombine.low %v3839_v45, %v3871_v12  ;;  %v3879_v49 = vcombine.high %v3839_v45, %v3871_v12 }
 0x465   : > { %v17756_v13 = vrot.slane %v3625_v15, %v24155_v14  ;;  %v24185_v20 = vcombine.high %v17395_v50, %v17401_v38  ;;  %v24187_v23 = vcombine.low %v17398_v40, %v17404_v17  ;;  %v24189_v48 = vcombine.high %v17398_v40, %v17404_v17 }
 0x466   : > { %v3896_v24 = vcombine.low %v17680_v47, %v3445_v0  ;;  %v24191_v45 = vcombine.high %v17413_v5, %v17407_v39  ;;  %v24193_v46 = vcombine.low %v17416_v1, %v17410_v31  ;;  %v3897_v17 = vcombine.high %v17680_v47, %v3445_v0 }
 0x467   : > { %v3451_v9 = vpop.permute.xlu0 %3450  ;;  %v3455_v21 = vpop.permute.xlu1 %3454  ;;  %v17761_v35 = vadd.f32 %v24185_v20, %v3873_v34  ;;  %v17766_v52 = vadd.f32 %v24187_v23, %v3874_v25  ;;  %v17771_v2 = vadd.f32 %v24189_v48, %v3875_v63  ;;  %v24195_v34 = vcombine.high %v17416_v1, %v17410_v31 }
 0x468   : > { %v17777_v15 = vadd.f32 %v24191_v45, %v3877_v28  ;;  %v17782_v12 = vadd.f32 %v24193_v46, %v3878_v26  ;;  %v3616_v40 = vrot.slane %v3608_v19, %v24155_v14  ;;  %v17792_v63 = vrot.slane %v3609_v61, %v24155_v14  ;;  %v24197_v45 = vld [vmem:[#allocation19_spill] sm:$0xff] }
 0x469   : > { %24186 = vst [vmem:[#allocation41_spill] sm:$0xff] %v17761_v35  ;;  %24188 = vst [vmem:[#allocation30_spill] sm:$0xff] %v17766_v52  ;;  %v17787_v25 = vadd.f32 %v24195_v34, %v3879_v49  ;;  %v17795_v23 = vrot.slane %v3880_v16, %v24155_v14  ;;  %v17800_v31 = vsub.s32 1, %v24197_v45  ;;  %v17803_v1 = vrot.slane %v3881_v11, %v24155_v14 }
 0x46a   : > { %24190 = vst [vmem:[#allocation47_spill] sm:$0xff] %v17771_v2  ;;  %24192 = vst [vmem:[#allocation34_spill] sm:$0xff] %v17777_v15  ;;  %v3673_v48 = vcombine.high %v3616_v40, %v3632_v53  ;;  %v3689_v26 = vcombine.high %v17792_v63, %v17756_v13  ;;  %v17806_v47 = vrot.slane %v3896_v24, %v24155_v14  ;;  %v17821_v34 = vsub.s32 2, %v24197_v45 }
 0x46b   : > { %24194 = vst [vmem:[#allocation54_spill] sm:$0xff] %v17782_v12  ;;  %24196 = vst [vmem:[#allocation55_spill] sm:$0xff] %v17787_v25  ;;  %v3457_v20 = vpop.permute.xlu0 %3456  ;;  %v3461_v28 = vpop.permute.xlu1 %3460  ;;  %v17809_v0 = vrot.slane %v3897_v17, %v24155_v14  ;;  %v5670_v19 = vrot.slane %v17733_v43, %v16600_v7  ;;  %v3672_v61 = vcombine.low %v3616_v40, %v3632_v53  ;;  %v17836_v25 = vsub.s32 5, %v24197_v45 }
 0x46c   : > { %24198 = vst [vmem:[#allocation19_spill] sm:$0xff] %v17800_v31  ;;  %v3688_v16 = vcombine.low %v17792_v63, %v17756_v13  ;;  %v3640_v24 = vcombine.low %v17736_v44, %v3461_v28  ;;  %24199 = vst [vmem:[#allocation56_spill] sm:$0xff] %v17821_v34  ;;  %v5681_v53 = vrot.slane %v17733_v43, %v17800_v31  ;;  %v17827_v63 = vsub.s32 3, %v24197_v45 }
 0x46d   : > { %5676 = vbcast.lane.b32.xlu1 %v5670_v19, 264  ;;  %5672 = vbcast.lane.b32.xlu0 %v5670_v19, 256  ;;  %v3641_v13 = vcombine.high %v17736_v44, %v3461_v28  ;;  %v17830_v11 = vrot.slane %v3672_v61, %v24156_v4  ;;  %v17833_v19 = vsub.s32 4, %v24197_v45  ;;  %24202 = vst [vmem:[#allocation59_spill] sm:$0xff] %v17836_v25 }
 0x46e   : > { %24200 = vst [vmem:[#allocation57_spill] sm:$0xff] %v17827_v63  ;;  %v3687_v2 = vrot.slane %v3673_v48, %v24156_v4  ;;  %v17840_v8 = vrot.slane %v3688_v16, %v24156_v4  ;;  %v3648_v61 = vrot.slane %v3640_v24, %v24155_v14 }
 0x46f   : > { %v3463_v46 = vpop.permute.xlu0 %3462  ;;  %v3467_v17 = vpop.permute.xlu1 %3466  ;;  %24201 = vst [vmem:[#allocation58_spill] sm:$0xff] %v17833_v19  ;;  %v3655_v52 = vrot.slane %v3641_v13, %v24155_v14 }
 0x470   : > { %v3912_v40 = vcombine.low %v3451_v9, %v3463_v46  ;;  %v3913_v49 = vcombine.high %v3451_v9, %v3463_v46  ;;  %v3656_v44 = vcombine.low %v3455_v21, %v3467_v17  ;;  %v3657_v28 = vcombine.high %v3455_v21, %v3467_v17 }
 0x471   : > { %5687 = vbcast.lane.b32.xlu1 %v5681_v53, 264  ;;  %5683 = vbcast.lane.b32.xlu0 %v5681_v53, 256  ;;  %v5692_v9 = vrot.slane %v17733_v43, %v17821_v34  ;;  %v5703_v21 = vrot.slane %v17733_v43, %v17827_v63 }
 0x472   : > { %v3920_v57 = vrot.slane %v3912_v40, %v24155_v14  ;;  %v3664_v48 = vrot.slane %v3656_v44, %v24155_v14  ;;  %v3671_v16 = vrot.slane %v3657_v28, %v24155_v14  ;;  %v3927_v55 = vrot.slane %v3913_v49, %v24155_v14 }
 0x473   : > { %v3469_v30 = vpop.permute.xlu0 %3468 }
 0x474   : > { %v3928_v46 = vcombine.low %v3457_v20, %v3469_v30  ;;  %v3929_v12 = vcombine.high %v3457_v20, %v3469_v30  ;;  %v3704_v53 = vcombine.low %v3648_v61, %v3664_v48  ;;  %v3705_v30 = vcombine.high %v3648_v61, %v3664_v48 }
 0x475   : > { %5698 = vbcast.lane.b32.xlu1 %v5692_v9, 264  ;;  %v3720_v20 = vcombine.low %v3655_v52, %v3671_v16  ;;  %v3721_v13 = vcombine.high %v3655_v52, %v3671_v16  ;;  %5694 = vbcast.lane.b32.xlu0 %v5692_v9, 256  ;;  %v3944_v52 = vcombine.low %v17795_v23, %v17806_v47 }
 0x476   : > { %v3936_v24 = vrot.slane %v3928_v46, %v24155_v14  ;;  %v3943_v17 = vrot.slane %v3929_v12, %v24155_v14  ;;  %v17855_v28 = vrot.slane %v3704_v53, %v24156_v4  ;;  %v3719_v49 = vrot.slane %v3705_v30, %v24156_v4 }
 0x477   : > { %v17859_v32 = vrot.slane %v3720_v20, %v24156_v4  ;;  %v3735_v12 = vrot.slane %v3721_v13, %v24156_v4  ;;  %v3703_v46 = vrot.slane %v3689_v26, %v24156_v4  ;;  %v24203_v30 = vcombine.high %v17451_v56, %v17471_v27 }
 0x478   : > { %v3976_v40 = vcombine.low %v3920_v57, %v3936_v24  ;;  %v3977_v15 = vcombine.high %v3920_v57, %v3936_v24  ;;  %v3992_v44 = vcombine.low %v3927_v55, %v3943_v17  ;;  %v3993_v35 = vcombine.high %v3927_v55, %v3943_v17 }
 0x479   : > { %v3960_v57 = vcombine.low %v17803_v1, %v17809_v0  ;;  %v5714_v55 = vrot.slane %v17733_v43, %v17833_v19  ;;  %v3737_v61 = vcombine.high %v17830_v11, %v17855_v28  ;;  %v3738_v9 = vcombine.low %v3687_v2, %v3719_v49  ;;  %5709 = vbcast.lane.b32.xlu1 %v5703_v21, 264 }
 0x47a   : > { %v3739_v48 = vcombine.high %v3687_v2, %v3719_v49  ;;  %v17872_v16 = vrot.slane %v3976_v40, %v24156_v4  ;;  %v3741_v26 = vcombine.high %v17840_v8, %v17859_v32  ;;  %v3742_v24 = vcombine.low %v3703_v46, %v3735_v12  ;;  %5705 = vbcast.lane.b32.xlu0 %v5703_v21, 256 }
 0x47b   : > { %v3743_v17 = vcombine.high %v3703_v46, %v3735_v12  ;;  %v3991_v53 = vrot.slane %v3977_v15, %v24156_v4  ;;  %v17880_v20 = vadd.f32 %v24203_v30, %v3737_v61  ;;  %v24205_v2 = vcombine.low %v17454_v29, %v17474_v33 }
 0x47c   : > { %v24207_v40 = vcombine.high %v17454_v29, %v17474_v33  ;;  %v17893_v12 = vrot.slane %v3992_v44, %v24156_v4  ;;  %v24209_v15 = vcombine.high %v17461_v60, %v17477_v36  ;;  %v24211_v46 = vcombine.low %v17464_v18, %v17480_v3 }
 0x47d   : > { %24204 = vst [vmem:[#allocation60_spill] sm:$0xff] %v17880_v20  ;;  %v17885_v13 = vadd.f32 %v24205_v2, %v3738_v9  ;;  %v24213_v9 = vcombine.high %v17464_v18, %v17480_v3  ;;  %v4007_v29 = vrot.slane %v3993_v35, %v24156_v4  ;;  %v17912_v33 = vrot.slane %v3944_v52, %v24156_v4 }
 0x47e   : > { %v17890_v49 = vadd.f32 %v24207_v40, %v3739_v48  ;;  %v17898_v21 = vadd.f32 %v24209_v15, %v3741_v26  ;;  %v17903_v61 = vadd.f32 %v24211_v46, %v3742_v24  ;;  %v24215_v44 = vcombine.high %v17795_v23, %v17806_v47  ;;  %5720 = vbcast.lane.b32.xlu1 %v5714_v55, 264  ;;  %v24221_v40 = vld [vmem:[#allocation24_spill] sm:$0xff]  ;;  %v24222_v15 = vld [vmem:[#allocation26_spill] sm:$0xff] }
 0x47f   : > { %24206 = vst [vmem:[#allocation61_spill] sm:$0xff] %v17885_v13  ;;  %v17908_v30 = vadd.f32 %v24213_v9, %v3743_v17  ;;  %v3604_v26 = vcombine.low %v17669_v62, %v17675_v41  ;;  %v17921_v24 = vrot.slane %v3960_v57, %v24156_v4  ;;  %v24216_v18 = vcombine.high %v17803_v1, %v17809_v0  ;;  %v24218_v0 = vld [vmem:[#allocation25_spill] sm:$0xff] }
 0x480   : > { %24208 = vst [vmem:[#allocation62_spill] sm:$0xff] %v17890_v49  ;;  %24210 = vst [vmem:[#allocation63_spill] sm:$0xff] %v17898_v21  ;;  %v3959_v48 = vrot.slane %v24215_v44, %v24156_v4  ;;  %5716 = vbcast.lane.b32.xlu0 %v5714_v55, 256  ;;  %v17928_v35 = vsub.s32 6, %v24197_v45  ;;  %v4009_v23 = vcombine.high %v17912_v33, %v17872_v16  ;;  %v24242_v49 = vld [vmem:[#allocation40_spill] sm:$0xff] }
 0x481   : > { %24212 = vst [vmem:[#allocation64_spill] sm:$0xff] %v17903_v61  ;;  %24214 = vst [vmem:[#allocation65_spill] sm:$0xff] %v17908_v30  ;;  %v3975_v3 = vrot.slane %v24216_v18, %v24156_v4  ;;  %v5725_v62 = vrot.slane %v17733_v43, %v17836_v25  ;;  %v4013_v41 = vcombine.high %v17921_v24, %v17893_v12 }
 0x482   : > { %24217 = vst [vmem:[#allocation66_spill] sm:$0xff] %v17928_v35  ;;  %v4010_v47 = vcombine.low %v3959_v48, %v3991_v53  ;;  %v4011_v52 = vcombine.high %v3959_v48, %v3991_v53  ;;  %v4961_v1 = vcombine.low %v17359_v54, %v17371_v58  ;;  %v24219_v55 = vcombine.high %v17483_v22, %v24218_v0  ;;  %v24228_v48 = vld [vmem:[#allocation49_spill] sm:$0xff]  ;;  %v24231_v58 = vld [vmem:[#allocation51_spill] sm:$0xff] }
 0x483   : > { %v4014_v57 = vcombine.low %v3975_v3, %v4007_v29  ;;  %v4015_v17 = vcombine.high %v3975_v3, %v4007_v29  ;;  %v24223_v46 = vcombine.low %v24221_v40, %v24222_v15  ;;  %v24225_v9 = vcombine.high %v24221_v40, %v24222_v15  ;;  %5731 = vbcast.lane.b32.xlu1 %v5725_v62, 264  ;;  %v24227_v29 = vld [vmem:[#allocation52_spill] sm:$0xff]  ;;  %v24232_v3 = vld [vmem:[#allocation53_spill] sm:$0xff] }
 0x484   : > { %v17941_v2 = vadd.f32 %v24219_v55, %v4009_v23  ;;  %v24229_v18 = vcombine.high %v24227_v29, %v24228_v48  ;;  %v24233_v23 = vcombine.low %v24231_v58, %v24232_v3  ;;  %5727 = vbcast.lane.b32.xlu0 %v5725_v62, 256  ;;  %v5381_v40 = vadd.f32 %v4961_v1, %v3604_v26 }
 0x485   : > { %v17946_v53 = vadd.f32 %v24223_v46, %v4010_v47  ;;  %v17951_v44 = vadd.f32 %v24225_v9, %v4011_v52  ;;  %v24235_v47 = vcombine.high %v24231_v58, %v24232_v3  ;;  %v5736_v52 = vrot.slane %v17733_v43, %v17928_v35 }
 0x486   : > { %24220 = vst [vmem:[#allocation25_spill] sm:$0xff] %v17941_v2  ;;  %v17956_v54 = vadd.f32 %v24229_v18, %v4013_v41  ;;  %v17961_v55 = vadd.f32 %v24233_v23, %v4014_v57  ;;  %v17971_v15 = vsub.s32 7, %v24197_v45  ;;  %v24238_v41 = vld [vmem:[#allocation46_spill] sm:$0xff]  ;;  %v3872_v1 = vcombine.low %v17721_v51, %v17739_v37 }
 0x487   : > { %24224 = vst [vmem:[#allocation24_spill] sm:$0xff] %v17946_v53  ;;  %24226 = vst [vmem:[#allocation26_spill] sm:$0xff] %v17951_v44  ;;  %v17966_v46 = vadd.f32 %v24235_v47, %v4015_v17  ;;  %5742 = vbcast.lane.b32.xlu1 %v5736_v52, 264  ;;  %v5643_v9 = vadd.f32 %v24238_v41, %v5381_v40  ;;  %v5229_v58 = vcombine.low %v17395_v50, %v17401_v38  ;;  %v24239_v47 = vld [vmem:[#allocation44_spill] sm:$0xff] }
 0x488   : > { %24230 = vst [vmem:[#allocation52_spill] sm:$0xff] %v17956_v54  ;;  %24234 = vst [vmem:[#allocation49_spill] sm:$0xff] %v17961_v55  ;;  %5738 = vbcast.lane.b32.xlu0 %v5736_v52, 256  ;;  %v5747_v57 = vrot.slane %v17733_v43, %v17971_v15  ;;  %v5645_v55 = vadd.f32 %v24242_v49, %v17702_v42 }
 0x489   : > { %24236 = vst [vmem:[#allocation51_spill] sm:$0xff] %v17966_v46  ;;  %24237 = vst [vmem:[#allocation53_spill] sm:$0xff] %v17971_v15  ;;  %v5846_v17 = vrot.slane %v5643_v9, %v16600_v7  ;;  %v5857_v26 = vrot.slane %v5643_v9, %v17800_v31  ;;  %v5868_v45 = vrot.slane %v5643_v9, %v17821_v34 }
 0x48a   : > { %v5879_v62 = vrot.slane %v5643_v9, %v17827_v63  ;;  %v5890_v43 = vrot.slane %v5643_v9, %v17833_v19  ;;  %v5901_v18 = vrot.slane %v5643_v9, %v17836_v25  ;;  %v5389_v3 = vadd.f32 %v5229_v58, %v3872_v1 }
 0x48b   : > { %5753 = vbcast.lane.b32.xlu1 %v5747_v57, 264  ;;  %v5912_v23 = vrot.slane %v5643_v9, %v17928_v35  ;;  %v5923_v52 = vrot.slane %v5643_v9, %v17971_v15  ;;  %v6550_v13 = vrot.slane %v5645_v55, %v16600_v7  ;;  %v6561_v42 = vrot.slane %v5645_v55, %v17800_v31 }
 0x48c   : > { %5749 = vbcast.lane.b32.xlu0 %v5747_v57, 256  ;;  %v5651_v40 = vadd.f32 %v24239_v47, %v5389_v3  ;;  %v3876_v57 = vcombine.low %v17726_v6, %v17743_v10 }
 0x48e   : > { %v6022_v51 = vrot.slane %v5651_v40, %v16600_v7  ;;  %v6033_v37 = vrot.slane %v5651_v40, %v17800_v31  ;;  %v6044_v50 = vrot.slane %v5651_v40, %v17821_v34  ;;  %v6055_v38 = vrot.slane %v5651_v40, %v17827_v63 }
 0x48f   : > { %5852 = vbcast.lane.b32.xlu1 %v5846_v17, 264  ;;  %v6066_v9 = vrot.slane %v5651_v40, %v17833_v19 }
 0x490   : > { %5848 = vbcast.lane.b32.xlu0 %v5846_v17, 256  ;;  %v6077_v17 = vrot.slane %v5651_v40, %v17836_v25 }
 0x493   : > { %5863 = vbcast.lane.b32.xlu1 %v5857_v26, 264 }
 0x494   : > { %5859 = vbcast.lane.b32.xlu0 %v5857_v26, 256  ;;  %v5233_v26 = vcombine.low %v17413_v5, %v17407_v39 }
 0x497   : > { %5874 = vbcast.lane.b32.xlu1 %v5868_v45, 264 }
 0x498   : > { %5870 = vbcast.lane.b32.xlu0 %v5868_v45, 256  ;;  %v5397_v45 = vadd.f32 %v5233_v26, %v3876_v57 }
 0x49b   : > { %5885 = vbcast.lane.b32.xlu1 %v5879_v62, 264 }
 0x49c   : > { %5881 = vbcast.lane.b32.xlu0 %v5879_v62, 256  ;;  %v6088_v62 = vrot.slane %v5651_v40, %v17928_v35 }
 0x49f   : > { %5896 = vbcast.lane.b32.xlu1 %v5890_v43, 264 }
 0x4a0   : > { %5892 = vbcast.lane.b32.xlu0 %v5890_v43, 256  ;;  %v24240_v43 = vld [vmem:[#allocation31_spill] sm:$0xff] }
 0x4a1   : > { %v5659_v1 = vadd.f32 %v24240_v43, %v5397_v45 }
 0x4a3   : > { %5907 = vbcast.lane.b32.xlu1 %v5901_v18, 264  ;;  %v6198_v6 = vrot.slane %v5659_v1, %v16600_v7  ;;  %v6209_v10 = vrot.slane %v5659_v1, %v17800_v31  ;;  %v6220_v39 = vrot.slane %v5659_v1, %v17821_v34  ;;  %v6231_v5 = vrot.slane %v5659_v1, %v17827_v63 }
 0x4a4   : > { %5903 = vbcast.lane.b32.xlu0 %v5901_v18, 256  ;;  %v6099_v18 = vrot.slane %v5651_v40, %v17971_v15  ;;  %v6242_v58 = vrot.slane %v5659_v1, %v17833_v19  ;;  %v6275_v57 = vrot.slane %v5659_v1, %v17971_v15 }
 0x4a7   : > { %5918 = vbcast.lane.b32.xlu1 %v5912_v23, 264 }
 0x4a8   : > { %5914 = vbcast.lane.b32.xlu0 %v5912_v23, 256  ;;  %v6253_v23 = vrot.slane %v5659_v1, %v17836_v25 }
 0x4ab   : > { %5929 = vbcast.lane.b32.xlu1 %v5923_v52, 264 }
 0x4ac   : > { %5925 = vbcast.lane.b32.xlu0 %v5923_v52, 256 }
 0x4af   : > { %6028 = vbcast.lane.b32.xlu1 %v6022_v51, 264 }
 0x4b0   : > { %6024 = vbcast.lane.b32.xlu0 %v6022_v51, 256  ;;  %v6264_v51 = vrot.slane %v5659_v1, %v17928_v35 }
 0x4b3   : > { %6039 = vbcast.lane.b32.xlu1 %v6033_v37, 264 }
 0x4b4   : > { %6035 = vbcast.lane.b32.xlu0 %v6033_v37, 256 }
 0x4b7   : > { %6050 = vbcast.lane.b32.xlu1 %v6044_v50, 264 }
 0x4b8   : > { %6046 = vbcast.lane.b32.xlu0 %v6044_v50, 256  ;;  %v24241_v50 = vld [vmem:[#allocation43_spill] sm:$0xff] }
 0x4bb   : > { %6061 = vbcast.lane.b32.xlu1 %v6055_v38, 264 }
 0x4bc   : > { %6057 = vbcast.lane.b32.xlu0 %v6055_v38, 256  ;;  %v5637_v38 = vadd.f32 %v24241_v50, %v17685_v59 }
 0x4be   : > { %v6374_v45 = vrot.slane %v5637_v38, %v16600_v7  ;;  %v6385_v59 = vrot.slane %v5637_v38, %v17800_v31  ;;  %v6451_v53 = vrot.slane %v5637_v38, %v17971_v15 }
 0x4bf   : > { %6072 = vbcast.lane.b32.xlu1 %v6066_v9, 264 }
 0x4c0   : > { %6068 = vbcast.lane.b32.xlu0 %v6066_v9, 256 }
 0x4c3   : > { %6083 = vbcast.lane.b32.xlu1 %v6077_v17, 264 }
 0x4c4   : > { %6079 = vbcast.lane.b32.xlu0 %v6077_v17, 256 }
 0x4c7   : > { %6094 = vbcast.lane.b32.xlu1 %v6088_v62, 264 }
 0x4c8   : > { %6090 = vbcast.lane.b32.xlu0 %v6088_v62, 256 }
 0x4cb   : > { %6105 = vbcast.lane.b32.xlu1 %v6099_v18, 264 }
 0x4cc   : > { %6101 = vbcast.lane.b32.xlu0 %v6099_v18, 256 }
 0x4cf   : > { %6204 = vbcast.lane.b32.xlu1 %v6198_v6, 264 }
 0x4d0   : > { %6200 = vbcast.lane.b32.xlu0 %v6198_v6, 256 }
 0x4d3   : > { %6215 = vbcast.lane.b32.xlu1 %v6209_v10, 264 }
 0x4d4   : > { %6211 = vbcast.lane.b32.xlu0 %v6209_v10, 256  ;;  %v6396_v10 = vrot.slane %v5637_v38, %v17821_v34 }
 0x4d7   : > { %6226 = vbcast.lane.b32.xlu1 %v6220_v39, 264 }
 0x4d8   : > { %6222 = vbcast.lane.b32.xlu0 %v6220_v39, 256 }
 0x4db   : > { %6237 = vbcast.lane.b32.xlu1 %v6231_v5, 264 }
 0x4dc   : > { %6233 = vbcast.lane.b32.xlu0 %v6231_v5, 256 }
 0x4df   : > { %6248 = vbcast.lane.b32.xlu1 %v6242_v58, 264  ;;  %v18007_v3 = vpop.permute.xlu1 %5676  ;;  %v18010_v40 = vpop.permute.xlu0 %5672 }
 0x4e0   : > { %6244 = vbcast.lane.b32.xlu0 %v6242_v58, 256  ;;  %v6407_v58 = vrot.slane %v5637_v38, %v17827_v63 }
 0x4e3   : > { %6259 = vbcast.lane.b32.xlu1 %v6253_v23, 264  ;;  %v18012_v52 = vpop.permute.xlu1 %5687  ;;  %v18015_v37 = vpop.permute.xlu0 %5683 }
 0x4e4   : > { %6255 = vbcast.lane.b32.xlu0 %v6253_v23, 256 }
 0x4e7   : > { %6270 = vbcast.lane.b32.xlu1 %v6264_v51, 264  ;;  %v18019_v9 = vpop.permute.xlu1 %5698  ;;  %v18022_v17 = vpop.permute.xlu0 %5694 }
 0x4e8   : > { %6266 = vbcast.lane.b32.xlu0 %v6264_v51, 256 }
 0x4eb   : > { %6281 = vbcast.lane.b32.xlu1 %v6275_v57, 264  ;;  %v18024_v26 = vpop.permute.xlu1 %5709 }
 0x4ec   : > { %6277 = vbcast.lane.b32.xlu0 %v6275_v57, 256  ;;  %v18027_v62 = vpop.permute.xlu0 %5705  ;;  %v6418_v57 = vrot.slane %v5637_v38, %v17833_v19 }
 0x4ef   : > { %6380 = vbcast.lane.b32.xlu1 %v6374_v45, 264 }
 0x4f0   : > { %6376 = vbcast.lane.b32.xlu0 %v6374_v45, 256  ;;  %v18029_v18 = vpop.permute.xlu1 %5720 }
 0x4f2   : > { %v18032_v6 = vpop.permute.xlu0 %5716 }
 0x4f3   : > { %6391 = vbcast.lane.b32.xlu1 %v6385_v59, 264 }
 0x4f4   : > { %6387 = vbcast.lane.b32.xlu0 %v6385_v59, 256 }
 0x4f5   : > { %v18034_v1 = vpop.permute.xlu1 %5731 }
 0x4f6   : > { %v18037_v39 = vpop.permute.xlu0 %5727 }
 0x4f7   : > { %6402 = vbcast.lane.b32.xlu1 %v6396_v10, 264 }
 0x4f8   : > { %6398 = vbcast.lane.b32.xlu0 %v6396_v10, 256  ;;  %v6429_v10 = vrot.slane %v5637_v38, %v17836_v25 }
 0x4f9   : > { %v18039_v5 = vpop.permute.xlu1 %5742 }
 0x4fa   : > { %v18042_v23 = vpop.permute.xlu0 %5738 }
 0x4fb   : > { %6413 = vbcast.lane.b32.xlu1 %v6407_v58, 264 }
 0x4fc   : > { %6409 = vbcast.lane.b32.xlu0 %v6407_v58, 256  ;;  %v6440_v58 = vrot.slane %v5637_v38, %v17928_v35 }
 0x4fd   : > { %v18044_v51 = vpop.permute.xlu1 %5753 }
 0x4fe   : > { %v18047_v45 = vpop.permute.xlu0 %5749 }
 0x4ff   : > { %6424 = vbcast.lane.b32.xlu1 %v6418_v57, 264 }
 0x500   : > { %6420 = vbcast.lane.b32.xlu0 %v6418_v57, 256 }
 0x501   : > { %v18049_v59 = vpop.permute.xlu1 %5852 }
 0x502   : > { %v18052_v46 = vpop.permute.xlu0 %5848 }
 0x503   : > { %6435 = vbcast.lane.b32.xlu1 %v6429_v10, 264 }
 0x504   : > { %6431 = vbcast.lane.b32.xlu0 %v6429_v10, 256 }
 0x505   : > { %v18054_v44 = vpop.permute.xlu1 %5863 }
 0x506   : > { %v18057_v30 = vpop.permute.xlu0 %5859 }
 0x507   : > { %6446 = vbcast.lane.b32.xlu1 %v6440_v58, 264 }
 0x508   : > { %6442 = vbcast.lane.b32.xlu0 %v6440_v58, 256 }
 0x509   : > { %v18061_v57 = vpop.permute.xlu1 %5874 }
 0x50a   : > { %v18064_v61 = vpop.permute.xlu0 %5870 }
 0x50b   : > { %6457 = vbcast.lane.b32.xlu1 %v6451_v53, 264 }
 0x50c   : > { %6453 = vbcast.lane.b32.xlu0 %v6451_v53, 256  ;;  %v6572_v53 = vrot.slane %v5645_v55, %v17821_v34 }
 0x50d   : > { %v18066_v10 = vpop.permute.xlu1 %5885 }
 0x50e   : > { %v18069_v54 = vpop.permute.xlu0 %5881 }
 0x50f   : > { %6556 = vbcast.lane.b32.xlu1 %v6550_v13, 264 }
 0x510   : > { %6552 = vbcast.lane.b32.xlu0 %v6550_v13, 256  ;;  %v6583_v13 = vrot.slane %v5645_v55, %v17827_v63 }
 0x511   : > { %v18071_v58 = vpop.permute.xlu1 %5896 }
 0x512   : > { %24243 = vst [vmem:[#allocation46_spill] sm:$0xff] %v18071_v58  ;;  %v18074_v2 = vpop.permute.xlu0 %5892 }
 0x513   : > { %24244 = vst [vmem:[#allocation44_spill] sm:$0xff] %v18074_v2  ;;  %6567 = vbcast.lane.b32.xlu1 %v6561_v42, 264 }
 0x514   : > { %6563 = vbcast.lane.b32.xlu0 %v6561_v42, 256  ;;  %v6594_v42 = vrot.slane %v5645_v55, %v17833_v19 }
 0x515   : > { %v18076_v38 = vpop.permute.xlu1 %5907 }
 0x516   : > { %24245 = vst [vmem:[#allocation31_spill] sm:$0xff] %v18076_v38  ;;  %v18079_v49 = vpop.permute.xlu0 %5903  ;;  %v6605_v38 = vrot.slane %v5645_v55, %v17836_v25 }
 0x517   : > { %24246 = vst [vmem:[#allocation67_spill] sm:$0xff] %v18079_v49  ;;  %6578 = vbcast.lane.b32.xlu1 %v6572_v53, 264  ;;  %v3736_v49 = vcombine.low %v17830_v11, %v17855_v28  ;;  %v24254_v11 = vld [vmem:[#allocation36_spill] sm:$0xff] }
 0x518   : > { %6574 = vbcast.lane.b32.xlu0 %v6572_v53, 256 }
 0x519   : > { %v18081_v21 = vpop.permute.xlu1 %5918 }
 0x51a   : > { %24247 = vst [vmem:[#allocation68_spill] sm:$0xff] %v18081_v21  ;;  %v18084_v50 = vpop.permute.xlu0 %5914 }
 0x51b   : > { %24248 = vst [vmem:[#allocation69_spill] sm:$0xff] %v18084_v50  ;;  %6589 = vbcast.lane.b32.xlu1 %v6583_v13, 264 }
 0x51c   : > { %6585 = vbcast.lane.b32.xlu0 %v6583_v13, 256  ;;  %v5093_v13 = vcombine.low %v17451_v56, %v17471_v27 }
 0x51d   : > { %v18086_v20 = vpop.permute.xlu1 %5929 }
 0x51e   : > { %24249 = vst [vmem:[#allocation70_spill] sm:$0xff] %v18086_v20  ;;  %v18089_v2 = vpop.permute.xlu0 %5925  ;;  %v5374_v20 = vadd.f32 %v5093_v13, %v3736_v49 }
 0x51f   : > { %24250 = vst [vmem:[#allocation71_spill] sm:$0xff] %v18089_v2  ;;  %6600 = vbcast.lane.b32.xlu1 %v6594_v42, 264  ;;  %v6616_v2 = vrot.slane %v5645_v55, %v17928_v35 }
 0x520   : > { %6596 = vbcast.lane.b32.xlu0 %v6594_v42, 256  ;;  %v5636_v28 = vadd.f32 %v24254_v11, %v5374_v20 }
 0x521   : > { %v18093_v53 = vpop.permute.xlu1 %6028 }
 0x522   : > { %24251 = vst [vmem:[#allocation72_spill] sm:$0xff] %v18093_v53  ;;  %v18096_v21 = vpop.permute.xlu0 %6024  ;;  %v5758_v27 = vrot.slane %v5636_v28, %v16600_v7  ;;  %v5769_v20 = vrot.slane %v5636_v28, %v17800_v31 }
 0x523   : > { %24252 = vst [vmem:[#allocation73_spill] sm:$0xff] %v18096_v21  ;;  %6611 = vbcast.lane.b32.xlu1 %v6605_v38, 264  ;;  %v6627_v21 = vrot.slane %v5645_v55, %v17971_v15 }
 0x524   : > { %6607 = vbcast.lane.b32.xlu0 %v6605_v38, 256 }
 0x525   : > { %v18100_v50 = vpop.permute.xlu1 %6039 }
 0x526   : > { %v18103_v42 = vpop.permute.xlu0 %6035 }
 0x527   : > { %24253 = vst [vmem:[#allocation74_spill] sm:$0xff] %v18103_v42  ;;  %6622 = vbcast.lane.b32.xlu1 %v6616_v2, 264 }
 0x528   : > { %6618 = vbcast.lane.b32.xlu0 %v6616_v2, 256 }
 0x529   : > { %v18106_v53 = vpop.permute.xlu1 %6050 }
 0x52a   : > { %v18109_v58 = vpop.permute.xlu0 %6046 }
 0x52b   : > { %6633 = vbcast.lane.b32.xlu1 %v6627_v21, 264 }
 0x52c   : > { %6629 = vbcast.lane.b32.xlu0 %v6627_v21, 256  ;;  %v5780_v21 = vrot.slane %v5636_v28, %v17821_v34 }
 0x52d   : > { %v18111_v56 = vpop.permute.xlu1 %6061 }
 0x52e   : > { %v18114_v49 = vpop.permute.xlu0 %6057 }
 0x52f   : > { %24255 = vst [vmem:[#allocation36_spill] sm:$0xff] %v18114_v49  ;;  %5764 = vbcast.lane.b32.xlu1 %v5758_v27, 264 }
 0x530   : > { %5760 = vbcast.lane.b32.xlu0 %v5758_v27, 256  ;;  %v5791_v27 = vrot.slane %v5636_v28, %v17827_v63 }
 0x531   : > { %v18116_v38 = vpop.permute.xlu1 %6072 }
 0x532   : > { %24256 = vst [vmem:[#allocation75_spill] sm:$0xff] %v18116_v38  ;;  %v18119_v2 = vpop.permute.xlu0 %6068 }
 0x533   : > { %24257 = vst [vmem:[#allocation76_spill] sm:$0xff] %v18119_v2  ;;  %5775 = vbcast.lane.b32.xlu1 %v5769_v20, 264 }
 0x534   : > { %5771 = vbcast.lane.b32.xlu0 %v5769_v20, 256  ;;  %v5802_v20 = vrot.slane %v5636_v28, %v17833_v19 }
 0x535   : > { %v18121_v55 = vpop.permute.xlu1 %6083 }
 0x536   : > { %24258 = vst [vmem:[#allocation77_spill] sm:$0xff] %v18121_v55  ;;  %v18124_v13 = vpop.permute.xlu0 %6079  ;;  %v5813_v55 = vrot.slane %v5636_v28, %v17836_v25 }
 0x537   : > { %24259 = vst [vmem:[#allocation78_spill] sm:$0xff] %v18124_v13  ;;  %5786 = vbcast.lane.b32.xlu1 %v5780_v21, 264  ;;  %v3740_v13 = vcombine.low %v17840_v8, %v17859_v32 }
 0x538   : > { %5782 = vbcast.lane.b32.xlu0 %v5780_v21, 256 }
 0x539   : > { %v18126_v11 = vpop.permute.xlu1 %6094 }
 0x53a   : > { %24260 = vst [vmem:[#allocation79_spill] sm:$0xff] %v18126_v11  ;;  %v18129_v49 = vpop.permute.xlu0 %6090 }
 0x53b   : > { %24261 = vst [vmem:[#allocation80_spill] sm:$0xff] %v18129_v49  ;;  %5797 = vbcast.lane.b32.xlu1 %v5791_v27, 264 }
 0x53c   : > { %5793 = vbcast.lane.b32.xlu0 %v5791_v27, 256  ;;  %v5097_v27 = vcombine.low %v17461_v60, %v17477_v36 }
 0x53d   : > { %v18131_v38 = vpop.permute.xlu1 %6105 }
 0x53e   : > { %24262 = vst [vmem:[#allocation81_spill] sm:$0xff] %v18131_v38  ;;  %v18134_v2 = vpop.permute.xlu0 %6101  ;;  %v5382_v38 = vadd.f32 %v5097_v27, %v3740_v13 }
 0x53f   : > { %24263 = vst [vmem:[#allocation82_spill] sm:$0xff] %v18134_v2  ;;  %5808 = vbcast.lane.b32.xlu1 %v5802_v20, 264  ;;  %v5824_v2 = vrot.slane %v5636_v28, %v17928_v35 }
 0x540   : > { %5804 = vbcast.lane.b32.xlu0 %v5802_v20, 256  ;;  %v5644_v32 = vadd.f32 %v24238_v41, %v5382_v38 }
 0x541   : > { %v18138_v21 = vpop.permute.xlu1 %6204 }
 0x542   : > { %24264 = vst [vmem:[#allocation83_spill] sm:$0xff] %v18138_v21  ;;  %v18141_v11 = vpop.permute.xlu0 %6200  ;;  %v5934_v36 = vrot.slane %v5644_v32, %v16600_v7  ;;  %v5945_v41 = vrot.slane %v5644_v32, %v17800_v31 }
 0x543   : > { %24265 = vst [vmem:[#allocation84_spill] sm:$0xff] %v18141_v11  ;;  %5819 = vbcast.lane.b32.xlu1 %v5813_v55, 264  ;;  %v5835_v11 = vrot.slane %v5636_v28, %v17971_v15 }
 0x544   : > { %5815 = vbcast.lane.b32.xlu0 %v5813_v55, 256 }
 0x545   : > { %v18145_v49 = vpop.permute.xlu1 %6215 }
 0x546   : > { %24266 = vst [vmem:[#allocation85_spill] sm:$0xff] %v18145_v49  ;;  %v18148_v20 = vpop.permute.xlu0 %6211 }
 0x547   : > { %24267 = vst [vmem:[#allocation86_spill] sm:$0xff] %v18148_v20  ;;  %5830 = vbcast.lane.b32.xlu1 %v5824_v2, 264  ;;  %v6000_v20 = vrot.slane %v5644_v32, %v17928_v35 }
 0x548   : > { %5826 = vbcast.lane.b32.xlu0 %v5824_v2, 256  ;;  %v5956_v2 = vrot.slane %v5644_v32, %v17821_v34 }
 0x549   : > { %v18151_v8 = vpop.permute.xlu1 %6226 }
 0x54a   : > { %24268 = vst [vmem:[#allocation87_spill] sm:$0xff] %v18151_v8  ;;  %v18154_v21 = vpop.permute.xlu0 %6222 }
 0x54b   : > { %24269 = vst [vmem:[#allocation88_spill] sm:$0xff] %v18154_v21  ;;  %5841 = vbcast.lane.b32.xlu1 %v5835_v11, 264 }
 0x54c   : > { %5837 = vbcast.lane.b32.xlu0 %v5835_v11, 256 }
 0x54d   : > { %v18156_v60 = vpop.permute.xlu1 %6237 }
 0x54e   : > { %24270 = vst [vmem:[#allocation89_spill] sm:$0xff] %v18156_v60  ;;  %v18159_v55 = vpop.permute.xlu0 %6233 }
 0x54f   : > { %24271 = vst [vmem:[#allocation90_spill] sm:$0xff] %v18159_v55  ;;  %5940 = vbcast.lane.b32.xlu1 %v5934_v36, 264 }
 0x550   : > { %5936 = vbcast.lane.b32.xlu0 %v5934_v36, 256  ;;  %v5967_v36 = vrot.slane %v5644_v32, %v17827_v63 }
 0x551   : > { %v18161_v13 = vpop.permute.xlu1 %6248 }
 0x552   : > { %24272 = vst [vmem:[#allocation91_spill] sm:$0xff] %v18161_v13  ;;  %v18164_v38 = vpop.permute.xlu0 %6244 }
 0x553   : > { %24273 = vst [vmem:[#allocation92_spill] sm:$0xff] %v18164_v38  ;;  %5951 = vbcast.lane.b32.xlu1 %v5945_v41, 264 }
 0x554   : > { %5947 = vbcast.lane.b32.xlu0 %v5945_v41, 256  ;;  %v5978_v41 = vrot.slane %v5644_v32, %v17833_v19 }
 0x555   : > { %v18166_v28 = vpop.permute.xlu1 %6259 }
 0x556   : > { %24274 = vst [vmem:[#allocation93_spill] sm:$0xff] %v18166_v28  ;;  %v18169_v11 = vpop.permute.xlu0 %6255  ;;  %v5989_v28 = vrot.slane %v5644_v32, %v17836_v25 }
 0x557   : > { %24275 = vst [vmem:[#allocation94_spill] sm:$0xff] %v18169_v11  ;;  %5962 = vbcast.lane.b32.xlu1 %v5956_v2, 264  ;;  %v4008_v11 = vcombine.low %v17912_v33, %v17872_v16  ;;  %v6011_v33 = vrot.slane %v5644_v32, %v17971_v15 }
 0x558   : > { %5958 = vbcast.lane.b32.xlu0 %v5956_v2, 256 }
 0x559   : > { %v18171_v27 = vpop.permute.xlu1 %6270 }
 0x55a   : > { %24276 = vst [vmem:[#allocation95_spill] sm:$0xff] %v18171_v27  ;;  %v18174_v21 = vpop.permute.xlu0 %6266 }
 0x55b   : > { %24277 = vst [vmem:[#allocation96_spill] sm:$0xff] %v18174_v21  ;;  %5973 = vbcast.lane.b32.xlu1 %v5967_v36, 264  ;;  %v5365_v21 = vcombine.low %v17483_v22, %v24218_v0 }
 0x55c   : > { %5969 = vbcast.lane.b32.xlu0 %v5967_v36, 256 }
 0x55d   : > { %v18176_v13 = vpop.permute.xlu1 %6281  ;;  %v5390_v36 = vadd.f32 %v5365_v21, %v4008_v11 }
 0x55e   : > { %24278 = vst [vmem:[#allocation97_spill] sm:$0xff] %v18176_v13  ;;  %v18179_v38 = vpop.permute.xlu0 %6277 }
 0x55f   : > { %24279 = vst [vmem:[#allocation98_spill] sm:$0xff] %v18179_v38  ;;  %5984 = vbcast.lane.b32.xlu1 %v5978_v41, 264 }
 0x560   : > { %5980 = vbcast.lane.b32.xlu0 %v5978_v41, 256  ;;  %v18188_v41 = vadd.f32 %v24239_v47, %v5390_v36 }
 0x561   : > { %v6381_v2 = vpop.permute.xlu1 %6380 }
 0x562   : > { %v6377_v27 = vpop.permute.xlu0 %6376  ;;  %v18193_v38 = vsel %vm518_vm3, %v18007_v3, %v6381_v2  ;;  %v6110_v3 = vrot.slane %v18188_v41, %v16600_v7 }
 0x563   : > { %5995 = vbcast.lane.b32.xlu1 %v5989_v28, 264  ;;  %24280 = vst [vmem:[#allocation99_spill] sm:$0xff] %v18193_v38  ;;  %v7075_v21 = vsel %vm518_vm3, %v18010_v40, %v6377_v27 }
 0x564   : > { %5991 = vbcast.lane.b32.xlu0 %v5989_v28, 256 }
 0x565   : > { %v6392_v13 = vpop.permute.xlu1 %6391 }
 0x566   : > { %v6388_v55 = vpop.permute.xlu0 %6387 }
 0x567   : > { %6006 = vbcast.lane.b32.xlu1 %v6000_v20, 264 }
 0x568   : > { %6002 = vbcast.lane.b32.xlu0 %v6000_v20, 256 }
 0x569   : > { %v6403_v16 = vpop.permute.xlu1 %6402 }
 0x56a   : > { %v6399_v22 = vpop.permute.xlu0 %6398  ;;  %v18197_v0 = vsel %vm518_vm3, %v18019_v9, %v6403_v16  ;;  %v18209_v9 = vsel %vm518_vm3, %v18012_v52, %v6392_v13 }
 0x56b   : > { %24281 = vst [vmem:[#allocation100_spill] sm:$0xff] %v18197_v0  ;;  %v7079_v20 = vsel %vm518_vm3, %v18022_v17, %v6399_v22  ;;  %v7476_v47 = vcombine.high %v18193_v38, %v18197_v0  ;;  %6017 = vbcast.lane.b32.xlu1 %v6011_v33, 264  ;;  %24282 = vst [vmem:[#allocation101_spill] sm:$0xff] %v18209_v9  ;;  %v7077_v17 = vsel %vm518_vm3, %v18015_v37, %v6388_v55 }
 0x56c   : > { %v7204_v32 = vcombine.high %v7075_v21, %v7079_v20  ;;  %6013 = vbcast.lane.b32.xlu0 %v6011_v33, 256  ;;  %v7203_v11 = vcombine.low %v7075_v21, %v7079_v20  ;;  %v6121_v37 = vrot.slane %v18188_v41, %v17800_v31 }
 0x56d   : > { %v6414_v28 = vpop.permute.xlu1 %6413  ;;  %v18222_v52 = vrot.slane %v7476_v47, %v24155_v14 }
 0x56e   : > { %v6410_v2 = vpop.permute.xlu0 %6409  ;;  %v18213_v40 = vsel %vm518_vm3, %v18024_v26, %v6414_v28  ;;  %v18230_v55 = vrot.slane %v7203_v11, %v24155_v14 }
 0x56f   : > { %24283 = vst [vmem:[#allocation102_spill] sm:$0xff] %v18213_v40  ;;  %v7081_v27 = vsel %vm518_vm3, %v18027_v62, %v6410_v2  ;;  %v7492_v36 = vcombine.high %v18209_v9, %v18213_v40  ;;  %6116 = vbcast.lane.b32.xlu1 %v6110_v3, 264  ;;  %v18233_v62 = vrot.slane %v7204_v32, %v24155_v14 }
 0x570   : > { %v7219_v16 = vcombine.low %v7077_v17, %v7081_v27  ;;  %v7220_v33 = vcombine.high %v7077_v17, %v7081_v27  ;;  %6112 = vbcast.lane.b32.xlu0 %v6110_v3, 256  ;;  %v6132_v17 = vrot.slane %v18188_v41, %v17821_v34 }
 0x571   : > { %v18225_v13 = vrot.slane %v7492_v36, %v24155_v14  ;;  %v6425_v26 = vpop.permute.xlu1 %6424 }
 0x572   : > { %v18236_v22 = vrot.slane %v7219_v16, %v24155_v14  ;;  %v18239_v21 = vrot.slane %v7220_v33, %v24155_v14  ;;  %v6421_v20 = vpop.permute.xlu0 %6420  ;;  %v6143_v16 = vrot.slane %v18188_v41, %v17827_v63  ;;  %v18257_v33 = vsel %vm518_vm3, %v18029_v18, %v6425_v26 }
 0x573   : > { %6127 = vbcast.lane.b32.xlu1 %v6121_v37, 264  ;;  %24284 = vst [vmem:[#allocation103_spill] sm:$0xff] %v18257_v33  ;;  %v7083_v11 = vsel %vm518_vm3, %v18032_v6, %v6421_v20  ;;  %v5369_v26 = vcombine.low %v24227_v29, %v24228_v48 }
 0x574   : > { %v7268_v3 = vcombine.high %v18230_v55, %v18236_v22  ;;  %6123 = vbcast.lane.b32.xlu0 %v6121_v37, 256  ;;  %v4012_v37 = vcombine.low %v17921_v24, %v17893_v12 }
 0x575   : > { %v6436_v2 = vpop.permute.xlu1 %6435 }
 0x576   : > { %v6432_v27 = vpop.permute.xlu0 %6431  ;;  %v18277_v12 = vsel %vm518_vm3, %v18034_v1, %v6436_v2  ;;  %v5398_v20 = vadd.f32 %v5369_v26, %v4012_v37 }
 0x577   : > { %6138 = vbcast.lane.b32.xlu1 %v6132_v17, 264  ;;  %24286 = vst [vmem:[#allocation105_spill] sm:$0xff] %v18277_v12 }
 0x578   : > { %6134 = vbcast.lane.b32.xlu0 %v6132_v17, 256 }
 0x579   : > { %v6447_v36 = vpop.permute.xlu1 %6446 }
 0x57a   : > { %v6443_v28 = vpop.permute.xlu0 %6442  ;;  %v18261_v47 = vsel %vm518_vm3, %v18039_v5, %v6447_v36  ;;  %v6154_v36 = vrot.slane %v18188_v41, %v17833_v19 }
 0x57b   : > { %24285 = vst [vmem:[#allocation104_spill] sm:$0xff] %v18261_v47  ;;  %v7087_v17 = vsel %vm518_vm3, %v18042_v23, %v6443_v28  ;;  %v7508_v32 = vcombine.high %v18257_v33, %v18261_v47  ;;  %6149 = vbcast.lane.b32.xlu1 %v6143_v16, 264  ;;  %v7085_v28 = vsel %vm518_vm3, %v18037_v39, %v6432_v27  ;;  %v24336_v33 = vld [vmem:[#allocation63_spill] sm:$0xff] }
 0x57c   : > { %v7236_v18 = vcombine.high %v7083_v11, %v7087_v17  ;;  %6145 = vbcast.lane.b32.xlu0 %v6143_v16, 256  ;;  %v7235_v24 = vcombine.low %v7083_v11, %v7087_v17  ;;  %v7267_v11 = vcombine.low %v18230_v55, %v18236_v22  ;;  %v6165_v39 = vrot.slane %v18188_v41, %v17836_v25 }
 0x57d   : > { %v6458_v5 = vpop.permute.xlu1 %6457 }
 0x57e   : > { %v6454_v6 = vpop.permute.xlu0 %6453  ;;  %v18281_v23 = vsel %vm518_vm3, %v18044_v51, %v6458_v5  ;;  %v7522_v51 = vrot.slane %v7508_v32, %v24155_v14  ;;  %v7250_v27 = vrot.slane %v7236_v18, %v24155_v14  ;;  %v18306_v18 = vrot.slane %v7268_v3, %v24156_v4 }
 0x57f   : > { %24287 = vst [vmem:[#allocation106_spill] sm:$0xff] %v18281_v23  ;;  %v7089_v29 = vsel %vm518_vm3, %v18047_v45, %v6454_v6  ;;  %v7524_v48 = vcombine.high %v18277_v12, %v18281_v23  ;;  %6160 = vbcast.lane.b32.xlu1 %v6154_v36, 264  ;;  %v7243_v45 = vrot.slane %v7235_v24, %v24155_v14 }
 0x580   : > { %v7251_v16 = vcombine.low %v7085_v28, %v7089_v29  ;;  %v7252_v1 = vcombine.high %v7085_v28, %v7089_v29  ;;  %6156 = vbcast.lane.b32.xlu0 %v6154_v36, 256  ;;  %v18300_v36 = vadd.f32 %v24240_v43, %v5398_v20  ;;  %v18303_v24 = vrot.slane %v7267_v11, %v24156_v4 }
 0x581   : > { %v7538_v2 = vrot.slane %v7524_v48, %v24155_v14  ;;  %v6557_v37 = vpop.permute.xlu1 %6556  ;;  %24289 = vst [vmem:[#allocation108_spill] sm:$0xff] %v18306_v18  ;;  %v6187_v43 = vrot.slane %v18188_v41, %v17971_v15  ;;  %v24343_v18 = vld [vmem:[#allocation27_spill] sm:$0xff] }
 0x582   : > { %v7259_v17 = vrot.slane %v7251_v16, %v24155_v14  ;;  %v7266_v26 = vrot.slane %v7252_v1, %v24155_v14  ;;  %v6553_v5 = vpop.permute.xlu0 %6552  ;;  %24288 = vst [vmem:[#allocation107_spill] sm:$0xff] %v18303_v24  ;;  %v6176_v16 = vrot.slane %v18188_v41, %v17928_v35  ;;  %v24296_v41 = vcombine.high %v18233_v62, %v18239_v21 }
 0x583   : > { %v7587_v55 = vcombine.low %v7522_v51, %v7538_v2  ;;  %v7588_v22 = vcombine.high %v7522_v51, %v7538_v2  ;;  %6171 = vbcast.lane.b32.xlu1 %v6165_v39, 264  ;;  %v24294_v2 = vcombine.low %v18233_v62, %v18239_v21  ;;  %v24308_v62 = vld [vmem:[#allocation46_spill] sm:$0xff] }
 0x584   : > { %v7299_v32 = vcombine.low %v7243_v45, %v7259_v17  ;;  %v7300_v6 = vcombine.high %v7243_v45, %v7259_v17  ;;  %v7315_v28 = vcombine.low %v7250_v27, %v7266_v26  ;;  %v7316_v29 = vcombine.high %v7250_v27, %v7266_v26  ;;  %6167 = vbcast.lane.b32.xlu0 %v6165_v39, 256 }
 0x585   : > { %v6568_v48 = vpop.permute.xlu1 %6567  ;;  %v18328_v39 = vrot.slane %v24294_v2, %v24156_v4  ;;  %v18334_v45 = vrot.slane %v24296_v41, %v24156_v4  ;;  %v24298_v27 = vcombine.low %v18222_v52, %v18225_v13  ;;  %v18343_v26 = vrot.slane %v7587_v55, %v24156_v4 }
 0x586   : > { %v18313_v20 = vrot.slane %v7299_v32, %v24156_v4  ;;  %v18316_v1 = vrot.slane %v7300_v6, %v24156_v4  ;;  %v18319_v51 = vrot.slane %v7315_v28, %v24156_v4  ;;  %v18322_v11 = vrot.slane %v7316_v29, %v24156_v4  ;;  %v6564_v3 = vpop.permute.xlu0 %6563 }
 0x587   : > { %24295 = vst [vmem:[#allocation113_spill] sm:$0xff] %v18328_v39  ;;  %24297 = vst [vmem:[#allocation114_spill] sm:$0xff] %v18334_v45  ;;  %v18340_v17 = vrot.slane %v24298_v27, %v24156_v4  ;;  %6182 = vbcast.lane.b32.xlu1 %v6176_v16, 264  ;;  %v18346_v32 = vrot.slane %v7588_v22, %v24156_v4  ;;  %v24302_v2 = vcombine.high %v18222_v52, %v18225_v13 }
 0x588   : > { %24290 = vst [vmem:[#allocation109_spill] sm:$0xff] %v18313_v20  ;;  %24291 = vst [vmem:[#allocation110_spill] sm:$0xff] %v18316_v1  ;;  %6178 = vbcast.lane.b32.xlu0 %v6176_v16, 256  ;;  %v18370_v27 = vsel %vm518_vm3, %v18049_v59, %v6557_v37  ;;  %v7107_v22 = vsel %vm518_vm3, %v18052_v46, %v6553_v5  ;;  %v6286_v46 = vrot.slane %v18300_v36, %v16600_v7  ;;  %v24342_v1 = vld [vmem:[#allocation41_spill] sm:$0xff] }
 0x589   : > { %24292 = vst [vmem:[#allocation111_spill] sm:$0xff] %v18319_v51  ;;  %24293 = vst [vmem:[#allocation112_spill] sm:$0xff] %v18322_v11  ;;  %v6579_v28 = vpop.permute.xlu1 %6578  ;;  %v18366_v41 = vrot.slane %v24302_v2, %v24156_v4  ;;  %v18394_v5 = vsel %vm518_vm3, %v18054_v44, %v6568_v48  ;;  %v5653_v60 = vadd.f32 %v24343_v18, %v24342_v1 }
 0x58a   : > { %24299 = vst [vmem:[#allocation115_spill] sm:$0xff] %v18340_v17  ;;  %24300 = vst [vmem:[#allocation116_spill] sm:$0xff] %v18343_v26  ;;  %v6575_v21 = vpop.permute.xlu0 %6574  ;;  %v18374_v55 = vsel %vm518_vm3, %v18061_v57, %v6579_v28  ;;  %v7109_v57 = vsel %vm518_vm3, %v18057_v30, %v6564_v3  ;;  %v6297_v30 = vrot.slane %v18300_v36, %v17800_v31 }
 0x58b   : > { %24301 = vst [vmem:[#allocation117_spill] sm:$0xff] %v18346_v32  ;;  %24303 = vst [vmem:[#allocation118_spill] sm:$0xff] %v18366_v41  ;;  %v7111_v16 = vsel %vm518_vm3, %v18064_v61, %v6575_v21  ;;  %v8020_v52 = vcombine.high %v18370_v27, %v18374_v55  ;;  %6193 = vbcast.lane.b32.xlu1 %v6187_v43, 264  ;;  %v24313_v32 = vld [vmem:[#allocation69_spill] sm:$0xff]  ;;  %v6737_v1 = vrot.slane %v5653_v60, %v17800_v31 }
 0x58c   : > { %24304 = vst [vmem:[#allocation119_spill] sm:$0xff] %v18370_v27  ;;  %24305 = vst [vmem:[#allocation120_spill] sm:$0xff] %v18374_v55  ;;  %v7748_v59 = vcombine.high %v7107_v22, %v7111_v16  ;;  %6189 = vbcast.lane.b32.xlu0 %v6187_v43, 256  ;;  %v7747_v21 = vcombine.low %v7107_v22, %v7111_v16  ;;  %v24319_v55 = vld [vmem:[#allocation71_spill] sm:$0xff] }
 0x58d   : > { %v6590_v28 = vpop.permute.xlu1 %6589  ;;  %24306 = vst [vmem:[#allocation121_spill] sm:$0xff] %v18394_v5  ;;  %v18407_v44 = vrot.slane %v8020_v52, %v24155_v14 }
 0x58e   : > { %v6586_v2 = vpop.permute.xlu0 %6585  ;;  %v18398_v43 = vsel %vm518_vm3, %v18066_v10, %v6590_v28  ;;  %v18415_v3 = vrot.slane %v7747_v21, %v24155_v14 }
 0x58f   : > { %24307 = vst [vmem:[#allocation122_spill] sm:$0xff] %v18398_v43  ;;  %v7113_v37 = vsel %vm518_vm3, %v18069_v54, %v6586_v2  ;;  %v8036_v13 = vcombine.high %v18394_v5, %v18398_v43  ;;  %6292 = vbcast.lane.b32.xlu1 %v6286_v46, 264  ;;  %v18418_v54 = vrot.slane %v7748_v59, %v24155_v14 }
 0x590   : > { %v7763_v61 = vcombine.low %v7109_v57, %v7113_v37  ;;  %v7764_v29 = vcombine.high %v7109_v57, %v7113_v37  ;;  %6288 = vbcast.lane.b32.xlu0 %v6286_v46, 256  ;;  %v6319_v2 = vrot.slane %v18300_v36, %v17827_v63 }
 0x591   : > { %v18410_v48 = vrot.slane %v8036_v13, %v24155_v14  ;;  %v6601_v10 = vpop.permute.xlu1 %6600  ;;  %v24310_v13 = vld [vmem:[#allocation68_spill] sm:$0xff] }
 0x592   : > { %v7771_v22 = vrot.slane %v7763_v61, %v24155_v14  ;;  %v18422_v16 = vrot.slane %v7764_v29, %v24155_v14  ;;  %v6597_v52 = vpop.permute.xlu0 %6596  ;;  %v6308_v29 = vrot.slane %v18300_v36, %v17821_v34  ;;  %v18439_v6 = vsel %vm518_vm3, %v24308_v62, %v6601_v10  ;;  %v24314_v10 = vld [vmem:[#allocation31_spill] sm:$0xff] }
 0x593   : > { %6303 = vbcast.lane.b32.xlu1 %v6297_v30, 264  ;;  %24309 = vst [vmem:[#allocation46_spill] sm:$0xff] %v18439_v6  ;;  %v6330_v62 = vrot.slane %v18300_v36, %v17833_v19 }
 0x594   : > { %v7812_v57 = vcombine.high %v18415_v3, %v7771_v22  ;;  %v7827_v28 = vcombine.low %v18418_v54, %v18422_v16  ;;  %v7828_v59 = vcombine.high %v18418_v54, %v18422_v16  ;;  %6299 = vbcast.lane.b32.xlu0 %v6297_v30, 256  ;;  %v24312_v30 = vld [vmem:[#allocation44_spill] sm:$0xff] }
 0x595   : > { %v6612_v46 = vpop.permute.xlu1 %6611  ;;  %v7115_v16 = vsel %vm518_vm3, %v24312_v30, %v6597_v52  ;;  %v24316_v52 = vld [vmem:[#allocation70_spill] sm:$0xff] }
 0x596   : > { %v6608_v61 = vpop.permute.xlu0 %6607 }
 0x597   : > { %6314 = vbcast.lane.b32.xlu1 %v6308_v29, 264 }
 0x598   : > { %6310 = vbcast.lane.b32.xlu0 %v6308_v29, 256 }
 0x599   : > { %v6623_v21 = vpop.permute.xlu1 %6622 }
 0x59a   : > { %v6619_v37 = vpop.permute.xlu0 %6618  ;;  %v18443_v54 = vsel %vm518_vm3, %v24310_v13, %v6623_v21  ;;  %v18455_v13 = vsel %vm518_vm3, %v24314_v10, %v6612_v46 }
 0x59b   : > { %24311 = vst [vmem:[#allocation68_spill] sm:$0xff] %v18443_v54  ;;  %v7119_v41 = vsel %vm518_vm3, %v24313_v32, %v6619_v37  ;;  %v8052_v29 = vcombine.high %v18439_v6, %v18443_v54  ;;  %6325 = vbcast.lane.b32.xlu1 %v6319_v2, 264  ;;  %24315 = vst [vmem:[#allocation44_spill] sm:$0xff] %v18455_v13  ;;  %v24318_v32 = vld [vmem:[#allocation67_spill] sm:$0xff] }
 0x59c   : > { %v7780_v26 = vcombine.high %v7115_v16, %v7119_v41  ;;  %6321 = vbcast.lane.b32.xlu0 %v6319_v2, 256  ;;  %v7779_v21 = vcombine.low %v7115_v16, %v7119_v41  ;;  %v7117_v37 = vsel %vm518_vm3, %v24318_v32, %v6608_v61  ;;  %v7811_v41 = vcombine.low %v18415_v3, %v7771_v22  ;;  %v24320_v3 = vld [vmem:[#allocation60_spill] sm:$0xff]  ;;  %v24321_v22 = vld [vmem:[#allocation43_spill] sm:$0xff] }
 0x59d   : > { %v6634_v17 = vpop.permute.xlu1 %6633  ;;  %v8066_v46 = vrot.slane %v8052_v29, %v24155_v14  ;;  %v6341_v61 = vrot.slane %v18300_v36, %v17836_v25  ;;  %v18482_v29 = vadd.f32 %v24321_v22, %v24320_v3 }
 0x59e   : > { %v6630_v27 = vpop.permute.xlu0 %6629  ;;  %v18459_v30 = vsel %vm518_vm3, %v24316_v52, %v6634_v17 }
 0x59f   : > { %24317 = vst [vmem:[#allocation69_spill] sm:$0xff] %v18459_v30  ;;  %v7121_v2 = vsel %vm518_vm3, %v24319_v55, %v6630_v27  ;;  %v8068_v6 = vcombine.high %v18455_v13, %v18459_v30  ;;  %6336 = vbcast.lane.b32.xlu1 %v6330_v62, 264  ;;  %v7787_v55 = vrot.slane %v7779_v21, %v24155_v14 }
 0x5a0   : > { %v7795_v54 = vcombine.low %v7117_v37, %v7121_v2  ;;  %v7796_v5 = vcombine.high %v7117_v37, %v7121_v2  ;;  %6332 = vbcast.lane.b32.xlu0 %v6330_v62, 256  ;;  %v7794_v27 = vrot.slane %v7780_v26, %v24155_v14  ;;  %v6352_v37 = vrot.slane %v18300_v36, %v17928_v35 }
 0x5a1   : > { %v8082_v17 = vrot.slane %v8068_v6, %v24155_v14  ;;  %v18470_v16 = vpop.permute.xlu1 %5764  ;;  %v6539_v40 = vrot.slane %v18482_v29, %v17971_v15 }
 0x5a2   : > { %v7803_v10 = vrot.slane %v7795_v54, %v24155_v14  ;;  %v7810_v52 = vrot.slane %v7796_v5, %v24155_v14  ;;  %v18478_v62 = vpop.permute.xlu0 %5760  ;;  %v18487_v54 = vrot.slane %v7811_v41, %v24156_v4  ;;  %v18490_v5 = vrot.slane %v7812_v57, %v24156_v4 }
 0x5a3   : > { %v8131_v6 = vcombine.low %v8066_v46, %v8082_v17  ;;  %v8132_v32 = vcombine.high %v8066_v46, %v8082_v17  ;;  %6347 = vbcast.lane.b32.xlu1 %v6341_v61, 264 }
 0x5a4   : > { %v7843_v2 = vcombine.low %v7787_v55, %v7803_v10  ;;  %v7844_v21 = vcombine.high %v7787_v55, %v7803_v10  ;;  %v7859_v43 = vcombine.low %v7794_v27, %v7810_v52  ;;  %v7860_v26 = vcombine.high %v7794_v27, %v7810_v52  ;;  %6343 = vbcast.lane.b32.xlu0 %v6341_v61, 256 }
 0x5a5   : > { %24322 = vst [vmem:[#allocation31_spill] sm:$0xff] %v18487_v54  ;;  %24323 = vst [vmem:[#allocation70_spill] sm:$0xff] %v18490_v5  ;;  %v18493_v3 = vrot.slane %v8131_v6, %v24156_v4  ;;  %v18496_v46 = vrot.slane %v8132_v32, %v24156_v4  ;;  %v18498_v17 = vpop.permute.xlu1 %5775  ;;  %v18515_v27 = vrot.slane %v7827_v28, %v24156_v4 }
 0x5a6   : > { %v18501_v22 = vrot.slane %v7843_v2, %v24156_v4  ;;  %v18504_v55 = vrot.slane %v7844_v21, %v24156_v4  ;;  %v18507_v41 = vrot.slane %v7859_v43, %v24156_v4  ;;  %v18510_v57 = vrot.slane %v7860_v26, %v24156_v4  ;;  %v18512_v61 = vpop.permute.xlu0 %5771 }
 0x5a7   : > { %24324 = vst [vmem:[#allocation67_spill] sm:$0xff] %v18493_v3  ;;  %24325 = vst [vmem:[#allocation71_spill] sm:$0xff] %v18496_v46  ;;  %v18518_v10 = vrot.slane %v7828_v59, %v24156_v4  ;;  %v24332_v52 = vcombine.low %v18407_v44, %v18410_v48  ;;  %6358 = vbcast.lane.b32.xlu1 %v6352_v37, 264  ;;  %v6363_v43 = vrot.slane %v18300_v36, %v17971_v15 }
 0x5a8   : > { %24326 = vst [vmem:[#allocation60_spill] sm:$0xff] %v18501_v22  ;;  %24327 = vst [vmem:[#allocation43_spill] sm:$0xff] %v18504_v55  ;;  %v24334_v32 = vcombine.high %v18407_v44, %v18410_v48  ;;  %6354 = vbcast.lane.b32.xlu0 %v6352_v37, 256  ;;  %v6462_v37 = vrot.slane %v18482_v29, %v16600_v7  ;;  %v6473_v21 = vrot.slane %v18482_v29, %v17800_v31 }
 0x5a9   : > { %24328 = vst [vmem:[#allocation123_spill] sm:$0xff] %v18507_v41  ;;  %24329 = vst [vmem:[#allocation124_spill] sm:$0xff] %v18510_v57  ;;  %v18524_v6 = vrot.slane %v24332_v52, %v24156_v4  ;;  %v18540_v26 = vpop.permute.xlu1 %5786 }
 0x5aa   : > { %24330 = vst [vmem:[#allocation125_spill] sm:$0xff] %v18515_v27  ;;  %24331 = vst [vmem:[#allocation126_spill] sm:$0xff] %v18518_v10  ;;  %v18532_v2 = vrot.slane %v24334_v32, %v24156_v4  ;;  %v18550_v52 = vpop.permute.xlu0 %5782 }
 0x5ab   : > { %24333 = vst [vmem:[#allocation127_spill] sm:$0xff] %v18524_v6  ;;  %6369 = vbcast.lane.b32.xlu1 %v6363_v43, 264 }
 0x5ac   : > { %24335 = vst [vmem:[#allocation128_spill] sm:$0xff] %v18532_v2  ;;  %6365 = vbcast.lane.b32.xlu0 %v6363_v43, 256  ;;  %v6484_v43 = vrot.slane %v18482_v29, %v17821_v34 }
 0x5ad   : > { %v18560_v48 = vpop.permute.xlu1 %5797 }
 0x5ae   : > { %v18564_v59 = vpop.permute.xlu0 %5793 }
 0x5af   : > { %6468 = vbcast.lane.b32.xlu1 %v6462_v37, 264 }
 0x5b0   : > { %6464 = vbcast.lane.b32.xlu0 %v6462_v37, 256  ;;  %v6495_v37 = vrot.slane %v18482_v29, %v17827_v63 }
 0x5b1   : > { %v18566_v32 = vpop.permute.xlu1 %5808 }
 0x5b2   : > { %v18570_v36 = vpop.permute.xlu0 %5804 }
 0x5b3   : > { %6479 = vbcast.lane.b32.xlu1 %v6473_v21, 264 }
 0x5b4   : > { %6475 = vbcast.lane.b32.xlu0 %v6473_v21, 256  ;;  %v6506_v21 = vrot.slane %v18482_v29, %v17833_v19 }
 0x5b5   : > { %v18572_v44 = vpop.permute.xlu1 %5819 }
 0x5b6   : > { %v18576_v28 = vpop.permute.xlu0 %5815 }
 0x5b7   : > { %6490 = vbcast.lane.b32.xlu1 %v6484_v43, 264 }
 0x5b8   : > { %6486 = vbcast.lane.b32.xlu0 %v6484_v43, 256  ;;  %v6517_v43 = vrot.slane %v18482_v29, %v17836_v25 }
 0x5b9   : > { %v18578_v46 = vpop.permute.xlu1 %5830 }
 0x5ba   : > { %v18582_v2 = vpop.permute.xlu0 %5826 }
 0x5bb   : > { %6501 = vbcast.lane.b32.xlu1 %v6495_v37, 264 }
 0x5bc   : > { %6497 = vbcast.lane.b32.xlu0 %v6495_v37, 256  ;;  %v6528_v37 = vrot.slane %v18482_v29, %v17928_v35 }
 0x5bd   : > { %v18584_v3 = vpop.permute.xlu1 %5841 }
 0x5be   : > { %v18588_v6 = vpop.permute.xlu0 %5837 }
 0x5bf   : > { %6512 = vbcast.lane.b32.xlu1 %v6506_v21, 264 }
 0x5c0   : > { %6508 = vbcast.lane.b32.xlu0 %v6506_v21, 256  ;;  %v24337_v21 = vld [vmem:[#allocation40_spill] sm:$0xff] }
 0x5c1   : > { %v18590_v13 = vpop.permute.xlu1 %5940  ;;  %v5646_v47 = vadd.f32 %v24337_v21, %v24336_v33 }
 0x5c2   : > { %v18594_v30 = vpop.permute.xlu0 %5936 }
 0x5c3   : > { %6523 = vbcast.lane.b32.xlu1 %v6517_v43, 264  ;;  %v6638_v23 = vrot.slane %v5646_v47, %v16600_v7  ;;  %v6649_v33 = vrot.slane %v5646_v47, %v17800_v31  ;;  %v6715_v49 = vrot.slane %v5646_v47, %v17971_v15 }
 0x5c4   : > { %6519 = vbcast.lane.b32.xlu0 %v6517_v43, 256 }
 0x5c5   : > { %v18596_v38 = vpop.permute.xlu1 %5951 }
 0x5c6   : > { %v18600_v0 = vpop.permute.xlu0 %5947 }
 0x5c7   : > { %6534 = vbcast.lane.b32.xlu1 %v6528_v37, 264 }
 0x5c8   : > { %6530 = vbcast.lane.b32.xlu0 %v6528_v37, 256 }
 0x5c9   : > { %v18604_v9 = vpop.permute.xlu1 %5962 }
 0x5ca   : > { %v18608_v12 = vpop.permute.xlu0 %5958 }
 0x5cb   : > { %6545 = vbcast.lane.b32.xlu1 %v6539_v40, 264 }
 0x5cc   : > { %6541 = vbcast.lane.b32.xlu0 %v6539_v40, 256  ;;  %v6660_v40 = vrot.slane %v5646_v47, %v17821_v34 }
 0x5cd   : > { %v18610_v43 = vpop.permute.xlu1 %5973 }
 0x5ce   : > { %v18613_v57 = vpop.permute.xlu0 %5969 }
 0x5cf   : > { %6644 = vbcast.lane.b32.xlu1 %v6638_v23, 264 }
 0x5d0   : > { %6640 = vbcast.lane.b32.xlu0 %v6638_v23, 256  ;;  %v6671_v23 = vrot.slane %v5646_v47, %v17827_v63 }
 0x5d1   : > { %v18615_v37 = vpop.permute.xlu1 %5984 }
 0x5d2   : > { %v18618_v21 = vpop.permute.xlu0 %5980 }
 0x5d3   : > { %6655 = vbcast.lane.b32.xlu1 %v6649_v33, 264 }
 0x5d4   : > { %6651 = vbcast.lane.b32.xlu0 %v6649_v33, 256  ;;  %v6682_v33 = vrot.slane %v5646_v47, %v17833_v19 }
 0x5d5   : > { %v18620_v29 = vpop.permute.xlu1 %5995 }
 0x5d6   : > { %v18623_v10 = vpop.permute.xlu0 %5991 }
 0x5d7   : > { %6666 = vbcast.lane.b32.xlu1 %v6660_v40, 264 }
 0x5d8   : > { %6662 = vbcast.lane.b32.xlu0 %v6660_v40, 256  ;;  %v6693_v40 = vrot.slane %v5646_v47, %v17836_v25 }
 0x5d9   : > { %v18625_v11 = vpop.permute.xlu1 %6006 }
 0x5da   : > { %v18628_v45 = vpop.permute.xlu0 %6002 }
 0x5db   : > { %6677 = vbcast.lane.b32.xlu1 %v6671_v23, 264 }
 0x5dc   : > { %6673 = vbcast.lane.b32.xlu0 %v6671_v23, 256  ;;  %v6704_v23 = vrot.slane %v5646_v47, %v17928_v35 }
 0x5dd   : > { %v18630_v41 = vpop.permute.xlu1 %6017 }
 0x5de   : > { %v18633_v27 = vpop.permute.xlu0 %6013 }
 0x5df   : > { %6688 = vbcast.lane.b32.xlu1 %v6682_v33, 264 }
 0x5e0   : > { %6684 = vbcast.lane.b32.xlu0 %v6682_v33, 256 }
 0x5e1   : > { %v18635_v51 = vpop.permute.xlu1 %6116 }
 0x5e2   : > { %24338 = vst [vmem:[#allocation63_spill] sm:$0xff] %v18635_v51  ;;  %v18638_v39 = vpop.permute.xlu0 %6112 }
 0x5e3   : > { %24339 = vst [vmem:[#allocation40_spill] sm:$0xff] %v18638_v39  ;;  %6699 = vbcast.lane.b32.xlu1 %v6693_v40, 264 }
 0x5e4   : > { %6695 = vbcast.lane.b32.xlu0 %v6693_v40, 256 }
 0x5e5   : > { %v18640_v55 = vpop.permute.xlu1 %6127 }
 0x5e6   : > { %24340 = vst [vmem:[#allocation129_spill] sm:$0xff] %v18640_v55  ;;  %v18643_v5 = vpop.permute.xlu0 %6123  ;;  %v6726_v55 = vrot.slane %v5653_v60, %v16600_v7 }
 0x5e7   : > { %24341 = vst [vmem:[#allocation130_spill] sm:$0xff] %v18643_v5  ;;  %6710 = vbcast.lane.b32.xlu1 %v6704_v23, 264 }
 0x5e8   : > { %6706 = vbcast.lane.b32.xlu0 %v6704_v23, 256 }
 0x5e9   : > { %v18647_v33 = vpop.permute.xlu1 %6138 }
 0x5ea   : > { %24344 = vst [vmem:[#allocation41_spill] sm:$0xff] %v18647_v33  ;;  %v18650_v8 = vpop.permute.xlu0 %6134 }
 0x5eb   : > { %24345 = vst [vmem:[#allocation27_spill] sm:$0xff] %v18650_v8  ;;  %6721 = vbcast.lane.b32.xlu1 %v6715_v49, 264 }
 0x5ec   : > { %6717 = vbcast.lane.b32.xlu0 %v6715_v49, 256  ;;  %v6748_v49 = vrot.slane %v5653_v60, %v17821_v34 }
 0x5ed   : > { %v18652_v40 = vpop.permute.xlu1 %6149 }
 0x5ee   : > { %24346 = vst [vmem:[#allocation131_spill] sm:$0xff] %v18652_v40  ;;  %v18655_v39 = vpop.permute.xlu0 %6145 }
 0x5ef   : > { %24347 = vst [vmem:[#allocation132_spill] sm:$0xff] %v18655_v39  ;;  %6732 = vbcast.lane.b32.xlu1 %v6726_v55, 264 }
 0x5f0   : > { %6728 = vbcast.lane.b32.xlu0 %v6726_v55, 256  ;;  %v6759_v55 = vrot.slane %v5653_v60, %v17827_v63 }
 0x5f1   : > { %v18657_v23 = vpop.permute.xlu1 %6160 }
 0x5f2   : > { %24348 = vst [vmem:[#allocation133_spill] sm:$0xff] %v18657_v23  ;;  %v18660_v5 = vpop.permute.xlu0 %6156 }
 0x5f3   : > { %24349 = vst [vmem:[#allocation134_spill] sm:$0xff] %v18660_v5  ;;  %6743 = vbcast.lane.b32.xlu1 %v6737_v1, 264 }
 0x5f4   : > { %6739 = vbcast.lane.b32.xlu0 %v6737_v1, 256  ;;  %v6770_v1 = vrot.slane %v5653_v60, %v17833_v19 }
 0x5f5   : > { %v18662_v47 = vpop.permute.xlu1 %6171 }
 0x5f6   : > { %24350 = vst [vmem:[#allocation135_spill] sm:$0xff] %v18662_v47  ;;  %v18665_v8 = vpop.permute.xlu0 %6167 }
 0x5f7   : > { %24351 = vst [vmem:[#allocation136_spill] sm:$0xff] %v18665_v8  ;;  %6754 = vbcast.lane.b32.xlu1 %v6748_v49, 264 }
 0x5f8   : > { %6750 = vbcast.lane.b32.xlu0 %v6748_v49, 256  ;;  %v6781_v49 = vrot.slane %v5653_v60, %v17836_v25 }
 0x5f9   : > { %v18667_v40 = vpop.permute.xlu1 %6182 }
 0x5fa   : > { %24352 = vst [vmem:[#allocation137_spill] sm:$0xff] %v18667_v40  ;;  %v18670_v39 = vpop.permute.xlu0 %6178 }
 0x5fb   : > { %24353 = vst [vmem:[#allocation138_spill] sm:$0xff] %v18670_v39  ;;  %6765 = vbcast.lane.b32.xlu1 %v6759_v55, 264 }
 0x5fc   : > { %6761 = vbcast.lane.b32.xlu0 %v6759_v55, 256  ;;  %v6792_v55 = vrot.slane %v5653_v60, %v17928_v35 }
 0x5fd   : > { %v18672_v23 = vpop.permute.xlu1 %6193 }
 0x5fe   : > { %24354 = vst [vmem:[#allocation139_spill] sm:$0xff] %v18672_v23  ;;  %v18675_v5 = vpop.permute.xlu0 %6189  ;;  %v24360_v23 = vld [vmem:[#allocation25_spill] sm:$0xff] }
 0x5ff   : > { %24355 = vst [vmem:[#allocation140_spill] sm:$0xff] %v18675_v5  ;;  %6776 = vbcast.lane.b32.xlu1 %v6770_v1, 264  ;;  %v5654_v5 = vadd.f32 %v24343_v18, %v24360_v23 }
 0x600   : > { %6772 = vbcast.lane.b32.xlu0 %v6770_v1, 256 }
 0x601   : > { %v18677_v47 = vpop.permute.xlu1 %6292  ;;  %v6825_v18 = vrot.slane %v5654_v5, %v17800_v31 }
 0x602   : > { %24356 = vst [vmem:[#allocation141_spill] sm:$0xff] %v18677_v47  ;;  %v18680_v8 = vpop.permute.xlu0 %6288  ;;  %v6803_v47 = vrot.slane %v5653_v60, %v17971_v15 }
 0x603   : > { %24357 = vst [vmem:[#allocation142_spill] sm:$0xff] %v18680_v8  ;;  %6787 = vbcast.lane.b32.xlu1 %v6781_v49, 264  ;;  %v6814_v8 = vrot.slane %v5654_v5, %v16600_v7 }
 0x604   : > { %6783 = vbcast.lane.b32.xlu0 %v6781_v49, 256 }
 0x605   : > { %v18682_v40 = vpop.permute.xlu1 %6303 }
 0x606   : > { %24358 = vst [vmem:[#allocation143_spill] sm:$0xff] %v18682_v40  ;;  %v18685_v39 = vpop.permute.xlu0 %6299 }
 0x607   : > { %24359 = vst [vmem:[#allocation144_spill] sm:$0xff] %v18685_v39  ;;  %6798 = vbcast.lane.b32.xlu1 %v6792_v55, 264 }
 0x608   : > { %6794 = vbcast.lane.b32.xlu0 %v6792_v55, 256 }
 0x609   : > { %v18689_v1 = vpop.permute.xlu1 %6314 }
 0x60a   : > { %24361 = vst [vmem:[#allocation25_spill] sm:$0xff] %v18689_v1  ;;  %v18692_v33 = vpop.permute.xlu0 %6310 }
 0x60b   : > { %24362 = vst [vmem:[#allocation145_spill] sm:$0xff] %v18692_v33  ;;  %6809 = vbcast.lane.b32.xlu1 %v6803_v47, 264 }
 0x60c   : > { %6805 = vbcast.lane.b32.xlu0 %v6803_v47, 256  ;;  %v6836_v47 = vrot.slane %v5654_v5, %v17821_v34 }
 0x60d   : > { %v18694_v49 = vpop.permute.xlu1 %6325 }
 0x60e   : > { %24363 = vst [vmem:[#allocation146_spill] sm:$0xff] %v18694_v49  ;;  %v18697_v40 = vpop.permute.xlu0 %6321  ;;  %v6880_v49 = vrot.slane %v5654_v5, %v17928_v35 }
 0x60f   : > { %24364 = vst [vmem:[#allocation147_spill] sm:$0xff] %v18697_v40  ;;  %6820 = vbcast.lane.b32.xlu1 %v6814_v8, 264 }
 0x610   : > { %6816 = vbcast.lane.b32.xlu0 %v6814_v8, 256  ;;  %v6847_v8 = vrot.slane %v5654_v5, %v17827_v63 }
 0x611   : > { %v18699_v55 = vpop.permute.xlu1 %6336 }
 0x612   : > { %24365 = vst [vmem:[#allocation148_spill] sm:$0xff] %v18699_v55  ;;  %v18702_v23 = vpop.permute.xlu0 %6332 }
 0x613   : > { %24366 = vst [vmem:[#allocation149_spill] sm:$0xff] %v18702_v23  ;;  %6831 = vbcast.lane.b32.xlu1 %v6825_v18, 264 }
 0x614   : > { %6827 = vbcast.lane.b32.xlu0 %v6825_v18, 256  ;;  %v6858_v18 = vrot.slane %v5654_v5, %v17833_v19 }
 0x615   : > { %v18704_v60 = vpop.permute.xlu1 %6347 }
 0x616   : > { %24367 = vst [vmem:[#allocation150_spill] sm:$0xff] %v18704_v60  ;;  %v18707_v33 = vpop.permute.xlu0 %6343 }
 0x617   : > { %24368 = vst [vmem:[#allocation151_spill] sm:$0xff] %v18707_v33  ;;  %6842 = vbcast.lane.b32.xlu1 %v6836_v47, 264  ;;  %v6869_v33 = vrot.slane %v5654_v5, %v17836_v25 }
 0x618   : > { %6838 = vbcast.lane.b32.xlu0 %v6836_v47, 256 }
 0x619   : > { %v18709_v39 = vpop.permute.xlu1 %6358 }
 0x61a   : > { %24369 = vst [vmem:[#allocation152_spill] sm:$0xff] %v18709_v39  ;;  %v18712_v40 = vpop.permute.xlu0 %6354 }
 0x61b   : > { %24370 = vst [vmem:[#allocation153_spill] sm:$0xff] %v18712_v40  ;;  %6853 = vbcast.lane.b32.xlu1 %v6847_v8, 264 }
 0x61c   : > { %6849 = vbcast.lane.b32.xlu0 %v6847_v8, 256  ;;  %v24373_v8 = vld [vmem:[#allocation34_spill] sm:$0xff] }
 0x61d   : > { %v18714_v55 = vpop.permute.xlu1 %6369 }
 0x61e   : > { %24371 = vst [vmem:[#allocation154_spill] sm:$0xff] %v18714_v55  ;;  %v18717_v23 = vpop.permute.xlu0 %6365  ;;  %v24374_v55 = vld [vmem:[#allocation32_spill] sm:$0xff] }
 0x61f   : > { %24372 = vst [vmem:[#allocation155_spill] sm:$0xff] %v18717_v23  ;;  %6864 = vbcast.lane.b32.xlu1 %v6858_v18, 264  ;;  %v18723_v1 = vadd.f32 %v24374_v55, %v24373_v8  ;;  %v6891_v23 = vrot.slane %v5654_v5, %v17971_v15 }
 0x620   : > { %6860 = vbcast.lane.b32.xlu0 %v6858_v18, 256 }
 0x621   : > { %v6469_v60 = vpop.permute.xlu1 %6468 }
 0x622   : > { %v6465_v47 = vpop.permute.xlu0 %6464  ;;  %v18728_v18 = vsel %vm518_vm3, %v18470_v16, %v6469_v60  ;;  %v6902_v16 = vrot.slane %v18723_v1, %v16600_v7 }
 0x623   : > { %6875 = vbcast.lane.b32.xlu1 %v6869_v33, 264  ;;  %24375 = vst [vmem:[#allocation34_spill] sm:$0xff] %v18728_v18  ;;  %v7091_v22 = vsel %vm518_vm3, %v18478_v62, %v6465_v47 }
 0x624   : > { %6871 = vbcast.lane.b32.xlu0 %v6869_v33, 256 }
 0x625   : > { %v6480_v39 = vpop.permute.xlu1 %6479 }
 0x626   : > { %v6476_v40 = vpop.permute.xlu0 %6475 }
 0x627   : > { %6886 = vbcast.lane.b32.xlu1 %v6880_v49, 264 }
 0x628   : > { %6882 = vbcast.lane.b32.xlu0 %v6880_v49, 256 }
 0x629   : > { %v6491_v51 = vpop.permute.xlu1 %6490 }
 0x62a   : > { %v6487_v54 = vpop.permute.xlu0 %6486  ;;  %v18732_v33 = vsel %vm518_vm3, %v18540_v26, %v6491_v51  ;;  %v18744_v51 = vsel %vm518_vm3, %v18498_v17, %v6480_v39 }
 0x62b   : > { %24376 = vst [vmem:[#allocation32_spill] sm:$0xff] %v18732_v33  ;;  %v7095_v49 = vsel %vm518_vm3, %v18550_v52, %v6487_v54  ;;  %v7612_v8 = vcombine.high %v18728_v18, %v18732_v33  ;;  %6897 = vbcast.lane.b32.xlu1 %v6891_v23, 264  ;;  %24377 = vst [vmem:[#allocation156_spill] sm:$0xff] %v18744_v51  ;;  %v7093_v54 = vsel %vm518_vm3, %v18512_v61, %v6476_v40 }
 0x62c   : > { %v7340_v5 = vcombine.high %v7091_v22, %v7095_v49  ;;  %6893 = vbcast.lane.b32.xlu0 %v6891_v23, 256  ;;  %v7339_v26 = vcombine.low %v7091_v22, %v7095_v49  ;;  %v6913_v22 = vrot.slane %v18723_v1, %v17800_v31 }
 0x62d   : > { %v6502_v42 = vpop.permute.xlu1 %6501  ;;  %v18757_v39 = vrot.slane %v7612_v8, %v24155_v14 }
 0x62e   : > { %v6498_v60 = vpop.permute.xlu0 %6497  ;;  %v18748_v62 = vsel %vm518_vm3, %v18560_v48, %v6502_v42  ;;  %v7347_v61 = vrot.slane %v7339_v26, %v24155_v14 }
 0x62f   : > { %24378 = vst [vmem:[#allocation157_spill] sm:$0xff] %v18748_v62  ;;  %v7097_v52 = vsel %vm518_vm3, %v18564_v59, %v6498_v60  ;;  %v7628_v23 = vcombine.high %v18744_v51, %v18748_v62  ;;  %6908 = vbcast.lane.b32.xlu1 %v6902_v16, 264  ;;  %v18766_v59 = vrot.slane %v7340_v5, %v24155_v14  ;;  %v24486_v62 = vld [vmem:[#allocation93_spill] sm:$0xff] }
 0x630   : > { %v7355_v47 = vcombine.low %v7093_v54, %v7097_v52  ;;  %v7356_v18 = vcombine.high %v7093_v54, %v7097_v52  ;;  %6904 = vbcast.lane.b32.xlu0 %v6902_v16, 256 }
 0x631   : > { %v18760_v17 = vrot.slane %v7628_v23, %v24155_v14  ;;  %v6513_v42 = vpop.permute.xlu1 %6512 }
 0x632   : > { %v7363_v48 = vrot.slane %v7355_v47, %v24155_v14  ;;  %v18770_v40 = vrot.slane %v7356_v18, %v24155_v14  ;;  %v6509_v49 = vpop.permute.xlu0 %6508  ;;  %v6924_v18 = vrot.slane %v18723_v1, %v17821_v34  ;;  %v6935_v47 = vrot.slane %v18723_v1, %v17827_v63 }
 0x633   : > { %6919 = vbcast.lane.b32.xlu1 %v6913_v22, 264  ;;  %v18786_v16 = vsel %vm518_vm3, %v18566_v32, %v6513_v42  ;;  %v6946_v32 = vrot.slane %v18723_v1, %v17833_v19 }
 0x634   : > { %v7404_v60 = vcombine.high %v7347_v61, %v7363_v48  ;;  %v7419_v26 = vcombine.low %v18766_v59, %v18770_v40  ;;  %v7420_v5 = vcombine.high %v18766_v59, %v18770_v40  ;;  %6915 = vbcast.lane.b32.xlu0 %v6913_v22, 256  ;;  %24379 = vst [vmem:[#allocation158_spill] sm:$0xff] %v18786_v16 }
 0x635   : > { %v6524_v54 = vpop.permute.xlu1 %6523  ;;  %v7099_v22 = vsel %vm518_vm3, %v18570_v36, %v6509_v49 }
 0x636   : > { %v6520_v52 = vpop.permute.xlu0 %6519 }
 0x637   : > { %6930 = vbcast.lane.b32.xlu1 %v6924_v18, 264 }
 0x638   : > { %6926 = vbcast.lane.b32.xlu0 %v6924_v18, 256 }
 0x639   : > { %v6535_v23 = vpop.permute.xlu1 %6534 }
 0x63a   : > { %v6531_v8 = vpop.permute.xlu0 %6530  ;;  %v18790_v59 = vsel %vm518_vm3, %v18578_v46, %v6535_v23  ;;  %v18802_v46 = vsel %vm518_vm3, %v18572_v44, %v6524_v54  ;;  %v7403_v44 = vcombine.low %v7347_v61, %v7363_v48 }
 0x63b   : > { %24380 = vst [vmem:[#allocation159_spill] sm:$0xff] %v18790_v59  ;;  %v7103_v40 = vsel %vm518_vm3, %v18582_v2, %v6531_v8  ;;  %v7644_v18 = vcombine.high %v18786_v16, %v18790_v59  ;;  %6941 = vbcast.lane.b32.xlu1 %v6935_v47, 264  ;;  %24381 = vst [vmem:[#allocation160_spill] sm:$0xff] %v18802_v46  ;;  %v7101_v2 = vsel %vm518_vm3, %v18576_v28, %v6520_v52 }
 0x63c   : > { %v7372_v33 = vcombine.high %v7099_v22, %v7103_v40  ;;  %6937 = vbcast.lane.b32.xlu0 %v6935_v47, 256  ;;  %v7371_v42 = vcombine.low %v7099_v22, %v7103_v40 }
 0x63d   : > { %v6546_v51 = vpop.permute.xlu1 %6545  ;;  %v7658_v54 = vrot.slane %v7644_v18, %v24155_v14 }
 0x63e   : > { %v6542_v23 = vpop.permute.xlu0 %6541  ;;  %v18806_v36 = vsel %vm518_vm3, %v18584_v3, %v6546_v51  ;;  %v6957_v51 = vrot.slane %v18723_v1, %v17836_v25  ;;  %v7379_v28 = vrot.slane %v7371_v42, %v24155_v14  ;;  %v18827_v42 = vrot.slane %v7403_v44, %v24156_v4 }
 0x63f   : > { %24382 = vst [vmem:[#allocation161_spill] sm:$0xff] %v18806_v36  ;;  %v7105_v49 = vsel %vm518_vm3, %v18588_v6, %v6542_v23  ;;  %v7660_v8 = vcombine.high %v18802_v46, %v18806_v36  ;;  %6952 = vbcast.lane.b32.xlu1 %v6946_v32, 264  ;;  %v7386_v6 = vrot.slane %v7372_v33, %v24155_v14  ;;  %v24490_v36 = vld [vmem:[#allocation94_spill] sm:$0xff] }
 0x640   : > { %v7387_v47 = vcombine.low %v7101_v2, %v7105_v49  ;;  %v7388_v16 = vcombine.high %v7101_v2, %v7105_v49  ;;  %6948 = vbcast.lane.b32.xlu0 %v6946_v32, 256  ;;  %v24383_v2 = vld [vmem:[#allocation52_spill] sm:$0xff]  ;;  %v18830_v33 = vrot.slane %v7404_v60, %v24156_v4 }
 0x641   : > { %v7674_v22 = vrot.slane %v7660_v8, %v24155_v14  ;;  %v6645_v3 = vpop.permute.xlu1 %6644  ;;  %v18824_v61 = vadd.f32 %v24374_v55, %v24383_v2  ;;  %24384 = vst [vmem:[#allocation52_spill] sm:$0xff] %v18827_v42  ;;  %v6979_v55 = vrot.slane %v18723_v1, %v17971_v15 }
 0x642   : > { %v7395_v52 = vrot.slane %v7387_v47, %v24155_v14  ;;  %v7402_v40 = vrot.slane %v7388_v16, %v24155_v14  ;;  %v6641_v23 = vpop.permute.xlu0 %6640  ;;  %v6968_v47 = vrot.slane %v18723_v1, %v17928_v35  ;;  %v24388_v1 = vcombine.low %v18757_v39, %v18760_v17 }
 0x643   : > { %v7723_v48 = vcombine.low %v7658_v54, %v7674_v22  ;;  %v7724_v18 = vcombine.high %v7658_v54, %v7674_v22  ;;  %6963 = vbcast.lane.b32.xlu1 %v6957_v51, 264 }
 0x644   : > { %v7435_v32 = vcombine.low %v7379_v28, %v7395_v52  ;;  %v7436_v49 = vcombine.high %v7379_v28, %v7395_v52  ;;  %v7451_v8 = vcombine.low %v7386_v6, %v7402_v40  ;;  %v7452_v59 = vcombine.high %v7386_v6, %v7402_v40  ;;  %6959 = vbcast.lane.b32.xlu0 %v6957_v51, 256 }
 0x645   : > { %v6656_v16 = vpop.permute.xlu1 %6655  ;;  %v18849_v28 = vrot.slane %v7419_v26, %v24156_v4  ;;  %v18852_v6 = vrot.slane %v7420_v5, %v24156_v4  ;;  %v18858_v52 = vrot.slane %v24388_v1, %v24156_v4  ;;  %v18861_v40 = vrot.slane %v7723_v48, %v24156_v4 }
 0x646   : > { %v18837_v54 = vrot.slane %v7435_v32, %v24156_v4  ;;  %v18840_v22 = vrot.slane %v7436_v49, %v24156_v4  ;;  %v18843_v51 = vrot.slane %v7451_v8, %v24156_v4  ;;  %v18846_v44 = vrot.slane %v7452_v59, %v24156_v4  ;;  %v6652_v60 = vpop.permute.xlu0 %6651 }
 0x647   : > { %24387 = vst [vmem:[#allocation164_spill] sm:$0xff] %v18852_v6  ;;  %24389 = vst [vmem:[#allocation165_spill] sm:$0xff] %v18858_v52  ;;  %6974 = vbcast.lane.b32.xlu1 %v6968_v47, 264  ;;  %v18864_v59 = vrot.slane %v7724_v18, %v24156_v4  ;;  %v18888_v26 = vsel %vm518_vm3, %v18590_v13, %v6645_v3  ;;  %v7123_v18 = vsel %vm518_vm3, %v18594_v30, %v6641_v23 }
 0x648   : > { %24385 = vst [vmem:[#allocation162_spill] sm:$0xff] %v18837_v54  ;;  %24386 = vst [vmem:[#allocation163_spill] sm:$0xff] %v18846_v44  ;;  %6970 = vbcast.lane.b32.xlu0 %v6968_v47, 256  ;;  %v24392_v47 = vcombine.high %v18757_v39, %v18760_v17  ;;  %v6990_v30 = vrot.slane %v18824_v61, %v16600_v7  ;;  %v18912_v23 = vsel %vm518_vm3, %v18596_v38, %v6656_v16 }
 0x649   : > { %24390 = vst [vmem:[#allocation166_spill] sm:$0xff] %v18861_v40  ;;  %24391 = vst [vmem:[#allocation167_spill] sm:$0xff] %v18864_v59  ;;  %v6667_v32 = vpop.permute.xlu1 %6666  ;;  %v24447_v40 = vld [vmem:[#allocation132_spill] sm:$0xff] }
 0x64a   : > { %v18884_v1 = vrot.slane %v24392_v47, %v24156_v4  ;;  %24394 = vst [vmem:[#allocation169_spill] sm:$0xff] %v18888_v26  ;;  %v6663_v49 = vpop.permute.xlu0 %6662  ;;  %v18892_v48 = vsel %vm518_vm3, %v18604_v9, %v6667_v32  ;;  %24396 = vst [vmem:[#allocation171_spill] sm:$0xff] %v18912_v23  ;;  %v7125_v9 = vsel %vm518_vm3, %v18600_v0, %v6652_v60 }
 0x64b   : > { %24395 = vst [vmem:[#allocation170_spill] sm:$0xff] %v18892_v48  ;;  %v7127_v8 = vsel %vm518_vm3, %v18608_v12, %v6663_v49  ;;  %v8156_v39 = vcombine.high %v18888_v26, %v18892_v48  ;;  %6985 = vbcast.lane.b32.xlu1 %v6979_v55, 264  ;;  %v7001_v0 = vrot.slane %v18824_v61, %v17800_v31  ;;  %v24426_v31 = vld [vmem:[#allocation81_spill] sm:$0xff]  ;;  %v24456_v48 = vld [vmem:[#allocation139_spill] sm:$0xff] }
 0x64c   : > { %24393 = vst [vmem:[#allocation168_spill] sm:$0xff] %v18884_v1  ;;  %v7884_v13 = vcombine.high %v7123_v18, %v7127_v8  ;;  %6981 = vbcast.lane.b32.xlu0 %v6979_v55, 256  ;;  %v7883_v49 = vcombine.low %v7123_v18, %v7127_v8 }
 0x64d   : > { %v6678_v32 = vpop.permute.xlu1 %6677  ;;  %v18925_v38 = vrot.slane %v8156_v39, %v24155_v14 }
 0x64e   : > { %v6674_v47 = vpop.permute.xlu0 %6673  ;;  %v18916_v55 = vsel %vm518_vm3, %v18610_v43, %v6678_v32  ;;  %v7891_v60 = vrot.slane %v7883_v49, %v24155_v14 }
 0x64f   : > { %24397 = vst [vmem:[#allocation172_spill] sm:$0xff] %v18916_v55  ;;  %v7129_v3 = vsel %vm518_vm3, %v18613_v57, %v6674_v47  ;;  %v8172_v17 = vcombine.high %v18912_v23, %v18916_v55  ;;  %6996 = vbcast.lane.b32.xlu1 %v6990_v30, 264  ;;  %v18934_v57 = vrot.slane %v7884_v13, %v24155_v14  ;;  %v24479_v55 = vld [vmem:[#allocation91_spill] sm:$0xff] }
 0x650   : > { %v7899_v12 = vcombine.low %v7125_v9, %v7129_v3  ;;  %v7900_v2 = vcombine.high %v7125_v9, %v7129_v3  ;;  %6992 = vbcast.lane.b32.xlu0 %v6990_v30, 256  ;;  %v7023_v47 = vrot.slane %v18824_v61, %v17827_v63 }
 0x651   : > { %v18928_v16 = vrot.slane %v8172_v17, %v24155_v14  ;;  %v6689_v43 = vpop.permute.xlu1 %6688 }
 0x652   : > { %v7907_v18 = vrot.slane %v7899_v12, %v24155_v14  ;;  %v18938_v8 = vrot.slane %v7900_v2, %v24155_v14  ;;  %v6685_v3 = vpop.permute.xlu0 %6684  ;;  %v7012_v2 = vrot.slane %v18824_v61, %v17821_v34  ;;  %v18954_v5 = vsel %vm518_vm3, %v18615_v37, %v6689_v43 }
 0x653   : > { %7007 = vbcast.lane.b32.xlu1 %v7001_v0, 264  ;;  %24398 = vst [vmem:[#allocation173_spill] sm:$0xff] %v18954_v5  ;;  %v7034_v37 = vrot.slane %v18824_v61, %v17833_v19 }
 0x654   : > { %v7948_v9 = vcombine.high %v7891_v60, %v7907_v18  ;;  %v7963_v32 = vcombine.low %v18934_v57, %v18938_v8  ;;  %v7964_v13 = vcombine.high %v18934_v57, %v18938_v8  ;;  %7003 = vbcast.lane.b32.xlu0 %v7001_v0, 256  ;;  %v7131_v0 = vsel %vm518_vm3, %v18618_v21, %v6685_v3 }
 0x655   : > { %v6700_v30 = vpop.permute.xlu1 %6699 }
 0x656   : > { %v6696_v12 = vpop.permute.xlu0 %6695 }
 0x657   : > { %7018 = vbcast.lane.b32.xlu1 %v7012_v2, 264 }
 0x658   : > { %7014 = vbcast.lane.b32.xlu0 %v7012_v2, 256 }
 0x659   : > { %v6711_v49 = vpop.permute.xlu1 %6710 }
 0x65a   : > { %v6707_v17 = vpop.permute.xlu0 %6706  ;;  %v18958_v57 = vsel %vm518_vm3, %v18625_v11, %v6711_v49  ;;  %v18970_v11 = vsel %vm518_vm3, %v18620_v29, %v6700_v30  ;;  %v7947_v29 = vcombine.low %v7891_v60, %v7907_v18 }
 0x65b   : > { %24399 = vst [vmem:[#allocation174_spill] sm:$0xff] %v18958_v57  ;;  %v7135_v8 = vsel %vm518_vm3, %v18628_v45, %v6707_v17  ;;  %v8188_v2 = vcombine.high %v18954_v5, %v18958_v57  ;;  %7029 = vbcast.lane.b32.xlu1 %v7023_v47, 264  ;;  %24400 = vst [vmem:[#allocation175_spill] sm:$0xff] %v18970_v11  ;;  %v7133_v45 = vsel %vm518_vm3, %v18623_v10, %v6696_v12  ;;  %v24477_v57 = vld [vmem:[#allocation86_spill] sm:$0xff] }
 0x65c   : > { %v7916_v39 = vcombine.high %v7131_v0, %v7135_v8  ;;  %7025 = vbcast.lane.b32.xlu0 %v7023_v47, 256  ;;  %v7915_v43 = vcombine.low %v7131_v0, %v7135_v8 }
 0x65d   : > { %v6722_v63 = vpop.permute.xlu1 %6721  ;;  %v8202_v30 = vrot.slane %v8188_v2, %v24155_v14 }
 0x65e   : > { %v6718_v49 = vpop.permute.xlu0 %6717  ;;  %v18974_v21 = vsel %vm518_vm3, %v18630_v41, %v6722_v63  ;;  %v7045_v41 = vrot.slane %v18824_v61, %v17836_v25  ;;  %v7923_v10 = vrot.slane %v7915_v43, %v24155_v14  ;;  %v18994_v43 = vrot.slane %v7948_v9, %v24156_v4  ;;  %v24424_v25 = vld [vmem:[#allocation80_spill] sm:$0xff] }
 0x65f   : > { %24401 = vst [vmem:[#allocation176_spill] sm:$0xff] %v18974_v21  ;;  %v7137_v3 = vsel %vm518_vm3, %v18633_v27, %v6718_v49  ;;  %v8204_v17 = vcombine.high %v18970_v11, %v18974_v21  ;;  %7040 = vbcast.lane.b32.xlu1 %v7034_v37, 264  ;;  %v7930_v27 = vrot.slane %v7916_v39, %v24155_v14  ;;  %v24481_v11 = vld [vmem:[#allocation95_spill] sm:$0xff] }
 0x660   : > { %v7931_v47 = vcombine.low %v7133_v45, %v7137_v3  ;;  %v7932_v19 = vcombine.high %v7133_v45, %v7137_v3  ;;  %7036 = vbcast.lane.b32.xlu0 %v7034_v37, 256  ;;  %v19011_v9 = vrot.slane %v7963_v32, %v24156_v4  ;;  %v24415_v32 = vld [vmem:[#allocation73_spill] sm:$0xff] }
 0x661   : > { %v8218_v0 = vrot.slane %v8204_v17, %v24155_v14  ;;  %v6733_v63 = vpop.permute.xlu1 %6732  ;;  %v18991_v17 = vrot.slane %v7947_v29, %v24156_v4 }
 0x662   : > { %v7939_v12 = vrot.slane %v7931_v47, %v24155_v14  ;;  %v7946_v8 = vrot.slane %v7932_v19, %v24155_v14  ;;  %v6729_v49 = vpop.permute.xlu0 %6728  ;;  %v7056_v47 = vrot.slane %v18824_v61, %v17928_v35 }
 0x663   : > { %v8267_v45 = vcombine.low %v8202_v30, %v8218_v0  ;;  %v8268_v37 = vcombine.high %v8202_v30, %v8218_v0  ;;  %7051 = vbcast.lane.b32.xlu1 %v7045_v41, 264  ;;  %24402 = vst [vmem:[#allocation177_spill] sm:$0xff] %v18991_v17 }
 0x664   : > { %v7979_v60 = vcombine.low %v7923_v10, %v7939_v12  ;;  %v7980_v18 = vcombine.high %v7923_v10, %v7939_v12  ;;  %v7995_v2 = vcombine.low %v7930_v27, %v7946_v8  ;;  %v7996_v3 = vcombine.high %v7930_v27, %v7946_v8  ;;  %7047 = vbcast.lane.b32.xlu0 %v7045_v41, 256 }
 0x665   : > { %v6744_v39 = vpop.permute.xlu1 %6743  ;;  %v19014_v10 = vrot.slane %v7964_v13, %v24156_v4  ;;  %v19017_v27 = vrot.slane %v8267_v45, %v24156_v4  ;;  %v7067_v12 = vrot.slane %v18824_v61, %v17971_v15  ;;  %v19022_v8 = vrot.slane %v8268_v37, %v24156_v4 }
 0x666   : > { %v18999_v19 = vrot.slane %v7979_v60, %v24156_v4  ;;  %v19002_v30 = vrot.slane %v7980_v18, %v24156_v4  ;;  %v19005_v0 = vrot.slane %v7995_v2, %v24156_v4  ;;  %v19008_v41 = vrot.slane %v7996_v3, %v24156_v4  ;;  %v6740_v29 = vpop.permute.xlu0 %6739  ;;  %v24410_v60 = vld [vmem:[#allocation72_spill] sm:$0xff] }
 0x667   : > { %24405 = vst [vmem:[#allocation180_spill] sm:$0xff] %v19014_v10  ;;  %24406 = vst [vmem:[#allocation181_spill] sm:$0xff] %v19017_v27  ;;  %7062 = vbcast.lane.b32.xlu1 %v7056_v47, 264  ;;  %v24408_v3 = vcombine.low %v18925_v38, %v18928_v16  ;;  %v19046_v13 = vsel %vm518_vm3, %v24410_v60, %v6733_v63  ;;  %v24413_v37 = vcombine.high %v18925_v38, %v18928_v16 }
 0x668   : > { %24403 = vst [vmem:[#allocation178_spill] sm:$0xff] %v18999_v19  ;;  %24404 = vst [vmem:[#allocation179_spill] sm:$0xff] %v19008_v41  ;;  %7058 = vbcast.lane.b32.xlu0 %v7056_v47, 256  ;;  %v7139_v15 = vsel %vm518_vm3, %v24415_v32, %v6729_v49  ;;  %v19076_v32 = vsel %vm518_vm3, %v18100_v50, %v6744_v39  ;;  %v7332_v38 = vcombine.high %v18303_v24, %v18313_v20  ;;  %v24417_v49 = vld [vmem:[#allocation36_spill] sm:$0xff]  ;;  %v24422_v24 = vld [vmem:[#allocation79_spill] sm:$0xff] }
 0x669   : > { %24407 = vst [vmem:[#allocation182_spill] sm:$0xff] %v19022_v8  ;;  %v6755_v18 = vpop.permute.xlu1 %6754  ;;  %v19042_v47 = vrot.slane %v24408_v3, %v24156_v4  ;;  %24411 = vst [vmem:[#allocation72_spill] sm:$0xff] %v19046_v13  ;;  %v19056_v2 = vrot.slane %v24413_v37, %v24156_v4  ;;  %v24425_v8 = vld [vmem:[#allocation77_spill] sm:$0xff] }
 0x66a   : > { %v6751_v45 = vpop.permute.xlu0 %6750  ;;  %v19050_v61 = vsel %vm518_vm3, %v18106_v53, %v6755_v18  ;;  %v7468_v18 = vcombine.high %v18827_v42, %v18837_v54  ;;  %v24416_v53 = vld [vmem:[#allocation74_spill] sm:$0xff] }
 0x66b   : > { %24409 = vst [vmem:[#allocation183_spill] sm:$0xff] %v19042_v47  ;;  %24412 = vst [vmem:[#allocation184_spill] sm:$0xff] %v19050_v61  ;;  %v7143_v3 = vsel %vm518_vm3, %v18109_v58, %v6751_v45  ;;  %v8564_v63 = vcombine.high %v19046_v13, %v19050_v61  ;;  %7073 = vbcast.lane.b32.xlu1 %v7067_v12, 264  ;;  %v7141_v54 = vsel %vm518_vm3, %v24416_v53, %v6740_v29  ;;  %v24419_v53 = vld [vmem:[#allocation31_spill] sm:$0xff]  ;;  %v24523_v61 = vld [vmem:[#allocation150_spill] sm:$0xff] }
 0x66c   : > { %24414 = vst [vmem:[#allocation185_spill] sm:$0xff] %v19056_v2  ;;  %v8292_v60 = vcombine.high %v7139_v15, %v7143_v3  ;;  %7069 = vbcast.lane.b32.xlu0 %v7067_v12, 256  ;;  %v8291_v12 = vcombine.low %v7139_v15, %v7143_v3  ;;  %v24418_v3 = vld [vmem:[#allocation60_spill] sm:$0xff] }
 0x66d   : > { %v6766_v16 = vpop.permute.xlu1 %6765 }
 0x66e   : > { %v6762_v45 = vpop.permute.xlu0 %6761  ;;  %v19080_v37 = vsel %vm518_vm3, %v18111_v56, %v6766_v16  ;;  %v19093_v56 = vrot.slane %v8564_v63, %v24155_v14  ;;  %v7876_v16 = vcombine.high %v24419_v53, %v24418_v3 }
 0x66f   : > { %v7145_v42 = vsel %vm518_vm3, %v24417_v49, %v6762_v45  ;;  %v8580_v58 = vcombine.high %v19076_v32, %v19080_v37  ;;  %9389 = vrot.lane.b32.xlu1 %v7468_v18, %s14929_s27  ;;  %v8012_v49 = vcombine.high %v18991_v17, %v18999_v19  ;;  %v8299_v45 = vrot.slane %v8291_v12, %v24155_v14 }
 0x670   : > { %v8307_v15 = vcombine.low %v7141_v54, %v7145_v42  ;;  %v8308_v50 = vcombine.high %v7141_v54, %v7145_v42  ;;  %9387 = vrot.lane.b32.xlu0 %v7332_v38, %s14929_s27  ;;  %v8306_v18 = vrot.slane %v8292_v60, %v24155_v14 }
 0x671   : > { %v19096_v39 = vrot.slane %v8580_v58, %v24155_v14  ;;  %v6777_v29 = vpop.permute.xlu1 %6776  ;;  %v24423_v58 = vld [vmem:[#allocation76_spill] sm:$0xff] }
 0x672   : > { %v8315_v42 = vrot.slane %v8307_v15, %v24155_v14  ;;  %v8322_v54 = vrot.slane %v8308_v50, %v24155_v14  ;;  %v6773_v63 = vpop.permute.xlu0 %6772  ;;  %v24420_v15 = vld [vmem:[#allocation75_spill] sm:$0xff] }
 0x673   : > { %v8643_v38 = vcombine.low %v19093_v56, %v19096_v39  ;;  %9393 = vrot.lane.b32.xlu1 %v8012_v49, %s14929_s27  ;;  %v19114_v50 = vsel %vm518_vm3, %v24420_v15, %v6777_v29  ;;  %v7147_v49 = vsel %vm518_vm3, %v24423_v58, %v6773_v63  ;;  %v24428_v58 = vld [vmem:[#allocation82_spill] sm:$0xff] }
 0x674   : > { %v8356_v3 = vcombine.high %v8299_v45, %v8315_v42  ;;  %v8371_v53 = vcombine.low %v8306_v18, %v8322_v54  ;;  %v8372_v19 = vcombine.high %v8306_v18, %v8322_v54  ;;  %9391 = vrot.lane.b32.xlu0 %v7876_v16, %s14929_s27  ;;  %24421 = vst [vmem:[#allocation73_spill] sm:$0xff] %v19114_v50 }
 0x675   : > { %v6788_v12 = vpop.permute.xlu1 %6787  ;;  %v8355_v7 = vcombine.low %v8299_v45, %v8315_v42 }
 0x676   : > { %v6784_v60 = vpop.permute.xlu0 %6783  ;;  %v19128_v29 = vsel %vm518_vm3, %v24425_v8, %v6788_v12 }
 0x677   : > { %v19147_v42 = vrot.slane %v8355_v7, %v24156_v4 }
 0x679   : > { %v6799_v17 = vpop.permute.xlu1 %6798  ;;  %24429 = vst [vmem:[#allocation74_spill] sm:$0xff] %v19147_v42 }
 0x67a   : > { %v6795_v20 = vpop.permute.xlu0 %6794  ;;  %v19118_v35 = vsel %vm518_vm3, %v24422_v24, %v6799_v17  ;;  %v24427_v17 = vld [vmem:[#allocation78_spill] sm:$0xff] }
 0x67b   : > { %v7151_v18 = vsel %vm518_vm3, %v24424_v25, %v6795_v20  ;;  %v8596_v16 = vcombine.high %v19114_v50, %v19118_v35  ;;  %v7149_v63 = vsel %vm518_vm3, %v24427_v17, %v6784_v60 }
 0x67c   : > { %v8324_v54 = vcombine.high %v7147_v49, %v7151_v18  ;;  %v8323_v15 = vcombine.low %v7147_v49, %v7151_v18 }
 0x67d   : > { %v6810_v34 = vpop.permute.xlu1 %6809  ;;  %v8610_v8 = vrot.slane %v8596_v16, %v24155_v14  ;;  %v19150_v16 = vrot.slane %v8356_v3, %v24156_v4  ;;  %v19168_v3 = vrot.slane %v8372_v19, %v24156_v4 }
 0x67e   : > { %v6806_v2 = vpop.permute.xlu0 %6805  ;;  %v19132_v24 = vsel %vm518_vm3, %v24426_v31, %v6810_v34  ;;  %v8331_v31 = vrot.slane %v8323_v15, %v24155_v14  ;;  %v8338_v34 = vrot.slane %v8324_v54, %v24155_v14  ;;  %v19153_v15 = vrot.slane %v8371_v53, %v24156_v4 }
 0x67f   : > { %v7153_v25 = vsel %vm518_vm3, %v24428_v58, %v6806_v2  ;;  %v8612_v20 = vcombine.high %v19128_v29, %v19132_v24  ;;  %v19171_v53 = vrot.slane %v8643_v38, %v24156_v4 }
 0x680   : > { %v8339_v59 = vcombine.low %v7149_v63, %v7153_v25  ;;  %v8340_v1 = vcombine.high %v7149_v63, %v7153_v25 }
 0x681   : > { %v8626_v12 = vrot.slane %v8612_v20, %v24155_v14  ;;  %v6821_v49 = vpop.permute.xlu1 %6820  ;;  %24431 = vst [vmem:[#allocation75_spill] sm:$0xff] %v19171_v53  ;;  %v24450_v53 = vld [vmem:[#allocation137_spill] sm:$0xff] }
 0x682   : > { %v8347_v60 = vrot.slane %v8339_v59, %v24155_v14  ;;  %v8354_v18 = vrot.slane %v8340_v1, %v24155_v14  ;;  %v6817_v2 = vpop.permute.xlu0 %6816 }
 0x683   : > { %v8675_v17 = vcombine.low %v8610_v8, %v8626_v12  ;;  %v8676_v58 = vcombine.high %v8610_v8, %v8626_v12  ;;  %v24441_v12 = vld [vmem:[#allocation27_spill] sm:$0xff] }
 0x684   : > { %v8387_v27 = vcombine.low %v8331_v31, %v8347_v60  ;;  %v8388_v47 = vcombine.high %v8331_v31, %v8347_v60  ;;  %v8403_v63 = vcombine.low %v8338_v34, %v8354_v18  ;;  %v8404_v45 = vcombine.high %v8338_v34, %v8354_v18  ;;  %v24438_v60 = vld [vmem:[#allocation41_spill] sm:$0xff]  ;;  %v24440_v18 = vld [vmem:[#allocation40_spill] sm:$0xff] }
 0x685   : > { %v6832_v54 = vpop.permute.xlu1 %6831  ;;  %v19174_v8 = vrot.slane %v8675_v17, %v24156_v4  ;;  %v7155_v17 = vsel %vm518_vm3, %v24440_v18, %v6817_v2  ;;  %v24442_v18 = vld [vmem:[#allocation129_spill] sm:$0xff] }
 0x686   : > { %v19156_v59 = vrot.slane %v8387_v27, %v24156_v4  ;;  %v19159_v1 = vrot.slane %v8388_v47, %v24156_v4  ;;  %v19162_v25 = vrot.slane %v8403_v63, %v24156_v4  ;;  %v19165_v20 = vrot.slane %v8404_v45, %v24156_v4  ;;  %v6828_v7 = vpop.permute.xlu0 %6827  ;;  %v24436_v45 = vld [vmem:[#allocation63_spill] sm:$0xff] }
 0x687   : > { %24432 = vst [vmem:[#allocation79_spill] sm:$0xff] %v19174_v8  ;;  %v19177_v27 = vrot.slane %v8676_v58, %v24156_v4  ;;  %v24434_v58 = vcombine.high %v19093_v56, %v19096_v39  ;;  %v19203_v19 = vsel %vm518_vm3, %v24436_v45, %v6821_v49  ;;  %v24444_v45 = vld [vmem:[#allocation131_spill] sm:$0xff] }
 0x688   : > { %24430 = vst [vmem:[#allocation36_spill] sm:$0xff] %v19156_v59  ;;  %v8420_v47 = vcombine.high %v19147_v42, %v19156_v59  ;;  %24437 = vst [vmem:[#allocation77_spill] sm:$0xff] %v19203_v19  ;;  %v24446_v42 = vld [vmem:[#allocation130_spill] sm:$0xff] }
 0x689   : > { %24433 = vst [vmem:[#allocation76_spill] sm:$0xff] %v19177_v27  ;;  %v6843_v38 = vpop.permute.xlu1 %6842  ;;  %v19199_v63 = vrot.slane %v24434_v58, %v24156_v4 }
 0x68a   : > { %9395 = vrot.lane.b32.xlu0 %v8420_v47, %s14929_s27  ;;  %v6839_v34 = vpop.permute.xlu0 %6838  ;;  %v19208_v31 = vsel %vm518_vm3, %v24438_v60, %v6843_v38  ;;  %v7157_v47 = vsel %vm518_vm3, %v24446_v42, %v6828_v7 }
 0x68b   : > { %24435 = vst [vmem:[#allocation80_spill] sm:$0xff] %v19199_v63  ;;  %24439 = vst [vmem:[#allocation81_spill] sm:$0xff] %v19208_v31  ;;  %v7159_v59 = vsel %vm518_vm3, %v24441_v12, %v6839_v34  ;;  %v8700_v56 = vcombine.high %v19203_v19, %v19208_v31  ;;  %v19226_v12 = vsel %vm518_vm3, %v24442_v18, %v6832_v54  ;;  %v24452_v19 = vld [vmem:[#allocation134_spill] sm:$0xff] }
 0x68c   : > { %v8428_v49 = vcombine.high %v7155_v17, %v7159_v59  ;;  %24443 = vst [vmem:[#allocation78_spill] sm:$0xff] %v19226_v12  ;;  %v8427_v34 = vcombine.low %v7155_v17, %v7159_v59 }
 0x68d   : > { %v6854_v60 = vpop.permute.xlu1 %6853  ;;  %v19239_v54 = vrot.slane %v8700_v56, %v24155_v14 }
 0x68e   : > { %v6850_v58 = vpop.permute.xlu0 %6849  ;;  %v19230_v39 = vsel %vm518_vm3, %v24444_v45, %v6854_v60  ;;  %v8435_v60 = vrot.slane %v8427_v34, %v24155_v14  ;;  %v8442_v18 = vrot.slane %v8428_v49, %v24155_v14  ;;  %v24448_v34 = vld [vmem:[#allocation133_spill] sm:$0xff] }
 0x68f   : > { %24445 = vst [vmem:[#allocation82_spill] sm:$0xff] %v19230_v39  ;;  %v7161_v38 = vsel %vm518_vm3, %v24447_v40, %v6850_v58  ;;  %v8716_v52 = vcombine.high %v19226_v12, %v19230_v39  ;;  %v24453_v12 = vld [vmem:[#allocation138_spill] sm:$0xff]  ;;  %v24454_v39 = vld [vmem:[#allocation135_spill] sm:$0xff] }
 0x690   : > { %v8443_v2 = vcombine.low %v7157_v47, %v7161_v38  ;;  %v8444_v27 = vcombine.high %v7157_v47, %v7161_v38 }
 0x691   : > { %v19242_v59 = vrot.slane %v8716_v52, %v24155_v14  ;;  %v6865_v17 = vpop.permute.xlu1 %6864 }
 0x692   : > { %v8451_v42 = vrot.slane %v8443_v2, %v24155_v14  ;;  %v8458_v40 = vrot.slane %v8444_v27, %v24155_v14  ;;  %v6861_v7 = vpop.permute.xlu0 %6860  ;;  %v19254_v49 = vsel %vm518_vm3, %v24448_v34, %v6865_v17 }
 0x693   : > { %v8779_v58 = vcombine.low %v19239_v54, %v19242_v59  ;;  %v8780_v56 = vcombine.high %v19239_v54, %v19242_v59  ;;  %24449 = vst [vmem:[#allocation63_spill] sm:$0xff] %v19254_v49  ;;  %v7163_v31 = vsel %vm518_vm3, %v24452_v19, %v6861_v7  ;;  %v24459_v7 = vld [vmem:[#allocation140_spill] sm:$0xff] }
 0x694   : > { %v8492_v47 = vcombine.high %v8435_v60, %v8451_v42  ;;  %v8507_v38 = vcombine.low %v8442_v18, %v8458_v40  ;;  %v8508_v52 = vcombine.high %v8442_v18, %v8458_v40  ;;  %v8491_v5 = vcombine.low %v8435_v60, %v8451_v42 }
 0x695   : > { %v6876_v45 = vpop.permute.xlu1 %6875 }
 0x696   : > { %v6872_v63 = vpop.permute.xlu0 %6871  ;;  %v19268_v17 = vsel %vm518_vm3, %v24454_v39, %v6876_v45  ;;  %v19287_v42 = vrot.slane %v8491_v5, %v24156_v4 }
 0x697   : > { %24455 = vst [vmem:[#allocation40_spill] sm:$0xff] %v19268_v17 }
 0x698   : > { %24460 = vst [vmem:[#allocation129_spill] sm:$0xff] %v19287_v42 }
 0x699   : > { %v6887_v8 = vpop.permute.xlu1 %6886 }
 0x69a   : > { %v6883_v2 = vpop.permute.xlu0 %6882  ;;  %v19258_v27 = vsel %vm518_vm3, %v24450_v53, %v6887_v8  ;;  %v24458_v8 = vld [vmem:[#allocation136_spill] sm:$0xff] }
 0x69b   : > { %24451 = vst [vmem:[#allocation41_spill] sm:$0xff] %v19258_v27  ;;  %v7167_v54 = vsel %vm518_vm3, %v24453_v12, %v6883_v2  ;;  %v8732_v59 = vcombine.high %v19254_v49, %v19258_v27  ;;  %v7165_v19 = vsel %vm518_vm3, %v24458_v8, %v6872_v63 }
 0x69c   : > { %v8460_v18 = vcombine.high %v7163_v31, %v7167_v54  ;;  %v8459_v34 = vcombine.low %v7163_v31, %v7167_v54 }
 0x69d   : > { %v6898_v40 = vpop.permute.xlu1 %6897  ;;  %v8746_v39 = vrot.slane %v8732_v59, %v24155_v14  ;;  %v19290_v59 = vrot.slane %v8492_v47, %v24156_v4  ;;  %v19308_v47 = vrot.slane %v8508_v52, %v24156_v4 }
 0x69e   : > { %v6894_v26 = vpop.permute.xlu0 %6893  ;;  %v19272_v53 = vsel %vm518_vm3, %v24456_v48, %v6898_v40  ;;  %v8467_v48 = vrot.slane %v8459_v34, %v24155_v14  ;;  %v8474_v54 = vrot.slane %v8460_v18, %v24155_v14  ;;  %v19293_v34 = vrot.slane %v8507_v38, %v24156_v4 }
 0x69f   : > { %24457 = vst [vmem:[#allocation27_spill] sm:$0xff] %v19272_v53  ;;  %v7169_v12 = vsel %vm518_vm3, %v24459_v7, %v6894_v26  ;;  %v8748_v2 = vcombine.high %v19268_v17, %v19272_v53  ;;  %24463 = vst [vmem:[#allocation132_spill] sm:$0xff] %v19308_v47  ;;  %v19311_v38 = vrot.slane %v8779_v58, %v24156_v4 }
 0x6a0   : > { %v8475_v49 = vcombine.low %v7165_v19, %v7169_v12  ;;  %v8476_v27 = vcombine.high %v7165_v19, %v7169_v12 }
 0x6a1   : > { %v8762_v31 = vrot.slane %v8748_v2, %v24155_v14  ;;  %v6909_v45 = vpop.permute.xlu1 %6908  ;;  %24464 = vst [vmem:[#allocation133_spill] sm:$0xff] %v19311_v38 }
 0x6a2   : > { %v8483_v63 = vrot.slane %v8475_v49, %v24155_v14  ;;  %v8490_v40 = vrot.slane %v8476_v27, %v24155_v14  ;;  %v6905_v26 = vpop.permute.xlu0 %6904 }
 0x6a3   : > { %v8811_v8 = vcombine.low %v8746_v39, %v8762_v31  ;;  %v8812_v7 = vcombine.high %v8746_v39, %v8762_v31  ;;  %v24474_v31 = vld [vmem:[#allocation89_spill] sm:$0xff] }
 0x6a4   : > { %v8523_v17 = vcombine.low %v8467_v48, %v8483_v63  ;;  %v8524_v53 = vcombine.high %v8467_v48, %v8483_v63  ;;  %v8539_v19 = vcombine.low %v8474_v54, %v8490_v40  ;;  %v8540_v60 = vcombine.high %v8474_v54, %v8490_v40  ;;  %v24470_v54 = vld [vmem:[#allocation87_spill] sm:$0xff]  ;;  %v24472_v63 = vld [vmem:[#allocation85_spill] sm:$0xff] }
 0x6a5   : > { %v6920_v18 = vpop.permute.xlu1 %6919  ;;  %v19314_v39 = vrot.slane %v8811_v8, %v24156_v4 }
 0x6a6   : > { %v19296_v49 = vrot.slane %v8523_v17, %v24156_v4  ;;  %v19299_v27 = vrot.slane %v8524_v53, %v24156_v4  ;;  %v19302_v12 = vrot.slane %v8539_v19, %v24156_v4  ;;  %v19305_v2 = vrot.slane %v8540_v60, %v24156_v4  ;;  %v6916_v5 = vpop.permute.xlu0 %6915  ;;  %v24468_v19 = vld [vmem:[#allocation83_spill] sm:$0xff] }
 0x6a7   : > { %24465 = vst [vmem:[#allocation137_spill] sm:$0xff] %v19314_v39  ;;  %v19317_v17 = vrot.slane %v8812_v7, %v24156_v4  ;;  %v19336_v7 = vrot.slane %v8780_v56, %v24156_v4  ;;  %v19340_v60 = vsel %vm518_vm3, %v24468_v19, %v6909_v45 }
 0x6a8   : > { %24461 = vst [vmem:[#allocation131_spill] sm:$0xff] %v19296_v49  ;;  %24462 = vst [vmem:[#allocation130_spill] sm:$0xff] %v19305_v2  ;;  %v8556_v53 = vcombine.high %v19287_v42, %v19296_v49 }
 0x6a9   : > { %24466 = vst [vmem:[#allocation134_spill] sm:$0xff] %v19317_v17  ;;  %v6931_v58 = vpop.permute.xlu1 %6930  ;;  %24467 = vst [vmem:[#allocation138_spill] sm:$0xff] %v19336_v7 }
 0x6aa   : > { %24469 = vst [vmem:[#allocation135_spill] sm:$0xff] %v19340_v60  ;;  %v6927_v52 = vpop.permute.xlu0 %6926  ;;  %9397 = vrot.lane.b32.xlu1 %v8556_v53, %s14929_s27  ;;  %v19345_v48 = vsel %vm518_vm3, %v24470_v54, %v6931_v58  ;;  %v19359_v58 = vsel %vm518_vm3, %v24472_v63, %v6920_v18  ;;  %v24476_v18 = vld [vmem:[#allocation90_spill] sm:$0xff] }
 0x6ab   : > { %24471 = vst [vmem:[#allocation139_spill] sm:$0xff] %v19345_v48  ;;  %v9108_v40 = vcombine.high %v19340_v60, %v19345_v48  ;;  %24473 = vst [vmem:[#allocation136_spill] sm:$0xff] %v19359_v58 }
 0x6ad   : > { %v6942_v19 = vpop.permute.xlu1 %6941  ;;  %v9122_v56 = vrot.slane %v9108_v40, %v24155_v14 }
 0x6ae   : > { %v6938_v54 = vpop.permute.xlu0 %6937  ;;  %v19363_v49 = vsel %vm518_vm3, %v24474_v31, %v6942_v19  ;;  %v19375_v31 = vsel %vm518_vm3, %v24477_v57, %v6916_v5  ;;  %v24478_v19 = vld [vmem:[#allocation88_spill] sm:$0xff] }
 0x6af   : > { %24475 = vst [vmem:[#allocation140_spill] sm:$0xff] %v19363_v49  ;;  %v9124_v8 = vcombine.high %v19359_v58, %v19363_v49  ;;  %v19371_v63 = vsel %vm518_vm3, %v24476_v18, %v6938_v54  ;;  %v19379_v23 = vsel %vm518_vm3, %v24478_v19, %v6927_v52  ;;  %v24483_v18 = vld [vmem:[#allocation84_spill] sm:$0xff] }
 0x6b0   : > { %v19393_v57 = vsel %vm518_vm3, %v24483_v18, %v6905_v26  ;;  %v24484_v5 = vld [vmem:[#allocation96_spill] sm:$0xff] }
 0x6b1   : > { %v9138_v45 = vrot.slane %v9124_v8, %v24155_v14  ;;  %v6953_v42 = vpop.permute.xlu1 %6952  ;;  %v8851_v8 = vcombine.low %v19375_v31, %v19371_v63 }
 0x6b2   : > { %v6949_v39 = vpop.permute.xlu0 %6948 }
 0x6b3   : > { %v9187_v38 = vcombine.low %v9122_v56, %v9138_v45  ;;  %v9188_v53 = vcombine.high %v9122_v56, %v9138_v45  ;;  %v19385_v56 = vsel %vm518_vm3, %v24479_v55, %v6953_v42  ;;  %v8835_v55 = vcombine.low %v19393_v57, %v19379_v23  ;;  %v24485_v42 = vld [vmem:[#allocation92_spill] sm:$0xff] }
 0x6b4   : > { %24480 = vst [vmem:[#allocation83_spill] sm:$0xff] %v19385_v56  ;;  %v19405_v21 = vsel %vm518_vm3, %v24485_v42, %v6949_v39  ;;  %v24491_v39 = vld [vmem:[#allocation98_spill] sm:$0xff] }
 0x6b5   : > { %v6964_v17 = vpop.permute.xlu1 %6963 }
 0x6b6   : > { %v6960_v7 = vpop.permute.xlu0 %6959  ;;  %v19410_v26 = vsel %vm518_vm3, %v24486_v62, %v6964_v17  ;;  %v8843_v17 = vrot.slane %v8835_v55, %v24155_v14 }
 0x6b7   : > { %24487 = vst [vmem:[#allocation85_spill] sm:$0xff] %v19410_v26  ;;  %v19420_v2 = vsel %vm518_vm3, %v24490_v36, %v6960_v7 }
 0x6b9   : > { %v6975_v40 = vpop.permute.xlu1 %6974 }
 0x6ba   : > { %v6971_v45 = vpop.permute.xlu0 %6970  ;;  %v19389_v54 = vsel %vm518_vm3, %v24481_v11, %v6975_v40  ;;  %v8859_v40 = vrot.slane %v8851_v8, %v24155_v14 }
 0x6bb   : > { %24482 = vst [vmem:[#allocation87_spill] sm:$0xff] %v19389_v54  ;;  %v19397_v52 = vsel %vm518_vm3, %v24484_v5, %v6971_v45  ;;  %v9140_v19 = vcombine.high %v19385_v56, %v19389_v54  ;;  %v24488_v5 = vld [vmem:[#allocation97_spill] sm:$0xff] }
 0x6bc   : > { %v8867_v45 = vcombine.low %v19405_v21, %v19397_v52  ;;  %v8899_v41 = vcombine.low %v8843_v17, %v8859_v40  ;;  %v24500_v56 = vld [vmem:[#allocation25_spill] sm:$0xff] }
 0x6bd   : > { %v6986_v11 = vpop.permute.xlu1 %6985  ;;  %v9154_v47 = vrot.slane %v9140_v19, %v24155_v14 }
 0x6be   : > { %v6982_v18 = vpop.permute.xlu0 %6981  ;;  %v19416_v46 = vsel %vm518_vm3, %v24488_v5, %v6986_v11  ;;  %v8875_v36 = vrot.slane %v8867_v45, %v24155_v14  ;;  %v19436_v55 = vrot.slane %v8899_v41, %v24156_v4 }
 0x6bf   : > { %24489 = vst [vmem:[#allocation89_spill] sm:$0xff] %v19416_v46  ;;  %v19424_v42 = vsel %vm518_vm3, %v24491_v39, %v6982_v18  ;;  %v9156_v62 = vcombine.high %v19410_v26, %v19416_v46 }
 0x6c0   : > { %v8883_v8 = vcombine.low %v19420_v2, %v19424_v42  ;;  %24492 = vst [vmem:[#allocation90_spill] sm:$0xff] %v19436_v55 }
 0x6c1   : > { %v9170_v11 = vrot.slane %v9156_v62, %v24155_v14  ;;  %v6997_v5 = vpop.permute.xlu1 %6996 }
 0x6c2   : > { %v8891_v7 = vrot.slane %v8883_v8, %v24155_v14  ;;  %v6993_v18 = vpop.permute.xlu0 %6992 }
 0x6c3   : > { %v9219_v39 = vcombine.low %v9154_v47, %v9170_v11  ;;  %v9220_v10 = vcombine.high %v9154_v47, %v9170_v11  ;;  %v19450_v47 = vrot.slane %v9187_v38, %v24156_v4  ;;  %v24498_v11 = vld [vmem:[#allocation141_spill] sm:$0xff] }
 0x6c4   : > { %v8931_v44 = vcombine.low %v8875_v36, %v8891_v7 }
 0x6c5   : > { %v7008_v6 = vpop.permute.xlu1 %7007  ;;  %v19442_v62 = vrot.slane %v9219_v39, %v24156_v4  ;;  %v19445_v48 = vrot.slane %v9220_v10, %v24156_v4  ;;  %24496 = vst [vmem:[#allocation95_spill] sm:$0xff] %v19450_v47  ;;  %v19459_v39 = vsel %vm518_vm3, %v24498_v11, %v6997_v5  ;;  %v24510_v47 = vld [vmem:[#allocation43_spill] sm:$0xff] }
 0x6c6   : > { %v19439_v60 = vrot.slane %v8931_v44, %v24156_v4  ;;  %v7004_v19 = vpop.permute.xlu0 %7003  ;;  %v19455_v44 = vrot.slane %v9188_v53, %v24156_v4  ;;  %24499 = vst [vmem:[#allocation96_spill] sm:$0xff] %v19459_v39 }
 0x6c7   : > { %24494 = vst [vmem:[#allocation88_spill] sm:$0xff] %v19442_v62  ;;  %24495 = vst [vmem:[#allocation91_spill] sm:$0xff] %v19445_v48  ;;  %v8932_v62 = vcombine.high %v8875_v36, %v8891_v7  ;;  %v8900_v48 = vcombine.high %v8843_v17, %v8859_v40  ;;  %v24512_v36 = vcombine.low %v19150_v16, %v19159_v1  ;;  %v24513_v40 = vld [vmem:[#allocation147_spill] sm:$0xff] }
 0x6c8   : > { %24493 = vst [vmem:[#allocation86_spill] sm:$0xff] %v19439_v60  ;;  %v8964_v45 = vcombine.high %v19436_v55, %v19439_v60  ;;  %24497 = vst [vmem:[#allocation84_spill] sm:$0xff] %v19455_v44  ;;  %v24502_v60 = vld [vmem:[#allocation143_spill] sm:$0xff]  ;;  %v24505_v55 = vld [vmem:[#allocation110_spill] sm:$0xff] }
 0x6c9   : > { %v7019_v8 = vpop.permute.xlu1 %7018  ;;  %v24509_v44 = vld [vmem:[#allocation70_spill] sm:$0xff] }
 0x6ca   : > { %9399 = vrot.lane.b32.xlu0 %v8964_v45, %s14929_s27  ;;  %v7015_v10 = vpop.permute.xlu0 %7014  ;;  %v19464_v54 = vsel %vm518_vm3, %v24500_v56, %v7019_v8  ;;  %v19478_v56 = vsel %vm518_vm3, %v24502_v60, %v7008_v6  ;;  %v24504_v8 = vld [vmem:[#allocation108_spill] sm:$0xff]  ;;  %v24511_v58 = vcombine.low %v24509_v44, %v24510_v47 }
 0x6cb   : > { %24501 = vst [vmem:[#allocation92_spill] sm:$0xff] %v19464_v54  ;;  %v9244_v38 = vcombine.high %v19459_v39, %v19464_v54  ;;  %24503 = vst [vmem:[#allocation93_spill] sm:$0xff] %v19478_v56  ;;  %v24506_v39 = vcombine.low %v24504_v8, %v24505_v55  ;;  %v24507_v54 = vld [vmem:[#allocation146_spill] sm:$0xff] }
 0x6cd   : > { %v7030_v11 = vpop.permute.xlu1 %7029  ;;  %v9258_v45 = vrot.slane %v9244_v38, %v24155_v14 }
 0x6ce   : > { %9419 = vrot.lane.b32.xlu0 %v24506_v39, %s14930_s20  ;;  %v7026_v41 = vpop.permute.xlu0 %7025  ;;  %v19486_v53 = vsel %vm518_vm3, %v24507_v54, %v7030_v11  ;;  %v8946_v54 = vrot.slane %v8932_v62, %v24156_v4 }
 0x6cf   : > { %24508 = vst [vmem:[#allocation97_spill] sm:$0xff] %v19486_v53  ;;  %v9260_v5 = vcombine.high %v19478_v56, %v19486_v53  ;;  %v8914_v56 = vrot.slane %v8900_v48, %v24156_v4  ;;  %v19504_v17 = vsel %vm518_vm3, %v24513_v40, %v7026_v41  ;;  %v24516_v53 = vld [vmem:[#allocation148_spill] sm:$0xff] }
 0x6d0   : > { %v24518_v40 = vld [vmem:[#allocation152_spill] sm:$0xff] }
 0x6d1   : > { %v9274_v6 = vrot.slane %v9260_v5, %v24155_v14  ;;  %v7041_v60 = vpop.permute.xlu1 %7040  ;;  %v8965_v38 = vcombine.low %v8914_v56, %v8946_v54 }
 0x6d2   : > { %9423 = vrot.lane.b32.xlu0 %v24511_v58, %s14930_s20  ;;  %v7037_v39 = vpop.permute.xlu0 %7036  ;;  %v24514_v58 = vld [vmem:[#allocation144_spill] sm:$0xff] }
 0x6d3   : > { %v9323_v49 = vcombine.low %v9258_v45, %v9274_v6  ;;  %v9324_v26 = vcombine.high %v9258_v45, %v9274_v6  ;;  %v19508_v5 = vsel %vm518_vm3, %v24514_v58, %v7004_v19  ;;  %v24515_v45 = vld [vmem:[#allocation145_spill] sm:$0xff]  ;;  %v24520_v19 = vld [vmem:[#allocation142_spill] sm:$0xff] }
 0x6d4   : > { %v19512_v62 = vsel %vm518_vm3, %v24515_v45, %v7015_v10  ;;  %v8987_v6 = vcombine.low %v19508_v5, %v19504_v17  ;;  %v19527_v58 = vsel %vm518_vm3, %v24520_v19, %v6993_v18  ;;  %v24521_v10 = vld [vmem:[#allocation153_spill] sm:$0xff]  ;;  %v24525_v19 = vcombine.high %v24504_v8, %v24505_v55 }
 0x6d5   : > { %v7052_v11 = vpop.permute.xlu1 %7051 }
 0x6d6   : > { %9427 = vrot.lane.b32.xlu0 %v24512_v36, %s14930_s20  ;;  %v7048_v7 = vpop.permute.xlu0 %7047  ;;  %v19518_v36 = vsel %vm518_vm3, %v24516_v53, %v7041_v60  ;;  %v8971_v53 = vcombine.low %v19527_v58, %v19512_v62  ;;  %v24522_v60 = vld [vmem:[#allocation149_spill] sm:$0xff]  ;;  %v19544_v18 = vsel %vm518_vm3, %v24523_v61, %v7052_v11  ;;  %v24528_v61 = vld [vmem:[#allocation155_spill] sm:$0xff] }
 0x6d7   : > { %24517 = vst [vmem:[#allocation94_spill] sm:$0xff] %v19518_v36  ;;  %24524 = vst [vmem:[#allocation141_spill] sm:$0xff] %v19544_v18 }
 0x6d8   : > { %v8979_v50 = vrot.slane %v8971_v53, %v24155_v14 }
 0x6d9   : > { %v7063_v48 = vpop.permute.xlu1 %7062 }
 0x6da   : > { %9431 = vrot.lane.b32.xlu0 %v8965_v38, %s14930_s20  ;;  %v7059_v41 = vpop.permute.xlu0 %7058  ;;  %v19523_v46 = vsel %vm518_vm3, %v24518_v40, %v7063_v48  ;;  %v19539_v38 = vsel %vm518_vm3, %v24522_v60, %v7037_v39  ;;  %v8995_v40 = vrot.slane %v8987_v6, %v24155_v14  ;;  %v24527_v60 = vld [vmem:[#allocation151_spill] sm:$0xff] }
 0x6db   : > { %24519 = vst [vmem:[#allocation98_spill] sm:$0xff] %v19523_v46  ;;  %v19531_v45 = vsel %vm518_vm3, %v24521_v10, %v7059_v41  ;;  %v9276_v13 = vcombine.high %v19518_v36, %v19523_v46  ;;  %v24526_v36 = vld [vmem:[#allocation154_spill] sm:$0xff]  ;;  %v19558_v6 = vsel %vm518_vm3, %v24527_v60, %v7048_v7 }
 0x6dc   : > { %v9003_v41 = vcombine.low %v19539_v38, %v19531_v45 }
 0x6dd   : > { %v7074_v48 = vpop.permute.xlu1 %7073  ;;  %v9290_v8 = vrot.slane %v9276_v13, %v24155_v14 }
 0x6de   : > { %9451 = vrot.lane.b32.xlu0 %v24525_v19, %s14931_s30  ;;  %v7070_v10 = vpop.permute.xlu0 %7069  ;;  %v19554_v39 = vsel %vm518_vm3, %v24526_v36, %v7074_v48  ;;  %v9035_v48 = vcombine.low %v8979_v50, %v8995_v40  ;;  %v9011_v7 = vrot.slane %v9003_v41, %v24155_v14 }
 0x6df   : > { %v19562_v11 = vsel %vm518_vm3, %v24528_v61, %v7070_v10  ;;  %v9292_v46 = vcombine.high %v19544_v18, %v19554_v39  ;;  %v24529_v10 = vcombine.high %v24509_v44, %v24510_v47  ;;  %v8884_v44 = vcombine.high %v19420_v2, %v19424_v42 }
 0x6e0   : > { %v9019_v55 = vcombine.low %v19558_v6, %v19562_v11  ;;  %v19578_v18 = vrot.slane %v9035_v48, %v24156_v4  ;;  %v19601_v48 = vrot.slane %v9324_v26, %v24156_v4 }
 0x6e1   : > { %v9306_v36 = vrot.slane %v9292_v46, %v24155_v14  ;;  %v24532_v46 = vcombine.high %v19150_v16, %v19159_v1  ;;  %v8852_v1 = vcombine.high %v19375_v31, %v19371_v63  ;;  %v8836_v63 = vcombine.high %v19393_v57, %v19379_v23 }
 0x6e2   : > { %v9027_v19 = vrot.slane %v9019_v55, %v24155_v14  ;;  %9455 = vrot.lane.b32.xlu0 %v24529_v10, %s14931_s30  ;;  %24530 = vst [vmem:[#allocation25_spill] sm:$0xff] %v19578_v18  ;;  %v8966_v55 = vcombine.high %v8914_v56, %v8946_v54  ;;  %v8868_v10 = vcombine.high %v19405_v21, %v19397_v52  ;;  %v24533_v56 = vld [vmem:[#allocation113_spill] sm:$0xff]  ;;  %v24534_v54 = vld [vmem:[#allocation111_spill] sm:$0xff] }
 0x6e3   : > { %v9355_v60 = vcombine.low %v9290_v8, %v9306_v36  ;;  %v9356_v61 = vcombine.high %v9290_v8, %v9306_v36  ;;  %v19598_v36 = vrot.slane %v9323_v49, %v24156_v4  ;;  %v8898_v21 = vrot.slane %v8884_v44, %v24155_v14  ;;  %v24683_v49 = vld [vmem:[#allocation76_spill] sm:$0xff] }
 0x6e4   : > { %v9067_v53 = vcombine.low %v9011_v7, %v9027_v19  ;;  %v8866_v31 = vrot.slane %v8852_v1, %v24155_v14  ;;  %v8882_v52 = vrot.slane %v8868_v10, %v24155_v14  ;;  %v9068_v57 = vcombine.high %v9011_v7, %v9027_v19 }
 0x6e5   : > { %v19588_v41 = vrot.slane %v9355_v60, %v24156_v4  ;;  %v19591_v47 = vrot.slane %v9356_v61, %v24156_v4  ;;  %v24535_v60 = vcombine.low %v24533_v56, %v24534_v54  ;;  %v24536_v61 = vcombine.low %v18830_v33, %v18840_v22 }
 0x6e6   : > { %v19581_v13 = vrot.slane %v9067_v53, %v24156_v4  ;;  %9459 = vrot.lane.b32.xlu0 %v24532_v46, %s14931_s30  ;;  %v8850_v53 = vrot.slane %v8836_v63, %v24155_v14  ;;  %v8947_v23 = vcombine.low %v8882_v52, %v8898_v21  ;;  %v9036_v44 = vcombine.high %v8979_v50, %v8995_v40 }
 0x6e7   : > { %v24540_v10 = vcombine.low %v18994_v43, %v19002_v30  ;;  %v24541_v50 = vcombine.low %v19153_v15, %v19162_v25  ;;  %v24542_v40 = vcombine.low %v19290_v59, %v19299_v27 }
 0x6e8   : > { %24531 = vst [vmem:[#allocation143_spill] sm:$0xff] %v19581_v13  ;;  %v9100_v8 = vcombine.high %v19578_v18, %v19581_v13  ;;  %v8915_v46 = vcombine.low %v8850_v53, %v8866_v31  ;;  %v9050_v7 = vrot.slane %v9036_v44, %v24156_v4  ;;  %v24546_v44 = vcombine.high %v18994_v43, %v19002_v30  ;;  %v24690_v13 = vld [vmem:[#allocation91_spill] sm:$0xff] }
 0x6e9   : > { %v9004_v43 = vcombine.high %v19539_v38, %v19531_v45  ;;  %v8972_v30 = vcombine.high %v19527_v58, %v19512_v62  ;;  %v24552_v45 = vcombine.low %v18849_v28, %v18843_v51  ;;  %v8948_v62 = vcombine.high %v8882_v52, %v8898_v21 }
 0x6ea   : > { %9463 = vrot.lane.b32.xlu0 %v8966_v55, %s14931_s30  ;;  %9401 = vrot.lane.b32.xlu1 %v9100_v8, %s14929_s27  ;;  %v24537_v55 = vld [vmem:[#allocation125_spill] sm:$0xff]  ;;  %v24538_v8 = vld [vmem:[#allocation123_spill] sm:$0xff]  ;;  %v8923_v63 = vrot.slane %v8915_v46, %v24156_v4 }
 0x6eb   : > { %v24539_v1 = vcombine.low %v24537_v55, %v24538_v8  ;;  %v24545_v46 = vcombine.high %v24537_v55, %v24538_v8  ;;  %v8988_v8 = vcombine.high %v19508_v5, %v19504_v17  ;;  %v24550_v17 = vld [vmem:[#allocation112_spill] sm:$0xff]  ;;  %v19707_v58 = vrot.slane %v8972_v30, %v24155_v14  ;;  %v24568_v30 = vld [vmem:[#allocation99_spill] sm:$0xff] }
 0x6ec   : > { %v8962_v21 = vrot.slane %v8948_v62, %v24156_v4  ;;  %v24569_v62 = vld [vmem:[#allocation69_spill] sm:$0xff] }
 0x6ee   : > { %9483 = vrot.lane.b32.xlu0 %v24535_v60, %s14932_s13  ;;  %9421 = vrot.lane.b32.xlu1 %v24536_v61, %s14930_s20  ;;  %v8955_v60 = vrot.slane %v8947_v23, %v24156_v4  ;;  %v9082_v61 = vrot.slane %v9068_v57, %v24156_v4  ;;  %v24543_v23 = vcombine.high %v24533_v56, %v24534_v54 }
 0x6ef   : > { %v24544_v57 = vcombine.high %v18830_v33, %v18840_v22  ;;  %v24547_v56 = vcombine.high %v19153_v15, %v19162_v25  ;;  %v24548_v33 = vcombine.high %v19290_v59, %v19299_v27  ;;  %v9020_v22 = vcombine.high %v19558_v6, %v19562_v11  ;;  %v24549_v27 = vld [vmem:[#allocation114_spill] sm:$0xff] }
 0x6f0   : > { %v8967_v19 = vcombine.low %v8923_v63, %v8955_v60  ;;  %v8968_v54 = vcombine.high %v8923_v63, %v8955_v60  ;;  %v9102_v55 = vcombine.high %v9050_v7, %v9082_v61  ;;  %v19693_v25 = vrot.slane %v8988_v8, %v24155_v14  ;;  %v24554_v60 = vld [vmem:[#allocation124_spill] sm:$0xff] }
 0x6f1   : > { %v19690_v15 = vrot.slane %v9020_v22, %v24155_v14  ;;  %v19696_v59 = vrot.slane %v9004_v43, %v24155_v14  ;;  %v24551_v5 = vcombine.low %v24549_v27, %v24550_v17  ;;  %v8916_v6 = vcombine.high %v8850_v53, %v8866_v31  ;;  %v24564_v22 = vld [vmem:[#allocation103_spill] sm:$0xff]  ;;  %v24567_v43 = vld [vmem:[#allocation100_spill] sm:$0xff] }
 0x6f2   : > { %9487 = vrot.lane.b32.xlu0 %v24539_v1, %s14932_s13  ;;  %9425 = vrot.lane.b32.xlu1 %v24540_v10, %s14930_s20  ;;  %v9101_v1 = vcombine.low %v9050_v7, %v9082_v61  ;;  %v9051_v11 = vcombine.low %v19707_v58, %v19693_v25  ;;  %v24553_v10 = vld [vmem:[#allocation126_spill] sm:$0xff]  ;;  %v24556_v63 = vcombine.low %v19011_v9, %v19005_v0 }
 0x6f3   : > { %v9083_v38 = vcombine.low %v19696_v59, %v19690_v15  ;;  %v24555_v61 = vcombine.low %v24553_v10, %v24554_v60  ;;  %v8930_v7 = vrot.slane %v8916_v6, %v24156_v4  ;;  %v24557_v53 = vcombine.low %v19168_v3, %v19165_v20 }
 0x6f4   : > { %v9059_v31 = vrot.slane %v9051_v11, %v24156_v4  ;;  %v24566_v8 = vcombine.high %v18849_v28, %v18843_v51  ;;  %v24573_v51 = vld [vmem:[#allocation68_spill] sm:$0xff]  ;;  %v24574_v28 = vld [vmem:[#allocation46_spill] sm:$0xff] }
 0x6f5   : > { %v9091_v52 = vrot.slane %v9083_v38, %v24156_v4  ;;  %v24570_v38 = vld [vmem:[#allocation44_spill] sm:$0xff] }
 0x6f6   : > { %9491 = vrot.lane.b32.xlu0 %v24541_v50, %s14932_s13  ;;  %9429 = vrot.lane.b32.xlu1 %v24542_v40, %s14930_s20  ;;  %v24558_v50 = vcombine.low %v19293_v34, %v19302_v12  ;;  %v8969_v40 = vcombine.low %v8930_v7, %v8962_v21  ;;  %v8067_v6 = vcombine.low %v24570_v38, %v24569_v62 }
 0x6fa   : > { %9495 = vrot.lane.b32.xlu0 %v8967_v19, %s14932_s13  ;;  %9433 = vrot.lane.b32.xlu1 %v9101_v1, %s14930_s20  ;;  %v9103_v19 = vcombine.low %v9059_v31, %v9091_v52  ;;  %v24559_v1 = vld [vmem:[#allocation106_spill] sm:$0xff] }
 0x6fe   : > { %9515 = vrot.lane.b32.xlu0 %v24543_v23, %s14933_s9  ;;  %9453 = vrot.lane.b32.xlu1 %v24544_v57, %s14931_s30  ;;  %v24560_v23 = vld [vmem:[#allocation105_spill] sm:$0xff] }
 0x6ff   : > { %v7523_v57 = vcombine.low %v24560_v23, %v24559_v1  ;;  %v24577_v23 = vld [vmem:[#allocation120_spill] sm:$0xff] }
 0x702   : > { %9519 = vrot.lane.b32.xlu0 %v24545_v46, %s14933_s9  ;;  %9457 = vrot.lane.b32.xlu1 %v24546_v44, %s14931_s30  ;;  %v24561_v46 = vld [vmem:[#allocation102_spill] sm:$0xff]  ;;  %v24562_v44 = vld [vmem:[#allocation101_spill] sm:$0xff] }
 0x706   : > { %9523 = vrot.lane.b32.xlu0 %v24547_v56, %s14933_s9  ;;  %9461 = vrot.lane.b32.xlu1 %v24548_v33, %s14931_s30  ;;  %v7491_v56 = vcombine.low %v24562_v44, %v24561_v46  ;;  %v24563_v33 = vld [vmem:[#allocation104_spill] sm:$0xff]  ;;  %v19782_v44 = vrot.slane %v8067_v6, %v24155_v14 }
 0x708   : > { %v19757_v11 = vrot.slane %v7491_v56, %v24155_v14  ;;  %v8579_v56 = vcombine.low %v19076_v32, %v19080_v37  ;;  %v24582_v37 = vld [vmem:[#allocation184_spill] sm:$0xff] }
 0x70a   : > { %9527 = vrot.lane.b32.xlu0 %v8968_v54, %s14933_s9  ;;  %9465 = vrot.lane.b32.xlu1 %v9102_v55, %s14931_s30  ;;  %v7507_v54 = vcombine.low %v24564_v22, %v24563_v33  ;;  %v24565_v55 = vcombine.high %v24549_v27, %v24550_v17  ;;  %v24571_v17 = vld [vmem:[#allocation122_spill] sm:$0xff]  ;;  %v24579_v33 = vld [vmem:[#allocation73_spill] sm:$0xff]  ;;  %v19823_v38 = vrot.slane %v8579_v56, %v24155_v14  ;;  %v19854_v56 = vpop.permute.xlu0 %9387 }
 0x70b   : > { %v8595_v22 = vcombine.low %v24579_v33, %v19118_v35  ;;  %v24583_v35 = vld [vmem:[#allocation72_spill] sm:$0xff] }
 0x70c   : > { %v19760_v27 = vrot.slane %v7507_v54, %v24155_v14  ;;  %v24580_v54 = vcombine.high %v19168_v3, %v19165_v20  ;;  %v24584_v20 = vld [vmem:[#allocation89_spill] sm:$0xff]  ;;  %v24592_v33 = vld [vmem:[#allocation164_spill] sm:$0xff] }
 0x70d   : > { %v24585_v3 = vld [vmem:[#allocation85_spill] sm:$0xff]  ;;  %v19826_v6 = vrot.slane %v8595_v22, %v24155_v14  ;;  %v24593_v22 = vld [vmem:[#allocation163_spill] sm:$0xff] }
 0x70e   : > { %9547 = vrot.lane.b32.xlu0 %v24551_v5, %s14934_s15  ;;  %9485 = vrot.lane.b32.xlu1 %v24552_v45, %s14932_s13  ;;  %v7475_v5 = vcombine.low %v24568_v30, %v24567_v43  ;;  %v19752_v45 = vrot.slane %v7523_v57, %v24155_v14  ;;  %v24578_v57 = vld [vmem:[#allocation119_spill] sm:$0xff]  ;;  %v9155_v30 = vcombine.low %v24585_v3, %v24584_v20 }
 0x70f   : > { %v8019_v46 = vcombine.low %v24578_v57, %v24577_v23 }
 0x710   : > { %v7571_v1 = vcombine.low %v19760_v27, %v19752_v45  ;;  %v19843_v23 = vrot.slane %v9155_v30, %v24155_v14  ;;  %v9052_v30 = vcombine.high %v19707_v58, %v19693_v25  ;;  %v24598_v58 = vld [vmem:[#allocation132_spill] sm:$0xff] }
 0x712   : > { %9551 = vrot.lane.b32.xlu0 %v24555_v61, %s14934_s15  ;;  %9489 = vrot.lane.b32.xlu1 %v24556_v63, %s14932_s13  ;;  %v24572_v61 = vld [vmem:[#allocation121_spill] sm:$0xff]  ;;  %v19891_v25 = vrot.slane %v9052_v30, %v24156_v4  ;;  %v24606_v30 = vld [vmem:[#allocation158_spill] sm:$0xff] }
 0x713   : > { %v8035_v63 = vcombine.low %v24572_v61, %v24571_v17  ;;  %v24586_v17 = vld [vmem:[#allocation140_spill] sm:$0xff] }
 0x714   : > { %v24587_v61 = vld [vmem:[#allocation136_spill] sm:$0xff] }
 0x716   : > { %9555 = vrot.lane.b32.xlu0 %v24557_v53, %s14934_s15  ;;  %9493 = vrot.lane.b32.xlu1 %v24558_v50, %s14932_s13  ;;  %v8051_v53 = vcombine.low %v24574_v28, %v24573_v51  ;;  %v24575_v50 = vcombine.high %v24553_v10, %v24554_v60  ;;  %v8611_v10 = vcombine.low %v19128_v29, %v19132_v24  ;;  %v24588_v51 = vld [vmem:[#allocation87_spill] sm:$0xff] }
 0x717   : > { %v24581_v29 = vcombine.high %v19293_v34, %v19302_v12  ;;  %v7579_v24 = vrot.slane %v7571_v1, %v24156_v4  ;;  %v9104_v34 = vcombine.high %v9059_v31, %v9091_v52  ;;  %v24589_v28 = vld [vmem:[#allocation83_spill] sm:$0xff] }
 0x718   : > { %v19815_v43 = vrot.slane %v8611_v10, %v24155_v14 }
 0x71a   : > { %9559 = vrot.lane.b32.xlu0 %v8969_v40, %s14934_s15  ;;  %9497 = vrot.lane.b32.xlu1 %v9103_v19, %s14932_s13  ;;  %v24576_v40 = vcombine.high %v19011_v9, %v19005_v0  ;;  %v19775_v19 = vrot.slane %v7475_v5, %v24155_v14  ;;  %v19789_v0 = vrot.slane %v8035_v63, %v24155_v14 }
 0x71b   : > { %v19792_v9 = vrot.slane %v8051_v53, %v24155_v14  ;;  %v8970_v5 = vcombine.high %v8930_v7, %v8962_v21  ;;  %v9123_v63 = vcombine.low %v24587_v61, %v24586_v17  ;;  %v9139_v53 = vcombine.low %v24589_v28, %v24588_v51  ;;  %v24599_v51 = vld [vmem:[#allocation130_spill] sm:$0xff] }
 0x71c   : > { %v7539_v60 = vcombine.low %v19775_v19, %v19757_v11  ;;  %v8659_v31 = vcombine.low %v19826_v6, %v19815_v43  ;;  %v24600_v28 = vcombine.low %v24598_v58, %v24599_v51 }
 0x71d   : > { %v8115_v32 = vcombine.low %v19792_v9, %v19782_v44  ;;  %v19849_v10 = vrot.slane %v9123_v63, %v24155_v14 }
 0x71e   : > { %9579 = vrot.lane.b32.xlu0 %v24565_v55, %s14935_s11  ;;  %9517 = vrot.lane.b32.xlu1 %v24566_v8, %s14933_s9  ;;  %v19808_v55 = vrot.slane %v8019_v46, %v24155_v14  ;;  %v8563_v8 = vcombine.low %v24583_v35, %v24582_v37  ;;  %v7547_v12 = vrot.slane %v7539_v60, %v24156_v4 }
 0x71f   : > { %v8123_v21 = vrot.slane %v8115_v32, %v24156_v4  ;;  %v19852_v60 = vrot.slane %v9139_v53, %v24155_v14  ;;  %v8667_v32 = vrot.slane %v8659_v31, %v24156_v4 }
 0x720   : > { %v8083_v62 = vcombine.low %v19808_v55, %v19789_v0  ;;  %v7603_v52 = vcombine.low %v7547_v12, %v7579_v24  ;;  %v19836_v7 = vrot.slane %v8563_v8, %v24155_v14  ;;  %v9084_v8 = vcombine.high %v19696_v59, %v19690_v15  ;;  %v19885_v59 = vpop.permute.xlu0 %9391 }
 0x721   : > { %v9203_v35 = vcombine.low %v19852_v60, %v19843_v23 }
 0x722   : > { %9583 = vrot.lane.b32.xlu0 %v24575_v50, %s14935_s11  ;;  %9521 = vrot.lane.b32.xlu1 %v24576_v40, %s14933_s9  ;;  %v24590_v50 = vld [vmem:[#allocation139_spill] sm:$0xff]  ;;  %v8091_v57 = vrot.slane %v8083_v62, %v24156_v4  ;;  %v8627_v46 = vcombine.low %v19836_v7, %v19823_v38  ;;  %v19883_v15 = vrot.slane %v9084_v8, %v24156_v4 }
 0x723   : > { %v24591_v40 = vld [vmem:[#allocation135_spill] sm:$0xff]  ;;  %v19880_v17 = vrot.slane %v9203_v35, %v24156_v4  ;;  %v24604_v35 = vld [vmem:[#allocation156_spill] sm:$0xff] }
 0x724   : > { %v9107_v1 = vcombine.low %v24591_v40, %v24590_v50  ;;  %v8635_v20 = vrot.slane %v8627_v46, %v24156_v4  ;;  %v19898_v53 = vpop.permute.xlu0 %9395  ;;  %v24601_v50 = vld [vmem:[#allocation161_spill] sm:$0xff]  ;;  %v24602_v40 = vld [vmem:[#allocation160_spill] sm:$0xff] }
 0x726   : > { %9587 = vrot.lane.b32.xlu0 %v24580_v54, %s14935_s11  ;;  %9525 = vrot.lane.b32.xlu1 %v24581_v29, %s14933_s9  ;;  %v24594_v54 = vcombine.low %v24592_v33, %v24593_v22  ;;  %v8147_v29 = vcombine.low %v8091_v57, %v8123_v21  ;;  %v19863_v37 = vrot.slane %v9107_v1, %v24155_v14 }
 0x727   : > { %v8691_v61 = vcombine.low %v8635_v20, %v8667_v32  ;;  %v7659_v1 = vcombine.low %v24602_v40, %v24601_v50  ;;  %v24610_v50 = vld [vmem:[#allocation176_spill] sm:$0xff]  ;;  %v24611_v40 = vld [vmem:[#allocation175_spill] sm:$0xff] }
 0x728   : > { %v9171_v3 = vcombine.low %v19863_v37, %v19849_v10 }
 0x72a   : > { %9591 = vrot.lane.b32.xlu0 %v8970_v5, %s14935_s11  ;;  %9529 = vrot.lane.b32.xlu1 %v9104_v34, %s14933_s9  ;;  %v24595_v5 = vld [vmem:[#allocation180_spill] sm:$0xff]  ;;  %v24596_v34 = vld [vmem:[#allocation179_spill] sm:$0xff]  ;;  %v19888_v63 = vrot.slane %v9171_v3, %v24156_v4 }
 0x72b   : > { %v24597_v62 = vcombine.low %v24595_v5, %v24596_v34  ;;  %v24605_v3 = vld [vmem:[#allocation159_spill] sm:$0xff] }
 0x72c   : > { %v9235_v31 = vcombine.low %v19888_v63, %v19880_v17 }
 0x72e   : > { %9611 = vrot.lane.b32.xlu0 %v7603_v52, %s14921_s8  ;;  %9549 = vrot.lane.b32.xlu1 %v24594_v54, %s14934_s15  ;;  %v9105_v52 = vcombine.low %v19891_v25, %v19883_v15  ;;  %v7604_v54 = vcombine.high %v7547_v12, %v7579_v24  ;;  %v19924_v12 = vrot.slane %v7659_v1, %v24155_v14  ;;  %v24614_v1 = vld [vmem:[#allocation174_spill] sm:$0xff] }
 0x732   : > { %9615 = vrot.lane.b32.xlu0 %v8147_v29, %s14921_s8  ;;  %9553 = vrot.lane.b32.xlu1 %v24597_v62, %s14934_s15  ;;  %v24603_v29 = vld [vmem:[#allocation157_spill] sm:$0xff]  ;;  %v7643_v62 = vcombine.low %v24606_v30, %v24605_v3  ;;  %v24613_v3 = vld [vmem:[#allocation171_spill] sm:$0xff] }
 0x733   : > { %v7627_v8 = vcombine.low %v24604_v35, %v24603_v29  ;;  %v8203_v29 = vcombine.low %v24611_v40, %v24610_v50  ;;  %v8148_v35 = vcombine.high %v8091_v57, %v8123_v21  ;;  %v24617_v57 = vld [vmem:[#allocation170_spill] sm:$0xff]  ;;  %v24619_v40 = vld [vmem:[#allocation27_spill] sm:$0xff] }
 0x735   : > { %v19958_v50 = vrot.slane %v8203_v29, %v24155_v14  ;;  %v24621_v29 = vld [vmem:[#allocation82_spill] sm:$0xff] }
 0x736   : > { %9557 = vrot.lane.b32.xlu1 %v24600_v28, %s14934_s15  ;;  %9619 = vrot.lane.b32.xlu0 %v8691_v61, %s14921_s8  ;;  %v7572_v61 = vcombine.high %v19760_v27, %v19752_v45  ;;  %v24607_v28 = vcombine.high %v24592_v33, %v24593_v22  ;;  %v7540_v45 = vcombine.high %v19775_v19, %v19757_v11 }
 0x737   : > { %v19933_v33 = vrot.slane %v7627_v8, %v24155_v14  ;;  %v19936_v22 = vrot.slane %v7643_v62, %v24155_v14  ;;  %v24616_v11 = vcombine.high %v24595_v5, %v24596_v34  ;;  %v24618_v8 = vld [vmem:[#allocation169_spill] sm:$0xff]  ;;  %v24620_v5 = vld [vmem:[#allocation40_spill] sm:$0xff] }
 0x738   : > { %v8155_v62 = vcombine.low %v24618_v8, %v24617_v57  ;;  %v8747_v34 = vcombine.low %v24620_v5, %v24619_v40  ;;  %v24623_v57 = vld [vmem:[#allocation41_spill] sm:$0xff]  ;;  %v24624_v8 = vld [vmem:[#allocation63_spill] sm:$0xff] }
 0x739   : > { %v7707_v21 = vcombine.low %v19936_v22, %v19924_v12  ;;  %v8731_v40 = vcombine.low %v24624_v8, %v24623_v57  ;;  %v24627_v5 = vld [vmem:[#allocation77_spill] sm:$0xff]  ;;  %v8084_v57 = vcombine.high %v19808_v55, %v19789_v0 }
 0x73a   : > { %9561 = vrot.lane.b32.xlu1 %v9105_v52, %s14934_s15  ;;  %9623 = vrot.lane.b32.xlu0 %v9235_v31, %s14921_s8  ;;  %v24608_v52 = vld [vmem:[#allocation32_spill] sm:$0xff]  ;;  %v24609_v31 = vld [vmem:[#allocation34_spill] sm:$0xff] }
 0x73b   : > { %v7611_v24 = vcombine.low %v24609_v31, %v24608_v52  ;;  %v19943_v31 = vrot.slane %v7572_v61, %v24156_v4  ;;  %v19961_v61 = vrot.slane %v7540_v45, %v24156_v4  ;;  %v8116_v45 = vcombine.high %v19792_v9, %v19782_v44  ;;  %v24626_v9 = vld [vmem:[#allocation81_spill] sm:$0xff] }
 0x73c   : > { %v19908_v46 = vpop.permute.xlu0 %9399 }
 0x73d   : > { %v19951_v19 = vrot.slane %v7611_v24, %v24155_v14  ;;  %v8130_v0 = vrot.slane %v8116_v45, %v24156_v4 }
 0x73e   : > { %9581 = vrot.lane.b32.xlu1 %v24607_v28, %s14935_s11  ;;  %9643 = vrot.lane.b32.xlu0 %v7604_v54, %s14936_s7  ;;  %v24612_v54 = vld [vmem:[#allocation172_spill] sm:$0xff]  ;;  %v24615_v28 = vld [vmem:[#allocation173_spill] sm:$0xff] }
 0x73f   : > { %v8171_v30 = vcombine.low %v24613_v3, %v24612_v54  ;;  %v8187_v52 = vcombine.low %v24615_v28, %v24614_v1  ;;  %v7675_v24 = vcombine.low %v19951_v19, %v19933_v33  ;;  %v24622_v28 = vld [vmem:[#allocation78_spill] sm:$0xff] }
 0x740   : > { %v19930_v27 = vpop.permute.xlu0 %9419 }
 0x741   : > { %v19970_v3 = vrot.slane %v8171_v30, %v24155_v14  ;;  %v19973_v1 = vrot.slane %v8187_v52, %v24155_v14  ;;  %v19989_v30 = vrot.slane %v7707_v21, %v24156_v4  ;;  %v19992_v52 = vrot.slane %v8155_v62, %v24155_v14 }
 0x742   : > { %9585 = vrot.lane.b32.xlu1 %v24616_v11, %s14935_s11  ;;  %9647 = vrot.lane.b32.xlu0 %v8148_v35, %s14936_s7  ;;  %v8692_v35 = vcombine.high %v8635_v20, %v8667_v32  ;;  %v8715_v11 = vcombine.low %v24622_v28, %v24621_v29  ;;  %v24625_v32 = vcombine.high %v24598_v58, %v24599_v51  ;;  %v24628_v51 = vld [vmem:[#allocation141_spill] sm:$0xff] }
 0x743   : > { %v7605_v20 = vcombine.low %v19961_v61, %v19943_v31  ;;  %v8251_v44 = vcombine.low %v19973_v1, %v19958_v50  ;;  %v8699_v29 = vcombine.low %v24627_v5, %v24626_v9  ;;  %v19999_v58 = vrot.slane %v8747_v34, %v24155_v14  ;;  %v24629_v9 = vld [vmem:[#allocation97_spill] sm:$0xff]  ;;  %v24631_v5 = vld [vmem:[#allocation98_spill] sm:$0xff] }
 0x744   : > { %v19965_v54 = vpop.permute.xlu0 %9423  ;;  %v9106_v21 = vcombine.high %v19891_v25, %v19883_v15  ;;  %v9236_v62 = vcombine.high %v19888_v63, %v19880_v17  ;;  %v20012_v8 = vrot.slane %v7675_v24, %v24156_v4  ;;  %v8219_v34 = vcombine.low %v19992_v52, %v19970_v3  ;;  %v24630_v15 = vld [vmem:[#allocation93_spill] sm:$0xff]  ;;  %v24632_v17 = vld [vmem:[#allocation94_spill] sm:$0xff] }
 0x745   : > { %v9259_v25 = vcombine.low %v24630_v15, %v24629_v9  ;;  %v9275_v63 = vcombine.low %v24632_v17, %v24631_v5  ;;  %v8259_v55 = vrot.slane %v8251_v44, %v24156_v4  ;;  %v8660_v24 = vcombine.high %v19826_v6, %v19815_v43  ;;  %v24633_v9 = vld [vmem:[#allocation92_spill] sm:$0xff] }
 0x746   : > { %9589 = vrot.lane.b32.xlu1 %v24625_v32, %s14935_s11  ;;  %9651 = vrot.lane.b32.xlu0 %v8692_v35, %s14936_s7  ;;  %v9291_v35 = vcombine.low %v24628_v51, %v19554_v39  ;;  %v20017_v32 = vrot.slane %v8715_v11, %v24155_v14  ;;  %v20020_v39 = vrot.slane %v8731_v40, %v24155_v14 }
 0x747   : > { %v7739_v11 = vcombine.low %v20012_v8, %v19989_v30  ;;  %v20035_v40 = vrot.slane %v8699_v29, %v24155_v14  ;;  %v8098_v44 = vrot.slane %v8084_v57, %v24156_v4  ;;  %v8227_v43 = vrot.slane %v8219_v34, %v24156_v4 }
 0x748   : > { %v20003_v28 = vpop.permute.xlu0 %9427  ;;  %v8795_v51 = vcombine.low %v20020_v39, %v19999_v58  ;;  %v8628_v6 = vcombine.high %v19836_v7, %v19823_v38  ;;  %v20053_v5 = vrot.slane %v9259_v25, %v24155_v14  ;;  %v20056_v17 = vrot.slane %v9275_v63, %v24155_v14 }
 0x749   : > { %v8763_v29 = vcombine.low %v20035_v40, %v20017_v32  ;;  %v8674_v57 = vrot.slane %v8660_v24, %v24156_v4  ;;  %v8283_v34 = vcombine.low %v8227_v43, %v8259_v55  ;;  %v8149_v38 = vcombine.low %v8098_v44, %v8130_v0 }
 0x74a   : > { %9593 = vrot.lane.b32.xlu1 %v9106_v21, %s14935_s11  ;;  %9655 = vrot.lane.b32.xlu0 %v9236_v62, %s14936_s7  ;;  %v24634_v21 = vld [vmem:[#allocation96_spill] sm:$0xff]  ;;  %v20042_v62 = vrot.slane %v9291_v35, %v24155_v14  ;;  %v20058_v35 = vpop.permute.xlu1 %9389  ;;  %v8803_v7 = vrot.slane %v8795_v51, %v24156_v4  ;;  %v9204_v25 = vcombine.high %v19852_v60, %v19843_v23 }
 0x74b   : > { %v9243_v15 = vcombine.low %v24634_v21, %v24633_v9  ;;  %24635 = vst [vmem:[#allocation108_spill] sm:$0xff] %v20058_v35  ;;  %v9172_v24 = vcombine.high %v19863_v37, %v19849_v10 }
 0x74c   : > { %v20044_v45 = vpop.permute.xlu0 %9431  ;;  %v9339_v63 = vcombine.low %v20056_v17, %v20042_v62  ;;  %v9218_v23 = vrot.slane %v9204_v25, %v24156_v4 }
 0x74d   : > { %v20067_v9 = vrot.slane %v9243_v15, %v24155_v14  ;;  %v9186_v42 = vrot.slane %v9172_v24, %v24156_v4  ;;  %v7606_v24 = vcombine.high %v19961_v61, %v19943_v31  ;;  %v7708_v31 = vcombine.high %v19936_v22, %v19924_v12  ;;  %v24685_v14 = vld [vmem:[#allocation133_spill] sm:$0xff] }
 0x74e   : > { %9613 = vrot.lane.b32.xlu1 %v7739_v11, %s14921_s8  ;;  %9675 = vrot.lane.b32.xlu0 %v7605_v20, %s14937_s1  ;;  %v8642_v11 = vrot.slane %v8628_v6, %v24156_v4  ;;  %v8771_v20 = vrot.slane %v8763_v29, %v24156_v4  ;;  %v9347_v60 = vrot.slane %v9339_v63, %v24156_v4  ;;  %v20083_v15 = vpop.permute.xlu1 %9393 }
 0x74f   : > { %v9307_v51 = vcombine.low %v20067_v9, %v20053_v5  ;;  %24636 = vst [vmem:[#allocation110_spill] sm:$0xff] %v20083_v15  ;;  %v9238_v22 = vcombine.high %v9186_v42, %v9218_v23 }
 0x750   : > { %v20071_v21 = vpop.permute.xlu0 %9451  ;;  %v8827_v6 = vcombine.low %v8771_v20, %v8803_v7  ;;  %v8693_v29 = vcombine.low %v8642_v11, %v8674_v57 }
 0x751   : > { %v9315_v10 = vrot.slane %v9307_v51, %v24156_v4  ;;  %v7740_v51 = vcombine.high %v20012_v8, %v19989_v30  ;;  %v8694_v8 = vcombine.high %v8642_v11, %v8674_v57 }
 0x752   : > { %9617 = vrot.lane.b32.xlu1 %v8283_v34, %s14921_s8  ;;  %9679 = vrot.lane.b32.xlu0 %v8149_v38, %s14937_s1  ;;  %v20091_v37 = vpop.permute.xlu1 %9397  ;;  %v9237_v38 = vcombine.low %v9186_v42, %v9218_v23 }
 0x753   : > { %24637 = vst [vmem:[#allocation146_spill] sm:$0xff] %v20091_v37  ;;  %v9371_v25 = vcombine.low %v9315_v10, %v9347_v60 }
 0x754   : > { %v20085_v16 = vpop.permute.xlu0 %9455 }
 0x756   : > { %9621 = vrot.lane.b32.xlu1 %v8827_v6, %s14921_s8  ;;  %9683 = vrot.lane.b32.xlu0 %v8693_v29, %s14937_s1 }
 0x758   : > { %v20093_v34 = vpop.permute.xlu0 %9459 }
 0x75a   : > { %9687 = vrot.lane.b32.xlu0 %v9237_v38, %s14937_s1  ;;  %9625 = vrot.lane.b32.xlu1 %v9371_v25, %s14921_s8  ;;  %v8150_v38 = vcombine.high %v8098_v44, %v8130_v0  ;;  %v8284_v25 = vcombine.high %v8227_v43, %v8259_v55  ;;  %v7722_v0 = vrot.slane %v7708_v31, %v24156_v4  ;;  %v24648_v31 = vld [vmem:[#allocation67_spill] sm:$0xff] }
 0x75b   : > { %v8252_v55 = vcombine.high %v19973_v1, %v19958_v50  ;;  %v9372_v43 = vcombine.high %v9315_v10, %v9347_v60  ;;  %v8796_v50 = vcombine.high %v20020_v39, %v19999_v58  ;;  %v9340_v39 = vcombine.high %v20056_v17, %v20042_v62 }
 0x75c   : > { %v20097_v63 = vpop.permute.xlu0 %9463  ;;  %v20099_v26 = vpop.permute.xlu1 %9401 }
 0x75d   : > { %24638 = vst [vmem:[#allocation70_spill] sm:$0xff] %v20099_v26  ;;  %v8810_v58 = vrot.slane %v8796_v50, %v24156_v4  ;;  %v24692_v26 = vcombine.low %v19598_v36, %v19588_v41 }
 0x75e   : > { %9707 = vrot.lane.b32.xlu0 %v7606_v24, %s14938_s17  ;;  %9645 = vrot.lane.b32.xlu1 %v7740_v51, %s14936_s7  ;;  %v8828_v24 = vcombine.high %v8771_v20, %v8803_v7  ;;  %v7676_v51 = vcombine.high %v19951_v19, %v19933_v33  ;;  %v8220_v33 = vcombine.high %v19992_v52, %v19970_v3  ;;  %v24643_v3 = vld [vmem:[#allocation115_spill] sm:$0xff]  ;;  %v24644_v52 = vld [vmem:[#allocation116_spill] sm:$0xff] }
 0x75f   : > { %v8266_v19 = vrot.slane %v8252_v55, %v24156_v4  ;;  %v8764_v20 = vcombine.high %v20035_v40, %v20017_v32  ;;  %v24645_v23 = vcombine.low %v24643_v3, %v24644_v52  ;;  %v9308_v40 = vcombine.high %v20067_v9, %v20053_v5 }
 0x760   : > { %v20107_v6 = vpop.permute.xlu0 %9483  ;;  %v20109_v29 = vpop.permute.xlu1 %9421  ;;  %v7690_v57 = vrot.slane %v7676_v51, %v24156_v4  ;;  %v8234_v11 = vrot.slane %v8220_v33, %v24156_v4 }
 0x761   : > { %24639 = vst [vmem:[#allocation43_spill] sm:$0xff] %v20109_v29  ;;  %v8778_v32 = vrot.slane %v8764_v20, %v24156_v4  ;;  %v9322_v55 = vrot.slane %v9308_v40, %v24156_v4  ;;  %v24656_v20 = vld [vmem:[#allocation88_spill] sm:$0xff] }
 0x762   : > { %9711 = vrot.lane.b32.xlu0 %v8150_v38, %s14938_s17  ;;  %9649 = vrot.lane.b32.xlu1 %v8284_v25, %s14936_s7  ;;  %v7741_v42 = vcombine.low %v7690_v57, %v7722_v0  ;;  %v8285_v38 = vcombine.low %v8234_v11, %v8266_v19  ;;  %v24647_v25 = vld [vmem:[#allocation127_spill] sm:$0xff]  ;;  %v7742_v40 = vcombine.high %v7690_v57, %v7722_v0 }
 0x763   : > { %v8829_v51 = vcombine.low %v8778_v32, %v8810_v58 }
 0x764   : > { %v20115_v61 = vpop.permute.xlu0 %9487  ;;  %v20117_v30 = vpop.permute.xlu1 %9425 }
 0x765   : > { %24640 = vst [vmem:[#allocation147_spill] sm:$0xff] %v20117_v30 }
 0x766   : > { %9715 = vrot.lane.b32.xlu0 %v8694_v8, %s14938_s17  ;;  %9653 = vrot.lane.b32.xlu1 %v8828_v24, %s14936_s7  ;;  %v24649_v8 = vcombine.low %v24647_v25, %v24648_v31  ;;  %v9354_v24 = vrot.slane %v9340_v39, %v24156_v4 }
 0x768   : > { %v20126_v44 = vpop.permute.xlu0 %9491  ;;  %v20128_v12 = vpop.permute.xlu1 %9429  ;;  %v9373_v50 = vcombine.low %v9322_v55, %v9354_v24 }
 0x769   : > { %24641 = vst [vmem:[#allocation144_spill] sm:$0xff] %v20128_v12 }
 0x76a   : > { %9719 = vrot.lane.b32.xlu0 %v9238_v22, %s14938_s17  ;;  %9657 = vrot.lane.b32.xlu1 %v9372_v43, %s14936_s7  ;;  %v24651_v22 = vld [vmem:[#allocation75_spill] sm:$0xff] }
 0x76b   : > { %v24652_v43 = vld [vmem:[#allocation79_spill] sm:$0xff] }
 0x76c   : > { %v20138_v1 = vpop.permute.xlu0 %9495  ;;  %v20140_v7 = vpop.permute.xlu1 %9433  ;;  %v24653_v5 = vcombine.low %v24651_v22, %v24652_v43 }
 0x76d   : > { %24642 = vst [vmem:[#allocation145_spill] sm:$0xff] %v20140_v7 }
 0x76e   : > { %9739 = vrot.lane.b32.xlu0 %v24645_v23, %s14939_s14  ;;  %9677 = vrot.lane.b32.xlu1 %v7741_v42, %s14937_s1  ;;  %v24655_v42 = vld [vmem:[#allocation95_spill] sm:$0xff] }
 0x76f   : > { %v24657_v23 = vcombine.low %v24655_v42, %v24656_v20 }
 0x770   : > { %v20153_v60 = vpop.permute.xlu0 %9515  ;;  %v20155_v10 = vpop.permute.xlu1 %9453 }
 0x771   : > { %24646 = vst [vmem:[#allocation148_spill] sm:$0xff] %v20155_v10  ;;  %v24733_v10 = vld [vmem:[#allocation59_spill] sm:$0xff] }
 0x772   : > { %9743 = vrot.lane.b32.xlu0 %v24649_v8, %s14939_s14  ;;  %9681 = vrot.lane.b32.xlu1 %v8285_v38, %s14937_s1  ;;  %v24659_v8 = vcombine.high %v24643_v3, %v24644_v52  ;;  %v8830_v3 = vcombine.high %v8778_v32, %v8810_v58  ;;  %v24663_v52 = vcombine.high %v24651_v22, %v24652_v43  ;;  %v24668_v22 = vld [vmem:[#allocation118_spill] sm:$0xff]  ;;  %v24669_v43 = vld [vmem:[#allocation117_spill] sm:$0xff] }
 0x774   : > { %v20166_v62 = vpop.permute.xlu0 %9519  ;;  %v20168_v17 = vpop.permute.xlu1 %9457 }
 0x775   : > { %24650 = vst [vmem:[#allocation152_spill] sm:$0xff] %v20168_v17  ;;  %v24726_v17 = vld [vmem:[#allocation57_spill] sm:$0xff] }
 0x776   : > { %9747 = vrot.lane.b32.xlu0 %v24653_v5, %s14939_s14  ;;  %9685 = vrot.lane.b32.xlu1 %v8829_v51, %s14937_s1 }
 0x778   : > { %v20176_v9 = vpop.permute.xlu0 %9523  ;;  %v20178_v33 = vpop.permute.xlu1 %9461 }
 0x779   : > { %24654 = vst [vmem:[#allocation142_spill] sm:$0xff] %v20178_v33 }
 0x77a   : > { %9751 = vrot.lane.b32.xlu0 %v24657_v23, %s14939_s14  ;;  %9689 = vrot.lane.b32.xlu1 %v9373_v50, %s14937_s1  ;;  %v8286_v23 = vcombine.high %v8234_v11, %v8266_v19  ;;  %v24661_v50 = vcombine.high %v24647_v25, %v24648_v31  ;;  %v9374_v25 = vcombine.high %v9322_v55, %v9354_v24  ;;  %v24672_v24 = vld [vmem:[#allocation166_spill] sm:$0xff] }
 0x77b   : > { %v24665_v31 = vcombine.high %v24655_v42, %v24656_v20  ;;  %v24675_v20 = vld [vmem:[#allocation128_spill] sm:$0xff] }
 0x77c   : > { %v20185_v39 = vpop.permute.xlu0 %9527  ;;  %v20187_v38 = vpop.permute.xlu1 %9465 }
 0x77d   : > { %24658 = vst [vmem:[#allocation153_spill] sm:$0xff] %v20187_v38 }
 0x77e   : > { %9771 = vrot.lane.b32.xlu0 %v24659_v8, %s14940_s26  ;;  %9709 = vrot.lane.b32.xlu1 %v7742_v40, %s14938_s17  ;;  %v24670_v40 = vcombine.low %v24668_v22, %v24669_v43  ;;  %v24671_v8 = vld [vmem:[#allocation165_spill] sm:$0xff] }
 0x77f   : > { %v24673_v55 = vcombine.low %v24671_v8, %v24672_v24 }
 0x780   : > { %v20194_v51 = vpop.permute.xlu0 %9547  ;;  %v20196_v5 = vpop.permute.xlu1 %9485 }
 0x781   : > { %24660 = vst [vmem:[#allocation149_spill] sm:$0xff] %v20196_v5 }
 0x782   : > { %9775 = vrot.lane.b32.xlu0 %v24661_v50, %s14940_s26  ;;  %9713 = vrot.lane.b32.xlu1 %v8286_v23, %s14938_s17  ;;  %v24676_v50 = vld [vmem:[#allocation71_spill] sm:$0xff] }
 0x784   : > { %v20203_v0 = vpop.permute.xlu0 %9551  ;;  %v20205_v57 = vpop.permute.xlu1 %9489 }
 0x785   : > { %24662 = vst [vmem:[#allocation150_spill] sm:$0xff] %v20205_v57 }
 0x786   : > { %9779 = vrot.lane.b32.xlu0 %v24663_v52, %s14940_s26  ;;  %9717 = vrot.lane.b32.xlu1 %v8830_v3, %s14938_s17  ;;  %v24677_v3 = vcombine.low %v24675_v20, %v24676_v50  ;;  %v24678_v52 = vld [vmem:[#allocation183_spill] sm:$0xff] }
 0x788   : > { %v20212_v19 = vpop.permute.xlu0 %9555  ;;  %v20214_v11 = vpop.permute.xlu1 %9493 }
 0x789   : > { %24664 = vst [vmem:[#allocation154_spill] sm:$0xff] %v20214_v11 }
 0x78a   : > { %9783 = vrot.lane.b32.xlu0 %v24665_v31, %s14940_s26  ;;  %9721 = vrot.lane.b32.xlu1 %v9374_v25, %s14938_s17  ;;  %v24679_v25 = vld [vmem:[#allocation181_spill] sm:$0xff] }
 0x78b   : > { %v24680_v31 = vcombine.low %v24678_v52, %v24679_v25 }
 0x78c   : > { %v20221_v58 = vpop.permute.xlu0 %9559  ;;  %v20223_v32 = vpop.permute.xlu1 %9497 }
 0x78d   : > { %24666 = vst [vmem:[#allocation151_spill] sm:$0xff] %v20221_v58  ;;  %24667 = vst [vmem:[#allocation155_spill] sm:$0xff] %v20223_v32  ;;  %v24686_v32 = vld [vmem:[#allocation137_spill] sm:$0xff] }
 0x78e   : > { %9803 = vrot.lane.b32.xlu0 %v24670_v40, %s14941_s29  ;;  %9741 = vrot.lane.b32.xlu1 %v24673_v55, %s14939_s14  ;;  %v24682_v55 = vld [vmem:[#allocation80_spill] sm:$0xff]  ;;  %v24687_v38 = vcombine.low %v24685_v14, %v24686_v32 }
 0x78f   : > { %v24684_v4 = vcombine.low %v24682_v55, %v24683_v49 }
 0x790   : > { %v20233_v23 = vpop.permute.xlu0 %9579  ;;  %v20235_v42 = vpop.permute.xlu1 %9517 }
 0x791   : > { %24674 = vst [vmem:[#allocation113_spill] sm:$0xff] %v20235_v42  ;;  %v24730_v42 = vld [vmem:[#allocation58_spill] sm:$0xff] }
 0x792   : > { %9807 = vrot.lane.b32.xlu0 %v24677_v3, %s14941_s29  ;;  %9745 = vrot.lane.b32.xlu1 %v24680_v31, %s14939_s14  ;;  %v24689_v31 = vld [vmem:[#allocation84_spill] sm:$0xff] }
 0x793   : > { %v24691_v18 = vcombine.low %v24689_v31, %v24690_v13 }
 0x794   : > { %v20245_v40 = vpop.permute.xlu0 %9583  ;;  %v20247_v2 = vpop.permute.xlu1 %9521 }
 0x795   : > { %24681 = vst [vmem:[#allocation111_spill] sm:$0xff] %v20247_v2  ;;  %v24722_v2 = vld [vmem:[#allocation134_spill] sm:$0xff] }
 0x796   : > { %9811 = vrot.lane.b32.xlu0 %v24684_v4, %s14941_s29  ;;  %9749 = vrot.lane.b32.xlu1 %v24687_v38, %s14939_s14  ;;  %v24695_v38 = vcombine.high %v24668_v22, %v24669_v43 }
 0x798   : > { %v20257_v3 = vpop.permute.xlu0 %9587  ;;  %v20259_v7 = vpop.permute.xlu1 %9525 }
 0x799   : > { %24688 = vst [vmem:[#allocation125_spill] sm:$0xff] %v20259_v7  ;;  %v24696_v7 = vcombine.high %v24671_v8, %v24672_v24  ;;  %v24702_v8 = vcombine.high %v24685_v14, %v24686_v32  ;;  %v24703_v24 = vld [vmem:[#allocation50_spill] sm:$0xff]  ;;  %v24710_v32 = vld [vmem:[#allocation33_spill] sm:$0xff] }
 0x79a   : > { %9815 = vrot.lane.b32.xlu0 %v24691_v18, %s14941_s29  ;;  %9753 = vrot.lane.b32.xlu1 %v24692_v26, %s14939_s14  ;;  %v24698_v26 = vcombine.high %v24675_v20, %v24676_v50  ;;  %v24704_v20 = vld [vmem:[#allocation42_spill] sm:$0xff] }
 0x79b   : > { %v5639_v50 = vadd.f32 %v24704_v20, %v24703_v24 }
 0x79c   : > { %v20269_v4 = vpop.permute.xlu0 %9591  ;;  %v20271_v11 = vpop.permute.xlu1 %9529 }
 0x79d   : > { %24693 = vst [vmem:[#allocation123_spill] sm:$0xff] %v20269_v4  ;;  %24694 = vst [vmem:[#allocation114_spill] sm:$0xff] %v20271_v11  ;;  %v24699_v11 = vcombine.high %v24678_v52, %v24679_v25  ;;  %v24706_v52 = vcombine.high %v24689_v31, %v24690_v13  ;;  %v24715_v31 = vld [vmem:[#allocation19_spill] sm:$0xff]  ;;  %v10054_v15 = vrot.slane %v5639_v50, %v24730_v42 }
 0x79e   : > { %9835 = vrot.lane.b32.xlu0 %v24695_v38, %s14942_s16  ;;  %9773 = vrot.lane.b32.xlu1 %v24696_v7, %s14940_s26  ;;  %v24701_v7 = vcombine.high %v24682_v55, %v24683_v49  ;;  %v24707_v49 = vcombine.high %v19598_v36, %v19588_v41  ;;  %v10010_v55 = vrot.slane %v5639_v50, %v24710_v32  ;;  %v24716_v41 = vld [vmem:[#allocation185_spill] sm:$0xff]  ;;  %v24717_v36 = vld [vmem:[#allocation182_spill] sm:$0xff] }
 0x79f   : > { %v10065_v29 = vrot.slane %v5639_v50, %v24733_v10 }
 0x7a0   : > { %v20281_v18 = vpop.permute.xlu0 %9611  ;;  %v20283_v33 = vpop.permute.xlu1 %9549 }
 0x7a1   : > { %24697 = vst [vmem:[#allocation112_spill] sm:$0xff] %v20283_v33  ;;  %v10043_v33 = vrot.slane %v5639_v50, %v24726_v17 }
 0x7a2   : > { %9839 = vrot.lane.b32.xlu0 %v24698_v26, %s14942_s16  ;;  %9777 = vrot.lane.b32.xlu1 %v24699_v11, %s14940_s26  ;;  %v24711_v26 = vld [vmem:[#allocation168_spill] sm:$0xff] }
 0x7a4   : > { %v20293_v22 = vpop.permute.xlu0 %9615  ;;  %v20295_v43 = vpop.permute.xlu1 %9553 }
 0x7a5   : > { %24700 = vst [vmem:[#allocation126_spill] sm:$0xff] %v20295_v43  ;;  %v24720_v43 = vld [vmem:[#allocation56_spill] sm:$0xff] }
 0x7a6   : > { %9843 = vrot.lane.b32.xlu0 %v24701_v7, %s14942_s16  ;;  %9781 = vrot.lane.b32.xlu1 %v24702_v8, %s14940_s26  ;;  %v24712_v7 = vld [vmem:[#allocation167_spill] sm:$0xff]  ;;  %v10032_v12 = vrot.slane %v5639_v50, %v24720_v43 }
 0x7a7   : > { %v24713_v8 = vcombine.low %v24711_v26, %v24712_v7 }
 0x7a8   : > { %v20307_v38 = vpop.permute.xlu0 %9619  ;;  %v20309_v11 = vpop.permute.xlu1 %9557 }
 0x7a9   : > { %24705 = vst [vmem:[#allocation124_spill] sm:$0xff] %v20309_v11 }
 0x7aa   : > { %9847 = vrot.lane.b32.xlu0 %v24706_v52, %s14942_s16  ;;  %9785 = vrot.lane.b32.xlu1 %v24707_v49, %s14940_s26  ;;  %v10021_v52 = vrot.slane %v5639_v50, %v24715_v31  ;;  %v24718_v49 = vcombine.low %v24716_v41, %v24717_v36 }
 0x7ac   : > { %v20319_v25 = vpop.permute.xlu0 %9623  ;;  %v20321_v14 = vpop.permute.xlu1 %9561 }
 0x7ad   : > { %24708 = vst [vmem:[#allocation106_spill] sm:$0xff] %v20319_v25  ;;  %24709 = vst [vmem:[#allocation105_spill] sm:$0xff] %v20321_v14 }
 0x7ae   : > { %10012 = vbcast.lane.b32.xlu0 %v10010_v55, 256  ;;  %9805 = vrot.lane.b32.xlu1 %v24713_v8, %s14941_s29  ;;  %v24721_v8 = vld [vmem:[#allocation138_spill] sm:$0xff] }
 0x7af   : > { %v24723_v37 = vcombine.low %v24721_v8, %v24722_v2 }
 0x7b0   : > { %v20328_v24 = vpop.permute.xlu0 %9643  ;;  %v20330_v13 = vpop.permute.xlu1 %9581 }
 0x7b1   : > { %24714 = vst [vmem:[#allocation102_spill] sm:$0xff] %v20330_v13 }
 0x7b2   : > { %10023 = vbcast.lane.b32.xlu0 %v10021_v52, 256  ;;  %9809 = vrot.lane.b32.xlu1 %v24718_v49, %s14941_s29  ;;  %v24727_v49 = vcombine.low %v19601_v48, %v19591_v47 }
 0x7b4   : > { %v20337_v14 = vpop.permute.xlu0 %9647  ;;  %v20339_v11 = vpop.permute.xlu1 %9585 }
 0x7b5   : > { %24719 = vst [vmem:[#allocation101_spill] sm:$0xff] %v20339_v11 }
 0x7b6   : > { %10034 = vbcast.lane.b32.xlu0 %v10032_v12, 256  ;;  %9813 = vrot.lane.b32.xlu1 %v24723_v37, %s14941_s29  ;;  %v24731_v37 = vcombine.high %v24711_v26, %v24712_v7  ;;  %v24737_v26 = vcombine.high %v24721_v8, %v24722_v2  ;;  %v24738_v7 = vld [vmem:[#allocation61_spill] sm:$0xff] }
 0x7b8   : > { %v20346_v57 = vpop.permute.xlu0 %9651  ;;  %v20348_v13 = vpop.permute.xlu1 %9589 }
 0x7b9   : > { %24724 = vst [vmem:[#allocation104_spill] sm:$0xff] %v20346_v57  ;;  %24725 = vst [vmem:[#allocation103_spill] sm:$0xff] %v20348_v13 }
 0x7ba   : > { %10045 = vbcast.lane.b32.xlu0 %v10043_v33, 256  ;;  %9817 = vrot.lane.b32.xlu1 %v24727_v49, %s14941_s29  ;;  %v24734_v49 = vcombine.high %v24716_v41, %v24717_v36  ;;  %v24741_v41 = vld [vmem:[#allocation53_spill] sm:$0xff] }
 0x7bb   : > { %v10087_v36 = vrot.slane %v5639_v50, %v24741_v41 }
 0x7bc   : > { %v20355_v11 = vpop.permute.xlu0 %9655  ;;  %v20357_v30 = vpop.permute.xlu1 %9593 }
 0x7bd   : > { %24728 = vst [vmem:[#allocation100_spill] sm:$0xff] %v20355_v11  ;;  %24729 = vst [vmem:[#allocation99_spill] sm:$0xff] %v20357_v30  ;;  %v24736_v11 = vld [vmem:[#allocation66_spill] sm:$0xff] }
 0x7be   : > { %10056 = vbcast.lane.b32.xlu0 %v10054_v15, 256  ;;  %9837 = vrot.lane.b32.xlu1 %v24731_v37, %s14942_s16  ;;  %v10076_v25 = vrot.slane %v5639_v50, %v24736_v11  ;;  %v5640_v37 = vadd.f32 %v24704_v20, %v24738_v7 }
 0x7c0   : > { %v20364_v13 = vpop.permute.xlu0 %9675  ;;  %v20366_v5 = vpop.permute.xlu1 %9613  ;;  %v10098_v2 = vrot.slane %v5640_v37, %v24710_v32  ;;  %v10109_v50 = vrot.slane %v5640_v37, %v24715_v31 }
 0x7c1   : > { %24732 = vst [vmem:[#allocation69_spill] sm:$0xff] %v20366_v5 }
 0x7c2   : > { %10067 = vbcast.lane.b32.xlu0 %v10065_v29, 256  ;;  %9841 = vrot.lane.b32.xlu1 %v24734_v49, %s14942_s16  ;;  %v24742_v49 = vcombine.high %v19601_v48, %v19591_v47  ;;  %v10120_v48 = vrot.slane %v5640_v37, %v24720_v43 }
 0x7c4   : > { %v20373_v30 = vpop.permute.xlu0 %9679  ;;  %v20375_v35 = vpop.permute.xlu1 %9617 }
 0x7c5   : > { %24735 = vst [vmem:[#allocation44_spill] sm:$0xff] %v20375_v35 }
 0x7c6   : > { %10078 = vbcast.lane.b32.xlu0 %v10076_v25, 256  ;;  %9845 = vrot.lane.b32.xlu1 %v24737_v26, %s14942_s16 }
 0x7c8   : > { %v20384_v5 = vpop.permute.xlu0 %9683  ;;  %v20386_v4 = vpop.permute.xlu1 %9621 }
 0x7c9   : > { %24739 = vst [vmem:[#allocation122_spill] sm:$0xff] %v20384_v5  ;;  %24740 = vst [vmem:[#allocation121_spill] sm:$0xff] %v20386_v4 }
 0x7ca   : > { %10089 = vbcast.lane.b32.xlu0 %v10087_v36, 256  ;;  %9849 = vrot.lane.b32.xlu1 %v24742_v49, %s14942_s16 }
 0x7cc   : > { %v20393_v35 = vpop.permute.xlu0 %9687  ;;  %v20395_v58 = vpop.permute.xlu1 %9625 }
 0x7cd   : > { %24743 = vst [vmem:[#allocation68_spill] sm:$0xff] %v20393_v35  ;;  %24744 = vst [vmem:[#allocation46_spill] sm:$0xff] %v20395_v58 }
 0x7ce   : > { %10100 = vbcast.lane.b32.xlu0 %v10098_v2, 256  ;;  %10016 = vbcast.lane.b32.xlu1 %v10010_v55, 264  ;;  %v10131_v55 = vrot.slane %v5640_v37, %v24726_v17 }
 0x7d0   : > { %v20398_v20 = vpop.permute.xlu0 %9707  ;;  %v20400_v8 = vpop.permute.xlu1 %9645 }
 0x7d1   : > { %24745 = vst [vmem:[#allocation120_spill] sm:$0xff] %v20400_v8 }
 0x7d2   : > { %10111 = vbcast.lane.b32.xlu0 %v10109_v50, 256  ;;  %10027 = vbcast.lane.b32.xlu1 %v10021_v52, 264  ;;  %v10142_v52 = vrot.slane %v5640_v37, %v24730_v42 }
 0x7d4   : > { %v20403_v26 = vpop.permute.xlu0 %9711  ;;  %v20405_v47 = vpop.permute.xlu1 %9649 }
 0x7d5   : > { %24746 = vst [vmem:[#allocation119_spill] sm:$0xff] %v20405_v47 }
 0x7d6   : > { %10122 = vbcast.lane.b32.xlu0 %v10120_v48, 256  ;;  %10038 = vbcast.lane.b32.xlu1 %v10032_v12, 264  ;;  %v10153_v12 = vrot.slane %v5640_v37, %v24733_v10 }
 0x7d8   : > { %v20408_v7 = vpop.permute.xlu0 %9715  ;;  %v20410_v49 = vpop.permute.xlu1 %9653 }
 0x7d9   : > { %24747 = vst [vmem:[#allocation73_spill] sm:$0xff] %v20408_v7  ;;  %24748 = vst [vmem:[#allocation184_spill] sm:$0xff] %v20410_v49 }
 0x7da   : > { %10133 = vbcast.lane.b32.xlu0 %v10131_v55, 256  ;;  %10049 = vbcast.lane.b32.xlu1 %v10043_v33, 264  ;;  %v10164_v33 = vrot.slane %v5640_v37, %v24736_v11 }
 0x7dc   : > { %v20413_v58 = vpop.permute.xlu0 %9719  ;;  %v20415_v4 = vpop.permute.xlu1 %9657 }
 0x7dd   : > { %24749 = vst [vmem:[#allocation72_spill] sm:$0xff] %v20413_v58  ;;  %24750 = vst [vmem:[#allocation89_spill] sm:$0xff] %v20415_v4  ;;  %v24753_v4 = vld [vmem:[#allocation37_spill] sm:$0xff]  ;;  %v24754_v58 = vld [vmem:[#allocation48_spill] sm:$0xff] }
 0x7de   : > { %10144 = vbcast.lane.b32.xlu0 %v10142_v52, 256  ;;  %10060 = vbcast.lane.b32.xlu1 %v10054_v15, 264  ;;  %v5647_v7 = vadd.f32 %v24754_v58, %v24753_v4 }
 0x7e0   : > { %v20418_v47 = vpop.permute.xlu0 %9739  ;;  %v20420_v8 = vpop.permute.xlu1 %9677  ;;  %v20443_v57 = vrot.slane %v5647_v7, %v24710_v32 }
 0x7e1   : > { %24751 = vst [vmem:[#allocation85_spill] sm:$0xff] %v20420_v8  ;;  %v20435_v8 = vrot.slane %v5640_v37, %v24741_v41  ;;  %v20451_v37 = vrot.slane %v5647_v7, %v24715_v31 }
 0x7e2   : > { %10155 = vbcast.lane.b32.xlu0 %v10153_v12, 256  ;;  %10071 = vbcast.lane.b32.xlu1 %v10065_v29, 264 }
 0x7e4   : > { %v20423_v49 = vpop.permute.xlu0 %9743  ;;  %v20425_v35 = vpop.permute.xlu1 %9681 }
 0x7e5   : > { %24752 = vst [vmem:[#allocation140_spill] sm:$0xff] %v20425_v35 }
 0x7e6   : > { %10166 = vbcast.lane.b32.xlu0 %v10164_v33, 256  ;;  %10082 = vbcast.lane.b32.xlu1 %v10076_v25, 264 }
 0x7e8   : > { %v20430_v15 = vpop.permute.xlu0 %9747  ;;  %v20432_v5 = vpop.permute.xlu1 %9685 }
 0x7e9   : > { %24755 = vst [vmem:[#allocation136_spill] sm:$0xff] %v20430_v15  ;;  %24756 = vst [vmem:[#allocation87_spill] sm:$0xff] %v20432_v5 }
 0x7ea   : > { %10177 = vbcast.lane.b32.xlu0 %v20435_v8, 256  ;;  %10093 = vbcast.lane.b32.xlu1 %v10087_v36, 264 }
 0x7ec   : > { %v20438_v29 = vpop.permute.xlu0 %9751  ;;  %v20440_v35 = vpop.permute.xlu1 %9689 }
 0x7ed   : > { %24757 = vst [vmem:[#allocation83_spill] sm:$0xff] %v20438_v29  ;;  %24758 = vst [vmem:[#allocation139_spill] sm:$0xff] %v20440_v35  ;;  %v20459_v35 = vrot.slane %v5647_v7, %v24720_v43 }
 0x7ee   : > { %10188 = vbcast.lane.b32.xlu0 %v20443_v57, 256  ;;  %10104 = vbcast.lane.b32.xlu1 %v10098_v2, 264 }
 0x7f0   : > { %v20446_v4 = vpop.permute.xlu0 %9771  ;;  %v20448_v25 = vpop.permute.xlu1 %9709 }
 0x7f1   : > { %24759 = vst [vmem:[#allocation135_spill] sm:$0xff] %v20448_v25  ;;  %v20467_v25 = vrot.slane %v5647_v7, %v24726_v17  ;;  %v20483_v17 = vrot.slane %v5647_v7, %v24733_v10 }
 0x7f2   : > { %10199 = vbcast.lane.b32.xlu0 %v20451_v37, 256  ;;  %10115 = vbcast.lane.b32.xlu1 %v10109_v50, 264 }
 0x7f3   : > { %24766 = vst [vmem:[#allocation161_spill] sm:$0xff] %v20483_v17 }
 0x7f4   : > { %v20454_v36 = vpop.permute.xlu0 %9775  ;;  %v20456_v5 = vpop.permute.xlu1 %9713 }
 0x7f5   : > { %24760 = vst [vmem:[#allocation164_spill] sm:$0xff] %v20456_v5  ;;  %v20475_v5 = vrot.slane %v5647_v7, %v24730_v42 }
 0x7f6   : > { %10210 = vbcast.lane.b32.xlu0 %v20459_v35, 256  ;;  %10126 = vbcast.lane.b32.xlu1 %v10120_v48, 264 }
 0x7f7   : > { %24764 = vst [vmem:[#allocation132_spill] sm:$0xff] %v20475_v5 }
 0x7f8   : > { %v20462_v2 = vpop.permute.xlu0 %9779  ;;  %v20464_v29 = vpop.permute.xlu1 %9717 }
 0x7f9   : > { %24761 = vst [vmem:[#allocation163_spill] sm:$0xff] %v20464_v29 }
 0x7fa   : > { %10221 = vbcast.lane.b32.xlu0 %v20467_v25, 256  ;;  %10137 = vbcast.lane.b32.xlu1 %v10131_v55, 264  ;;  %v24767_v55 = vld [vmem:[#allocation107_spill] sm:$0xff] }
 0x7fc   : > { %v20470_v50 = vpop.permute.xlu0 %9783  ;;  %v20472_v15 = vpop.permute.xlu1 %9721 }
 0x7fd   : > { %24762 = vst [vmem:[#allocation180_spill] sm:$0xff] %v20470_v50  ;;  %24763 = vst [vmem:[#allocation179_spill] sm:$0xff] %v20472_v15  ;;  %v24768_v15 = vld [vmem:[#allocation109_spill] sm:$0xff]  ;;  %v20498_v50 = vrot.slane %v5647_v7, %v24736_v11 }
 0x7fe   : > { %10232 = vbcast.lane.b32.xlu0 %v20475_v5, 256  ;;  %10148 = vbcast.lane.b32.xlu1 %v10142_v52, 264  ;;  %v24769_v42 = vcombine.low %v24767_v55, %v24768_v15 }
 0x800   : > { %v20478_v48 = vpop.permute.xlu0 %9803  ;;  %v20480_v29 = vpop.permute.xlu1 %9741  ;;  %v9860_v5 = vsel %vm9859_vm14, %v24769_v42, %v19854_v56 }
 0x801   : > { %24765 = vst [vmem:[#allocation130_spill] sm:$0xff] %v20480_v29  ;;  %v9869_v52 = vsel %vm9868_vm15, %v9860_v5, %v19930_v27  ;;  %v24771_v27 = vld [vmem:[#allocation31_spill] sm:$0xff]  ;;  %v24772_v5 = vld [vmem:[#allocation60_spill] sm:$0xff] }
 0x802   : > { %10243 = vbcast.lane.b32.xlu0 %v20483_v17, 256  ;;  %10159 = vbcast.lane.b32.xlu1 %v10153_v12, 264  ;;  %v24770_v17 = vld [vmem:[#allocation64_spill] sm:$0xff]  ;;  %v9878_v15 = vsel %vm9877_vm0, %v9869_v52, %v20071_v21  ;;  %v24773_v42 = vcombine.low %v24771_v27, %v24772_v5 }
 0x803   : > { %v20502_v12 = vadd.f32 %v24754_v58, %v24770_v17  ;;  %v9887_v56 = vsel %vm9886_vm1, %v9878_v15, %v20107_v6 }
 0x804   : > { %v20493_v29 = vpop.permute.xlu0 %9807  ;;  %v20495_v10 = vpop.permute.xlu1 %9745  ;;  %v9862_v55 = vsel %vm9859_vm14, %v24773_v42, %v19885_v59  ;;  %v9896_v17 = vsel %vm9895_vm2, %v9887_v56, %v20153_v60 }
 0x805   : > { %v9871_v58 = vsel %vm9868_vm15, %v9862_v55, %v19965_v54  ;;  %v9904_v21 = vsel %vm1340_vm13, %v9896_v17, %v20194_v51  ;;  %v20533_v54 = vrot.slane %v20502_v12, %v24710_v32 }
 0x806   : > { %10254 = vbcast.lane.b32.xlu0 %v20498_v50, 256  ;;  %10170 = vbcast.lane.b32.xlu1 %v10164_v33, 264  ;;  %v20525_v33 = vrot.slane %v5647_v7, %v24741_v41  ;;  %v9880_v59 = vsel %vm9877_vm0, %v9871_v58, %v20085_v16  ;;  %v9913_v60 = vsel %vm9912_vm4, %v9904_v21, %v20233_v23  ;;  %v24774_v23 = vld [vmem:[#allocation74_spill] sm:$0xff]  ;;  %v24775_v7 = vld [vmem:[#allocation36_spill] sm:$0xff] }
 0x807   : > { %v9889_v51 = vsel %vm9886_vm1, %v9880_v59, %v20115_v61  ;;  %v9921_v15 = vsel %vm1214_vm5, %v9913_v60, %v20281_v18  ;;  %v20543_v16 = vrot.slane %v20502_v12, %v24715_v31  ;;  %v24776_v56 = vcombine.low %v24774_v23, %v24775_v7 }
 0x808   : > { %v20520_v6 = vpop.permute.xlu0 %9811  ;;  %v20522_v52 = vpop.permute.xlu1 %9749  ;;  %v9898_v61 = vsel %vm9895_vm2, %v9889_v51, %v20166_v62  ;;  %v9930_v18 = vsel %vm9929_vm6, %v9921_v15, %v20328_v24  ;;  %v24782_v15 = vld [vmem:[#allocation122_spill] sm:$0xff] }
 0x809   : > { %v9864_v27 = vsel %vm9859_vm14, %v24776_v56, %v19898_v53  ;;  %v9906_v5 = vsel %vm1340_vm13, %v9898_v61, %v20203_v0  ;;  %v9939_v42 = vsel %vm9938_vm7, %v9930_v18, %v20364_v13 }
 0x80a   : > { %10265 = vbcast.lane.b32.xlu0 %v20525_v33, 256  ;;  %10181 = vbcast.lane.b32.xlu1 %v20435_v8, 264  ;;  %v9873_v8 = vsel %vm9868_vm15, %v9864_v27, %v20003_v28  ;;  %v9915_v24 = vsel %vm9912_vm4, %v9906_v5, %v20245_v40  ;;  %v9948_v28 = vsel %vm9947_vm8, %v9939_v42, %v20398_v20  ;;  %v24778_v40 = vld [vmem:[#allocation86_spill] sm:$0xff]  ;;  %v24783_v27 = vld [vmem:[#allocation123_spill] sm:$0xff] }
 0x80b   : > { %v9882_v62 = vsel %vm9877_vm0, %v9873_v8, %v20093_v34  ;;  %v9923_v13 = vsel %vm1214_vm5, %v9915_v24, %v20293_v22  ;;  %v9957_v17 = vsel %vm9956_vm9, %v9948_v28, %v20418_v47  ;;  %v24777_v34 = vld [vmem:[#allocation90_spill] sm:$0xff]  ;;  %v24787_v24 = vld [vmem:[#allocation100_spill] sm:$0xff] }
 0x80c   : > { %v20560_v55 = vpop.permute.xlu0 %9815  ;;  %v20562_v53 = vpop.permute.xlu1 %9753  ;;  %v9891_v0 = vsel %vm9886_vm1, %v9882_v62, %v20126_v44  ;;  %v24779_v58 = vcombine.low %v24777_v34, %v24778_v40  ;;  %v9932_v22 = vsel %vm9929_vm6, %v9923_v13, %v20337_v14  ;;  %v9966_v47 = vsel %vm9965_vm10, %v9957_v17, %v20446_v4  ;;  %v24785_v5 = vld [vmem:[#allocation106_spill] sm:$0xff]  ;;  %v24788_v13 = vld [vmem:[#allocation68_spill] sm:$0xff] }
 0x80d   : > { %v9900_v44 = vsel %vm9895_vm2, %v9891_v0, %v20176_v9  ;;  %v9941_v59 = vsel %vm9938_vm7, %v9932_v22, %v20373_v30 }
 0x80e   : > { %10276 = vbcast.lane.b32.xlu0 %v20533_v54, 256  ;;  %10192 = vbcast.lane.b32.xlu1 %v20443_v57, 264  ;;  %v9866_v20 = vsel %vm9859_vm14, %v24779_v58, %v19908_v46  ;;  %v9908_v57 = vsel %vm1340_vm13, %v9900_v44, %v20212_v19  ;;  %v9975_v46 = vsel %vm9974_vm11, %v9966_v47, %v20478_v48 }
 0x80f   : > { %v9875_v21 = vsel %vm9868_vm15, %v9866_v20, %v20044_v45  ;;  %v9917_v4 = vsel %vm9912_vm4, %v9908_v57, %v20257_v3  ;;  %v9950_v45 = vsel %vm9947_vm8, %v9941_v59, %v20403_v26  ;;  %v24780_v3 = vld [vmem:[#allocation104_spill] sm:$0xff]  ;;  %v24781_v26 = vld [vmem:[#allocation151_spill] sm:$0xff]  ;;  %v24789_v20 = vld [vmem:[#allocation57_spill] sm:$0xff] }
 0x810   : > { %v9836_v60 = vpop.permute.xlu0 %9835  ;;  %v20598_v9 = vpop.permute.xlu1 %9773  ;;  %v9884_v14 = vsel %vm9877_vm0, %v9875_v21, %v20097_v63  ;;  %v9925_v48 = vsel %vm1214_vm5, %v9917_v4, %v20307_v38  ;;  %v9959_v51 = vsel %vm9956_vm9, %v9950_v45, %v20423_v49  ;;  %v20660_v44 = vrot.slane %v20502_v12, %v24789_v20 }
 0x811   : > { %v9984_v19 = vsel %vm9983_vm12, %v9975_v46, %v9836_v60  ;;  %v9893_v30 = vsel %vm9886_vm1, %v9884_v14, %v20138_v1  ;;  %v9934_v1 = vsel %vm9929_vm6, %v9925_v48, %v24780_v3  ;;  %v9968_v38 = vsel %vm9965_vm10, %v9959_v51, %v20454_v36  ;;  %v24784_v36 = vld [vmem:[#allocation73_spill] sm:$0xff]  ;;  %v24793_v14 = vld [vmem:[#allocation58_spill] sm:$0xff]  ;;  %v24795_v48 = vld [vmem:[#allocation59_spill] sm:$0xff] }
 0x812   : > { %9992 = vst [vmem:[%s20613_s24] ss:$2 sm:$0xff] %v9984_v19  ;;  %10287 = vbcast.lane.b32.xlu0 %v20543_v16, 256  ;;  %10203 = vbcast.lane.b32.xlu1 %v20451_v37, 264  ;;  %v9902_v63 = vsel %vm9895_vm2, %v9893_v30, %v20185_v39  ;;  %v9943_v23 = vsel %vm9938_vm7, %v9934_v1, %v24782_v15  ;;  %v24794_v19 = vld [vmem:[#allocation132_spill] sm:$0xff]  ;;  %v24796_v51 = vld [vmem:[#allocation161_spill] sm:$0xff]  ;;  %v24799_v1 = vld [vmem:[#allocation162_spill] sm:$0xff] }
 0x813   : > { %v9910_v49 = vsel %vm1340_vm13, %v9902_v63, %v24781_v26  ;;  %v9977_v7 = vsel %vm9974_vm11, %v9968_v38, %v20493_v29  ;;  %v20634_v39 = vrot.slane %v20502_v12, %v24720_v43  ;;  %v9952_v18 = vsel %vm9947_vm8, %v9943_v23, %v24784_v36  ;;  %v24786_v29 = vld [vmem:[#allocation136_spill] sm:$0xff]  ;;  %v24803_v36 = vld [vmem:[#allocation149_spill] sm:$0xff] }
 0x814   : > { %v9840_v56 = vpop.permute.xlu0 %9839  ;;  %v20630_v37 = vpop.permute.xlu1 %9777  ;;  %v9919_v61 = vsel %vm9912_vm4, %v9910_v49, %v24783_v27  ;;  %v9961_v62 = vsel %vm9956_vm9, %v9952_v18, %v24786_v29  ;;  %v20678_v4 = vrot.slane %v20502_v12, %v24793_v14  ;;  %v24797_v63 = vld [vmem:[#allocation108_spill] sm:$0xff]  ;;  %v24801_v49 = vld [vmem:[#allocation43_spill] sm:$0xff] }
 0x815   : > { %v9986_v8 = vsel %vm9983_vm12, %v9977_v7, %v9840_v56  ;;  %v9927_v42 = vsel %vm1214_vm5, %v9919_v61, %v24785_v5  ;;  %v9970_v0 = vsel %vm9965_vm10, %v9961_v62, %v20462_v2  ;;  %v24791_v2 = vld [vmem:[#allocation83_spill] sm:$0xff]  ;;  %v24798_v3 = vld [vmem:[#allocation52_spill] sm:$0xff]  ;;  %v20705_v56 = vrot.slane %v20502_v12, %v24736_v11  ;;  %v24805_v5 = vld [vmem:[#allocation177_spill] sm:$0xff] }
 0x816   : > { %14560 = vst [vmem:[%s20613_s24 + $0x20] ss:$2 sm:$0xff] %v9986_v8  ;;  %10298 = vbcast.lane.b32.xlu0 %v20634_v39, 256  ;;  %10214 = vbcast.lane.b32.xlu1 %v20459_v35, 264  ;;  %v9936_v28 = vsel %vm9929_vm6, %v9927_v42, %v24787_v24  ;;  %v9979_v34 = vsel %vm9974_vm11, %v9970_v0, %v20520_v6  ;;  %v24790_v35 = vld [vmem:[#allocation72_spill] sm:$0xff]  ;;  %v24804_v8 = vld [vmem:[#allocation110_spill] sm:$0xff] }
 0x817   : > { %v9945_v17 = vsel %vm9938_vm7, %v9936_v28, %v24788_v13  ;;  %v24792_v6 = vld [vmem:[#allocation180_spill] sm:$0xff]  ;;  %v24800_v38 = vcombine.low %v24798_v3, %v24799_v1  ;;  %v24806_v42 = vld [vmem:[#allocation178_spill] sm:$0xff]  ;;  %v24808_v24 = vld [vmem:[#allocation113_spill] sm:$0xff] }
 0x818   : > { %v9844_v40 = vpop.permute.xlu0 %9843  ;;  %v20656_v58 = vpop.permute.xlu1 %9781  ;;  %v9954_v22 = vsel %vm9947_vm8, %v9945_v17, %v24790_v35  ;;  %v24802_v27 = vld [vmem:[#allocation148_spill] sm:$0xff]  ;;  %v24807_v29 = vcombine.low %v24805_v5, %v24806_v42  ;;  %v24809_v0 = vld [vmem:[#allocation30_spill] sm:$0xff]  ;;  %v24818_v3 = vld [vmem:[#allocation129_spill] sm:$0xff] }
 0x819   : > { %v9988_v47 = vsel %vm9983_vm12, %v9979_v34, %v9844_v40  ;;  %v9963_v21 = vsel %vm9956_vm9, %v9954_v22, %v24791_v2  ;;  %v9861_v26 = vsel %vm9859_vm14, %v24800_v38, %v24797_v63  ;;  %v24810_v13 = vld [vmem:[#allocation28_spill] sm:$0xff]  ;;  %v24811_v34 = vld [vmem:[#allocation147_spill] sm:$0xff]  ;;  %v20734_v2 = vrot.slane %v20502_v12, %v24741_v41  ;;  %v24817_v63 = vld [vmem:[#allocation146_spill] sm:$0xff] }
 0x81a   : > { %14562 = vst [vmem:[%s20613_s24 + $0x40] ss:$2 sm:$0xff] %v9988_v47  ;;  %10309 = vbcast.lane.b32.xlu0 %v20660_v44, 256  ;;  %10225 = vbcast.lane.b32.xlu1 %v20467_v25, 264  ;;  %v9972_v57 = vsel %vm9965_vm10, %v9963_v21, %v24792_v6  ;;  %v9870_v15 = vsel %vm9868_vm15, %v9861_v26, %v24801_v49  ;;  %v24812_v35 = vld [vmem:[#allocation112_spill] sm:$0xff]  ;;  %v24821_v26 = vld [vmem:[#allocation111_spill] sm:$0xff] }
 0x81b   : > { %v9981_v59 = vsel %vm9974_vm11, %v9972_v57, %v20560_v55  ;;  %v20688_v55 = vrot.slane %v20502_v12, %v24795_v48  ;;  %v9879_v61 = vsel %vm9877_vm0, %v9870_v15, %v24802_v27  ;;  %v9863_v62 = vsel %vm9859_vm14, %v24807_v29, %v24804_v8  ;;  %v24813_v21 = vld [vmem:[#allocation152_spill] sm:$0xff]  ;;  %v24814_v57 = vld [vmem:[#allocation102_spill] sm:$0xff]  ;;  %v24819_v12 = vld [vmem:[#allocation131_spill] sm:$0xff] }
 0x81c   : > { %v9848_v46 = vpop.permute.xlu0 %9847  ;;  %v20674_v60 = vpop.permute.xlu1 %9785  ;;  %v9888_v18 = vsel %vm9886_vm1, %v9879_v61, %v24803_v36  ;;  %v20722_v17 = vadd.f32 %v24810_v13, %v24809_v0  ;;  %v9872_v40 = vsel %vm9868_vm15, %v9863_v62, %v24811_v34  ;;  %v24820_v1 = vcombine.low %v24818_v3, %v24819_v12  ;;  %v24822_v15 = vld [vmem:[#allocation120_spill] sm:$0xff]  ;;  %v24825_v5 = vld [vmem:[#allocation85_spill] sm:$0xff] }
 0x81d   : > { %v9990_v45 = vsel %vm9983_vm12, %v9981_v59, %v9848_v46  ;;  %v9897_v28 = vsel %vm9895_vm2, %v9888_v18, %v24808_v24  ;;  %v9881_v6 = vsel %vm9877_vm0, %v9872_v40, %v24813_v21  ;;  %v24815_v46 = vld [vmem:[#allocation150_spill] sm:$0xff]  ;;  %v24823_v61 = vld [vmem:[#allocation144_spill] sm:$0xff]  ;;  %v24827_v0 = vld [vmem:[#allocation101_spill] sm:$0xff] }
 0x81e   : > { %14564 = vst [vmem:[%s20613_s24 + $0x60] ss:$2 sm:$0xff] %v9990_v45  ;;  %10320 = vbcast.lane.b32.xlu0 %v20678_v4, 256  ;;  %10236 = vbcast.lane.b32.xlu1 %v24794_v19, 264  ;;  %v9905_v22 = vsel %vm1340_vm13, %v9897_v28, %v24812_v35  ;;  %v9890_v45 = vsel %vm9886_vm1, %v9881_v6, %v24815_v46  ;;  %v24816_v19 = vld [vmem:[#allocation69_spill] sm:$0xff]  ;;  %v24824_v18 = vld [vmem:[#allocation126_spill] sm:$0xff] }
 0x81f   : > { %v9914_v59 = vsel %vm9912_vm4, %v9905_v22, %v24814_v57  ;;  %v9865_v38 = vsel %vm9859_vm14, %v24820_v1, %v24817_v63  ;;  %v9899_v49 = vsel %vm9895_vm2, %v9890_v45, %v24821_v26  ;;  %v20767_v62 = vrot.slane %v20722_v17, %v24710_v32  ;;  %v24826_v24 = vld [vmem:[#allocation142_spill] sm:$0xff]  ;;  %v24828_v40 = vld [vmem:[#allocation135_spill] sm:$0xff]  ;;  %v24830_v57 = vld [vmem:[#allocation44_spill] sm:$0xff] }
 0x820   : > { %v20684_v25 = vpop.permute.xlu0 %10012  ;;  %v9806_v30 = vpop.permute.xlu1 %9805  ;;  %v9874_v36 = vsel %vm9868_vm15, %v9865_v38, %v24823_v61  ;;  %v9907_v8 = vsel %vm1340_vm13, %v9899_v49, %v24824_v18  ;;  %v20777_v22 = vrot.slane %v20722_v17, %v24715_v31  ;;  %v24829_v21 = vld [vmem:[#allocation154_spill] sm:$0xff]  ;;  %v24834_v63 = vld [vmem:[#allocation143_spill] sm:$0xff]  ;;  %v24836_v1 = vld [vmem:[#allocation125_spill] sm:$0xff] }
 0x821   : > { %v9883_v28 = vsel %vm9877_vm0, %v9874_v36, %v24826_v24  ;;  %v9916_v34 = vsel %vm9912_vm4, %v9907_v8, %v24827_v0  ;;  %v24831_v46 = vld [vmem:[#allocation130_spill] sm:$0xff]  ;;  %v24837_v26 = vld [vmem:[#allocation119_spill] sm:$0xff]  ;;  %v24840_v18 = vld [vmem:[#allocation140_spill] sm:$0xff] }
 0x822   : > { %10331 = vbcast.lane.b32.xlu0 %v20688_v55, 256  ;;  %10247 = vbcast.lane.b32.xlu1 %v24796_v51, 264  ;;  %v9922_v51 = vsel %vm1214_vm5, %v9914_v59, %v24816_v19  ;;  %v9892_v6 = vsel %vm9886_vm1, %v9883_v28, %v24829_v21  ;;  %v9924_v59 = vsel %vm1214_vm5, %v9916_v34, %v24830_v57  ;;  %v24832_v19 = vld [vmem:[#allocation70_spill] sm:$0xff]  ;;  %v24841_v28 = vld [vmem:[#allocation153_spill] sm:$0xff]  ;;  %v24842_v34 = vld [vmem:[#allocation103_spill] sm:$0xff] }
 0x823   : > { %v9931_v27 = vsel %vm9929_vm6, %v9922_v51, %v24822_v15  ;;  %v24833_v51 = vld [vmem:[#allocation25_spill] sm:$0xff]  ;;  %v9901_v38 = vsel %vm9895_vm2, %v9892_v6, %v24836_v1  ;;  %v9933_v49 = vsel %vm9929_vm6, %v9924_v59, %v24837_v26  ;;  %v24844_v6 = vld [vmem:[#allocation155_spill] sm:$0xff] }
 0x824   : > { %v20699_v23 = vpop.permute.xlu0 %10023  ;;  %v20701_v7 = vpop.permute.xlu1 %9809  ;;  %v24835_v3 = vcombine.low %v24833_v51, %v24834_v63  ;;  %v9942_v8 = vsel %vm9938_vm7, %v9933_v49, %v24840_v18  ;;  %v24845_v59 = vld [vmem:[#allocation121_spill] sm:$0xff]  ;;  %v24847_v51 = vld [vmem:[#allocation184_spill] sm:$0xff]  ;;  %v24852_v18 = vld [vmem:[#allocation46_spill] sm:$0xff] }
 0x826   : > { %10342 = vbcast.lane.b32.xlu0 %v20705_v56, 256  ;;  %10258 = vbcast.lane.b32.xlu1 %v20498_v50, 264  ;;  %v9867_v12 = vsel %vm9859_vm14, %v24835_v3, %v24832_v19 }
 0x828   : > { %v20728_v50 = vpop.permute.xlu0 %10034  ;;  %v20730_v47 = vpop.permute.xlu1 %9813 }
 0x82a   : > { %10353 = vbcast.lane.b32.xlu0 %v20734_v2, 256  ;;  %10269 = vbcast.lane.b32.xlu1 %v20525_v33, 264  ;;  %v9940_v33 = vsel %vm9938_vm7, %v9931_v27, %v24825_v5  ;;  %v24838_v27 = vld [vmem:[#allocation145_spill] sm:$0xff] }
 0x82b   : > { %v9949_v35 = vsel %vm9947_vm8, %v9940_v33, %v24828_v40  ;;  %v9876_v61 = vsel %vm9868_vm15, %v9867_v12, %v24838_v27  ;;  %v24843_v40 = vld [vmem:[#allocation164_spill] sm:$0xff]  ;;  %v24848_v12 = vld [vmem:[#allocation105_spill] sm:$0xff]  ;;  %v24850_v27 = vld [vmem:[#allocation99_spill] sm:$0xff] }
 0x82c   : > { %v20761_v42 = vpop.permute.xlu0 %10045  ;;  %v20763_v29 = vpop.permute.xlu1 %9817  ;;  %v9958_v45 = vsel %vm9956_vm9, %v9949_v35, %v24831_v46  ;;  %v9885_v0 = vsel %vm9877_vm0, %v9876_v61, %v24841_v28  ;;  %v9951_v35 = vsel %vm9947_vm8, %v9942_v8, %v24843_v40 }
 0x82d   : > { %v9967_v15 = vsel %vm9965_vm10, %v9958_v45, %v20598_v9  ;;  %v9894_v57 = vsel %vm9886_vm1, %v9885_v0, %v24844_v6  ;;  %v9960_v46 = vsel %vm9956_vm9, %v9951_v35, %v20495_v10  ;;  %v24846_v45 = vld [vmem:[#allocation114_spill] sm:$0xff]  ;;  %v24854_v0 = vld [vmem:[#allocation139_spill] sm:$0xff]  ;;  %v10395_v35 = vrot.slane %v20722_v17, %v24789_v20 }
 0x82e   : > { %10364 = vbcast.lane.b32.xlu0 %v20767_v62, 256  ;;  %10280 = vbcast.lane.b32.xlu1 %v20533_v54, 264  ;;  %v24839_v54 = vld [vmem:[#allocation124_spill] sm:$0xff]  ;;  %v9976_v5 = vsel %vm9974_vm11, %v9967_v15, %v9806_v30  ;;  %v9903_v19 = vsel %vm9895_vm2, %v9894_v57, %v24846_v45  ;;  %v9969_v3 = vsel %vm9965_vm10, %v9960_v46, %v20630_v37 }
 0x82f   : > { %v9909_v36 = vsel %vm1340_vm13, %v9901_v38, %v24839_v54  ;;  %v9911_v1 = vsel %vm1340_vm13, %v9903_v19, %v24848_v12  ;;  %v24849_v38 = vld [vmem:[#allocation87_spill] sm:$0xff]  ;;  %v9978_v26 = vsel %vm9974_vm11, %v9969_v3, %v20701_v7  ;;  %v10384_v15 = vrot.slane %v20722_v17, %v24720_v43 }
 0x830   : > { %v20805_v33 = vpop.permute.xlu0 %10056  ;;  %v9838_v24 = vpop.permute.xlu1 %9837  ;;  %v9918_v9 = vsel %vm9912_vm4, %v9909_v36, %v24842_v34  ;;  %v9920_v61 = vsel %vm9912_vm4, %v9911_v1, %v24850_v27  ;;  %v24851_v54 = vld [vmem:[#allocation163_spill] sm:$0xff]  ;;  %v10406_v46 = vrot.slane %v20722_v17, %v24793_v14 }
 0x831   : > { %v9985_v21 = vsel %vm9983_vm12, %v9976_v5, %v9838_v24  ;;  %v9926_v30 = vsel %vm1214_vm5, %v9918_v9, %v24845_v59  ;;  %v9928_v8 = vsel %vm1214_vm5, %v9920_v61, %v24852_v18  ;;  %v24853_v5 = vld [vmem:[#allocation89_spill] sm:$0xff] }
 0x832   : > { %14559 = vst [vmem:[%s20613_s24 + $0x10] ss:$2 sm:$0xff] %v9985_v21  ;;  %10375 = vbcast.lane.b32.xlu0 %v20777_v22, 256  ;;  %10291 = vbcast.lane.b32.xlu1 %v20543_v16, 264  ;;  %v9935_v63 = vsel %vm9929_vm6, %v9926_v30, %v24847_v51  ;;  %v9937_v24 = vsel %vm9929_vm6, %v9928_v8, %v24853_v5 }
 0x833   : > { %v9944_v10 = vsel %vm9938_vm7, %v9935_v63, %v24849_v38  ;;  %v9946_v34 = vsel %vm9938_vm7, %v9937_v24, %v24854_v0  ;;  %v10428_v51 = vrot.slane %v20722_v17, %v24736_v11  ;;  %v24857_v24 = vld [vmem:[#allocation54_spill] sm:$0xff] }
 0x834   : > { %v20835_v49 = vpop.permute.xlu0 %10067  ;;  %v9842_v16 = vpop.permute.xlu1 %9841  ;;  %v9953_v37 = vsel %vm9947_vm8, %v9944_v10, %v24851_v54 }
 0x835   : > { %v9987_v36 = vsel %vm9983_vm12, %v9978_v26, %v9842_v16  ;;  %v9962_v7 = vsel %vm9956_vm9, %v9953_v37, %v20522_v52 }
 0x836   : > { %14561 = vst [vmem:[%s20613_s24 + $0x30] ss:$2 sm:$0xff] %v9987_v36  ;;  %10386 = vbcast.lane.b32.xlu0 %v10384_v15, 256  ;;  %10302 = vbcast.lane.b32.xlu1 %v20634_v39, 264  ;;  %v9971_v28 = vsel %vm9965_vm10, %v9962_v7, %v20656_v58  ;;  %v24855_v39 = vld [vmem:[#allocation179_spill] sm:$0xff] }
 0x837   : > { %v9980_v9 = vsel %vm9974_vm11, %v9971_v28, %v20730_v47  ;;  %v9955_v21 = vsel %vm9947_vm8, %v9946_v34, %v24855_v39  ;;  %v24858_v28 = vld [vmem:[#allocation29_spill] sm:$0xff] }
 0x838   : > { %v20858_v40 = vpop.permute.xlu0 %10078  ;;  %v9846_v52 = vpop.permute.xlu1 %9845  ;;  %v9964_v58 = vsel %vm9956_vm9, %v9955_v21, %v20562_v53  ;;  %v5663_v0 = vadd.f32 %v24858_v28, %v24857_v24 }
 0x839   : > { %v9989_v6 = vsel %vm9983_vm12, %v9980_v9, %v9846_v52  ;;  %v9973_v47 = vsel %vm9965_vm10, %v9964_v58, %v20674_v60  ;;  %v10417_v60 = vrot.slane %v20722_v17, %v24795_v48 }
 0x83a   : > { %14563 = vst [vmem:[%s20613_s24 + $0x50] ss:$2 sm:$0xff] %v9989_v6  ;;  %10397 = vbcast.lane.b32.xlu0 %v10395_v35, 256  ;;  %10313 = vbcast.lane.b32.xlu1 %v20660_v44, 264  ;;  %v9982_v57 = vsel %vm9974_vm11, %v9973_v47, %v20763_v29  ;;  %v10538_v21 = vrot.slane %v5663_v0, %v24710_v32 }
 0x83b   : > { %v10549_v47 = vrot.slane %v5663_v0, %v24715_v31 }
 0x83c   : > { %v20873_v59 = vpop.permute.xlu0 %10089  ;;  %v9850_v30 = vpop.permute.xlu1 %9849 }
 0x83d   : > { %v9991_v45 = vsel %vm9983_vm12, %v9982_v57, %v9850_v30 }
 0x83e   : > { %14565 = vst [vmem:[%s20613_s24 + $0x70] ss:$2 sm:$0xff] %v9991_v45  ;;  %10408 = vbcast.lane.b32.xlu0 %v10406_v46, 256  ;;  %10324 = vbcast.lane.b32.xlu1 %v20678_v4, 264  ;;  %v24856_v4 = vld [vmem:[#allocation24_spill] sm:$0xff] }
 0x83f   : > { %v5656_v63 = vadd.f32 %v24810_v13, %v24856_v4 }
 0x840   : > { %v20880_v53 = vpop.permute.xlu0 %10100  ;;  %v20882_v44 = vpop.permute.xlu1 %10016 }
 0x841   : > { %v10450_v10 = vrot.slane %v5656_v63, %v24710_v32  ;;  %v10461_v26 = vrot.slane %v5656_v63, %v24715_v31  ;;  %v10472_v16 = vrot.slane %v5656_v63, %v24720_v43  ;;  %v10483_v61 = vrot.slane %v5656_v63, %v24789_v20 }
 0x842   : > { %10419 = vbcast.lane.b32.xlu0 %v10417_v60, 256  ;;  %10335 = vbcast.lane.b32.xlu1 %v20688_v55, 264  ;;  %v10439_v55 = vrot.slane %v20722_v17, %v24741_v41  ;;  %v10516_v5 = vrot.slane %v5656_v63, %v24736_v11  ;;  %v10527_v52 = vrot.slane %v5656_v63, %v24741_v41 }
 0x844   : > { %v20887_v29 = vpop.permute.xlu0 %10111  ;;  %v20889_v19 = vpop.permute.xlu1 %10027 }
 0x846   : > { %10430 = vbcast.lane.b32.xlu0 %v10428_v51, 256  ;;  %10346 = vbcast.lane.b32.xlu1 %v20705_v56, 264 }
 0x848   : > { %v20896_v3 = vpop.permute.xlu0 %10122  ;;  %v20898_v12 = vpop.permute.xlu1 %10038 }
 0x84a   : > { %10441 = vbcast.lane.b32.xlu0 %v10439_v55, 256  ;;  %10357 = vbcast.lane.b32.xlu1 %v20734_v2, 264 }
 0x84c   : > { %v20903_v1 = vpop.permute.xlu0 %10133  ;;  %v20905_v38 = vpop.permute.xlu1 %10049 }
 0x84e   : > { %10452 = vbcast.lane.b32.xlu0 %v10450_v10, 256  ;;  %10368 = vbcast.lane.b32.xlu1 %v20767_v62, 264 }
 0x850   : > { %v20909_v56 = vpop.permute.xlu0 %10144  ;;  %v20911_v13 = vpop.permute.xlu1 %10060 }
 0x852   : > { %10463 = vbcast.lane.b32.xlu0 %v10461_v26, 256  ;;  %10379 = vbcast.lane.b32.xlu1 %v20777_v22, 264  ;;  %v10494_v22 = vrot.slane %v5656_v63, %v24793_v14 }
 0x854   : > { %v20915_v17 = vpop.permute.xlu0 %10155  ;;  %v20917_v2 = vpop.permute.xlu1 %10071 }
 0x856   : > { %10474 = vbcast.lane.b32.xlu0 %v10472_v16, 256  ;;  %10390 = vbcast.lane.b32.xlu1 %v10384_v15, 264  ;;  %v10505_v15 = vrot.slane %v5656_v63, %v24795_v48 }
 0x858   : > { %v20920_v27 = vpop.permute.xlu0 %10166  ;;  %v20922_v62 = vpop.permute.xlu1 %10082 }
 0x85a   : > { %10485 = vbcast.lane.b32.xlu0 %v10483_v61, 256  ;;  %10401 = vbcast.lane.b32.xlu1 %v10395_v35, 264 }
 0x85c   : > { %v20925_v54 = vpop.permute.xlu0 %10177  ;;  %v20927_v37 = vpop.permute.xlu1 %10093 }
 0x85e   : > { %10496 = vbcast.lane.b32.xlu0 %v10494_v22, 256  ;;  %10412 = vbcast.lane.b32.xlu1 %v10406_v46, 264  ;;  %v10560_v46 = vrot.slane %v5663_v0, %v24720_v43 }
 0x860   : > { %v20930_v36 = vpop.permute.xlu0 %10188  ;;  %v20932_v18 = vpop.permute.xlu1 %10104 }
 0x862   : > { %10507 = vbcast.lane.b32.xlu0 %v10505_v15, 256  ;;  %10423 = vbcast.lane.b32.xlu1 %v10417_v60, 264 }
 0x864   : > { %v20935_v8 = vpop.permute.xlu0 %10199  ;;  %v20937_v7 = vpop.permute.xlu1 %10115 }
 0x866   : > { %10518 = vbcast.lane.b32.xlu0 %v10516_v5, 256  ;;  %10434 = vbcast.lane.b32.xlu1 %v10428_v51, 264  ;;  %v10571_v51 = vrot.slane %v5663_v0, %v24789_v20 }
 0x868   : > { %v20942_v34 = vpop.permute.xlu0 %10210  ;;  %v20944_v9 = vpop.permute.xlu1 %10126 }
 0x86a   : > { %10529 = vbcast.lane.b32.xlu0 %v10527_v52, 256  ;;  %10445 = vbcast.lane.b32.xlu1 %v10439_v55, 264  ;;  %v10582_v55 = vrot.slane %v5663_v0, %v24793_v14 }
 0x86c   : > { %v20947_v35 = vpop.permute.xlu0 %10221  ;;  %v20949_v39 = vpop.permute.xlu1 %10137 }
 0x86d   : > { %24859 = vst [vmem:[#allocation160_spill] sm:$0xff] %v20949_v39 }
 0x86e   : > { %10540 = vbcast.lane.b32.xlu0 %v10538_v21, 256  ;;  %10456 = vbcast.lane.b32.xlu1 %v10450_v10, 264 }
 0x870   : > { %v20952_v6 = vpop.permute.xlu0 %10232  ;;  %v20954_v58 = vpop.permute.xlu1 %10148 }
 0x871   : > { %24860 = vst [vmem:[#allocation157_spill] sm:$0xff] %v20952_v6  ;;  %24861 = vst [vmem:[#allocation156_spill] sm:$0xff] %v20954_v58 }
 0x872   : > { %10551 = vbcast.lane.b32.xlu0 %v10549_v47, 256  ;;  %10467 = vbcast.lane.b32.xlu1 %v10461_v26, 264 }
 0x874   : > { %v20957_v57 = vpop.permute.xlu0 %10243  ;;  %v20959_v30 = vpop.permute.xlu1 %10159 }
 0x875   : > { %24862 = vst [vmem:[#allocation159_spill] sm:$0xff] %v20957_v57  ;;  %24863 = vst [vmem:[#allocation158_spill] sm:$0xff] %v20959_v30 }
 0x876   : > { %10562 = vbcast.lane.b32.xlu0 %v10560_v46, 256  ;;  %10478 = vbcast.lane.b32.xlu1 %v10472_v16, 264  ;;  %v10593_v16 = vrot.slane %v5663_v0, %v24795_v48 }
 0x878   : > { %v20962_v45 = vpop.permute.xlu0 %10254  ;;  %v20964_v60 = vpop.permute.xlu1 %10170 }
 0x879   : > { %24864 = vst [vmem:[#allocation32_spill] sm:$0xff] %v20962_v45  ;;  %24865 = vst [vmem:[#allocation34_spill] sm:$0xff] %v20964_v60 }
 0x87a   : > { %10573 = vbcast.lane.b32.xlu0 %v10571_v51, 256  ;;  %10489 = vbcast.lane.b32.xlu1 %v10483_v61, 264  ;;  %v10604_v61 = vrot.slane %v5663_v0, %v24736_v11 }
 0x87c   : > { %v20967_v4 = vpop.permute.xlu0 %10265  ;;  %v20969_v63 = vpop.permute.xlu1 %10181 }
 0x87d   : > { %24866 = vst [vmem:[#allocation176_spill] sm:$0xff] %v20967_v4  ;;  %24867 = vst [vmem:[#allocation175_spill] sm:$0xff] %v20969_v63  ;;  %v24872_v63 = vld [vmem:[#allocation49_spill] sm:$0xff] }
 0x87e   : > { %10584 = vbcast.lane.b32.xlu0 %v10582_v55, 256  ;;  %10500 = vbcast.lane.b32.xlu1 %v10494_v22, 264  ;;  %v5664_v4 = vadd.f32 %v24858_v28, %v24872_v63 }
 0x880   : > { %v20972_v10 = vpop.permute.xlu0 %10276  ;;  %v20974_v26 = vpop.permute.xlu1 %10192  ;;  %v10637_v28 = vrot.slane %v5664_v4, %v24715_v31 }
 0x881   : > { %24868 = vst [vmem:[#allocation172_spill] sm:$0xff] %v20972_v10  ;;  %24869 = vst [vmem:[#allocation171_spill] sm:$0xff] %v20974_v26  ;;  %v10615_v26 = vrot.slane %v5663_v0, %v24741_v41 }
 0x882   : > { %10595 = vbcast.lane.b32.xlu0 %v10593_v16, 256  ;;  %10511 = vbcast.lane.b32.xlu1 %v10505_v15, 264 }
 0x884   : > { %v20977_v24 = vpop.permute.xlu0 %10287  ;;  %v20979_v30 = vpop.permute.xlu1 %10203 }
 0x885   : > { %24870 = vst [vmem:[#allocation174_spill] sm:$0xff] %v20977_v24  ;;  %24871 = vst [vmem:[#allocation173_spill] sm:$0xff] %v20979_v30  ;;  %v10626_v30 = vrot.slane %v5664_v4, %v24710_v32 }
 0x886   : > { %10606 = vbcast.lane.b32.xlu0 %v10604_v61, 256  ;;  %10522 = vbcast.lane.b32.xlu1 %v10516_v5, 264 }
 0x888   : > { %v20984_v22 = vpop.permute.xlu0 %10298  ;;  %v20986_v10 = vpop.permute.xlu1 %10214 }
 0x889   : > { %24873 = vst [vmem:[#allocation170_spill] sm:$0xff] %v20984_v22  ;;  %24874 = vst [vmem:[#allocation169_spill] sm:$0xff] %v20986_v10 }
 0x88a   : > { %10617 = vbcast.lane.b32.xlu0 %v10615_v26, 256  ;;  %10533 = vbcast.lane.b32.xlu1 %v10527_v52, 264  ;;  %v10648_v52 = vrot.slane %v5664_v4, %v24720_v43 }
 0x88c   : > { %v20989_v15 = vpop.permute.xlu0 %10309  ;;  %v20991_v24 = vpop.permute.xlu1 %10225 }
 0x88d   : > { %24875 = vst [vmem:[#allocation27_spill] sm:$0xff] %v20989_v15  ;;  %24876 = vst [vmem:[#allocation40_spill] sm:$0xff] %v20991_v24 }
 0x88e   : > { %10628 = vbcast.lane.b32.xlu0 %v10626_v30, 256  ;;  %10544 = vbcast.lane.b32.xlu1 %v10538_v21, 264  ;;  %v10659_v21 = vrot.slane %v5664_v4, %v24789_v20 }
 0x890   : > { %v20994_v5 = vpop.permute.xlu0 %10320  ;;  %v20996_v57 = vpop.permute.xlu1 %10236 }
 0x891   : > { %24877 = vst [vmem:[#allocation82_spill] sm:$0xff] %v20994_v5  ;;  %24878 = vst [vmem:[#allocation78_spill] sm:$0xff] %v20996_v57 }
 0x892   : > { %10639 = vbcast.lane.b32.xlu0 %v10637_v28, 256  ;;  %10555 = vbcast.lane.b32.xlu1 %v10549_v47, 264  ;;  %v10670_v47 = vrot.slane %v5664_v4, %v24793_v14 }
 0x894   : > { %v20999_v63 = vpop.permute.xlu0 %10331  ;;  %v21001_v0 = vpop.permute.xlu1 %10247 }
 0x895   : > { %24879 = vst [vmem:[#allocation41_spill] sm:$0xff] %v20999_v63  ;;  %24880 = vst [vmem:[#allocation63_spill] sm:$0xff] %v21001_v0 }
 0x896   : > { %10650 = vbcast.lane.b32.xlu0 %v10648_v52, 256  ;;  %10566 = vbcast.lane.b32.xlu1 %v10560_v46, 264  ;;  %v10681_v46 = vrot.slane %v5664_v4, %v24795_v48 }
 0x898   : > { %v21004_v24 = vpop.permute.xlu0 %10342  ;;  %v21006_v15 = vpop.permute.xlu1 %10258 }
 0x899   : > { %24881 = vst [vmem:[#allocation81_spill] sm:$0xff] %v21004_v24  ;;  %24882 = vst [vmem:[#allocation77_spill] sm:$0xff] %v21006_v15 }
 0x89a   : > { %10661 = vbcast.lane.b32.xlu0 %v10659_v21, 256  ;;  %10577 = vbcast.lane.b32.xlu1 %v10571_v51, 264  ;;  %v10692_v51 = vrot.slane %v5664_v4, %v24736_v11 }
 0x89c   : > { %v21009_v57 = vpop.permute.xlu0 %10353  ;;  %v21011_v5 = vpop.permute.xlu1 %10269 }
 0x89d   : > { %24883 = vst [vmem:[#allocation141_spill] sm:$0xff] %v21009_v57  ;;  %24884 = vst [vmem:[#allocation97_spill] sm:$0xff] %v21011_v5  ;;  %v24889_v5 = vld [vmem:[#allocation39_spill] sm:$0xff]  ;;  %v24890_v57 = vld [vmem:[#allocation38_spill] sm:$0xff] }
 0x89e   : > { %10672 = vbcast.lane.b32.xlu0 %v10670_v47, 256  ;;  %10588 = vbcast.lane.b32.xlu1 %v10582_v55, 264  ;;  %v5641_v10 = vadd.f32 %v24890_v57, %v24889_v5 }
 0x8a0   : > { %v21014_v0 = vpop.permute.xlu0 %10364  ;;  %v21016_v63 = vpop.permute.xlu1 %10280  ;;  %v10725_v5 = vrot.slane %v5641_v10, %v24715_v31 }
 0x8a1   : > { %24885 = vst [vmem:[#allocation93_spill] sm:$0xff] %v21014_v0  ;;  %24886 = vst [vmem:[#allocation98_spill] sm:$0xff] %v21016_v63  ;;  %v10703_v63 = vrot.slane %v5664_v4, %v24741_v41 }
 0x8a2   : > { %10683 = vbcast.lane.b32.xlu0 %v10681_v46, 256  ;;  %10599 = vbcast.lane.b32.xlu1 %v10593_v16, 264 }
 0x8a4   : > { %v21019_v15 = vpop.permute.xlu0 %10375  ;;  %v21021_v24 = vpop.permute.xlu1 %10291 }
 0x8a5   : > { %24887 = vst [vmem:[#allocation94_spill] sm:$0xff] %v21019_v15  ;;  %24888 = vst [vmem:[#allocation92_spill] sm:$0xff] %v21021_v24  ;;  %v10714_v24 = vrot.slane %v5641_v10, %v24710_v32 }
 0x8a6   : > { %10694 = vbcast.lane.b32.xlu0 %v10692_v51, 256  ;;  %10610 = vbcast.lane.b32.xlu1 %v10604_v61, 264 }
 0x8a8   : > { %v21026_v55 = vpop.permute.xlu0 %10386  ;;  %v21028_v0 = vpop.permute.xlu1 %10302 }
 0x8a9   : > { %24891 = vst [vmem:[#allocation96_spill] sm:$0xff] %v21026_v55  ;;  %24892 = vst [vmem:[#allocation115_spill] sm:$0xff] %v21028_v0 }
 0x8aa   : > { %10705 = vbcast.lane.b32.xlu0 %v10703_v63, 256  ;;  %10621 = vbcast.lane.b32.xlu1 %v10615_v26, 264  ;;  %v10736_v26 = vrot.slane %v5641_v10, %v24720_v43 }
 0x8ac   : > { %v21031_v16 = vpop.permute.xlu0 %10397  ;;  %v21033_v15 = vpop.permute.xlu1 %10313 }
 0x8ad   : > { %24893 = vst [vmem:[#allocation116_spill] sm:$0xff] %v21031_v16  ;;  %24894 = vst [vmem:[#allocation127_spill] sm:$0xff] %v21033_v15 }
 0x8ae   : > { %10716 = vbcast.lane.b32.xlu0 %v10714_v24, 256  ;;  %10632 = vbcast.lane.b32.xlu1 %v10626_v30, 264  ;;  %v10747_v30 = vrot.slane %v5641_v10, %v24789_v20 }
 0x8b0   : > { %v21036_v61 = vpop.permute.xlu0 %10408  ;;  %v21038_v22 = vpop.permute.xlu1 %10324 }
 0x8b1   : > { %24895 = vst [vmem:[#allocation67_spill] sm:$0xff] %v21036_v61  ;;  %24896 = vst [vmem:[#allocation75_spill] sm:$0xff] %v21038_v22 }
 0x8b2   : > { %10727 = vbcast.lane.b32.xlu0 %v10725_v5, 256  ;;  %10643 = vbcast.lane.b32.xlu1 %v10637_v28, 264  ;;  %v10758_v28 = vrot.slane %v5641_v10, %v24793_v14 }
 0x8b4   : > { %v21041_v0 = vpop.permute.xlu0 %10419  ;;  %v21043_v4 = vpop.permute.xlu1 %10335 }
 0x8b5   : > { %24897 = vst [vmem:[#allocation79_spill] sm:$0xff] %v21041_v0  ;;  %24898 = vst [vmem:[#allocation95_spill] sm:$0xff] %v21043_v4 }
 0x8b6   : > { %10738 = vbcast.lane.b32.xlu0 %v10736_v26, 256  ;;  %10654 = vbcast.lane.b32.xlu1 %v10648_v52, 264  ;;  %v10769_v52 = vrot.slane %v5641_v10, %v24795_v48 }
 0x8b8   : > { %v21046_v15 = vpop.permute.xlu0 %10430  ;;  %v21048_v16 = vpop.permute.xlu1 %10346 }
 0x8b9   : > { %24899 = vst [vmem:[#allocation88_spill] sm:$0xff] %v21046_v15  ;;  %24900 = vst [vmem:[#allocation118_spill] sm:$0xff] %v21048_v16 }
 0x8ba   : > { %10749 = vbcast.lane.b32.xlu0 %v10747_v30, 256  ;;  %10665 = vbcast.lane.b32.xlu1 %v10659_v21, 264  ;;  %v10780_v21 = vrot.slane %v5641_v10, %v24736_v11 }
 0x8bc   : > { %v21051_v22 = vpop.permute.xlu0 %10441  ;;  %v21053_v61 = vpop.permute.xlu1 %10357 }
 0x8bd   : > { %24901 = vst [vmem:[#allocation117_spill] sm:$0xff] %v21051_v22  ;;  %24902 = vst [vmem:[#allocation165_spill] sm:$0xff] %v21053_v61  ;;  %v24907_v61 = vld [vmem:[#allocation62_spill] sm:$0xff] }
 0x8be   : > { %10760 = vbcast.lane.b32.xlu0 %v10758_v28, 256  ;;  %10676 = vbcast.lane.b32.xlu1 %v10670_v47, 264  ;;  %v5642_v22 = vadd.f32 %v24890_v57, %v24907_v61 }
 0x8c0   : > { %v21056_v4 = vpop.permute.xlu0 %10452  ;;  %v21058_v0 = vpop.permute.xlu1 %10368  ;;  %v10813_v57 = vrot.slane %v5642_v22, %v24715_v31 }
 0x8c1   : > { %24903 = vst [vmem:[#allocation166_spill] sm:$0xff] %v21056_v4  ;;  %24904 = vst [vmem:[#allocation128_spill] sm:$0xff] %v21058_v0  ;;  %v10791_v0 = vrot.slane %v5641_v10, %v24741_v41 }
 0x8c2   : > { %10771 = vbcast.lane.b32.xlu0 %v10769_v52, 256  ;;  %10687 = vbcast.lane.b32.xlu1 %v10681_v46, 264 }
 0x8c4   : > { %v21061_v16 = vpop.permute.xlu0 %10463  ;;  %v21063_v15 = vpop.permute.xlu1 %10379 }
 0x8c5   : > { %24905 = vst [vmem:[#allocation71_spill] sm:$0xff] %v21061_v16  ;;  %24906 = vst [vmem:[#allocation183_spill] sm:$0xff] %v21063_v15  ;;  %v10802_v15 = vrot.slane %v5642_v22, %v24710_v32 }
 0x8c6   : > { %10782 = vbcast.lane.b32.xlu0 %v10780_v21, 256  ;;  %10698 = vbcast.lane.b32.xlu1 %v10692_v51, 264 }
 0x8c8   : > { %v21068_v47 = vpop.permute.xlu0 %10474  ;;  %v21070_v4 = vpop.permute.xlu1 %10390 }
 0x8c9   : > { %24908 = vst [vmem:[#allocation181_spill] sm:$0xff] %v21068_v47  ;;  %24909 = vst [vmem:[#allocation80_spill] sm:$0xff] %v21070_v4 }
 0x8ca   : > { %10793 = vbcast.lane.b32.xlu0 %v10791_v0, 256  ;;  %10709 = vbcast.lane.b32.xlu1 %v10703_v63, 264  ;;  %v10824_v63 = vrot.slane %v5642_v22, %v24720_v43 }
 0x8cc   : > { %v21073_v46 = vpop.permute.xlu0 %10485  ;;  %v21075_v16 = vpop.permute.xlu1 %10401 }
 0x8cd   : > { %24910 = vst [vmem:[#allocation76_spill] sm:$0xff] %v21073_v46  ;;  %24911 = vst [vmem:[#allocation133_spill] sm:$0xff] %v21075_v16 }
 0x8ce   : > { %10804 = vbcast.lane.b32.xlu0 %v10802_v15, 256  ;;  %10720 = vbcast.lane.b32.xlu1 %v10714_v24, 264  ;;  %v10835_v24 = vrot.slane %v5642_v22, %v24789_v20 }
 0x8d0   : > { %v21078_v51 = vpop.permute.xlu0 %10496  ;;  %v21080_v55 = vpop.permute.xlu1 %10412 }
 0x8d1   : > { %24912 = vst [vmem:[#allocation137_spill] sm:$0xff] %v21078_v51  ;;  %24913 = vst [vmem:[#allocation84_spill] sm:$0xff] %v21080_v55 }
 0x8d2   : > { %10815 = vbcast.lane.b32.xlu0 %v10813_v57, 256  ;;  %10731 = vbcast.lane.b32.xlu1 %v10725_v5, 264  ;;  %v10846_v5 = vrot.slane %v5642_v22, %v24793_v14 }
 0x8d4   : > { %v21083_v61 = vpop.permute.xlu0 %10507  ;;  %v21085_v10 = vpop.permute.xlu1 %10423 }
 0x8d5   : > { %24914 = vst [vmem:[#allocation91_spill] sm:$0xff] %v21083_v61  ;;  %24915 = vst [vmem:[#allocation50_spill] sm:$0xff] %v21085_v10 }
 0x8d6   : > { %10826 = vbcast.lane.b32.xlu0 %v10824_v63, 256  ;;  %10742 = vbcast.lane.b32.xlu1 %v10736_v26, 264  ;;  %v10857_v26 = vrot.slane %v5642_v22, %v24795_v48 }
 0x8d8   : > { %v21088_v16 = vpop.permute.xlu0 %10518  ;;  %v21090_v46 = vpop.permute.xlu1 %10434 }
 0x8d9   : > { %24916 = vst [vmem:[#allocation42_spill] sm:$0xff] %v21088_v16  ;;  %24917 = vst [vmem:[#allocation33_spill] sm:$0xff] %v21090_v46 }
 0x8da   : > { %10837 = vbcast.lane.b32.xlu0 %v10835_v24, 256  ;;  %10753 = vbcast.lane.b32.xlu1 %v10747_v30, 264  ;;  %v10868_v30 = vrot.slane %v5642_v22, %v24736_v11 }
 0x8dc   : > { %v21093_v55 = vpop.permute.xlu0 %10529  ;;  %v21095_v51 = vpop.permute.xlu1 %10445 }
 0x8dd   : > { %24918 = vst [vmem:[#allocation168_spill] sm:$0xff] %v21093_v55  ;;  %24919 = vst [vmem:[#allocation167_spill] sm:$0xff] %v21095_v51  ;;  %v24924_v51 = vld [vmem:[#allocation22_spill] sm:$0xff]  ;;  %v24925_v55 = vld [vmem:[#allocation45_spill] sm:$0xff] }
 0x8de   : > { %10848 = vbcast.lane.b32.xlu0 %v10846_v5, 256  ;;  %10764 = vbcast.lane.b32.xlu1 %v10758_v28, 264  ;;  %v5649_v4 = vadd.f32 %v24925_v55, %v24924_v51 }
 0x8e0   : > { %v21098_v10 = vpop.permute.xlu0 %10540  ;;  %v21100_v61 = vpop.permute.xlu1 %10456  ;;  %v10901_v51 = vrot.slane %v5649_v4, %v24715_v31 }
 0x8e1   : > { %24920 = vst [vmem:[#allocation19_spill] sm:$0xff] %v21098_v10  ;;  %24921 = vst [vmem:[#allocation185_spill] sm:$0xff] %v21100_v61  ;;  %v10879_v61 = vrot.slane %v5642_v22, %v24741_v41 }
 0x8e2   : > { %10859 = vbcast.lane.b32.xlu0 %v10857_v26, 256  ;;  %10775 = vbcast.lane.b32.xlu1 %v10769_v52, 264 }
 0x8e4   : > { %v21103_v46 = vpop.permute.xlu0 %10551  ;;  %v21105_v16 = vpop.permute.xlu1 %10467 }
 0x8e5   : > { %24922 = vst [vmem:[#allocation182_spill] sm:$0xff] %v21103_v46  ;;  %24923 = vst [vmem:[#allocation56_spill] sm:$0xff] %v21105_v16  ;;  %v10890_v16 = vrot.slane %v5649_v4, %v24710_v32 }
 0x8e6   : > { %10870 = vbcast.lane.b32.xlu0 %v10868_v30, 256  ;;  %10786 = vbcast.lane.b32.xlu1 %v10780_v21, 264 }
 0x8e8   : > { %v21110_v28 = vpop.permute.xlu0 %10562  ;;  %v21112_v10 = vpop.permute.xlu1 %10478 }
 0x8e9   : > { %24926 = vst [vmem:[#allocation138_spill] sm:$0xff] %v21110_v28  ;;  %24927 = vst [vmem:[#allocation134_spill] sm:$0xff] %v21112_v10 }
 0x8ea   : > { %10881 = vbcast.lane.b32.xlu0 %v10879_v61, 256  ;;  %10797 = vbcast.lane.b32.xlu1 %v10791_v0, 264  ;;  %v10912_v0 = vrot.slane %v5649_v4, %v24720_v43 }
 0x8ec   : > { %v21115_v52 = vpop.permute.xlu0 %10573  ;;  %v21117_v46 = vpop.permute.xlu1 %10489 }
 0x8ed   : > { %24928 = vst [vmem:[#allocation66_spill] sm:$0xff] %v21115_v52  ;;  %24929 = vst [vmem:[#allocation61_spill] sm:$0xff] %v21117_v46 }
 0x8ee   : > { %10892 = vbcast.lane.b32.xlu0 %v10890_v16, 256  ;;  %10808 = vbcast.lane.b32.xlu1 %v10802_v15, 264  ;;  %v10923_v15 = vrot.slane %v5649_v4, %v24789_v20 }
 0x8f0   : > { %v21120_v21 = vpop.permute.xlu0 %10584  ;;  %v21122_v47 = vpop.permute.xlu1 %10500 }
 0x8f1   : > { %24930 = vst [vmem:[#allocation53_spill] sm:$0xff] %v21120_v21  ;;  %24931 = vst [vmem:[#allocation37_spill] sm:$0xff] %v21122_v47 }
 0x8f2   : > { %10903 = vbcast.lane.b32.xlu0 %v10901_v51, 256  ;;  %10819 = vbcast.lane.b32.xlu1 %v10813_v57, 264  ;;  %v10934_v57 = vrot.slane %v5649_v4, %v24793_v14 }
 0x8f4   : > { %v21125_v28 = vpop.permute.xlu0 %10595  ;;  %v21127_v22 = vpop.permute.xlu1 %10511 }
 0x8f5   : > { %24932 = vst [vmem:[#allocation48_spill] sm:$0xff] %v21125_v28  ;;  %24933 = vst [vmem:[#allocation107_spill] sm:$0xff] %v21127_v22 }
 0x8f6   : > { %10914 = vbcast.lane.b32.xlu0 %v10912_v0, 256  ;;  %10830 = vbcast.lane.b32.xlu1 %v10824_v63, 264  ;;  %v10945_v63 = vrot.slane %v5649_v4, %v24795_v48 }
 0x8f8   : > { %v21130_v52 = vpop.permute.xlu0 %10606  ;;  %v21132_v46 = vpop.permute.xlu1 %10522 }
 0x8f9   : > { %24934 = vst [vmem:[#allocation109_spill] sm:$0xff] %v21130_v52  ;;  %24935 = vst [vmem:[#allocation64_spill] sm:$0xff] %v21132_v46 }
 0x8fa   : > { %10925 = vbcast.lane.b32.xlu0 %v10923_v15, 256  ;;  %10841 = vbcast.lane.b32.xlu1 %v10835_v24, 264  ;;  %v10956_v24 = vrot.slane %v5649_v4, %v24736_v11 }
 0x8fc   : > { %v21135_v21 = vpop.permute.xlu0 %10617  ;;  %v21137_v47 = vpop.permute.xlu1 %10533 }
 0x8fd   : > { %24936 = vst [vmem:[#allocation31_spill] sm:$0xff] %v21135_v21  ;;  %24937 = vst [vmem:[#allocation60_spill] sm:$0xff] %v21137_v47  ;;  %v24942_v47 = vld [vmem:[#allocation65_spill] sm:$0xff] }
 0x8fe   : > { %10936 = vbcast.lane.b32.xlu0 %v10934_v57, 256  ;;  %10852 = vbcast.lane.b32.xlu1 %v10846_v5, 264  ;;  %v5650_v21 = vadd.f32 %v24925_v55, %v24942_v47 }
 0x900   : > { %v21140_v22 = vpop.permute.xlu0 %10628  ;;  %v21142_v28 = vpop.permute.xlu1 %10544  ;;  %v10989_v55 = vrot.slane %v5650_v21, %v24715_v31 }
 0x901   : > { %24938 = vst [vmem:[#allocation74_spill] sm:$0xff] %v21140_v22  ;;  %24939 = vst [vmem:[#allocation36_spill] sm:$0xff] %v21142_v28  ;;  %v10967_v28 = vrot.slane %v5649_v4, %v24741_v41 }
 0x902   : > { %10947 = vbcast.lane.b32.xlu0 %v10945_v63, 256  ;;  %10863 = vbcast.lane.b32.xlu1 %v10857_v26, 264 }
 0x904   : > { %v21145_v46 = vpop.permute.xlu0 %10639  ;;  %v21147_v52 = vpop.permute.xlu1 %10555 }
 0x905   : > { %24940 = vst [vmem:[#allocation90_spill] sm:$0xff] %v21145_v46  ;;  %24941 = vst [vmem:[#allocation86_spill] sm:$0xff] %v21147_v52  ;;  %v10978_v52 = vrot.slane %v5650_v21, %v24710_v32 }
 0x906   : > { %10958 = vbcast.lane.b32.xlu0 %v10956_v24, 256  ;;  %10874 = vbcast.lane.b32.xlu1 %v10868_v30, 264 }
 0x908   : > { %v21152_v5 = vpop.permute.xlu0 %10650  ;;  %v21154_v22 = vpop.permute.xlu1 %10566 }
 0x909   : > { %24943 = vst [vmem:[#allocation104_spill] sm:$0xff] %v21152_v5  ;;  %24944 = vst [vmem:[#allocation151_spill] sm:$0xff] %v21154_v22  ;;  %v21204_v22 = vrot.slane %v5650_v21, %v24741_v41 }
 0x90a   : > { %10969 = vbcast.lane.b32.xlu0 %v10967_v28, 256  ;;  %10885 = vbcast.lane.b32.xlu1 %v10879_v61, 264  ;;  %v11000_v61 = vrot.slane %v5650_v21, %v24720_v43 }
 0x90c   : > { %v21157_v26 = vpop.permute.xlu0 %10661  ;;  %v21159_v46 = vpop.permute.xlu1 %10577 }
 0x90d   : > { %24945 = vst [vmem:[#allocation122_spill] sm:$0xff] %v21157_v26  ;;  %24946 = vst [vmem:[#allocation123_spill] sm:$0xff] %v21159_v46 }
 0x90e   : > { %10980 = vbcast.lane.b32.xlu0 %v10978_v52, 256  ;;  %10896 = vbcast.lane.b32.xlu1 %v10890_v16, 264  ;;  %v11011_v16 = vrot.slane %v5650_v21, %v24789_v20 }
 0x910   : > { %v21162_v30 = vpop.permute.xlu0 %10672  ;;  %v21164_v10 = vpop.permute.xlu1 %10588 }
 0x911   : > { %24947 = vst [vmem:[#allocation73_spill] sm:$0xff] %v21162_v30  ;;  %24948 = vst [vmem:[#allocation106_spill] sm:$0xff] %v21164_v10 }
 0x912   : > { %10991 = vbcast.lane.b32.xlu0 %v10989_v55, 256  ;;  %10907 = vbcast.lane.b32.xlu1 %v10901_v51, 264  ;;  %v21182_v51 = vrot.slane %v5650_v21, %v24793_v14 }
 0x914   : > { %v21167_v47 = vpop.permute.xlu0 %10683  ;;  %v21169_v4 = vpop.permute.xlu1 %10599 }
 0x915   : > { %24949 = vst [vmem:[#allocation136_spill] sm:$0xff] %v21167_v47  ;;  %24950 = vst [vmem:[#allocation100_spill] sm:$0xff] %v21169_v4  ;;  %v21188_v47 = vrot.slane %v5650_v21, %v24795_v48 }
 0x916   : > { %11002 = vbcast.lane.b32.xlu0 %v11000_v61, 256  ;;  %10918 = vbcast.lane.b32.xlu1 %v10912_v0, 264 }
 0x918   : > { %v21172_v5 = vpop.permute.xlu0 %10694  ;;  %v21174_v26 = vpop.permute.xlu1 %10610 }
 0x919   : > { %24951 = vst [vmem:[#allocation68_spill] sm:$0xff] %v21172_v5  ;;  %24952 = vst [vmem:[#allocation57_spill] sm:$0xff] %v21174_v26 }
 0x91a   : > { %11013 = vbcast.lane.b32.xlu0 %v11011_v16, 256  ;;  %10929 = vbcast.lane.b32.xlu1 %v10923_v15, 264 }
 0x91c   : > { %v21177_v30 = vpop.permute.xlu0 %10705  ;;  %v21179_v10 = vpop.permute.xlu1 %10621 }
 0x91d   : > { %24953 = vst [vmem:[#allocation72_spill] sm:$0xff] %v21177_v30  ;;  %24954 = vst [vmem:[#allocation83_spill] sm:$0xff] %v21179_v10  ;;  %v21194_v10 = vrot.slane %v5650_v21, %v24736_v11  ;;  %v24957_v30 = vld [vmem:[#allocation47_spill] sm:$0xff] }
 0x91e   : > { %11024 = vbcast.lane.b32.xlu0 %v21182_v51, 256  ;;  %10940 = vbcast.lane.b32.xlu1 %v10934_v57, 264  ;;  %v24958_v57 = vld [vmem:[#allocation35_spill] sm:$0xff] }
 0x91f   : > { %v21199_v5 = vadd.f32 %v24958_v57, %v24957_v30 }
 0x920   : > { %v10717_v4 = vpop.permute.xlu0 %10716  ;;  %v21185_v0 = vpop.permute.xlu1 %10632 }
 0x921   : > { %24955 = vst [vmem:[#allocation180_spill] sm:$0xff] %v21185_v0 }
 0x922   : > { %11035 = vbcast.lane.b32.xlu0 %v21188_v47, 256  ;;  %10951 = vbcast.lane.b32.xlu1 %v10945_v63, 264  ;;  %v11415_v63 = vsel %vm518_vm3, %v20684_v25, %v10717_v4 }
 0x924   : > { %v10728_v15 = vpop.permute.xlu0 %10727  ;;  %v21191_v26 = vpop.permute.xlu1 %10643 }
 0x925   : > { %24956 = vst [vmem:[#allocation58_spill] sm:$0xff] %v21191_v26  ;;  %v11417_v21 = vsel %vm518_vm3, %v20699_v23, %v10728_v15 }
 0x926   : > { %11046 = vbcast.lane.b32.xlu0 %v21194_v10, 256  ;;  %10962 = vbcast.lane.b32.xlu1 %v10956_v24, 264 }
 0x928   : > { %v10739_v0 = vpop.permute.xlu0 %10738  ;;  %v21201_v46 = vpop.permute.xlu1 %10654 }
 0x929   : > { %24959 = vst [vmem:[#allocation132_spill] sm:$0xff] %v21201_v46  ;;  %v11419_v26 = vsel %vm518_vm3, %v20728_v50, %v10739_v0  ;;  %v21215_v46 = vrot.slane %v21199_v5, %v24710_v32 }
 0x92a   : > { %v11544_v60 = vcombine.high %v11415_v63, %v11419_v26  ;;  %11057 = vbcast.lane.b32.xlu0 %v21204_v22, 256  ;;  %10973 = vbcast.lane.b32.xlu1 %v10967_v28, 264  ;;  %v11543_v24 = vcombine.low %v11415_v63, %v11419_v26  ;;  %v21224_v28 = vrot.slane %v21199_v5, %v24715_v31  ;;  %v24961_v26 = vld [vmem:[#allocation20_spill] sm:$0xff] }
 0x92c   : > { %v10750_v45 = vpop.permute.xlu0 %10749  ;;  %v21211_v30 = vpop.permute.xlu1 %10665  ;;  %v11551_v0 = vrot.slane %v11543_v24, %v24961_v26  ;;  %v11558_v63 = vrot.slane %v11544_v60, %v24961_v26  ;;  %v21237_v24 = vrot.slane %v21199_v5, %v24720_v43 }
 0x92d   : > { %24960 = vst [vmem:[#allocation59_spill] sm:$0xff] %v21211_v30  ;;  %v11421_v25 = vsel %vm518_vm3, %v20761_v42, %v10750_v45 }
 0x92e   : > { %v11559_v4 = vcombine.low %v11417_v21, %v11421_v25  ;;  %v11560_v50 = vcombine.high %v11417_v21, %v11421_v25  ;;  %11068 = vbcast.lane.b32.xlu0 %v21215_v46, 256  ;;  %10984 = vbcast.lane.b32.xlu1 %v10978_v52, 264 }
 0x930   : > { %v11567_v30 = vrot.slane %v11559_v4, %v24961_v26  ;;  %v11574_v23 = vrot.slane %v11560_v50, %v24961_v26  ;;  %v10761_v15 = vpop.permute.xlu0 %10760  ;;  %v21230_v58 = vpop.permute.xlu1 %10676  ;;  %v21244_v50 = vrot.slane %v21199_v5, %v24789_v20 }
 0x931   : > { %24962 = vst [vmem:[#allocation161_spill] sm:$0xff] %v21230_v58 }
 0x932   : > { %v11608_v42 = vcombine.high %v11551_v0, %v11567_v30  ;;  %v11623_v45 = vcombine.low %v11558_v63, %v11574_v23  ;;  %v11624_v21 = vcombine.high %v11558_v63, %v11574_v23  ;;  %11079 = vbcast.lane.b32.xlu0 %v21224_v28, 256  ;;  %10995 = vbcast.lane.b32.xlu1 %v10989_v55, 264 }
 0x933   : > { %v11423_v55 = vsel %vm518_vm3, %v20805_v33, %v10761_v15 }
 0x934   : > { %v10772_v52 = vpop.permute.xlu0 %10771  ;;  %v21233_v25 = vpop.permute.xlu1 %10687 }
 0x935   : > { %24963 = vst [vmem:[#allocation108_spill] sm:$0xff] %v21233_v25  ;;  %v11425_v6 = vsel %vm518_vm3, %v20835_v49, %v10772_v52 }
 0x936   : > { %11090 = vbcast.lane.b32.xlu0 %v21237_v24, 256  ;;  %11006 = vbcast.lane.b32.xlu1 %v11000_v61, 264 }
 0x938   : > { %v10783_v60 = vpop.permute.xlu0 %10782  ;;  %v21240_v4 = vpop.permute.xlu1 %10698 }
 0x939   : > { %24964 = vst [vmem:[#allocation52_spill] sm:$0xff] %v21240_v4  ;;  %v11427_v63 = vsel %vm518_vm3, %v20858_v40, %v10783_v60  ;;  %v21255_v4 = vrot.slane %v21199_v5, %v24793_v14  ;;  %v11607_v60 = vcombine.low %v11551_v0, %v11567_v30 }
 0x93a   : > { %v11576_v23 = vcombine.high %v11423_v55, %v11427_v63  ;;  %11101 = vbcast.lane.b32.xlu0 %v21244_v50, 256  ;;  %11017 = vbcast.lane.b32.xlu1 %v11011_v16, 264  ;;  %v11575_v25 = vcombine.low %v11423_v55, %v11427_v63  ;;  %v21265_v16 = vrot.slane %v21199_v5, %v24795_v48 }
 0x93c   : > { %v10794_v58 = vpop.permute.xlu0 %10793  ;;  %v21251_v61 = vpop.permute.xlu1 %10709  ;;  %v11583_v55 = vrot.slane %v11575_v25, %v24961_v26  ;;  %v11590_v63 = vrot.slane %v11576_v23, %v24961_v26  ;;  %v21281_v25 = vrot.slane %v21199_v5, %v24736_v11 }
 0x93d   : > { %24965 = vst [vmem:[#allocation162_spill] sm:$0xff] %v21251_v61  ;;  %v11429_v33 = vsel %vm518_vm3, %v20873_v59, %v10794_v58 }
 0x93e   : > { %v11591_v15 = vcombine.low %v11425_v6, %v11429_v33  ;;  %v11592_v40 = vcombine.high %v11425_v6, %v11429_v33  ;;  %11112 = vbcast.lane.b32.xlu0 %v21255_v4, 256  ;;  %11028 = vbcast.lane.b32.xlu1 %v21182_v51, 264  ;;  %v24966_v51 = vld [vmem:[#allocation21_spill] sm:$0xff] }
 0x93f   : > { %v21273_v0 = vrot.slane %v11607_v60, %v24966_v51  ;;  %v21276_v39 = vrot.slane %v11608_v42, %v24966_v51 }
 0x940   : > { %v11599_v49 = vrot.slane %v11591_v15, %v24961_v26  ;;  %v11606_v52 = vrot.slane %v11592_v40, %v24961_v26  ;;  %v10805_v59 = vpop.permute.xlu0 %10804  ;;  %v10721_v58 = vpop.permute.xlu1 %10720 }
 0x941   : > { %24967 = vst [vmem:[#allocation43_spill] sm:$0xff] %v21273_v0 }
 0x942   : > { %v11639_v6 = vcombine.low %v11583_v55, %v11599_v49  ;;  %v11640_v33 = vcombine.high %v11583_v55, %v11599_v49  ;;  %v11655_v61 = vcombine.low %v11590_v63, %v11606_v52  ;;  %v11656_v30 = vcombine.high %v11590_v63, %v11606_v52  ;;  %11123 = vbcast.lane.b32.xlu0 %v21265_v16, 256 }
 0x943   : > { %11039 = vbcast.lane.b32.xlu1 %v21188_v47, 264  ;;  %v21296_v47 = vrot.slane %v11623_v45, %v24966_v51  ;;  %v21299_v63 = vrot.slane %v11624_v21, %v24966_v51  ;;  %v11431_v45 = vsel %vm518_vm3, %v20880_v53, %v10805_v59  ;;  %v21329_v21 = vsel %vm518_vm3, %v20882_v44, %v10721_v58 }
 0x944   : > { %v21284_v23 = vrot.slane %v11639_v6, %v24966_v51  ;;  %v21287_v15 = vrot.slane %v11640_v33, %v24966_v51  ;;  %v21290_v40 = vrot.slane %v11655_v61, %v24966_v51  ;;  %v21293_v60 = vrot.slane %v11656_v30, %v24966_v51  ;;  %v10816_v42 = vpop.permute.xlu0 %10815  ;;  %v10732_v55 = vpop.permute.xlu1 %10731  ;;  %v24969_v30 = vld [vmem:[#allocation26_spill] sm:$0xff]  ;;  %24970 = vst [vmem:[#allocation149_spill] sm:$0xff] %v21329_v21 }
 0x945   : > { %v21319_v61 = vadd.f32 %v24958_v57, %v24969_v30 }
 0x946   : > { %24968 = vst [vmem:[#allocation148_spill] sm:$0xff] %v21284_v23  ;;  %11134 = vbcast.lane.b32.xlu0 %v21281_v25, 256 }
 0x947   : > { %11050 = vbcast.lane.b32.xlu1 %v21194_v10, 264  ;;  %v21323_v10 = vrot.slane %v21199_v5, %v24741_v41  ;;  %v21343_v44 = vrot.slane %v21319_v61, %v24710_v32 }
 0x948   : > { %v10827_v49 = vpop.permute.xlu0 %10826  ;;  %v10743_v52 = vpop.permute.xlu1 %10742 }
 0x949   : > { %v11435_v33 = vsel %vm518_vm3, %v20896_v3, %v10827_v49  ;;  %v21335_v57 = vsel %vm518_vm3, %v20898_v12, %v10743_v52  ;;  %v11433_v3 = vsel %vm518_vm3, %v20887_v29, %v10816_v42  ;;  %v21349_v12 = vsel %vm518_vm3, %v20889_v19, %v10732_v55 }
 0x94a   : > { %24971 = vst [vmem:[#allocation110_spill] sm:$0xff] %v21335_v57  ;;  %v11680_v30 = vcombine.high %v11431_v45, %v11435_v33  ;;  %v11816_v6 = vcombine.high %v21329_v21, %v21335_v57  ;;  %11145 = vbcast.lane.b32.xlu0 %v21323_v10, 256  ;;  %v11679_v5 = vcombine.low %v11431_v45, %v11435_v33  ;;  %24972 = vst [vmem:[#allocation177_spill] sm:$0xff] %v21349_v12 }
 0x94b   : > { %11061 = vbcast.lane.b32.xlu1 %v21204_v22, 264  ;;  %v21366_v19 = vrot.slane %v21319_v61, %v24715_v31 }
 0x94c   : > { %v10838_v53 = vpop.permute.xlu0 %10837  ;;  %v10754_v59 = vpop.permute.xlu1 %10753  ;;  %v21361_v29 = vrot.slane %v11679_v5, %v24961_v26 }
 0x94d   : > { %v11437_v58 = vsel %vm518_vm3, %v20903_v1, %v10838_v53  ;;  %v21355_v49 = vsel %vm518_vm3, %v20905_v38, %v10754_v59  ;;  %v21369_v1 = vrot.slane %v11680_v30, %v24961_v26 }
 0x94e   : > { %24973 = vst [vmem:[#allocation178_spill] sm:$0xff] %v21355_v49  ;;  %v11695_v22 = vcombine.low %v11433_v3, %v11437_v58  ;;  %v11696_v52 = vcombine.high %v11433_v3, %v11437_v58  ;;  %v11832_v45 = vcombine.high %v21349_v12, %v21355_v49  ;;  %11156 = vbcast.lane.b32.xlu0 %v21343_v44, 256 }
 0x94f   : > { %11072 = vbcast.lane.b32.xlu1 %v21215_v46, 264  ;;  %v21381_v46 = vrot.slane %v11816_v6, %v24961_v26  ;;  %v21403_v3 = vrot.slane %v21319_v61, %v24789_v20 }
 0x950   : > { %v21372_v38 = vrot.slane %v11695_v22, %v24961_v26  ;;  %v21375_v42 = vrot.slane %v11696_v52, %v24961_v26  ;;  %v21378_v55 = vrot.slane %v11832_v45, %v24961_v26  ;;  %v10849_v33 = vpop.permute.xlu0 %10848  ;;  %v10765_v5 = vpop.permute.xlu1 %10764  ;;  %v21397_v52 = vrot.slane %v21319_v61, %v24720_v43 }
 0x951   : > { %v11439_v58 = vsel %vm518_vm3, %v20909_v56, %v10849_v33 }
 0x952   : > { %v11744_v53 = vcombine.high %v21361_v29, %v21372_v38  ;;  %11167 = vbcast.lane.b32.xlu0 %v21366_v19, 256 }
 0x953   : > { %11083 = vbcast.lane.b32.xlu1 %v21224_v28, 264  ;;  %v21409_v28 = vsel %vm518_vm3, %v20911_v13, %v10765_v5  ;;  %v21423_v13 = vrot.slane %v21319_v61, %v24793_v14 }
 0x954   : > { %v10860_v6 = vpop.permute.xlu0 %10859  ;;  %v10776_v22 = vpop.permute.xlu1 %10775  ;;  %24974 = vst [vmem:[#allocation113_spill] sm:$0xff] %v21409_v28 }
 0x956   : > { %11178 = vbcast.lane.b32.xlu0 %v21397_v52, 256 }
 0x957   : > { %11094 = vbcast.lane.b32.xlu1 %v21237_v24, 264 }
 0x958   : > { %v10871_v45 = vpop.permute.xlu0 %10870  ;;  %v10787_v59 = vpop.permute.xlu1 %10786 }
 0x959   : > { %v11443_v30 = vsel %vm518_vm3, %v20920_v27, %v10871_v45  ;;  %v21415_v21 = vsel %vm518_vm3, %v20922_v62, %v10787_v59  ;;  %v11441_v27 = vsel %vm518_vm3, %v20915_v17, %v10860_v6  ;;  %v21429_v62 = vsel %vm518_vm3, %v20917_v2, %v10776_v22 }
 0x95a   : > { %24975 = vst [vmem:[#allocation30_spill] sm:$0xff] %v21415_v21  ;;  %v11712_v24 = vcombine.high %v11439_v58, %v11443_v30  ;;  %v11848_v57 = vcombine.high %v21409_v28, %v21415_v21  ;;  %11189 = vbcast.lane.b32.xlu0 %v21403_v3, 256  ;;  %v11711_v12 = vcombine.low %v11439_v58, %v11443_v30  ;;  %24976 = vst [vmem:[#allocation28_spill] sm:$0xff] %v21429_v62 }
 0x95b   : > { %11105 = vbcast.lane.b32.xlu1 %v21244_v50, 264  ;;  %v21444_v2 = vrot.slane %v21319_v61, %v24795_v48 }
 0x95c   : > { %v10882_v56 = vpop.permute.xlu0 %10881  ;;  %v10798_v33 = vpop.permute.xlu1 %10797  ;;  %v11719_v17 = vrot.slane %v11711_v12, %v24961_v26  ;;  %v11862_v12 = vrot.slane %v11848_v57, %v24961_v26 }
 0x95d   : > { %v11445_v5 = vsel %vm518_vm3, %v20925_v54, %v10882_v56  ;;  %v21435_v30 = vsel %vm518_vm3, %v20927_v37, %v10798_v33  ;;  %v11726_v54 = vrot.slane %v11712_v24, %v24961_v26  ;;  %v11743_v33 = vcombine.low %v21361_v29, %v21372_v38 }
 0x95e   : > { %24977 = vst [vmem:[#allocation147_spill] sm:$0xff] %v21435_v30  ;;  %v11727_v50 = vcombine.low %v11441_v27, %v11445_v5  ;;  %v11728_v59 = vcombine.high %v11441_v27, %v11445_v5  ;;  %v11864_v58 = vcombine.high %v21429_v62, %v21435_v30  ;;  %11200 = vbcast.lane.b32.xlu0 %v21423_v13, 256 }
 0x95f   : > { %11116 = vbcast.lane.b32.xlu1 %v21255_v4, 264  ;;  %v21455_v24 = vrot.slane %v11744_v53, %v24966_v51 }
 0x960   : > { %v11735_v37 = vrot.slane %v11727_v50, %v24961_v26  ;;  %v11742_v6 = vrot.slane %v11728_v59, %v24961_v26  ;;  %v11878_v22 = vrot.slane %v11864_v58, %v24961_v26  ;;  %v10893_v45 = vpop.permute.xlu0 %10892  ;;  %v10809_v56 = vpop.permute.xlu1 %10808  ;;  %v21460_v58 = vrot.slane %v21319_v61, %v24736_v11 }
 0x961   : > { %v11447_v21 = vsel %vm518_vm3, %v20930_v36, %v10893_v45 }
 0x962   : > { %v11775_v4 = vcombine.low %v11719_v17, %v11735_v37  ;;  %v11776_v27 = vcombine.high %v11719_v17, %v11735_v37  ;;  %v11791_v5 = vcombine.low %v11726_v54, %v11742_v6  ;;  %v11792_v28 = vcombine.high %v11726_v54, %v11742_v6  ;;  %11211 = vbcast.lane.b32.xlu0 %v21444_v2, 256  ;;  %v24980_v37 = vld [vmem:[#allocation55_spill] sm:$0xff] }
 0x963   : > { %v11927_v50 = vcombine.low %v11862_v12, %v11878_v22  ;;  %v11928_v59 = vcombine.high %v11862_v12, %v11878_v22  ;;  %11127 = vbcast.lane.b32.xlu1 %v21265_v16, 264  ;;  %v24981_v16 = vld [vmem:[#allocation23_spill] sm:$0xff]  ;;  %v21479_v22 = vrot.slane %v11743_v33, %v24966_v51  ;;  %v24983_v12 = vcombine.low %v21369_v1, %v21375_v42 }
 0x964   : > { %v21463_v29 = vrot.slane %v11775_v4, %v24966_v51  ;;  %v21466_v57 = vrot.slane %v11776_v27, %v24966_v51  ;;  %v21469_v38 = vrot.slane %v11791_v5, %v24966_v51  ;;  %v21472_v53 = vrot.slane %v11792_v28, %v24966_v51  ;;  %v10904_v17 = vpop.permute.xlu0 %10903  ;;  %v10820_v54 = vpop.permute.xlu1 %10819 }
 0x965   : > { %v21476_v6 = vadd.f32 %v24981_v16, %v24980_v37  ;;  %24982 = vst [vmem:[#allocation102_spill] sm:$0xff] %v21479_v22  ;;  %v21485_v4 = vrot.slane %v24983_v12, %v24966_v51  ;;  %v21489_v27 = vrot.slane %v21319_v61, %v24741_v41  ;;  %v24984_v28 = vcombine.high %v21369_v1, %v21375_v42 }
 0x966   : > { %24978 = vst [vmem:[#allocation112_spill] sm:$0xff] %v21463_v29  ;;  %24979 = vst [vmem:[#allocation152_spill] sm:$0xff] %v21472_v53  ;;  %v21498_v37 = vrot.slane %v11927_v50, %v24966_v51  ;;  %v21501_v33 = vrot.slane %v11928_v59, %v24966_v51  ;;  %11222 = vbcast.lane.b32.xlu0 %v21460_v58, 256  ;;  %v24988_v59 = vcombine.low %v21381_v46, %v21378_v55  ;;  %v25021_v53 = vld [vmem:[#allocation171_spill] sm:$0xff] }
 0x967   : > { %v21495_v5 = vrot.slane %v24984_v28, %v24966_v51  ;;  %11138 = vbcast.lane.b32.xlu1 %v21281_v25, 264  ;;  %v24990_v25 = vcombine.high %v21381_v46, %v21378_v55 }
 0x968   : > { %24986 = vst [vmem:[#allocation69_spill] sm:$0xff] %v21498_v37  ;;  %24987 = vst [vmem:[#allocation146_spill] sm:$0xff] %v21501_v33  ;;  %v21519_v28 = vrot.slane %v24988_v59, %v24966_v51  ;;  %v10915_v12 = vpop.permute.xlu0 %10914  ;;  %v10831_v1 = vpop.permute.xlu1 %10830  ;;  %v21535_v59 = vsel %vm518_vm3, %v20932_v18, %v10809_v56  ;;  %v21557_v56 = vrot.slane %v21476_v6, %v24710_v32 }
 0x969   : > { %24985 = vst [vmem:[#allocation150_spill] sm:$0xff] %v21495_v5  ;;  %v21525_v61 = vrot.slane %v24990_v25, %v24966_v51  ;;  %24992 = vst [vmem:[#allocation111_spill] sm:$0xff] %v21535_v59  ;;  %v11451_v55 = vsel %vm518_vm3, %v20942_v34, %v10915_v12  ;;  %v21541_v46 = vsel %vm518_vm3, %v20944_v9, %v10831_v1  ;;  %v25023_v5 = vld [vmem:[#allocation170_spill] sm:$0xff] }
 0x96a   : > { %24989 = vst [vmem:[#allocation129_spill] sm:$0xff] %v21519_v28  ;;  %24993 = vst [vmem:[#allocation120_spill] sm:$0xff] %v21541_v46  ;;  %v12087_v25 = vcombine.low %v11447_v21, %v11451_v55  ;;  %v12088_v49 = vcombine.high %v11447_v21, %v11451_v55  ;;  %v11952_v42 = vcombine.high %v21535_v59, %v21541_v46  ;;  %11233 = vbcast.lane.b32.xlu0 %v21489_v27, 256  ;;  %v24995_v55 = vld [vmem:[#allocation160_spill] sm:$0xff]  ;;  %v25001_v28 = vld [vmem:[#allocation34_spill] sm:$0xff] }
 0x96b   : > { %24991 = vst [vmem:[#allocation131_spill] sm:$0xff] %v21525_v61  ;;  %11149 = vbcast.lane.b32.xlu1 %v21323_v10, 264  ;;  %v11449_v10 = vsel %vm518_vm3, %v20935_v8, %v10904_v17  ;;  %v21563_v12 = vsel %vm518_vm3, %v20937_v7, %v10820_v54  ;;  %v21580_v7 = vrot.slane %v21476_v6, %v24715_v31  ;;  %v25000_v61 = vld [vmem:[#allocation32_spill] sm:$0xff] }
 0x96c   : > { %v10926_v21 = vpop.permute.xlu0 %10925  ;;  %v10842_v45 = vpop.permute.xlu1 %10841  ;;  %24994 = vst [vmem:[#allocation144_spill] sm:$0xff] %v21563_v12  ;;  %v21575_v8 = vrot.slane %v12087_v25, %v24961_v26 }
 0x96d   : > { %v11453_v1 = vsel %vm518_vm3, %v20947_v35, %v10926_v21  ;;  %v21569_v34 = vsel %vm518_vm3, %v24995_v55, %v10842_v45  ;;  %v21583_v35 = vrot.slane %v12088_v49, %v24961_v26  ;;  %v21611_v55 = vrot.slane %v21476_v6, %v24720_v43  ;;  %v24997_v49 = vld [vmem:[#allocation157_spill] sm:$0xff] }
 0x96e   : > { %24996 = vst [vmem:[#allocation126_spill] sm:$0xff] %v21569_v34  ;;  %v12103_v9 = vcombine.low %v11449_v10, %v11453_v1  ;;  %v12104_v18 = vcombine.high %v11449_v10, %v11453_v1  ;;  %v11968_v36 = vcombine.high %v21563_v12, %v21569_v34  ;;  %11244 = vbcast.lane.b32.xlu0 %v21557_v56, 256 }
 0x96f   : > { %11160 = vbcast.lane.b32.xlu1 %v21343_v44, 264  ;;  %v21595_v44 = vrot.slane %v11952_v42, %v24961_v26 }
 0x970   : > { %v21586_v17 = vrot.slane %v12103_v9, %v24961_v26  ;;  %v21589_v54 = vrot.slane %v12104_v18, %v24961_v26  ;;  %v21592_v21 = vrot.slane %v11968_v36, %v24961_v26  ;;  %v10937_v25 = vpop.permute.xlu0 %10936  ;;  %v10853_v45 = vpop.permute.xlu1 %10852  ;;  %v21617_v36 = vrot.slane %v21476_v6, %v24789_v20 }
 0x971   : > { %v11455_v18 = vsel %vm518_vm3, %v24997_v49, %v10937_v25 }
 0x972   : > { %v12152_v10 = vcombine.high %v21575_v8, %v21586_v17  ;;  %11255 = vbcast.lane.b32.xlu0 %v21580_v7, 256 }
 0x973   : > { %11171 = vbcast.lane.b32.xlu1 %v21366_v19, 264  ;;  %v24998_v19 = vld [vmem:[#allocation156_spill] sm:$0xff] }
 0x974   : > { %v10948_v42 = vpop.permute.xlu0 %10947  ;;  %v10864_v1 = vpop.permute.xlu1 %10863  ;;  %v21623_v33 = vsel %vm518_vm3, %v24998_v19, %v10853_v45  ;;  %v21637_v45 = vrot.slane %v21476_v6, %v24793_v14  ;;  %v25006_v19 = vld [vmem:[#allocation176_spill] sm:$0xff] }
 0x975   : > { %24999 = vst [vmem:[#allocation85_spill] sm:$0xff] %v21623_v33 }
 0x976   : > { %11266 = vbcast.lane.b32.xlu0 %v21611_v55, 256 }
 0x977   : > { %11182 = vbcast.lane.b32.xlu1 %v21397_v52, 264 }
 0x978   : > { %v10959_v50 = vpop.permute.xlu0 %10958  ;;  %v10875_v9 = vpop.permute.xlu1 %10874 }
 0x979   : > { %v11459_v37 = vsel %vm518_vm3, %v25000_v61, %v10959_v50  ;;  %v21629_v59 = vsel %vm518_vm3, %v25001_v28, %v10875_v9  ;;  %v25003_v61 = vld [vmem:[#allocation159_spill] sm:$0xff]  ;;  %v25004_v28 = vld [vmem:[#allocation158_spill] sm:$0xff] }
 0x97a   : > { %25002 = vst [vmem:[#allocation142_spill] sm:$0xff] %v21629_v59  ;;  %v12120_v52 = vcombine.high %v11455_v18, %v11459_v37  ;;  %v11984_v46 = vcombine.high %v21623_v33, %v21629_v59  ;;  %11277 = vbcast.lane.b32.xlu0 %v21617_v36, 256  ;;  %v12119_v12 = vcombine.low %v11455_v18, %v11459_v37  ;;  %v25007_v33 = vld [vmem:[#allocation175_spill] sm:$0xff] }
 0x97b   : > { %11193 = vbcast.lane.b32.xlu1 %v21403_v3, 264  ;;  %v11457_v50 = vsel %vm518_vm3, %v25003_v61, %v10948_v42  ;;  %v21643_v9 = vsel %vm518_vm3, %v25004_v28, %v10864_v1  ;;  %v21658_v1 = vrot.slane %v21476_v6, %v24795_v48  ;;  %v12151_v28 = vcombine.low %v21575_v8, %v21586_v17 }
 0x97c   : > { %v10970_v25 = vpop.permute.xlu0 %10969  ;;  %v10886_v49 = vpop.permute.xlu1 %10885  ;;  %25005 = vst [vmem:[#allocation101_spill] sm:$0xff] %v21643_v9  ;;  %v12127_v42 = vrot.slane %v12119_v12, %v24961_v26  ;;  %v11998_v12 = vrot.slane %v11984_v46, %v24961_v26 }
 0x97d   : > { %v11461_v34 = vsel %vm518_vm3, %v25006_v19, %v10970_v25  ;;  %v21649_v37 = vsel %vm518_vm3, %v25007_v33, %v10886_v49  ;;  %v12134_v25 = vrot.slane %v12120_v52, %v24961_v26  ;;  %v21669_v52 = vrot.slane %v12152_v10, %v24966_v51 }
 0x97e   : > { %25008 = vst [vmem:[#allocation135_spill] sm:$0xff] %v21649_v37  ;;  %v12135_v3 = vcombine.low %v11457_v50, %v11461_v34  ;;  %v12136_v18 = vcombine.high %v11457_v50, %v11461_v34  ;;  %v12000_v59 = vcombine.high %v21643_v9, %v21649_v37  ;;  %11288 = vbcast.lane.b32.xlu0 %v21637_v45, 256 }
 0x97f   : > { %11204 = vbcast.lane.b32.xlu1 %v21423_v13, 264 }
 0x980   : > { %v12143_v33 = vrot.slane %v12135_v3, %v24961_v26  ;;  %v12150_v49 = vrot.slane %v12136_v18, %v24961_v26  ;;  %v12014_v34 = vrot.slane %v12000_v59, %v24961_v26  ;;  %v10981_v61 = vpop.permute.xlu0 %10980  ;;  %v10897_v50 = vpop.permute.xlu1 %10896  ;;  %v21674_v59 = vrot.slane %v21476_v6, %v24736_v11 }
 0x982   : > { %v12183_v13 = vcombine.low %v12127_v42, %v12143_v33  ;;  %v12184_v19 = vcombine.high %v12127_v42, %v12143_v33  ;;  %v12199_v9 = vcombine.low %v12134_v25, %v12150_v49  ;;  %v12200_v37 = vcombine.high %v12134_v25, %v12150_v49  ;;  %11299 = vbcast.lane.b32.xlu0 %v21658_v1, 256  ;;  %v25010_v33 = vld [vmem:[#allocation51_spill] sm:$0xff] }
 0x983   : > { %v12063_v3 = vcombine.low %v11998_v12, %v12014_v34  ;;  %v12064_v18 = vcombine.high %v11998_v12, %v12014_v34  ;;  %11215 = vbcast.lane.b32.xlu1 %v21444_v2, 264  ;;  %v21690_v2 = vadd.f32 %v24981_v16, %v25010_v33  ;;  %v21693_v49 = vrot.slane %v12151_v28, %v24966_v51 }
 0x984   : > { %v21677_v8 = vrot.slane %v12183_v13, %v24966_v51  ;;  %v21680_v46 = vrot.slane %v12184_v19, %v24966_v51  ;;  %v21683_v17 = vrot.slane %v12199_v9, %v24966_v51  ;;  %v21686_v10 = vrot.slane %v12200_v37, %v24966_v51  ;;  %v10992_v42 = vpop.permute.xlu0 %10991  ;;  %v10908_v25 = vpop.permute.xlu1 %10907 }
 0x985   : > { %25011 = vst [vmem:[#allocation44_spill] sm:$0xff] %v21693_v49  ;;  %v25012_v34 = vcombine.low %v21583_v35, %v21589_v54  ;;  %v21703_v9 = vrot.slane %v21476_v6, %v24741_v41  ;;  %v25013_v37 = vcombine.high %v21583_v35, %v21589_v54  ;;  %v21712_v16 = vrot.slane %v12063_v3, %v24966_v51  ;;  %v25020_v6 = vld [vmem:[#allocation172_spill] sm:$0xff] }
 0x986   : > { %25009 = vst [vmem:[#allocation154_spill] sm:$0xff] %v21677_v8  ;;  %v21715_v28 = vrot.slane %v12064_v18, %v24966_v51  ;;  %11310 = vbcast.lane.b32.xlu0 %v21674_v59, 256  ;;  %v25016_v18 = vcombine.low %v21595_v44, %v21592_v21  ;;  %v11463_v19 = vsel %vm518_vm3, %v25020_v6, %v10981_v61  ;;  %v25029_v61 = vld [vmem:[#allocation27_spill] sm:$0xff] }
 0x987   : > { %v21699_v12 = vrot.slane %v25012_v34, %v24966_v51  ;;  %v21709_v13 = vrot.slane %v25013_v37, %v24966_v51  ;;  %25014 = vst [vmem:[#allocation130_spill] sm:$0xff] %v21712_v16  ;;  %11226 = vbcast.lane.b32.xlu1 %v21460_v58, 264  ;;  %v25018_v58 = vcombine.high %v21595_v44, %v21592_v21  ;;  %v25024_v44 = vld [vmem:[#allocation169_spill] sm:$0xff]  ;;  %v25032_v16 = vld [vmem:[#allocation82_spill] sm:$0xff] }
 0x988   : > { %25015 = vst [vmem:[#allocation70_spill] sm:$0xff] %v21715_v28  ;;  %v21733_v33 = vrot.slane %v25016_v18, %v24966_v51  ;;  %v11003_v37 = vpop.permute.xlu0 %11002  ;;  %v10919_v35 = vpop.permute.xlu1 %10918  ;;  %v21749_v18 = vsel %vm518_vm3, %v25021_v53, %v10897_v50 }
 0x989   : > { %v21739_v34 = vrot.slane %v25018_v58, %v24966_v51  ;;  %25022 = vst [vmem:[#allocation125_spill] sm:$0xff] %v21749_v18  ;;  %v11467_v21 = vsel %vm518_vm3, %v25023_v5, %v11003_v37  ;;  %v21755_v58 = vsel %vm518_vm3, %v25024_v44, %v10919_v35  ;;  %v21771_v35 = vrot.slane %v21690_v2, %v24710_v32  ;;  %v25026_v37 = vld [vmem:[#allocation174_spill] sm:$0xff]  ;;  %v25030_v5 = vld [vmem:[#allocation40_spill] sm:$0xff] }
 0x98a   : > { %25017 = vst [vmem:[#allocation25_spill] sm:$0xff] %v21733_v33  ;;  %25025 = vst [vmem:[#allocation119_spill] sm:$0xff] %v21755_v58  ;;  %v12223_v62 = vcombine.low %v11463_v19, %v11467_v21  ;;  %v12224_v30 = vcombine.high %v11463_v19, %v11467_v21  ;;  %v12360_v54 = vcombine.high %v21749_v18, %v21755_v58  ;;  %11321 = vbcast.lane.b32.xlu0 %v21703_v9, 256  ;;  %v25027_v21 = vld [vmem:[#allocation173_spill] sm:$0xff] }
 0x98b   : > { %25019 = vst [vmem:[#allocation143_spill] sm:$0xff] %v21739_v34  ;;  %11237 = vbcast.lane.b32.xlu1 %v21489_v27, 264  ;;  %v11465_v27 = vsel %vm518_vm3, %v25026_v37, %v10992_v42  ;;  %v21777_v44 = vsel %vm518_vm3, %v25027_v21, %v10908_v25  ;;  %v21794_v25 = vrot.slane %v21690_v2, %v24715_v31  ;;  %v25035_v18 = vld [vmem:[#allocation81_spill] sm:$0xff] }
 0x98c   : > { %v11014_v19 = vpop.permute.xlu0 %11013  ;;  %v10930_v6 = vpop.permute.xlu1 %10929  ;;  %25028 = vst [vmem:[#allocation145_spill] sm:$0xff] %v21777_v44  ;;  %v21789_v42 = vrot.slane %v12223_v62, %v24961_v26  ;;  %v21825_v21 = vrot.slane %v21690_v2, %v24720_v43  ;;  %v21831_v34 = vrot.slane %v21690_v2, %v24789_v20  ;;  %v25036_v58 = vld [vmem:[#allocation77_spill] sm:$0xff] }
 0x98d   : > { %v11469_v53 = vsel %vm518_vm3, %v25029_v61, %v11014_v19  ;;  %v21783_v3 = vsel %vm518_vm3, %v25030_v5, %v10930_v6  ;;  %v21797_v61 = vrot.slane %v12224_v30, %v24961_v26 }
 0x98e   : > { %25031 = vst [vmem:[#allocation124_spill] sm:$0xff] %v21783_v3  ;;  %v12239_v50 = vcombine.low %v11465_v27, %v11469_v53  ;;  %v12240_v28 = vcombine.high %v11465_v27, %v11469_v53  ;;  %v12376_v32 = vcombine.high %v21777_v44, %v21783_v3  ;;  %11332 = vbcast.lane.b32.xlu0 %v21771_v35, 256 }
 0x98f   : > { %11248 = vbcast.lane.b32.xlu1 %v21557_v56, 264  ;;  %v21809_v56 = vrot.slane %v12360_v54, %v24961_v26 }
 0x990   : > { %v21800_v5 = vrot.slane %v12239_v50, %v24961_v26  ;;  %v21803_v53 = vrot.slane %v12240_v28, %v24961_v26  ;;  %v21806_v19 = vrot.slane %v12376_v32, %v24961_v26  ;;  %v11025_v62 = vpop.permute.xlu0 %11024  ;;  %v10941_v6 = vpop.permute.xlu1 %10940 }
 0x991   : > { %v11471_v37 = vsel %vm518_vm3, %v25032_v16, %v11025_v62 }
 0x992   : > { %v12288_v31 = vcombine.high %v21789_v42, %v21800_v5  ;;  %v12303_v30 = vcombine.low %v21797_v61, %v21803_v53  ;;  %11343 = vbcast.lane.b32.xlu0 %v21794_v25, 256  ;;  %v12439_v28 = vcombine.low %v21809_v56, %v21806_v19 }
 0x993   : > { %11259 = vbcast.lane.b32.xlu1 %v21580_v7, 264  ;;  %v25033_v7 = vld [vmem:[#allocation78_spill] sm:$0xff] }
 0x994   : > { %v11036_v54 = vpop.permute.xlu0 %11035  ;;  %v10952_v27 = vpop.permute.xlu1 %10951  ;;  %v21837_v33 = vsel %vm518_vm3, %v25033_v7, %v10941_v6  ;;  %v21851_v6 = vrot.slane %v21690_v2, %v24793_v14  ;;  %v25041_v7 = vld [vmem:[#allocation141_spill] sm:$0xff] }
 0x995   : > { %25034 = vst [vmem:[#allocation140_spill] sm:$0xff] %v21837_v33 }
 0x996   : > { %11354 = vbcast.lane.b32.xlu0 %v21825_v21, 256 }
 0x997   : > { %11270 = vbcast.lane.b32.xlu1 %v21611_v55, 264 }
 0x998   : > { %v11047_v32 = vpop.permute.xlu0 %11046  ;;  %v10963_v50 = vpop.permute.xlu1 %10962 }
 0x999   : > { %v11475_v43 = vsel %vm518_vm3, %v25035_v18, %v11047_v32  ;;  %v21843_v44 = vsel %vm518_vm3, %v25036_v58, %v10963_v50  ;;  %v25038_v18 = vld [vmem:[#allocation41_spill] sm:$0xff]  ;;  %v25039_v58 = vld [vmem:[#allocation63_spill] sm:$0xff] }
 0x99a   : > { %25037 = vst [vmem:[#allocation153_spill] sm:$0xff] %v21843_v44  ;;  %v12256_v55 = vcombine.high %v11471_v37, %v11475_v43  ;;  %v12392_v3 = vcombine.high %v21837_v33, %v21843_v44  ;;  %11365 = vbcast.lane.b32.xlu0 %v21831_v34, 256  ;;  %v12255_v20 = vcombine.low %v11471_v37, %v11475_v43  ;;  %v25042_v44 = vld [vmem:[#allocation97_spill] sm:$0xff] }
 0x99b   : > { %11281 = vbcast.lane.b32.xlu1 %v21617_v36, 264  ;;  %v11473_v32 = vsel %vm518_vm3, %v25038_v18, %v11036_v54  ;;  %v21857_v50 = vsel %vm518_vm3, %v25039_v58, %v10952_v27  ;;  %v21872_v27 = vrot.slane %v21690_v2, %v24795_v48  ;;  %v12287_v58 = vcombine.low %v21789_v42, %v21800_v5 }
 0x99c   : > { %v11058_v16 = vpop.permute.xlu0 %11057  ;;  %v10974_v62 = vpop.permute.xlu1 %10973  ;;  %25040 = vst [vmem:[#allocation103_spill] sm:$0xff] %v21857_v50  ;;  %v12263_v54 = vrot.slane %v12255_v20, %v24961_v26  ;;  %v12406_v20 = vrot.slane %v12392_v3, %v24961_v26 }
 0x99d   : > { %v11477_v33 = vsel %vm518_vm3, %v25041_v7, %v11058_v16  ;;  %v21863_v37 = vsel %vm518_vm3, %v25042_v44, %v10974_v62  ;;  %v12270_v16 = vrot.slane %v12256_v55, %v24961_v26  ;;  %v21883_v55 = vrot.slane %v12288_v31, %v24966_v51 }
 0x99e   : > { %25043 = vst [vmem:[#allocation164_spill] sm:$0xff] %v21863_v37  ;;  %v12271_v36 = vcombine.low %v11473_v32, %v11477_v33  ;;  %v12272_v43 = vcombine.high %v11473_v32, %v11477_v33  ;;  %v12408_v14 = vcombine.high %v21857_v50, %v21863_v37  ;;  %11376 = vbcast.lane.b32.xlu0 %v21851_v6, 256  ;;  %v25152_v37 = vld [vmem:[#allocation151_spill] sm:$0xff] }
 0x99f   : > { %11292 = vbcast.lane.b32.xlu1 %v21637_v45, 264 }
 0x9a0   : > { %v12279_v44 = vrot.slane %v12271_v36, %v24961_v26  ;;  %v12286_v62 = vrot.slane %v12272_v43, %v24961_v26  ;;  %v12422_v33 = vrot.slane %v12408_v14, %v24961_v26  ;;  %v11069_v18 = vpop.permute.xlu0 %11068  ;;  %v10985_v32 = vpop.permute.xlu1 %10984  ;;  %v21888_v14 = vrot.slane %v21690_v2, %v24736_v11 }
 0x9a2   : > { %v12319_v45 = vcombine.low %v12263_v54, %v12279_v44  ;;  %v12320_v7 = vcombine.high %v12263_v54, %v12279_v44  ;;  %v12335_v50 = vcombine.low %v12270_v16, %v12286_v62  ;;  %v12336_v48 = vcombine.high %v12270_v16, %v12286_v62  ;;  %11387 = vbcast.lane.b32.xlu0 %v21872_v27, 256 }
 0x9a3   : > { %v12471_v36 = vcombine.low %v12406_v20, %v12422_v33  ;;  %v12472_v43 = vcombine.high %v12406_v20, %v12422_v33  ;;  %11303 = vbcast.lane.b32.xlu1 %v21658_v1, 264  ;;  %v21903_v16 = vrot.slane %v12287_v58, %v24966_v51  ;;  %v21906_v1 = vrot.slane %v12303_v30, %v24966_v51  ;;  %v25058_v30 = vld [vmem:[#allocation115_spill] sm:$0xff] }
 0x9a4   : > { %v21891_v42 = vrot.slane %v12319_v45, %v24966_v51  ;;  %v21894_v3 = vrot.slane %v12320_v7, %v24966_v51  ;;  %v21897_v5 = vrot.slane %v12335_v50, %v24966_v51  ;;  %v21900_v31 = vrot.slane %v12336_v48, %v24966_v51  ;;  %v11080_v54 = vpop.permute.xlu0 %11079  ;;  %v10996_v44 = vpop.permute.xlu1 %10995 }
 0x9a5   : > { %25046 = vst [vmem:[#allocation114_spill] sm:$0xff] %v21903_v16  ;;  %v21909_v11 = vrot.slane %v12471_v36, %v24966_v51  ;;  %v25048_v62 = vcombine.high %v21797_v61, %v21803_v53  ;;  %v21918_v33 = vrot.slane %v12439_v28, %v24966_v51  ;;  %v21921_v20 = vrot.slane %v12472_v43, %v24966_v51  ;;  %v25055_v28 = vld [vmem:[#allocation96_spill] sm:$0xff] }
 0x9a6   : > { %25044 = vst [vmem:[#allocation155_spill] sm:$0xff] %v21891_v42  ;;  %25045 = vst [vmem:[#allocation121_spill] sm:$0xff] %v21900_v31  ;;  %11398 = vbcast.lane.b32.xlu0 %v21888_v14, 256  ;;  %v21937_v7 = vrot.slane %v21690_v2, %v24741_v41  ;;  %v25052_v36 = vcombine.high %v21809_v56, %v21806_v19 }
 0x9a7   : > { %25047 = vst [vmem:[#allocation184_spill] sm:$0xff] %v21909_v11  ;;  %v21915_v50 = vrot.slane %v25048_v62, %v24966_v51  ;;  %25050 = vst [vmem:[#allocation87_spill] sm:$0xff] %v21918_v33  ;;  %11314 = vbcast.lane.b32.xlu1 %v21674_v59, 264  ;;  %v25054_v62 = vld [vmem:[#allocation93_spill] sm:$0xff]  ;;  %v25056_v59 = vld [vmem:[#allocation98_spill] sm:$0xff] }
 0x9a8   : > { %25051 = vst [vmem:[#allocation99_spill] sm:$0xff] %v21921_v20  ;;  %v11091_v45 = vpop.permute.xlu0 %11090  ;;  %v21947_v43 = vrot.slane %v25052_v36, %v24966_v51  ;;  %v11479_v61 = vsel %vm518_vm3, %v25054_v62, %v11069_v18  ;;  %v11007_v41 = vpop.permute.xlu1 %11006  ;;  %v21957_v58 = vsel %vm518_vm3, %v25056_v59, %v10985_v32  ;;  %v25060_v36 = vld [vmem:[#allocation94_spill] sm:$0xff]  ;;  %v25062_v11 = vld [vmem:[#allocation92_spill] sm:$0xff] }
 0x9a9   : > { %25049 = vst [vmem:[#allocation105_spill] sm:$0xff] %v21915_v50  ;;  %v11483_v53 = vsel %vm518_vm3, %v25055_v28, %v11091_v45  ;;  %25057 = vst [vmem:[#allocation46_spill] sm:$0xff] %v21957_v58  ;;  %v21961_v19 = vsel %vm518_vm3, %v25058_v30, %v11007_v41  ;;  %v11672_v30 = vcombine.high %v21273_v0, %v21284_v23  ;;  %v25061_v41 = vld [vmem:[#allocation116_spill] sm:$0xff]  ;;  %v25137_v50 = vld [vmem:[#allocation53_spill] sm:$0xff] }
 0x9aa   : > { %25053 = vst [vmem:[#allocation163_spill] sm:$0xff] %v21947_v43  ;;  %v12632_v48 = vcombine.high %v11479_v61, %v11483_v53  ;;  %25059 = vst [vmem:[#allocation89_spill] sm:$0xff] %v21961_v19  ;;  %11409 = vbcast.lane.b32.xlu0 %v21937_v7, 256  ;;  %v12496_v18 = vcombine.high %v21957_v58, %v21961_v19  ;;  %v12631_v45 = vcombine.low %v11479_v61, %v11483_v53  ;;  %v25064_v58 = vld [vmem:[#allocation127_spill] sm:$0xff]  ;;  %v25067_v20 = vld [vmem:[#allocation88_spill] sm:$0xff] }
 0x9ab   : > { %11325 = vbcast.lane.b32.xlu1 %v21703_v9, 264  ;;  %v11481_v62 = vsel %vm518_vm3, %v25060_v36, %v11080_v54  ;;  %v21981_v9 = vsel %vm518_vm3, %v25062_v11, %v10996_v44  ;;  %v12216_v54 = vcombine.high %v21693_v49, %v21677_v8  ;;  %v25076_v19 = vld [vmem:[#allocation165_spill] sm:$0xff] }
 0x9ac   : > { %v11102_v59 = vpop.permute.xlu0 %11101  ;;  %v11018_v2 = vpop.permute.xlu1 %11017  ;;  %25063 = vst [vmem:[#allocation139_spill] sm:$0xff] %v21981_v9  ;;  %v21995_v11 = vrot.slane %v12632_v48, %v24961_v26 }
 0x9ad   : > { %v11485_v56 = vsel %vm518_vm3, %v25061_v41, %v11102_v59  ;;  %v21985_v61 = vsel %vm518_vm3, %v25064_v58, %v11018_v2  ;;  %v12639_v59 = vrot.slane %v12631_v45, %v24961_v26 }
 0x9ae   : > { %v12647_v28 = vcombine.low %v11481_v62, %v11485_v56  ;;  %v12648_v33 = vcombine.high %v11481_v62, %v11485_v56  ;;  %25065 = vst [vmem:[#allocation179_spill] sm:$0xff] %v21985_v61  ;;  %13727 = vrot.lane.b32.xlu0 %v11672_v30, %s14929_s27  ;;  %v12512_v53 = vcombine.high %v21981_v9, %v21985_v61  ;;  %v25104_v9 = vld [vmem:[#allocation91_spill] sm:$0xff]  ;;  %v25106_v61 = vld [vmem:[#allocation50_spill] sm:$0xff] }
 0x9af   : > { %11336 = vbcast.lane.b32.xlu1 %v21771_v35, 264  ;;  %v22000_v56 = vrot.slane %v12496_v18, %v24961_v26 }
 0x9b0   : > { %v12655_v44 = vrot.slane %v12647_v28, %v24961_v26  ;;  %v12662_v58 = vrot.slane %v12648_v33, %v24961_v26  ;;  %v11113_v2 = vpop.permute.xlu0 %11112  ;;  %v22003_v30 = vrot.slane %v12512_v53, %v24961_v26  ;;  %v11029_v35 = vpop.permute.xlu1 %11028  ;;  %v25066_v53 = vld [vmem:[#allocation67_spill] sm:$0xff]  ;;  %v25070_v33 = vld [vmem:[#allocation118_spill] sm:$0xff] }
 0x9b1   : > { %v11487_v32 = vsel %vm518_vm3, %v25066_v53, %v11113_v2  ;;  %v25072_v53 = vld [vmem:[#allocation79_spill] sm:$0xff] }
 0x9b2   : > { %v12696_v36 = vcombine.high %v12639_v59, %v12655_v44  ;;  %v12711_v62 = vcombine.low %v21995_v11, %v12662_v58  ;;  %v12712_v45 = vcombine.high %v21995_v11, %v12662_v58  ;;  %13731 = vrot.lane.b32.xlu0 %v12216_v54, %s14929_s27  ;;  %v12575_v48 = vcombine.low %v22000_v56, %v22003_v30  ;;  %v25068_v58 = vld [vmem:[#allocation75_spill] sm:$0xff] }
 0x9b3   : > { %11347 = vbcast.lane.b32.xlu1 %v21794_v25, 264  ;;  %v22020_v43 = vsel %vm518_vm3, %v25068_v58, %v11029_v35  ;;  %v25074_v58 = vld [vmem:[#allocation95_spill] sm:$0xff] }
 0x9b4   : > { %v11124_v18 = vpop.permute.xlu0 %11123  ;;  %25069 = vst [vmem:[#allocation24_spill] sm:$0xff] %v22020_v43 }
 0x9b5   : > { %v11040_v28 = vpop.permute.xlu1 %11039 }
 0x9b6   : > { %v22035_v0 = vsel %vm518_vm3, %v25074_v58, %v11040_v28 }
 0x9b7   : > { %11358 = vbcast.lane.b32.xlu1 %v21825_v21, 264  ;;  %25075 = vst [vmem:[#allocation29_spill] sm:$0xff] %v22035_v0 }
 0x9b8   : > { %v11135_v41 = vpop.permute.xlu0 %11134 }
 0x9b9   : > { %v11491_v11 = vsel %vm518_vm3, %v25067_v20, %v11135_v41  ;;  %v11051_v54 = vpop.permute.xlu1 %11050  ;;  %v11489_v20 = vsel %vm518_vm3, %v25072_v53, %v11124_v18  ;;  %v25073_v41 = vld [vmem:[#allocation117_spill] sm:$0xff] }
 0x9ba   : > { %v12664_v8 = vcombine.high %v11487_v32, %v11491_v11  ;;  %v22024_v25 = vsel %vm518_vm3, %v25070_v33, %v11051_v54  ;;  %v12663_v49 = vcombine.low %v11487_v32, %v11491_v11 }
 0x9bb   : > { %25071 = vst [vmem:[#allocation54_spill] sm:$0xff] %v22024_v25  ;;  %v12528_v21 = vcombine.high %v22020_v43, %v22024_v25  ;;  %11369 = vbcast.lane.b32.xlu1 %v21831_v34, 264  ;;  %v12695_v34 = vcombine.low %v12639_v59, %v12655_v44 }
 0x9bc   : > { %v11146_v2 = vpop.permute.xlu0 %11145  ;;  %v12671_v18 = vrot.slane %v12663_v49, %v24961_v26  ;;  %v12678_v11 = vrot.slane %v12664_v8, %v24961_v26 }
 0x9bd   : > { %v11493_v23 = vsel %vm518_vm3, %v25073_v41, %v11146_v2  ;;  %v11062_v35 = vpop.permute.xlu1 %11061 }
 0x9be   : > { %v12679_v33 = vcombine.low %v11489_v20, %v11493_v23  ;;  %v12680_v54 = vcombine.high %v11489_v20, %v11493_v23  ;;  %v22039_v43 = vsel %vm518_vm3, %v25076_v19, %v11062_v35  ;;  %v12542_v23 = vrot.slane %v12528_v21, %v24961_v26 }
 0x9bf   : > { %25077 = vst [vmem:[#allocation49_spill] sm:$0xff] %v22039_v43  ;;  %v12544_v32 = vcombine.high %v22035_v0, %v22039_v43  ;;  %11380 = vbcast.lane.b32.xlu1 %v21851_v6, 264  ;;  %v22051_v6 = vrot.slane %v12695_v34, %v24966_v51  ;;  %v22067_v34 = vrot.slane %v12696_v36, %v24966_v51 }
 0x9c0   : > { %v12687_v2 = vrot.slane %v12679_v33, %v24961_v26  ;;  %v12694_v28 = vrot.slane %v12680_v54, %v24961_v26  ;;  %v11157_v53 = vpop.permute.xlu0 %11156 }
 0x9c1   : > { %v12558_v19 = vrot.slane %v12544_v32, %v24961_v26  ;;  %v11073_v20 = vpop.permute.xlu1 %11072  ;;  %25078 = vst [vmem:[#allocation39_spill] sm:$0xff] %v22051_v6 }
 0x9c2   : > { %v12727_v59 = vcombine.low %v12671_v18, %v12687_v2  ;;  %v12728_v44 = vcombine.high %v12671_v18, %v12687_v2  ;;  %v12743_v41 = vcombine.low %v12678_v11, %v12694_v28  ;;  %v12744_v35 = vcombine.high %v12678_v11, %v12694_v28 }
 0x9c3   : > { %v12607_v49 = vcombine.low %v12542_v23, %v12558_v19  ;;  %v12608_v58 = vcombine.high %v12542_v23, %v12558_v19  ;;  %11391 = vbcast.lane.b32.xlu1 %v21872_v27, 264  ;;  %v22070_v18 = vrot.slane %v12711_v62, %v24966_v51  ;;  %v22073_v11 = vrot.slane %v12712_v45, %v24966_v51 }
 0x9c4   : > { %v22055_v8 = vrot.slane %v12727_v59, %v24966_v51  ;;  %v22058_v33 = vrot.slane %v12728_v44, %v24966_v51  ;;  %v22061_v21 = vrot.slane %v12743_v41, %v24966_v51  ;;  %v22064_v54 = vrot.slane %v12744_v35, %v24966_v51  ;;  %v11168_v32 = vpop.permute.xlu0 %11167 }
 0x9c5   : > { %v11084_v27 = vpop.permute.xlu1 %11083  ;;  %v22076_v2 = vrot.slane %v12607_v49, %v24966_v51  ;;  %v22079_v28 = vrot.slane %v12608_v58, %v24966_v51  ;;  %v22093_v59 = vrot.slane %v12575_v48, %v24966_v51  ;;  %v25084_v49 = vcombine.high %v22000_v56, %v22003_v30  ;;  %v25086_v48 = vld [vmem:[#allocation166_spill] sm:$0xff] }
 0x9c6   : > { %25079 = vst [vmem:[#allocation38_spill] sm:$0xff] %v22055_v8  ;;  %25080 = vst [vmem:[#allocation62_spill] sm:$0xff] %v22064_v54  ;;  %v12760_v23 = vcombine.high %v22051_v6, %v22055_v8  ;;  %v11495_v19 = vsel %vm518_vm3, %v25086_v48, %v11157_v53  ;;  %v25090_v8 = vld [vmem:[#allocation80_spill] sm:$0xff]  ;;  %v25094_v6 = vld [vmem:[#allocation183_spill] sm:$0xff] }
 0x9c7   : > { %25081 = vst [vmem:[#allocation22_spill] sm:$0xff] %v22076_v2  ;;  %25082 = vst [vmem:[#allocation45_spill] sm:$0xff] %v22079_v28  ;;  %11402 = vbcast.lane.b32.xlu1 %v21888_v14, 264  ;;  %v22106_v58 = vrot.slane %v25084_v49, %v24966_v51  ;;  %v25088_v14 = vld [vmem:[#allocation128_spill] sm:$0xff]  ;;  %v22139_v53 = vsel %vm518_vm3, %v25094_v6, %v11084_v27 }
 0x9c8   : > { %25083 = vst [vmem:[#allocation65_spill] sm:$0xff] %v22093_v59  ;;  %13735 = vrot.lane.b32.xlu0 %v12760_v23, %s14929_s27  ;;  %v11179_v44 = vpop.permute.xlu0 %11178  ;;  %v25087_v23 = vld [vmem:[#allocation181_spill] sm:$0xff]  ;;  %v22114_v36 = vsel %vm518_vm3, %v25088_v14, %v11073_v20  ;;  %v25093_v48 = vld [vmem:[#allocation76_spill] sm:$0xff]  ;;  %25095 = vst [vmem:[#allocation21_spill] sm:$0xff] %v22139_v53 }
 0x9c9   : > { %25085 = vst [vmem:[#allocation47_spill] sm:$0xff] %v22106_v58  ;;  %v11499_v45 = vsel %vm518_vm3, %v25087_v23, %v11179_v44  ;;  %v11095_v62 = vpop.permute.xlu1 %11094  ;;  %25089 = vst [vmem:[#allocation35_spill] sm:$0xff] %v22114_v36  ;;  %v25099_v59 = vld [vmem:[#allocation42_spill] sm:$0xff] }
 0x9ca   : > { %v12768_v41 = vcombine.high %v11495_v19, %v11499_v45  ;;  %v22118_v35 = vsel %vm518_vm3, %v25090_v8, %v11095_v62  ;;  %v12767_v44 = vcombine.low %v11495_v19, %v11499_v45  ;;  %v25092_v62 = vld [vmem:[#allocation71_spill] sm:$0xff]  ;;  %v25096_v19 = vld [vmem:[#allocation133_spill] sm:$0xff] }
 0x9cb   : > { %25091 = vst [vmem:[#allocation20_spill] sm:$0xff] %v22118_v35  ;;  %v12904_v30 = vcombine.high %v22114_v36, %v22118_v35  ;;  %11413 = vbcast.lane.b32.xlu1 %v21937_v7, 264  ;;  %v11497_v49 = vsel %vm518_vm3, %v25092_v62, %v11168_v32  ;;  %v11808_v7 = vcombine.high %v21479_v22, %v21463_v29  ;;  %v25100_v29 = vld [vmem:[#allocation84_spill] sm:$0xff]  ;;  %v25102_v22 = vld [vmem:[#allocation33_spill] sm:$0xff] }
 0x9cc   : > { %v11190_v14 = vpop.permute.xlu0 %11189  ;;  %v12782_v62 = vrot.slane %v12768_v41, %v24961_v26  ;;  %v25138_v35 = vld [vmem:[#allocation48_spill] sm:$0xff] }
 0x9cd   : > { %v11501_v23 = vsel %vm518_vm3, %v25093_v48, %v11190_v14  ;;  %v11106_v56 = vpop.permute.xlu1 %11105  ;;  %v12775_v14 = vrot.slane %v12767_v44, %v24961_v26 }
 0x9ce   : > { %v12783_v20 = vcombine.low %v11497_v49, %v11501_v23  ;;  %v12784_v45 = vcombine.high %v11497_v49, %v11501_v23  ;;  %v22143_v2 = vsel %vm518_vm3, %v25096_v19, %v11106_v56  ;;  %v22153_v49 = vrot.slane %v12904_v30, %v24961_v26 }
 0x9cf   : > { %25097 = vst [vmem:[#allocation26_spill] sm:$0xff] %v22143_v2  ;;  %v12920_v32 = vcombine.high %v22139_v53, %v22143_v2  ;;  %13729 = vrot.lane.b32.xlu1 %v11808_v7, %s14929_s27  ;;  %v12352_v19 = vcombine.high %v21903_v16, %v21891_v42 }
 0x9d0   : > { %v12791_v48 = vrot.slane %v12783_v20, %v24961_v26  ;;  %v12798_v6 = vrot.slane %v12784_v45, %v24961_v26  ;;  %v11201_v27 = vpop.permute.xlu0 %11200 }
 0x9d1   : > { %v22156_v56 = vrot.slane %v12920_v32, %v24961_v26  ;;  %v11117_v23 = vpop.permute.xlu1 %11116  ;;  %v25098_v32 = vld [vmem:[#allocation137_spill] sm:$0xff] }
 0x9d2   : > { %v12832_v7 = vcombine.high %v12775_v14, %v12791_v48  ;;  %v12847_v8 = vcombine.low %v12782_v62, %v12798_v6  ;;  %v12848_v44 = vcombine.high %v12782_v62, %v12798_v6  ;;  %v11503_v58 = vsel %vm518_vm3, %v25098_v32, %v11201_v27  ;;  %v25105_v32 = vld [vmem:[#allocation168_spill] sm:$0xff] }
 0x9d3   : > { %v12983_v41 = vcombine.low %v22153_v49, %v22156_v56  ;;  %v12984_v20 = vcombine.high %v22153_v49, %v22156_v56  ;;  %13733 = vrot.lane.b32.xlu1 %v12352_v19, %s14929_s27  ;;  %v22171_v62 = vsel %vm518_vm3, %v25100_v29, %v11117_v23  ;;  %v12831_v43 = vcombine.low %v12775_v14, %v12791_v48 }
 0x9d4   : > { %v11212_v30 = vpop.permute.xlu0 %11211  ;;  %25101 = vst [vmem:[#allocation55_spill] sm:$0xff] %v22171_v62 }
 0x9d5   : > { %v11128_v45 = vpop.permute.xlu1 %11127  ;;  %v11505_v27 = vsel %vm518_vm3, %v25104_v9, %v11212_v30 }
 0x9d6   : > { %v22185_v29 = vsel %vm518_vm3, %v25106_v61, %v11128_v45 }
 0x9d7   : > { %25107 = vst [vmem:[#allocation160_spill] sm:$0xff] %v22185_v29 }
 0x9d8   : > { %v11223_v28 = vpop.permute.xlu0 %11222 }
 0x9d9   : > { %v11507_v42 = vsel %vm518_vm3, %v25099_v59, %v11223_v28  ;;  %v11139_v16 = vpop.permute.xlu1 %11138 }
 0x9da   : > { %v12800_v6 = vcombine.high %v11503_v58, %v11507_v42  ;;  %v22175_v49 = vsel %vm518_vm3, %v25102_v22, %v11139_v16  ;;  %v12799_v19 = vcombine.low %v11503_v58, %v11507_v42  ;;  %v25108_v22 = vld [vmem:[#allocation167_spill] sm:$0xff] }
 0x9db   : > { %25103 = vst [vmem:[#allocation23_spill] sm:$0xff] %v22175_v49  ;;  %v12936_v56 = vcombine.high %v22171_v62, %v22175_v49 }
 0x9dc   : > { %v11234_v25 = vpop.permute.xlu0 %11233  ;;  %v12807_v9 = vrot.slane %v12799_v19, %v24961_v26  ;;  %v12814_v58 = vrot.slane %v12800_v6, %v24961_v26 }
 0x9dd   : > { %v11509_v28 = vsel %vm518_vm3, %v25105_v32, %v11234_v25  ;;  %v11150_v59 = vpop.permute.xlu1 %11149  ;;  %v12950_v45 = vrot.slane %v12936_v56, %v24961_v26 }
 0x9de   : > { %v12815_v23 = vcombine.low %v11505_v27, %v11509_v28  ;;  %v12816_v0 = vcombine.high %v11505_v27, %v11509_v28  ;;  %v22189_v16 = vsel %vm518_vm3, %v25108_v22, %v11150_v59  ;;  %v22200_v22 = vrot.slane %v12831_v43, %v24966_v51 }
 0x9df   : > { %25109 = vst [vmem:[#allocation157_spill] sm:$0xff] %v22189_v16  ;;  %v12952_v42 = vcombine.high %v22185_v29, %v22189_v16  ;;  %v22218_v43 = vrot.slane %v12847_v8, %v24966_v51 }
 0x9e0   : > { %v12823_v25 = vrot.slane %v12815_v23, %v24961_v26  ;;  %v12830_v30 = vrot.slane %v12816_v0, %v24961_v26  ;;  %v11245_v61 = vpop.permute.xlu0 %11244  ;;  %25110 = vst [vmem:[#allocation156_spill] sm:$0xff] %v22200_v22 }
 0x9e1   : > { %v12966_v27 = vrot.slane %v12952_v42, %v24961_v26  ;;  %v11161_v32 = vpop.permute.xlu1 %11160  ;;  %25114 = vst [vmem:[#allocation158_spill] sm:$0xff] %v22218_v43 }
 0x9e2   : > { %v12863_v28 = vcombine.low %v12807_v9, %v12823_v25  ;;  %v12864_v59 = vcombine.high %v12807_v9, %v12823_v25  ;;  %v12879_v14 = vcombine.low %v12814_v58, %v12830_v30  ;;  %v12880_v48 = vcombine.high %v12814_v58, %v12830_v30 }
 0x9e3   : > { %v13015_v19 = vcombine.low %v12950_v45, %v12966_v27  ;;  %v13016_v31 = vcombine.high %v12950_v45, %v12966_v27  ;;  %v22215_v9 = vrot.slane %v12832_v7, %v24966_v51  ;;  %v22221_v25 = vrot.slane %v12848_v44, %v24966_v51  ;;  %v25120_v44 = vld [vmem:[#allocation185_spill] sm:$0xff]  ;;  %v25122_v7 = vld [vmem:[#allocation134_spill] sm:$0xff] }
 0x9e4   : > { %v22203_v6 = vrot.slane %v12863_v28, %v24966_v51  ;;  %v22206_v0 = vrot.slane %v12864_v59, %v24966_v51  ;;  %v22209_v56 = vrot.slane %v12879_v14, %v24966_v51  ;;  %v22212_v23 = vrot.slane %v12880_v48, %v24966_v51  ;;  %v11256_v42 = vpop.permute.xlu0 %11255 }
 0x9e5   : > { %v11172_v58 = vpop.permute.xlu1 %11171  ;;  %25115 = vst [vmem:[#allocation176_spill] sm:$0xff] %v22221_v25  ;;  %v22224_v30 = vrot.slane %v13015_v19, %v24966_v51  ;;  %v22227_v45 = vrot.slane %v13016_v31, %v24966_v51  ;;  %v22240_v59 = vrot.slane %v12983_v41, %v24966_v51  ;;  %v22250_v28 = vrot.slane %v12984_v20, %v24966_v51 }
 0x9e6   : > { %25111 = vst [vmem:[#allocation32_spill] sm:$0xff] %v22203_v6  ;;  %25112 = vst [vmem:[#allocation34_spill] sm:$0xff] %v22209_v56  ;;  %v12896_v27 = vcombine.high %v22200_v22, %v22203_v6  ;;  %v22254_v41 = vsel %vm518_vm3, %v25120_v44, %v11161_v32  ;;  %v25124_v22 = vld [vmem:[#allocation56_spill] sm:$0xff]  ;;  %v25170_v56 = vld [vmem:[#allocation73_spill] sm:$0xff] }
 0x9e7   : > { %25113 = vst [vmem:[#allocation159_spill] sm:$0xff] %v22212_v23  ;;  %25116 = vst [vmem:[#allocation175_spill] sm:$0xff] %v22224_v30  ;;  %v25129_v23 = vld [vmem:[#allocation182_spill] sm:$0xff] }
 0x9e8   : > { %25117 = vst [vmem:[#allocation51_spill] sm:$0xff] %v22227_v45  ;;  %25118 = vst [vmem:[#allocation172_spill] sm:$0xff] %v22240_v59  ;;  %v11267_v31 = vpop.permute.xlu0 %11266  ;;  %13737 = vrot.lane.b32.xlu1 %v12896_v27, %s14929_s27 }
 0x9e9   : > { %25119 = vst [vmem:[#allocation171_spill] sm:$0xff] %v22250_v28  ;;  %v11183_v8 = vpop.permute.xlu1 %11182  ;;  %25121 = vst [vmem:[#allocation170_spill] sm:$0xff] %v22254_v41  ;;  %v25128_v28 = vld [vmem:[#allocation66_spill] sm:$0xff] }
 0x9ea   : > { %v22258_v27 = vsel %vm518_vm3, %v25122_v7, %v11183_v8  ;;  %v22272_v7 = vsel %vm518_vm3, %v25124_v22, %v11172_v58  ;;  %v25126_v8 = vld [vmem:[#allocation61_spill] sm:$0xff] }
 0x9eb   : > { %25123 = vst [vmem:[#allocation169_spill] sm:$0xff] %v22258_v27  ;;  %v13040_v48 = vcombine.high %v22254_v41, %v22258_v27  ;;  %25125 = vst [vmem:[#allocation174_spill] sm:$0xff] %v22272_v7 }
 0x9ec   : > { %v11278_v6 = vpop.permute.xlu0 %11277 }
 0x9ed   : > { %v11194_v44 = vpop.permute.xlu1 %11193  ;;  %v13054_v30 = vrot.slane %v13040_v48, %v24961_v26  ;;  %v22284_v22 = vsel %vm518_vm3, %v25128_v28, %v11278_v6 }
 0x9ee   : > { %v22276_v14 = vsel %vm518_vm3, %v25126_v8, %v11194_v44  ;;  %v22288_v44 = vsel %vm518_vm3, %v25129_v23, %v11256_v42  ;;  %v25130_v8 = vld [vmem:[#allocation138_spill] sm:$0xff]  ;;  %v25133_v42 = vld [vmem:[#allocation37_spill] sm:$0xff] }
 0x9ef   : > { %25127 = vst [vmem:[#allocation173_spill] sm:$0xff] %v22276_v14  ;;  %v13056_v41 = vcombine.high %v22272_v7, %v22276_v14  ;;  %v22292_v7 = vsel %vm518_vm3, %v25130_v8, %v11267_v31  ;;  %v13191_v48 = vcombine.low %v22288_v44, %v22284_v22  ;;  %v25131_v14 = vld [vmem:[#allocation19_spill] sm:$0xff]  ;;  %v25135_v8 = vld [vmem:[#allocation64_spill] sm:$0xff] }
 0x9f0   : > { %v11289_v19 = vpop.permute.xlu0 %11288 }
 0x9f1   : > { %v13070_v20 = vrot.slane %v13056_v41, %v24961_v26  ;;  %v11205_v59 = vpop.permute.xlu1 %11204 }
 0x9f2   : > { %v22308_v31 = vsel %vm518_vm3, %v25133_v42, %v11205_v59  ;;  %v25139_v42 = vld [vmem:[#allocation31_spill] sm:$0xff] }
 0x9f3   : > { %v13119_v27 = vcombine.low %v13054_v30, %v13070_v20  ;;  %v13120_v32 = vcombine.high %v13054_v30, %v13070_v20  ;;  %v22298_v30 = vsel %vm518_vm3, %v25131_v14, %v11245_v61  ;;  %v25132_v20 = vld [vmem:[#allocation109_spill] sm:$0xff]  ;;  %25134 = vst [vmem:[#allocation27_spill] sm:$0xff] %v22308_v31  ;;  %v22316_v61 = vsel %vm518_vm3, %v25137_v50, %v11289_v19  ;;  %v25140_v19 = vld [vmem:[#allocation107_spill] sm:$0xff] }
 0x9f4   : > { %v11300_v45 = vpop.permute.xlu0 %11299  ;;  %v13175_v23 = vcombine.low %v22298_v30, %v22292_v7 }
 0x9f5   : > { %v11216_v58 = vpop.permute.xlu1 %11215  ;;  %v22325_v59 = vsel %vm518_vm3, %v25138_v35, %v11300_v45 }
 0x9f6   : > { %v13183_v50 = vrot.slane %v13175_v23, %v24961_v26 }
 0x9f8   : > { %v11311_v41 = vpop.permute.xlu0 %11310 }
 0x9f9   : > { %v22302_v6 = vsel %vm518_vm3, %v25132_v20, %v11311_v41  ;;  %v11227_v28 = vpop.permute.xlu1 %11226  ;;  %v13199_v41 = vrot.slane %v13191_v48, %v24961_v26 }
 0x9fa   : > { %v22312_v25 = vsel %vm518_vm3, %v25135_v8, %v11227_v28  ;;  %v13207_v20 = vcombine.low %v22316_v61, %v22302_v6 }
 0x9fb   : > { %25136 = vst [vmem:[#allocation40_spill] sm:$0xff] %v22312_v25  ;;  %v13072_v14 = vcombine.high %v22308_v31, %v22312_v25  ;;  %v22334_v31 = vsel %vm518_vm3, %v25140_v19, %v11216_v58  ;;  %v25142_v25 = vld [vmem:[#allocation60_spill] sm:$0xff]  ;;  %v13239_v45 = vcombine.low %v13183_v50, %v13199_v41 }
 0x9fc   : > { %v11322_v36 = vpop.permute.xlu0 %11321  ;;  %25141 = vst [vmem:[#allocation82_spill] sm:$0xff] %v22334_v31 }
 0x9fd   : > { %v22329_v28 = vsel %vm518_vm3, %v25139_v42, %v11322_v36  ;;  %v11238_v8 = vpop.permute.xlu1 %11237  ;;  %v13215_v36 = vrot.slane %v13207_v20, %v24961_v26  ;;  %v13086_v49 = vrot.slane %v13072_v14, %v24961_v26 }
 0x9fe   : > { %v13223_v48 = vcombine.low %v22325_v59, %v22329_v28  ;;  %v22340_v62 = vsel %vm518_vm3, %v25142_v25, %v11238_v8  ;;  %v22349_v25 = vrot.slane %v13239_v45, %v24966_v51  ;;  %v22369_v45 = vrot.slane %v13120_v32, %v24966_v51 }
 0x9ff   : > { %25143 = vst [vmem:[#allocation78_spill] sm:$0xff] %v22340_v62  ;;  %v13088_v35 = vcombine.high %v22334_v31, %v22340_v62 }
 0xa00   : > { %v13231_v42 = vrot.slane %v13223_v48, %v24961_v26  ;;  %v11333_v23 = vpop.permute.xlu0 %11332  ;;  %25144 = vst [vmem:[#allocation81_spill] sm:$0xff] %v22349_v25  ;;  %25149 = vst [vmem:[#allocation97_spill] sm:$0xff] %v22369_v45  ;;  %v25161_v45 = vld [vmem:[#allocation122_spill] sm:$0xff] }
 0xa01   : > { %v13102_v58 = vrot.slane %v13088_v35, %v24961_v26  ;;  %v11249_v19 = vpop.permute.xlu1 %11248  ;;  %v22363_v35 = vrot.slane %v13119_v27, %v24966_v51 }
 0xa02   : > { %v13271_v53 = vcombine.low %v13215_v36, %v13231_v42  ;;  %v13272_v27 = vcombine.high %v13215_v36, %v13231_v42 }
 0xa03   : > { %v13151_v2 = vcombine.low %v13086_v49, %v13102_v58  ;;  %v13152_v29 = vcombine.high %v13086_v49, %v13102_v58  ;;  %25148 = vst [vmem:[#allocation141_spill] sm:$0xff] %v22363_v35  ;;  %v25150_v58 = vld [vmem:[#allocation36_spill] sm:$0xff] }
 0xa04   : > { %v22352_v8 = vrot.slane %v13271_v53, %v24966_v51  ;;  %v11344_v31 = vpop.permute.xlu0 %11343  ;;  %v22373_v16 = vsel %vm518_vm3, %v25150_v58, %v11249_v19  ;;  %v25154_v19 = vcombine.low %v21276_v39, %v21287_v15 }
 0xa05   : > { %v11260_v62 = vpop.permute.xlu1 %11259  ;;  %v22355_v20 = vrot.slane %v13151_v2, %v24966_v51  ;;  %v22360_v48 = vrot.slane %v13152_v29, %v24966_v51  ;;  %25151 = vst [vmem:[#allocation93_spill] sm:$0xff] %v22373_v16 }
 0xa06   : > { %25145 = vst [vmem:[#allocation77_spill] sm:$0xff] %v22352_v8  ;;  %v13304_v14 = vcombine.high %v22349_v25, %v22352_v8  ;;  %v25155_v8 = vld [vmem:[#allocation86_spill] sm:$0xff] }
 0xa07   : > { %25146 = vst [vmem:[#allocation41_spill] sm:$0xff] %v22355_v20  ;;  %25147 = vst [vmem:[#allocation63_spill] sm:$0xff] %v22360_v48  ;;  %v22395_v25 = vsel %vm518_vm3, %v25155_v8, %v11260_v62  ;;  %v13240_v20 = vcombine.high %v13183_v50, %v13199_v41  ;;  %v13286_v8 = vrot.slane %v13272_v27, %v24966_v51  ;;  %v25163_v27 = vld [vmem:[#allocation104_spill] sm:$0xff] }
 0xa08   : > { %13739 = vrot.lane.b32.xlu0 %v13304_v14, %s14929_s27  ;;  %v11355_v49 = vpop.permute.xlu0 %11354  ;;  %25156 = vst [vmem:[#allocation98_spill] sm:$0xff] %v22395_v25  ;;  %v25160_v41 = vcombine.low %v22067_v34, %v22058_v33 }
 0xa09   : > { %v11271_v2 = vpop.permute.xlu1 %11270 }
 0xa0a   : > { %v22377_v29 = vsel %vm518_vm3, %v25152_v37, %v11271_v2 }
 0xa0b   : > { %25153 = vst [vmem:[#allocation96_spill] sm:$0xff] %v22377_v29  ;;  %v13448_v14 = vcombine.high %v22373_v16, %v22377_v29  ;;  %v25157_v16 = vld [vmem:[#allocation123_spill] sm:$0xff] }
 0xa0c   : > { %13759 = vrot.lane.b32.xlu0 %v25154_v19, %s14930_s20  ;;  %v11366_v58 = vpop.permute.xlu0 %11365  ;;  %v25159_v19 = vcombine.low %v21669_v52, %v21680_v46 }
 0xa0d   : > { %v11282_v2 = vpop.permute.xlu1 %11281  ;;  %v13462_v36 = vrot.slane %v13448_v14, %v24961_v26 }
 0xa0e   : > { %v22399_v53 = vsel %vm518_vm3, %v25157_v16, %v11282_v2  ;;  %v13254_v2 = vrot.slane %v13240_v20, %v24966_v51 }
 0xa0f   : > { %25158 = vst [vmem:[#allocation115_spill] sm:$0xff] %v22399_v53  ;;  %v13464_v32 = vcombine.high %v22395_v25, %v22399_v53  ;;  %v25168_v53 = vld [vmem:[#allocation57_spill] sm:$0xff] }
 0xa10   : > { %13763 = vrot.lane.b32.xlu0 %v25159_v19, %s14930_s20  ;;  %v11377_v37 = vpop.permute.xlu0 %11376  ;;  %v22417_v19 = vsel %vm518_vm3, %v25161_v45, %v11366_v58  ;;  %v13305_v35 = vcombine.low %v13254_v2, %v13286_v8  ;;  %v25165_v58 = vld [vmem:[#allocation68_spill] sm:$0xff] }
 0xa11   : > { %v13478_v42 = vrot.slane %v13464_v32, %v24961_v26  ;;  %v11293_v62 = vpop.permute.xlu1 %11292  ;;  %v25162_v32 = vld [vmem:[#allocation90_spill] sm:$0xff] }
 0xa12   : > { %v22421_v29 = vsel %vm518_vm3, %v25162_v32, %v11344_v31 }
 0xa13   : > { %v13527_v48 = vcombine.low %v13462_v36, %v13478_v42  ;;  %v13528_v16 = vcombine.high %v13462_v36, %v13478_v42  ;;  %v22425_v36 = vsel %vm518_vm3, %v25163_v27, %v11355_v49  ;;  %v13327_v20 = vcombine.low %v22421_v29, %v22417_v19  ;;  %v25166_v49 = vld [vmem:[#allocation106_spill] sm:$0xff] }
 0xa14   : > { %13767 = vrot.lane.b32.xlu0 %v25160_v41, %s14930_s20  ;;  %v11388_v50 = vpop.permute.xlu0 %11387  ;;  %v25164_v41 = vld [vmem:[#allocation74_spill] sm:$0xff]  ;;  %v22442_v27 = vsel %vm518_vm3, %v25166_v49, %v11293_v62  ;;  %v25171_v62 = vcombine.high %v21276_v39, %v21287_v15  ;;  %v25176_v15 = vld [vmem:[#allocation83_spill] sm:$0xff] }
 0xa15   : > { %v11304_v14 = vpop.permute.xlu1 %11303  ;;  %v22432_v45 = vsel %vm518_vm3, %v25164_v41, %v11333_v23  ;;  %25167 = vst [vmem:[#allocation94_spill] sm:$0xff] %v22442_v27  ;;  %v22450_v23 = vsel %vm518_vm3, %v25170_v56, %v11377_v37  ;;  %v22455_v41 = vrot.slane %v13327_v20, %v24961_v26  ;;  %v25173_v56 = vld [vmem:[#allocation72_spill] sm:$0xff] }
 0xa16   : > { %v13311_v32 = vcombine.low %v22432_v45, %v22425_v36 }
 0xa18   : > { %13771 = vrot.lane.b32.xlu0 %v13305_v35, %s14930_s20  ;;  %v11399_v42 = vpop.permute.xlu0 %11398  ;;  %v22472_v20 = vrot.slane %v13311_v32, %v24961_v26 }
 0xa19   : > { %v22436_v25 = vsel %vm518_vm3, %v25165_v58, %v11399_v42  ;;  %v11315_v31 = vpop.permute.xlu1 %11314 }
 0xa1a   : > { %v22446_v35 = vsel %vm518_vm3, %v25168_v53, %v11315_v31  ;;  %v13343_v58 = vcombine.low %v22450_v23, %v22436_v25  ;;  %v25172_v31 = vld [vmem:[#allocation136_spill] sm:$0xff] }
 0xa1b   : > { %25169 = vst [vmem:[#allocation116_spill] sm:$0xff] %v22446_v35  ;;  %v13480_v42 = vcombine.high %v22442_v27, %v22446_v35  ;;  %v22465_v49 = vsel %vm518_vm3, %v25172_v31, %v11388_v50  ;;  %v25174_v35 = vld [vmem:[#allocation100_spill] sm:$0xff] }
 0xa1c   : > { %13791 = vrot.lane.b32.xlu0 %v25171_v62, %s14931_s30  ;;  %v11410_v53 = vpop.permute.xlu0 %11409  ;;  %v22476_v43 = vsel %vm518_vm3, %v25174_v35, %v11304_v14  ;;  %v13351_v32 = vrot.slane %v13343_v58, %v24961_v26  ;;  %v25178_v14 = vcombine.high %v21669_v52, %v21680_v46  ;;  %v13224_v52 = vcombine.high %v22325_v59, %v22329_v28  ;;  %v25183_v28 = vld [vmem:[#allocation132_spill] sm:$0xff] }
 0xa1d   : > { %v22469_v37 = vsel %vm518_vm3, %v25173_v56, %v11410_v53  ;;  %v11326_v27 = vpop.permute.xlu1 %11325  ;;  %25175 = vst [vmem:[#allocation92_spill] sm:$0xff] %v22476_v43  ;;  %v13375_v53 = vcombine.low %v22472_v20, %v22455_v41  ;;  %v13494_v35 = vrot.slane %v13480_v42, %v24961_v26  ;;  %v22524_v59 = vrot.slane %v13528_v16, %v24966_v51 }
 0xa1e   : > { %v13359_v39 = vcombine.low %v22465_v49, %v22469_v37  ;;  %v22482_v62 = vsel %vm518_vm3, %v25176_v15, %v11326_v27 }
 0xa1f   : > { %25177 = vst [vmem:[#allocation127_spill] sm:$0xff] %v22482_v62  ;;  %v13496_v50 = vcombine.high %v22476_v43, %v22482_v62  ;;  %v22497_v62 = vrot.slane %v13375_v53, %v24966_v51  ;;  %v13306_v53 = vcombine.high %v13254_v2, %v13286_v8  ;;  %25181 = vst [vmem:[#allocation88_spill] sm:$0xff] %v22524_v59  ;;  %v25265_v8 = vld [vmem:[#allocation85_spill] sm:$0xff] }
 0xa20   : > { %v13367_v31 = vrot.slane %v13359_v39, %v24961_v26  ;;  %13795 = vrot.lane.b32.xlu0 %v25178_v14, %s14931_s30  ;;  %v25179_v39 = vcombine.high %v22067_v34, %v22058_v33  ;;  %v13208_v33 = vcombine.high %v22316_v61, %v22302_v6  ;;  %v22521_v34 = vrot.slane %v13527_v48, %v24966_v51 }
 0xa21   : > { %v13510_v27 = vrot.slane %v13496_v50, %v24961_v26  ;;  %v11337_v56 = vpop.permute.xlu1 %11336 }
 0xa22   : > { %v13407_v15 = vcombine.low %v13351_v32, %v13367_v31 }
 0xa23   : > { %v13559_v54 = vcombine.low %v13494_v35, %v13510_v27  ;;  %v13560_v43 = vcombine.high %v13494_v35, %v13510_v27  ;;  %v13192_v35 = vcombine.high %v22288_v44, %v22284_v22  ;;  %v25182_v22 = vld [vmem:[#allocation180_spill] sm:$0xff] }
 0xa24   : > { %v22500_v58 = vrot.slane %v13407_v15, %v24966_v51  ;;  %13799 = vrot.lane.b32.xlu0 %v25179_v39, %s14931_s30  ;;  %v22535_v44 = vsel %vm518_vm3, %v25182_v22, %v11337_v56  ;;  %v22557_v56 = vrot.slane %v13208_v33, %v24961_v26  ;;  %v25184_v15 = vcombine.low %v21296_v47, %v21290_v40  ;;  %v25186_v33 = vld [vmem:[#allocation58_spill] sm:$0xff] }
 0xa25   : > { %v11348_v46 = vpop.permute.xlu1 %11347  ;;  %v22509_v42 = vrot.slane %v13559_v54, %v24966_v51  ;;  %v22512_v50 = vrot.slane %v13560_v43, %v24966_v51  ;;  %v13176_v54 = vcombine.high %v22298_v30, %v22292_v7  ;;  %v22531_v43 = vrot.slane %v13224_v52, %v24961_v26 }
 0xa26   : > { %v13440_v14 = vcombine.high %v22497_v62, %v22500_v58  ;;  %v22554_v27 = vrot.slane %v13192_v35, %v24961_v26  ;;  %v25185_v39 = vcombine.low %v21455_v24, %v21466_v57  ;;  %v13408_v35 = vcombine.high %v13351_v32, %v13367_v31 }
 0xa27   : > { %25180 = vst [vmem:[#allocation67_spill] sm:$0xff] %v22512_v50  ;;  %v22568_v52 = vrot.slane %v13176_v54, %v24961_v26  ;;  %v22574_v22 = vsel %vm518_vm3, %v25186_v33, %v11348_v46  ;;  %v25188_v32 = vcombine.low %v21699_v12, %v21683_v17  ;;  %v25189_v31 = vcombine.low %v21883_v55, %v21894_v3 }
 0xa28   : > { %13803 = vrot.lane.b32.xlu0 %v13306_v53, %s14931_s30  ;;  %13741 = vrot.lane.b32.xlu1 %v13440_v14, %s14929_s27  ;;  %v13287_v14 = vcombine.low %v22557_v56, %v22531_v43  ;;  %v13422_v2 = vrot.slane %v13408_v35, %v24966_v51  ;;  %v25190_v7 = vcombine.low %v22070_v18, %v22061_v21 }
 0xa29   : > { %v11359_v6 = vpop.permute.xlu1 %11358  ;;  %v13255_v54 = vcombine.low %v22568_v52, %v22554_v27 }
 0xa2a   : > { %v22541_v48 = vsel %vm518_vm3, %v25183_v28, %v11359_v6  ;;  %v25187_v6 = vld [vmem:[#allocation59_spill] sm:$0xff] }
 0xa2b   : > { %v13584_v16 = vcombine.high %v22535_v44, %v22541_v48  ;;  %v13263_v30 = vrot.slane %v13255_v54, %v24966_v51  ;;  %v25192_v54 = vld [vmem:[#allocation161_spill] sm:$0xff] }
 0xa2c   : > { %13823 = vrot.lane.b32.xlu0 %v25184_v15, %s14932_s13  ;;  %13761 = vrot.lane.b32.xlu1 %v25185_v39, %s14930_s20  ;;  %v13376_v39 = vcombine.high %v22472_v20, %v22455_v41 }
 0xa2d   : > { %v11370_v53 = vpop.permute.xlu1 %11369  ;;  %v13598_v46 = vrot.slane %v13584_v16, %v24961_v26  ;;  %v25191_v16 = vcombine.low %v22215_v9, %v22206_v0 }
 0xa2e   : > { %v22578_v28 = vsel %vm518_vm3, %v25187_v6, %v11370_v53  ;;  %v13295_v6 = vrot.slane %v13287_v14, %v24966_v51 }
 0xa2f   : > { %v13600_v15 = vcombine.high %v22574_v22, %v22578_v28 }
 0xa30   : > { %13827 = vrot.lane.b32.xlu0 %v25188_v32, %s14932_s13  ;;  %13765 = vrot.lane.b32.xlu1 %v25189_v31, %s14930_s20  ;;  %v13390_v32 = vrot.slane %v13376_v39, %v24966_v51  ;;  %v13307_v14 = vcombine.low %v13263_v30, %v13295_v6 }
 0xa31   : > { %v13614_v53 = vrot.slane %v13600_v15, %v24961_v26  ;;  %v11381_v33 = vpop.permute.xlu1 %11380 }
 0xa32   : > { %v13441_v31 = vcombine.low %v13390_v32, %v13422_v2  ;;  %v22612_v39 = vsel %vm518_vm3, %v25192_v54, %v11381_v33  ;;  %v25196_v33 = vld [vmem:[#allocation108_spill] sm:$0xff] }
 0xa33   : > { %v13663_v41 = vcombine.low %v13598_v46, %v13614_v53  ;;  %v13664_v20 = vcombine.high %v13598_v46, %v13614_v53  ;;  %v25193_v46 = vld [vmem:[#allocation52_spill] sm:$0xff] }
 0xa34   : > { %13831 = vrot.lane.b32.xlu0 %v25190_v7, %s14932_s13  ;;  %13769 = vrot.lane.b32.xlu1 %v25191_v16, %s14930_s20  ;;  %v25194_v16 = vcombine.high %v21296_v47, %v21290_v40  ;;  %v25198_v40 = vcombine.high %v21699_v12, %v21683_v17  ;;  %v25199_v47 = vcombine.high %v21883_v55, %v21894_v3 }
 0xa35   : > { %v11392_v15 = vpop.permute.xlu1 %11391  ;;  %v25201_v17 = vcombine.high %v22215_v9, %v22206_v0  ;;  %v13308_v3 = vcombine.high %v13263_v30, %v13295_v6  ;;  %v13328_v0 = vcombine.high %v22421_v29, %v22417_v19  ;;  %v13344_v9 = vcombine.high %v22450_v23, %v22436_v25 }
 0xa36   : > { %v22630_v54 = vsel %vm518_vm3, %v25196_v33, %v11392_v15  ;;  %v13312_v29 = vcombine.high %v22432_v45, %v22425_v36  ;;  %v25206_v6 = vcombine.low %v21299_v63, %v21293_v60  ;;  %v13288_v36 = vcombine.high %v22557_v56, %v22531_v43 }
 0xa37   : > { %v22690_v19 = vrot.slane %v13328_v0, %v24961_v26  ;;  %v22693_v23 = vrot.slane %v13344_v9, %v24961_v26  ;;  %v25208_v33 = vcombine.low %v21709_v13, %v21686_v10  ;;  %v25209_v43 = vcombine.low %v21906_v1, %v21897_v5  ;;  %v25218_v0 = vld [vmem:[#allocation177_spill] sm:$0xff] }
 0xa38   : > { %13835 = vrot.lane.b32.xlu0 %v13307_v14, %s14932_s13  ;;  %13773 = vrot.lane.b32.xlu1 %v13441_v31, %s14930_s20  ;;  %v25195_v14 = vcombine.high %v21455_v24, %v21466_v57  ;;  %v22706_v45 = vrot.slane %v13312_v29, %v24961_v26  ;;  %v13302_v56 = vrot.slane %v13288_v36, %v24966_v51  ;;  %v25219_v29 = vld [vmem:[#allocation30_spill] sm:$0xff] }
 0xa39   : > { %v11403_v35 = vpop.permute.xlu1 %11402  ;;  %v25221_v36 = vcombine.high %v21299_v63, %v21293_v60  ;;  %v25227_v63 = vld [vmem:[#allocation124_spill] sm:$0xff] }
 0xa3a   : > { %v22616_v7 = vsel %vm518_vm3, %v25193_v46, %v11403_v35  ;;  %v25197_v35 = vld [vmem:[#allocation162_spill] sm:$0xff] }
 0xa3b   : > { %v13616_v53 = vcombine.high %v22612_v39, %v22616_v7 }
 0xa3c   : > { %13855 = vrot.lane.b32.xlu0 %v25194_v16, %s14933_s9  ;;  %13793 = vrot.lane.b32.xlu1 %v25195_v14, %s14931_s30  ;;  %v25200_v14 = vcombine.high %v22070_v18, %v22061_v21  ;;  %v22668_v21 = vrot.slane %v13664_v20, %v24966_v51  ;;  %v13442_v18 = vcombine.high %v13390_v32, %v13422_v2  ;;  %v25260_v2 = vld [vmem:[#allocation159_spill] sm:$0xff] }
 0xa3d   : > { %v11414_v31 = vpop.permute.xlu1 %11413  ;;  %v13630_v24 = vrot.slane %v13616_v53, %v24961_v26  ;;  %v22665_v53 = vrot.slane %v13663_v41, %v24966_v51  ;;  %v25207_v41 = vcombine.low %v21485_v4, %v21469_v38  ;;  %v13256_v32 = vcombine.high %v22568_v52, %v22554_v27  ;;  %v25210_v52 = vld [vmem:[#allocation62_spill] sm:$0xff] }
 0xa3e   : > { %v22634_v46 = vsel %vm518_vm3, %v25197_v35, %v11414_v31  ;;  %25205 = vst [vmem:[#allocation117_spill] sm:$0xff] %v22668_v21  ;;  %v13391_v31 = vcombine.low %v22706_v45, %v22690_v19  ;;  %v25266_v21 = vld [vmem:[#allocation126_spill] sm:$0xff] }
 0xa3f   : > { %v13632_v61 = vcombine.high %v22630_v54, %v22634_v46  ;;  %25204 = vst [vmem:[#allocation79_spill] sm:$0xff] %v22665_v53 }
 0xa40   : > { %13859 = vrot.lane.b32.xlu0 %v25198_v40, %s14933_s9  ;;  %13797 = vrot.lane.b32.xlu1 %v25199_v47, %s14931_s30  ;;  %v13270_v40 = vrot.slane %v13256_v32, %v24966_v51  ;;  %v13399_v27 = vrot.slane %v13391_v31, %v24966_v51  ;;  %v25211_v47 = vcombine.low %v22073_v11, %v25210_v52  ;;  %v25223_v32 = vld [vmem:[#allocation110_spill] sm:$0xff]  ;;  %v25224_v31 = vld [vmem:[#allocation149_spill] sm:$0xff] }
 0xa41   : > { %v13646_v57 = vrot.slane %v13632_v61, %v24961_v26  ;;  %v13360_v61 = vcombine.high %v22465_v49, %v22469_v37  ;;  %v25263_v37 = vld [vmem:[#allocation101_spill] sm:$0xff] }
 0xa43   : > { %v13695_v15 = vcombine.low %v13630_v24, %v13646_v57  ;;  %v13696_v16 = vcombine.high %v13630_v24, %v13646_v57  ;;  %v22687_v25 = vrot.slane %v13360_v61, %v24961_v26  ;;  %v25212_v24 = vld [vmem:[#allocation158_spill] sm:$0xff] }
 0xa44   : > { %13863 = vrot.lane.b32.xlu0 %v25200_v14, %s14933_s9  ;;  %13801 = vrot.lane.b32.xlu1 %v25201_v17, %s14931_s30  ;;  %v25213_v57 = vld [vmem:[#allocation34_spill] sm:$0xff]  ;;  %v25215_v17 = vld [vmem:[#allocation147_spill] sm:$0xff] }
 0xa45   : > { %v22657_v12 = vrot.slane %v13695_v15, %v24966_v51  ;;  %v22660_v55 = vrot.slane %v13696_v16, %v24966_v51  ;;  %v13423_v20 = vcombine.low %v22693_v23, %v22687_v25  ;;  %v25214_v15 = vcombine.low %v25212_v24, %v25213_v57 }
 0xa46   : > { %v13309_v16 = vcombine.low %v13270_v40, %v13302_v56 }
 0xa47   : > { %25202 = vst [vmem:[#allocation75_spill] sm:$0xff] %v22657_v12  ;;  %25203 = vst [vmem:[#allocation118_spill] sm:$0xff] %v22660_v55  ;;  %v13431_v35 = vrot.slane %v13423_v20, %v24966_v51  ;;  %v25222_v20 = vcombine.high %v21485_v4, %v21469_v38  ;;  %v25229_v38 = vld [vmem:[#allocation153_spill] sm:$0xff]  ;;  %v25230_v4 = vld [vmem:[#allocation140_spill] sm:$0xff] }
 0xa48   : > { %13867 = vrot.lane.b32.xlu0 %v13308_v3, %s14933_s9  ;;  %13805 = vrot.lane.b32.xlu1 %v13442_v18, %s14931_s30  ;;  %v25216_v3 = vld [vmem:[#allocation28_spill] sm:$0xff]  ;;  %v25217_v18 = vld [vmem:[#allocation178_spill] sm:$0xff]  ;;  %s14818_s30 = scalar_lea.vmem %s23467_s22, 2048 }
 0xa49   : > { %v13443_v14 = vcombine.low %v13399_v27, %v13431_v35  ;;  %v11863_v61 = vcombine.low %v25216_v3, %v25215_v17  ;;  %v11831_v9 = vcombine.low %v25218_v0, %v25217_v18  ;;  %v25228_v17 = vld [vmem:[#allocation145_spill] sm:$0xff]  ;;  %v12391_v18 = vcombine.low %v25230_v4, %v25229_v38  ;;  %v25267_v12 = vld [vmem:[#allocation144_spill] sm:$0xff]  ;;  %p14819_p11 = scmp.ne.s32.totalorder %s23467_s22, %s14818_s30 }
 0xa4a   : > { %v12375_v3 = vcombine.low %v25228_v17, %v25227_v63  ;;  %v25232_v0 = vcombine.high %v21906_v1, %v21897_v5  ;;  %v25239_v63 = vld [vmem:[#allocation23_spill] sm:$0xff]  ;;  %v25242_v4 = vcombine.high %v25212_v24, %v25213_v57  ;;  %v13444_v24 = vcombine.high %v13399_v27, %v13431_v35 }
 0xa4b   : > { %v22793_v1 = vrot.slane %v12391_v18, %v24961_v26  ;;  %v25240_v17 = vld [vmem:[#allocation55_spill] sm:$0xff]  ;;  %v11967_v53 = vcombine.low %v25267_v12, %v25266_v21  ;;  %p14820_p0 = pnand %p14819_p11, %p15071_p12 }
 0xa4c   : > { %13887 = vrot.lane.b32.xlu0 %v25206_v6, %s14934_s15  ;;  %13825 = vrot.lane.b32.xlu1 %v25207_v41, %s14932_s13  ;;  %v25220_v6 = vld [vmem:[#allocation113_spill] sm:$0xff]  ;;  %v22790_v5 = vrot.slane %v12375_v3, %v24961_v26  ;;  %v12935_v38 = vcombine.low %v25240_v17, %v25239_v63  ;;  %v25247_v63 = vld [vmem:[#allocation115_spill] sm:$0xff]  ;;  %v25248_v17 = vld [vmem:[#allocation98_spill] sm:$0xff] }
 0xa4d   : > { %v11847_v41 = vcombine.low %v25220_v6, %v25219_v29  ;;  %v25233_v6 = vld [vmem:[#allocation119_spill] sm:$0xff]  ;;  %p14821_p1 = pneg %p14820_p0 }
 0xa4f   : > { %v22761_v60 = vrot.slane %v11847_v41, %v24961_v26  ;;  %v25234_v41 = vld [vmem:[#allocation125_spill] sm:$0xff] }
 0xa50   : > { %13891 = vrot.lane.b32.xlu0 %v25208_v33, %s14934_s15  ;;  %13829 = vrot.lane.b32.xlu1 %v25209_v43, %s14932_s13  ;;  %v11815_v33 = vcombine.low %v25224_v31, %v25223_v32  ;;  %v22753_v43 = vrot.slane %v11863_v61, %v24961_v26  ;;  %v25231_v61 = vcombine.high %v21709_v13, %v21686_v10  ;;  %v25235_v32 = vld [vmem:[#allocation157_spill] sm:$0xff]  ;;  %v25236_v10 = vld [vmem:[#allocation160_spill] sm:$0xff] }
 0xa51   : > { %v12951_v13 = vcombine.low %v25236_v10, %v25235_v32 }
 0xa52   : > { %v11911_v29 = vcombine.low %v22761_v60, %v22753_v43  ;;  %v11912_v50 = vcombine.high %v22761_v60, %v22753_v43  ;;  %v22937_v60 = vrot.slane %v11967_v53, %v24961_v26 }
 0xa53   : > { %v22816_v32 = vrot.slane %v12951_v13, %v24961_v26  ;;  %v13463_v13 = vcombine.low %v25248_v17, %v25247_v63  ;;  %v25254_v63 = vld [vmem:[#allocation152_spill] sm:$0xff] }
 0xa54   : > { %13895 = vrot.lane.b32.xlu0 %v25211_v47, %s14934_s15  ;;  %13833 = vrot.lane.b32.xlu1 %v25214_v15, %s14932_s13  ;;  %v25225_v47 = vld [vmem:[#allocation164_spill] sm:$0xff]  ;;  %v25226_v15 = vld [vmem:[#allocation103_spill] sm:$0xff]  ;;  %v11919_v3 = vrot.slane %v11911_v29, %v24966_v51 }
 0xa58   : > { %13899 = vrot.lane.b32.xlu0 %v13309_v16, %s14934_s15  ;;  %13837 = vrot.lane.b32.xlu1 %v13443_v14, %s14932_s13  ;;  %v12407_v16 = vcombine.low %v25226_v15, %v25225_v47  ;;  %v22758_v14 = vrot.slane %v11831_v9, %v24961_v26  ;;  %v22776_v9 = vrot.slane %v11815_v33, %v24961_v26  ;;  %v25237_v33 = vld [vmem:[#allocation26_spill] sm:$0xff]  ;;  %v25238_v47 = vld [vmem:[#allocation21_spill] sm:$0xff] }
 0xa59   : > { %v12919_v15 = vcombine.low %v25238_v47, %v25237_v33  ;;  %v13310_v33 = vcombine.high %v13270_v40, %v13302_v56  ;;  %v22827_v47 = vrot.slane %v12935_v38, %v24961_v26 }
 0xa5a   : > { %v11879_v31 = vcombine.low %v22776_v9, %v22758_v14  ;;  %v11880_v12 = vcombine.high %v22776_v9, %v22758_v14 }
 0xa5b   : > { %v12999_v27 = vcombine.low %v22827_v47, %v22816_v32 }
 0xa5c   : > { %13919 = vrot.lane.b32.xlu0 %v25221_v36, %s14935_s11  ;;  %13857 = vrot.lane.b32.xlu1 %v25222_v20, %s14933_s9  ;;  %v12359_v36 = vcombine.low %v25234_v41, %v25233_v6  ;;  %v22783_v20 = vrot.slane %v12407_v16, %v24961_v26  ;;  %v25241_v16 = vcombine.high %v22073_v11, %v25210_v52  ;;  %v25244_v6 = vld [vmem:[#allocation35_spill] sm:$0xff]  ;;  %v25246_v52 = vld [vmem:[#allocation92_spill] sm:$0xff] }
 0xa5d   : > { %v25245_v11 = vld [vmem:[#allocation127_spill] sm:$0xff]  ;;  %v11887_v57 = vrot.slane %v11879_v31, %v24966_v51  ;;  %v25251_v31 = vld [vmem:[#allocation96_spill] sm:$0xff] }
 0xa5e   : > { %v22809_v18 = vrot.slane %v12359_v36, %v24961_v26  ;;  %v13495_v10 = vcombine.low %v25246_v52, %v25245_v11  ;;  %v22824_v36 = vrot.slane %v12919_v15, %v24961_v26  ;;  %v25252_v15 = vld [vmem:[#allocation93_spill] sm:$0xff] }
 0xa5f   : > { %v11943_v35 = vcombine.low %v11887_v57, %v11919_v3  ;;  %v13447_v38 = vcombine.low %v25252_v15, %v25251_v31  ;;  %v25257_v15 = vld [vmem:[#allocation121_spill] sm:$0xff] }
 0xa60   : > { %13923 = vrot.lane.b32.xlu0 %v25231_v61, %s14935_s11  ;;  %13861 = vrot.lane.b32.xlu1 %v25232_v0, %s14933_s9  ;;  %v12455_v61 = vcombine.low %v22793_v1, %v22783_v20  ;;  %v25243_v0 = vld [vmem:[#allocation20_spill] sm:$0xff]  ;;  %v12423_v29 = vcombine.low %v22809_v18, %v22790_v5 }
 0xa61   : > { %v12903_v41 = vcombine.low %v25244_v6, %v25243_v0  ;;  %v22844_v6 = vrot.slane %v13495_v10, %v24961_v26 }
 0xa62   : > { %v12463_v56 = vrot.slane %v12455_v61, %v24966_v51  ;;  %v12431_v11 = vrot.slane %v12423_v29, %v24966_v51  ;;  %v22850_v61 = vrot.slane %v13463_v13, %v24961_v26  ;;  %v13007_v29 = vrot.slane %v12999_v27, %v24966_v51  ;;  %v25256_v27 = vld [vmem:[#allocation105_spill] sm:$0xff] }
 0xa63   : > { %v22837_v40 = vrot.slane %v12903_v41, %v24961_v26  ;;  %v13424_v13 = vcombine.high %v22693_v23, %v22687_v25  ;;  %v25277_v9 = vcombine.high %v25256_v27, %v25257_v15 }
 0xa64   : > { %13927 = vrot.lane.b32.xlu0 %v25241_v16, %s14935_s11  ;;  %13865 = vrot.lane.b32.xlu1 %v25242_v4, %s14933_s9  ;;  %v25249_v16 = vld [vmem:[#allocation116_spill] sm:$0xff]  ;;  %v25250_v4 = vld [vmem:[#allocation94_spill] sm:$0xff]  ;;  %v12487_v17 = vcombine.low %v12431_v11, %v12463_v56  ;;  %v12488_v43 = vcombine.high %v12431_v11, %v12463_v56  ;;  %v25278_v56 = vld [vmem:[#allocation89_spill] sm:$0xff] }
 0xa65   : > { %v13479_v0 = vcombine.low %v25250_v4, %v25249_v16  ;;  %v12967_v52 = vcombine.low %v22837_v40, %v22824_v36  ;;  %v22864_v16 = vrot.slane %v13447_v38, %v24961_v26  ;;  %v25258_v38 = vcombine.low %v25256_v27, %v25257_v15  ;;  %v25279_v11 = vld [vmem:[#allocation46_spill] sm:$0xff] }
 0xa66   : > { %v22881_v25 = vrot.slane %v13424_v13, %v24966_v51 }
 0xa67   : > { %v22853_v41 = vrot.slane %v13479_v0, %v24961_v26  ;;  %v12975_v0 = vrot.slane %v12967_v52, %v24966_v51  ;;  %v13511_v31 = vcombine.low %v22864_v16, %v22850_v61 }
 0xa68   : > { %13931 = vrot.lane.b32.xlu0 %v13310_v33, %s14935_s11  ;;  %13869 = vrot.lane.b32.xlu1 %v13444_v24, %s14933_s9  ;;  %v22855_v33 = vpop.permute.xlu0 %13727  ;;  %v25253_v24 = vld [vmem:[#allocation150_spill] sm:$0xff]  ;;  %s14943_s9 = smov [#allocation10]  }
 0xa69   : > { %v25255_v10 = vcombine.low %v25253_v24, %v25254_v63  ;;  %v13543_v4 = vcombine.low %v22853_v41, %v22844_v6  ;;  %v13032_v27 = vcombine.high %v12975_v0, %v13007_v29 }
 0xa6b   : > { %v22884_v23 = vrot.slane %v13543_v4, %v24966_v51 }
 0xa6c   : > { %13951 = vrot.lane.b32.xlu0 %v11943_v35, %s14921_s8  ;;  %13889 = vrot.lane.b32.xlu1 %v25255_v10, %s14934_s15  ;;  %v13392_v35 = vcombine.high %v22706_v45, %v22690_v19  ;;  %v22886_v52 = vpop.permute.xlu0 %13731  ;;  %v13031_v10 = vcombine.low %v12975_v0, %v13007_v29  ;;  %v22892_v45 = vrot.slane %v13511_v31, %v24966_v51  ;;  %v25264_v31 = vld [vmem:[#allocation142_spill] sm:$0xff] }
 0xa6e   : > { %v22889_v19 = vrot.slane %v13392_v35, %v24966_v51  ;;  %v25262_v35 = vld [vmem:[#allocation135_spill] sm:$0xff] }
 0xa6f   : > { %v11999_v49 = vcombine.low %v25263_v37, %v25262_v35  ;;  %v25268_v37 = vcombine.high %v25253_v24, %v25254_v63  ;;  %v25273_v24 = vld [vmem:[#allocation179_spill] sm:$0xff] }
 0xa70   : > { %13955 = vrot.lane.b32.xlu0 %v12487_v17, %s14921_s8  ;;  %13893 = vrot.lane.b32.xlu1 %v25258_v38, %s14934_s15  ;;  %v25259_v17 = vld [vmem:[#allocation176_spill] sm:$0xff]  ;;  %v22899_v13 = vpop.permute.xlu0 %13735  ;;  %v13445_v4 = vcombine.low %v22889_v19, %v22881_v25  ;;  %v13575_v38 = vcombine.low %v22892_v45, %v22884_v23  ;;  %v25274_v63 = vld [vmem:[#allocation139_spill] sm:$0xff] }
 0xa71   : > { %v25261_v30 = vcombine.low %v25259_v17, %v25260_v2  ;;  %v22918_v59 = vrot.slane %v11999_v49, %v24961_v26  ;;  %v25286_v29 = vcombine.high %v25259_v17, %v25260_v2  ;;  %v13631_v17 = vcombine.low %v22630_v54, %v22634_v46 }
 0xa72   : > { %v13599_v46 = vcombine.low %v22574_v22, %v22578_v28 }
 0xa74   : > { %13897 = vrot.lane.b32.xlu1 %v25261_v30, %s14934_s15  ;;  %13959 = vrot.lane.b32.xlu0 %v13031_v10, %s14921_s8  ;;  %v11983_v30 = vcombine.low %v25265_v8, %v25264_v31  ;;  %v11944_v10 = vcombine.high %v11887_v57, %v11919_v3  ;;  %v25269_v8 = vld [vmem:[#allocation120_spill] sm:$0xff]  ;;  %v25271_v3 = vld [vmem:[#allocation49_spill] sm:$0xff]  ;;  %v12511_v31 = vcombine.low %v25274_v63, %v25273_v24  ;;  %v25281_v24 = vld [vmem:[#allocation82_spill] sm:$0xff] }
 0xa75   : > { %v25272_v57 = vld [vmem:[#allocation29_spill] sm:$0xff] }
 0xa76   : > { %v12543_v35 = vcombine.low %v25272_v57, %v25271_v3  ;;  %v22932_v21 = vrot.slane %v11983_v30, %v24961_v26  ;;  %v12495_v30 = vcombine.low %v25279_v11, %v25278_v56  ;;  %v25280_v57 = vld [vmem:[#allocation78_spill] sm:$0xff]  ;;  %v25284_v56 = vld [vmem:[#allocation40_spill] sm:$0xff]  ;;  %v25285_v11 = vld [vmem:[#allocation27_spill] sm:$0xff] }
 0xa77   : > { %v13087_v63 = vcombine.low %v25281_v24, %v25280_v57  ;;  %v13071_v57 = vcombine.low %v25285_v11, %v25284_v56  ;;  %v25287_v24 = vld [vmem:[#allocation169_spill] sm:$0xff]  ;;  %v12424_v56 = vcombine.high %v22809_v18, %v22790_v5 }
 0xa78   : > { %13901 = vrot.lane.b32.xlu1 %v13445_v4, %s14934_s15  ;;  %13963 = vrot.lane.b32.xlu0 %v13575_v38, %s14921_s8  ;;  %v25270_v4 = vld [vmem:[#allocation111_spill] sm:$0xff]  ;;  %v12047_v14 = vcombine.low %v22932_v21, %v22918_v59  ;;  %v22959_v3 = vrot.slane %v12543_v35, %v24961_v26  ;;  %v25282_v35 = vld [vmem:[#allocation173_spill] sm:$0xff]  ;;  %s14822_s15 = sshll.u32 %s14943_s9, 4  ;;  %s14823_s15 = int_to_ptr.vmem [resolvable:$false] %s14822_s15 }
 0xa79   : > { %v11951_v38 = vcombine.low %v25270_v4, %v25269_v8  ;;  %v22944_v4 = vrot.slane %v11912_v50, %v24966_v51  ;;  %v22962_v50 = vrot.slane %v11880_v12, %v24966_v51  ;;  %v23000_v2 = vrot.slane %v13087_v63, %v24961_v26  ;;  %p14825_p3 = scmp.lt.s32.totalorder %s23467_s22, %s14823_s15 }
 0xa7a   : > { %v22911_v55 = vpop.permute.xlu0 %13739  ;;  %v22979_v12 = vrot.slane %v12047_v14, %v24966_v51  ;;  %v23021_v54 = vrot.slane %v13071_v57, %v24961_v26  ;;  %v23056_v57 = vrot.slane %v13599_v46, %v24961_v26 }
 0xa7b   : > { %v22954_v53 = vrot.slane %v11951_v38, %v24961_v26  ;;  %v22971_v38 = vrot.slane %v12511_v31, %v24961_v26  ;;  %v11945_v0 = vcombine.low %v22962_v50, %v22944_v4  ;;  %v12456_v31 = vcombine.high %v22793_v1, %v22783_v20 }
 0xa7c   : > { %13921 = vrot.lane.b32.xlu1 %v25268_v37, %s14935_s11  ;;  %13983 = vrot.lane.b32.xlu0 %v11944_v10, %s14936_s7  ;;  %v25275_v10 = vld [vmem:[#allocation54_spill] sm:$0xff]  ;;  %v25276_v37 = vld [vmem:[#allocation24_spill] sm:$0xff]  ;;  %v13446_v20 = vcombine.high %v22889_v19, %v22881_v25  ;;  %v13576_v1 = vcombine.high %v22892_v45, %v22884_v23  ;;  %v13615_v25 = vcombine.low %v22612_v39, %v22616_v7 }
 0xa7d   : > { %v12527_v8 = vcombine.low %v25276_v37, %v25275_v10  ;;  %v12015_v15 = vcombine.low %v22954_v53, %v22937_v60  ;;  %v25283_v37 = vld [vmem:[#allocation174_spill] sm:$0xff]  ;;  %v23030_v5 = vrot.slane %v12456_v31, %v24966_v51  ;;  %v13000_v23 = vcombine.high %v22827_v47, %v22816_v32 }
 0xa7e   : > { %v22934_v49 = vpop.permute.xlu0 %13759  ;;  %v13135_v28 = vcombine.low %v23021_v54, %v23000_v2  ;;  %v13583_v39 = vcombine.low %v22535_v44, %v22541_v48  ;;  %v23047_v7 = vrot.slane %v13631_v17, %v24961_v26  ;;  %v12968_v47 = vcombine.high %v22837_v40, %v22824_v36  ;;  %v23061_v44 = vpop.permute.xlu1 %13729 }
 0xa7f   : > { %v13014_v48 = vrot.slane %v13000_v23, %v24966_v51 }
 0xa80   : > { %13925 = vrot.lane.b32.xlu1 %v25277_v9, %s14935_s11  ;;  %13987 = vrot.lane.b32.xlu0 %v12488_v43, %s14936_s7  ;;  %v22974_v43 = vrot.slane %v12527_v8, %v24961_v26  ;;  %v13055_v9 = vcombine.low %v25283_v37, %v25282_v35  ;;  %v22993_v8 = vrot.slane %v12495_v30, %v24961_v26  ;;  %v25288_v35 = vld [vmem:[#allocation170_spill] sm:$0xff] }
 0xa81   : > { %v13039_v37 = vcombine.low %v25288_v35, %v25287_v24  ;;  %v23011_v30 = vrot.slane %v12015_v15, %v24966_v51  ;;  %v12438_v15 = vrot.slane %v12424_v56, %v24966_v51  ;;  %v13143_v40 = vrot.slane %v13135_v28, %v24966_v51 }
 0xa82   : > { %v22966_v10 = vpop.permute.xlu0 %13763  ;;  %v12591_v14 = vcombine.low %v22974_v43, %v22959_v3  ;;  %v12559_v63 = vcombine.low %v22993_v8, %v22971_v38  ;;  %v23018_v11 = vrot.slane %v13055_v9, %v24961_v26  ;;  %v23072_v24 = vrot.slane %v13583_v39, %v24961_v26  ;;  %v25289_v39 = vld [vmem:[#allocation81_spill] sm:$0xff] }
 0xa83   : > { %v12079_v19 = vcombine.low %v23011_v30, %v22979_v12  ;;  %v23040_v22 = vrot.slane %v13039_v37, %v24961_v26  ;;  %v12489_v36 = vcombine.low %v12438_v15, %v23030_v5 }
 0xa84   : > { %13929 = vrot.lane.b32.xlu1 %v25286_v29, %s14935_s11  ;;  %13991 = vrot.lane.b32.xlu0 %v13032_v27, %s14936_s7  ;;  %v23033_v18 = vrot.slane %v12591_v14, %v24966_v51  ;;  %v12567_v32 = vrot.slane %v12559_v63, %v24966_v51  ;;  %v23059_v29 = vrot.slane %v13615_v25, %v24961_v26 }
 0xa85   : > { %v13103_v9 = vcombine.low %v23040_v22, %v23018_v11  ;;  %v13544_v14 = vcombine.high %v22853_v41, %v22844_v6  ;;  %v23086_v41 = vpop.permute.xlu1 %13733 }
 0xa86   : > { %v23004_v27 = vpop.permute.xlu0 %13767  ;;  %v12623_v31 = vcombine.low %v12567_v32, %v23033_v18  ;;  %v13679_v35 = vcombine.low %v23059_v29, %v23047_v7 }
 0xa87   : > { %v13111_v17 = vrot.slane %v13103_v9, %v24966_v51  ;;  %v13558_v26 = vrot.slane %v13544_v14, %v24966_v51 }
 0xa88   : > { %13933 = vrot.lane.b32.xlu1 %v13446_v20, %s14935_s11  ;;  %13995 = vrot.lane.b32.xlu0 %v13576_v1, %s14936_s7  ;;  %v13512_v20 = vcombine.high %v22864_v16, %v22850_v61  ;;  %v13647_v1 = vcombine.low %v23072_v24, %v23056_v57  ;;  %v13687_v6 = vrot.slane %v13679_v35, %v24966_v51  ;;  %s14824_s11 = scalar_lea.vmem %s14823_s15, 4096 }
 0xa89   : > { %v13167_v63 = vcombine.low %v13111_v17, %v13143_v40  ;;  %v23092_v16 = vpop.permute.xlu1 %13737  ;;  %p14826_p5 = scmp.lt.s32.totalorder %s14824_s11, %s14818_s30 }
 0xa8a   : > { %v13772_v45 = vpop.permute.xlu0 %13771  ;;  %v13526_v25 = vrot.slane %v13512_v20, %v24966_v51  ;;  %v13655_v61 = vrot.slane %v13647_v1, %v24966_v51  ;;  %v11946_v20 = vcombine.high %v22962_v50, %v22944_v4  ;;  %v12080_v1 = vcombine.high %v23011_v30, %v22979_v12 }
 0xa8b   : > { %v12490_v12 = vcombine.high %v12438_v15, %v23030_v5  ;;  %v12624_v30 = vcombine.high %v12567_v32, %v23033_v18  ;;  %p14827_p8 = por %p14826_p5, %p14825_p3 }
 0xa8c   : > { %13953 = vrot.lane.b32.xlu1 %v12079_v19, %s14921_s8  ;;  %14015 = vrot.lane.b32.xlu0 %v11945_v0, %s14937_s1  ;;  %v12982_v0 = vrot.slane %v12968_v47, %v24966_v51  ;;  %v13577_v19 = vcombine.low %v13526_v25, %v13558_v26  ;;  %v13711_v28 = vcombine.low %v13655_v61, %v13687_v6  ;;  %v25290_v47 = vld [vmem:[#allocation77_spill] sm:$0xff] }
 0xa8d   : > { %v25291_v9 = vcombine.low %v25289_v39, %v25290_v47  ;;  %p14828_p6 = pnand %p14827_p8, %p14821_p1 }
 0xa8e   : > { %v13792_v37 = vpop.permute.xlu0 %13791  ;;  %v13033_v46 = vcombine.low %v12982_v0, %v13014_v48 }
 0xa90   : > { %13957 = vrot.lane.b32.xlu1 %v12623_v31, %s14921_s8  ;;  %14019 = vrot.lane.b32.xlu0 %v12489_v36, %s14937_s1  ;;  %v14205_v31 = vsel %vm9859_vm14, %v25291_v9, %v22911_v55  ;;  %v25296_v9 = vld [vmem:[#allocation154_spill] sm:$0xff] }
 0xa91   : > { %v14213_v36 = vsel %vm9868_vm15, %v14205_v31, %v13772_v45 }
 0xa92   : > { %v13796_v56 = vpop.permute.xlu0 %13795 }
 0xa94   : > { %13961 = vrot.lane.b32.xlu1 %v13167_v63, %s14921_s8  ;;  %14023 = vrot.lane.b32.xlu0 %v13033_v46, %s14937_s1  ;;  %v25292_v46 = vld [vmem:[#allocation43_spill] sm:$0xff] }
 0xa96   : > { %v13800_v23 = vpop.permute.xlu0 %13799 }
 0xa98   : > { %14027 = vrot.lane.b32.xlu0 %v13577_v19, %s14937_s1  ;;  %13965 = vrot.lane.b32.xlu1 %v13711_v28, %s14921_s8  ;;  %v25293_v19 = vld [vmem:[#allocation148_spill] sm:$0xff]  ;;  %s14583_s8 = sshll.u32 %s14898_s21, 11  ;;  %s14336_s21 = scalar_lea.sflag [#allocation4], %s15150_s28 }
 0xa99   : > { %v25294_v28 = vcombine.low %v25292_v46, %v25293_v19  ;;  %v25299_v46 = vld [vmem:[#allocation38_spill] sm:$0xff]  ;;  %s23464_s20 = scalar_lea.hbm %s23523_s5, %s14583_s8 }
 0xa9a   : > { %v13804_v14 = vpop.permute.xlu0 %13803  ;;  %v23102_v35 = vpop.permute.xlu1 %13741 }
 0xa9b   : > { %v14221_v63 = vsel %vm9877_vm0, %v14213_v36, %v13804_v14  ;;  %v14199_v39 = vsel %vm9859_vm14, %v25294_v28, %v22855_v33  ;;  %v25295_v33 = vld [vmem:[#allocation44_spill] sm:$0xff]  ;;  %v13168_v14 = vcombine.high %v13111_v17, %v13143_v40  ;;  %v13712_v17 = vcombine.high %v13655_v61, %v13687_v6 }
 0xa9c   : > { %14047 = vrot.lane.b32.xlu0 %v11946_v20, %s14938_s17  ;;  %13985 = vrot.lane.b32.xlu1 %v12080_v1, %s14936_s7  ;;  %v14207_v55 = vsel %vm9868_vm15, %v14199_v39, %v22934_v49  ;;  %v25297_v31 = vcombine.low %v25295_v33, %v25296_v9  ;;  %v12048_v49 = vcombine.high %v22932_v21, %v22918_v59  ;;  %v25298_v1 = vld [vmem:[#allocation39_spill] sm:$0xff] }
 0xa9d   : > { %v14215_v4 = vsel %vm9877_vm0, %v14207_v55, %v13792_v37  ;;  %v13034_v37 = vcombine.high %v12982_v0, %v13014_v48  ;;  %v25300_v19 = vcombine.low %v25298_v1, %v25299_v46  ;;  %v12592_v48 = vcombine.high %v22974_v43, %v22959_v3 }
 0xa9e   : > { %v13824_v50 = vpop.permute.xlu0 %13823  ;;  %v23119_v45 = vpop.permute.xlu1 %13761  ;;  %v14201_v36 = vsel %vm9859_vm14, %v25297_v31, %v22886_v52  ;;  %v12016_v52 = vcombine.high %v22954_v53, %v22937_v60  ;;  %v12062_v21 = vrot.slane %v12048_v49, %v24966_v51  ;;  %v13578_v0 = vcombine.high %v13526_v25, %v13558_v26  ;;  %v25307_v49 = vld [vmem:[#allocation172_spill] sm:$0xff] }
 0xa9f   : > { %v14223_v47 = vsel %vm9886_vm1, %v14215_v4, %v13824_v50  ;;  %v14209_v5 = vsel %vm9868_vm15, %v14201_v36, %v22966_v10  ;;  %v14203_v59 = vsel %vm9859_vm14, %v25300_v19, %v22899_v13  ;;  %v12560_v28 = vcombine.high %v22993_v8, %v22971_v38  ;;  %v25301_v38 = vld [vmem:[#allocation129_spill] sm:$0xff] }
 0xaa0   : > { %14051 = vrot.lane.b32.xlu0 %v12490_v12, %s14938_s17  ;;  %13989 = vrot.lane.b32.xlu1 %v12624_v30, %s14936_s7  ;;  %v14217_v18 = vsel %vm9877_vm0, %v14209_v5, %v13796_v56  ;;  %v14211_v10 = vsel %vm9868_vm15, %v14203_v59, %v23004_v27  ;;  %v12030_v56 = vrot.slane %v12016_v52, %v24966_v51  ;;  %v25302_v8 = vld [vmem:[#allocation69_spill] sm:$0xff]  ;;  %v25305_v30 = vld [vmem:[#allocation184_spill] sm:$0xff]  ;;  %v25308_v5 = vld [vmem:[#allocation175_spill] sm:$0xff] }
 0xaa1   : > { %v14219_v60 = vsel %vm9877_vm0, %v14211_v10, %v13800_v23  ;;  %v12606_v3 = vrot.slane %v12592_v48, %v24966_v51  ;;  %v13136_v43 = vcombine.high %v23021_v54, %v23000_v2  ;;  %v12574_v25 = vrot.slane %v12560_v28, %v24966_v51  ;;  %v25312_v48 = vld [vmem:[#allocation102_spill] sm:$0xff] }
 0xaa2   : > { %v13828_v15 = vpop.permute.xlu0 %13827  ;;  %v23136_v32 = vpop.permute.xlu1 %13765  ;;  %v12081_v26 = vcombine.low %v12030_v56, %v12062_v21  ;;  %v13104_v61 = vcombine.high %v23040_v22, %v23018_v11  ;;  %v25303_v39 = vcombine.low %v25301_v38, %v25302_v8  ;;  %v13680_v2 = vcombine.high %v23059_v29, %v23047_v7  ;;  %v25304_v22 = vld [vmem:[#allocation87_spill] sm:$0xff] }
 0xaa3   : > { %v14225_v20 = vsel %vm9886_vm1, %v14217_v18, %v13828_v15  ;;  %v13150_v55 = vrot.slane %v13136_v43, %v24966_v51  ;;  %v13648_v11 = vcombine.high %v23072_v24, %v23056_v57  ;;  %v25306_v33 = vcombine.low %v25304_v22, %v25305_v30  ;;  %v25317_v43 = vld [vmem:[#allocation155_spill] sm:$0xff] }
 0xaa4   : > { %14055 = vrot.lane.b32.xlu0 %v13034_v37, %s14938_s17  ;;  %13993 = vrot.lane.b32.xlu1 %v13168_v14, %s14936_s7  ;;  %v13118_v12 = vrot.slane %v13104_v61, %v24966_v51  ;;  %v13694_v9 = vrot.slane %v13680_v2, %v24966_v51  ;;  %v25309_v57 = vcombine.low %v25307_v49, %v25308_v5 }
 0xaa5   : > { %v25310_v14 = vcombine.low %v22521_v34, %v22509_v42  ;;  %v12082_v19 = vcombine.high %v12030_v56, %v12062_v21 }
 0xaa6   : > { %v13832_v53 = vpop.permute.xlu0 %13831  ;;  %v23154_v40 = vpop.permute.xlu1 %13769  ;;  %v13169_v31 = vcombine.low %v13118_v12, %v13150_v55  ;;  %v13170_v61 = vcombine.high %v13118_v12, %v13150_v55 }
 0xaa7   : > { %v14227_v13 = vsel %vm9886_vm1, %v14219_v60, %v13832_v53  ;;  %v25313_v60 = vld [vmem:[#allocation112_spill] sm:$0xff] }
 0xaa8   : > { %14059 = vrot.lane.b32.xlu0 %v13578_v0, %s14938_s17  ;;  %13997 = vrot.lane.b32.xlu1 %v13712_v17, %s14936_s7  ;;  %v25314_v53 = vcombine.low %v25312_v48, %v25313_v60  ;;  %v25340_v48 = vld [vmem:[#allocation141_spill] sm:$0xff] }
 0xaa9   : > { %v25341_v60 = vld [vmem:[#allocation41_spill] sm:$0xff] }
 0xaaa   : > { %v13836_v27 = vpop.permute.xlu0 %13835  ;;  %v13774_v23 = vpop.permute.xlu1 %13773  ;;  %v14200_v0 = vsel %vm9859_vm14, %v25314_v53, %v23061_v44  ;;  %v25316_v44 = vld [vmem:[#allocation114_spill] sm:$0xff]  ;;  %v25342_v53 = vcombine.low %v25340_v48, %v25341_v60 }
 0xaab   : > { %v14229_v6 = vsel %vm9886_vm1, %v14221_v63, %v13836_v27  ;;  %v12625_v63 = vcombine.low %v12574_v25, %v12606_v3  ;;  %v25318_v27 = vcombine.low %v25316_v44, %v25317_v43 }
 0xaac   : > { %14079 = vrot.lane.b32.xlu0 %v25303_v39, %s14939_s14  ;;  %14017 = vrot.lane.b32.xlu1 %v12081_v26, %s14937_s1  ;;  %v25319_v26 = vcombine.high %v25304_v22, %v25305_v30  ;;  %v25321_v39 = vld [vmem:[#allocation32_spill] sm:$0xff] }
 0xaae   : > { %v13856_v54 = vpop.permute.xlu0 %13855  ;;  %v13794_v4 = vpop.permute.xlu1 %13793 }
 0xaaf   : > { %v14231_v50 = vsel %vm9895_vm2, %v14223_v47, %v13856_v54  ;;  %v13662_v47 = vrot.slane %v13648_v11, %v24966_v51  ;;  %v25311_v51 = vcombine.low %v22497_v62, %v22500_v58  ;;  %v25315_v62 = vcombine.high %v25301_v38, %v25302_v8 }
 0xab0   : > { %14083 = vrot.lane.b32.xlu0 %v25306_v33, %s14939_s14  ;;  %14021 = vrot.lane.b32.xlu1 %v12625_v63, %s14937_s1  ;;  %v14208_v58 = vsel %vm9868_vm15, %v14200_v0, %v23119_v45 }
 0xab1   : > { %v13713_v15 = vcombine.low %v13662_v47, %v13694_v9  ;;  %v13714_v12 = vcombine.high %v13662_v47, %v13694_v9  ;;  %v25326_v9 = vld [vmem:[#allocation146_spill] sm:$0xff] }
 0xab2   : > { %v13860_v7 = vpop.permute.xlu0 %13859  ;;  %v13798_v29 = vpop.permute.xlu1 %13797  ;;  %v25329_v47 = vld [vmem:[#allocation130_spill] sm:$0xff] }
 0xab3   : > { %v14233_v36 = vsel %vm9895_vm2, %v14225_v20, %v13860_v7  ;;  %v14206_v20 = vsel %vm9859_vm14, %v25311_v51, %v23102_v35  ;;  %v14216_v35 = vsel %vm9877_vm0, %v14208_v58, %v13794_v4  ;;  %v25323_v4 = vcombine.high %v25307_v49, %v25308_v5 }
 0xab4   : > { %14087 = vrot.lane.b32.xlu0 %v25309_v57, %s14939_s14  ;;  %14025 = vrot.lane.b32.xlu1 %v13169_v31, %s14937_s1  ;;  %v14214_v52 = vsel %vm9868_vm15, %v14206_v20, %v13774_v23  ;;  %v14202_v23 = vsel %vm9859_vm14, %v25318_v27, %v23086_v41  ;;  %v25320_v41 = vld [vmem:[#allocation156_spill] sm:$0xff] }
 0xab5   : > { %v14210_v45 = vsel %vm9868_vm15, %v14202_v23, %v23136_v32  ;;  %v25322_v2 = vcombine.low %v25320_v41, %v25321_v39 }
 0xab6   : > { %v13864_v24 = vpop.permute.xlu0 %13863  ;;  %v13802_v18 = vpop.permute.xlu1 %13801 }
 0xab7   : > { %v14235_v37 = vsel %vm9895_vm2, %v14227_v13, %v13864_v24  ;;  %v12626_v13 = vcombine.high %v12574_v25, %v12606_v3  ;;  %v14218_v3 = vsel %vm9877_vm0, %v14210_v45, %v13798_v29  ;;  %v14204_v54 = vsel %vm9859_vm14, %v25322_v2, %v23092_v16  ;;  %v25325_v29 = vld [vmem:[#allocation131_spill] sm:$0xff] }
 0xab8   : > { %14091 = vrot.lane.b32.xlu0 %v25310_v14, %s14939_s14  ;;  %14029 = vrot.lane.b32.xlu1 %v13713_v15, %s14937_s1  ;;  %v14212_v32 = vsel %vm9868_vm15, %v14204_v54, %v23154_v40  ;;  %v25324_v16 = vcombine.high %v22521_v34, %v22509_v42  ;;  %v25327_v31 = vcombine.low %v25325_v29, %v25326_v9  ;;  %v25331_v24 = vld [vmem:[#allocation163_spill] sm:$0xff]  ;;  %v25335_v14 = vld [vmem:[#allocation22_spill] sm:$0xff] }
 0xab9   : > { %v14220_v55 = vsel %vm9877_vm0, %v14212_v32, %v13802_v18  ;;  %v25332_v18 = vld [vmem:[#allocation99_spill] sm:$0xff]  ;;  %v25349_v45 = vcombine.high %v25325_v29, %v25326_v9  ;;  %v25358_v9 = vld [vmem:[#allocation70_spill] sm:$0xff] }
 0xaba   : > { %v13868_v1 = vpop.permute.xlu0 %13867  ;;  %v13806_v46 = vpop.permute.xlu1 %13805  ;;  %v25333_v15 = vcombine.low %v25331_v24, %v25332_v18  ;;  %v25357_v29 = vld [vmem:[#allocation143_spill] sm:$0xff] }
 0xabb   : > { %v14237_v59 = vsel %vm9895_vm2, %v14229_v6, %v13868_v1  ;;  %v14222_v10 = vsel %vm9877_vm0, %v14214_v52, %v13806_v46 }
 0xabc   : > { %14111 = vrot.lane.b32.xlu0 %v25315_v62, %s14940_s26  ;;  %14049 = vrot.lane.b32.xlu1 %v12082_v19, %s14938_s17  ;;  %v25337_v19 = vld [vmem:[#allocation171_spill] sm:$0xff] }
 0xabe   : > { %v13888_v21 = vpop.permute.xlu0 %13887  ;;  %v13826_v17 = vpop.permute.xlu1 %13825 }
 0xabf   : > { %v14239_v56 = vsel %vm1340_vm13, %v14231_v50, %v13888_v21  ;;  %v14224_v28 = vsel %vm9886_vm1, %v14216_v35, %v13826_v17  ;;  %v25343_v21 = vld [vmem:[#allocation88_spill] sm:$0xff]  ;;  %v25344_v17 = vld [vmem:[#allocation67_spill] sm:$0xff] }
 0xac0   : > { %14115 = vrot.lane.b32.xlu0 %v25319_v26, %s14940_s26  ;;  %14053 = vrot.lane.b32.xlu1 %v12626_v13, %s14938_s17  ;;  %v25345_v13 = vcombine.low %v25343_v21, %v25344_v17 }
 0xac2   : > { %v13892_v6 = vpop.permute.xlu0 %13891  ;;  %v13830_v25 = vpop.permute.xlu1 %13829 }
 0xac3   : > { %v14241_v38 = vsel %vm1340_vm13, %v14233_v36, %v13892_v6  ;;  %v14226_v8 = vsel %vm9886_vm1, %v14218_v3, %v13830_v25  ;;  %v25328_v36 = vld [vmem:[#allocation25_spill] sm:$0xff] }
 0xac4   : > { %14119 = vrot.lane.b32.xlu0 %v25323_v4, %s14940_s26  ;;  %14057 = vrot.lane.b32.xlu1 %v13170_v61, %s14938_s17  ;;  %v25330_v49 = vcombine.low %v25328_v36, %v25329_v47  ;;  %v25350_v3 = vcombine.high %v25328_v36, %v25329_v47 }
 0xac6   : > { %v13896_v63 = vpop.permute.xlu0 %13895  ;;  %v13834_v50 = vpop.permute.xlu1 %13833 }
 0xac7   : > { %v14243_v11 = vsel %vm1340_vm13, %v14235_v37, %v13896_v63  ;;  %v14228_v22 = vsel %vm9886_vm1, %v14220_v55, %v13834_v50  ;;  %v25334_v37 = vld [vmem:[#allocation65_spill] sm:$0xff]  ;;  %v25354_v55 = vcombine.high %v25340_v48, %v25341_v60 }
 0xac8   : > { %14123 = vrot.lane.b32.xlu0 %v25324_v16, %s14940_s26  ;;  %14061 = vrot.lane.b32.xlu1 %v13714_v12, %s14938_s17  ;;  %v25336_v51 = vcombine.low %v25334_v37, %v25335_v14  ;;  %v25352_v41 = vcombine.high %v25334_v37, %v25335_v14  ;;  %v25363_v14 = vld [vmem:[#allocation97_spill] sm:$0xff] }
 0xaca   : > { %v13900_v30 = vpop.permute.xlu0 %13899  ;;  %v13838_v33 = vpop.permute.xlu1 %13837 }
 0xacb   : > { %v14245_v40 = vsel %vm1340_vm13, %v14237_v59, %v13900_v30  ;;  %v14230_v7 = vsel %vm9886_vm1, %v14222_v10, %v13838_v33  ;;  %v25338_v59 = vld [vmem:[#allocation51_spill] sm:$0xff] }
 0xacc   : > { %14143 = vrot.lane.b32.xlu0 %v25327_v31, %s14941_s29  ;;  %14081 = vrot.lane.b32.xlu1 %v25330_v49, %s14939_s14  ;;  %v25339_v10 = vcombine.low %v25337_v19, %v25338_v59  ;;  %v25353_v32 = vcombine.high %v25337_v19, %v25338_v59  ;;  %v25359_v31 = vcombine.low %v25357_v29, %v25358_v9  ;;  %v25366_v59 = vld [vmem:[#allocation117_spill] sm:$0xff] }
 0xace   : > { %v13920_v42 = vpop.permute.xlu0 %13919  ;;  %v13858_v34 = vpop.permute.xlu1 %13857 }
 0xacf   : > { %v14247_v5 = vsel %vm9912_vm4, %v14239_v56, %v13920_v42  ;;  %v14232_v57 = vsel %vm9895_vm2, %v14224_v28, %v13858_v34  ;;  %v25346_v56 = vld [vmem:[#allocation79_spill] sm:$0xff] }
 0xad0   : > { %14147 = vrot.lane.b32.xlu0 %v25333_v15, %s14941_s29  ;;  %14085 = vrot.lane.b32.xlu1 %v25336_v51, %s14939_s14  ;;  %v25347_v28 = vld [vmem:[#allocation75_spill] sm:$0xff] }
 0xad1   : > { %v25348_v44 = vcombine.low %v25346_v56, %v25347_v28  ;;  %v25356_v16 = vcombine.high %v25346_v56, %v25347_v28  ;;  %v25360_v34 = vld [vmem:[#allocation47_spill] sm:$0xff] }
 0xad2   : > { %v13924_v20 = vpop.permute.xlu0 %13923  ;;  %v13862_v52 = vpop.permute.xlu1 %13861  ;;  %v25364_v51 = vld [vmem:[#allocation63_spill] sm:$0xff] }
 0xad3   : > { %v14249_v1 = vsel %vm9912_vm4, %v14241_v38, %v13924_v20  ;;  %v14234_v46 = vsel %vm9895_vm2, %v14226_v8, %v13862_v52  ;;  %v25351_v8 = vcombine.high %v25331_v24, %v25332_v18  ;;  %v25365_v20 = vcombine.low %v25363_v14, %v25364_v51 }
 0xad4   : > { %14151 = vrot.lane.b32.xlu0 %v25339_v10, %s14941_s29  ;;  %14089 = vrot.lane.b32.xlu1 %v25342_v53, %s14939_s14  ;;  %v25367_v10 = vld [vmem:[#allocation118_spill] sm:$0xff] }
 0xad5   : > { %v25368_v48 = vcombine.low %v25366_v59, %v25367_v10 }
 0xad6   : > { %v13928_v0 = vpop.permute.xlu0 %13927  ;;  %v13866_v62 = vpop.permute.xlu1 %13865 }
 0xad7   : > { %v14251_v58 = vsel %vm9912_vm4, %v14243_v11, %v13928_v0  ;;  %v14236_v35 = vsel %vm9895_vm2, %v14228_v22, %v13866_v62  ;;  %v25355_v22 = vcombine.high %v25343_v21, %v25344_v17 }
 0xad8   : > { %14155 = vrot.lane.b32.xlu0 %v25345_v13, %s14941_s29  ;;  %14093 = vrot.lane.b32.xlu1 %v25348_v44, %s14939_s14 }
 0xada   : > { %v13932_v43 = vpop.permute.xlu0 %13931  ;;  %v13870_v27 = vpop.permute.xlu1 %13869 }
 0xadb   : > { %v14253_v23 = vsel %vm9912_vm4, %v14245_v40, %v13932_v43  ;;  %v14238_v26 = vsel %vm9895_vm2, %v14230_v7, %v13870_v27 }
 0xadc   : > { %14175 = vrot.lane.b32.xlu0 %v25349_v45, %s14942_s16  ;;  %14113 = vrot.lane.b32.xlu1 %v25350_v3, %s14940_s26 }
 0xade   : > { %v13952_v6 = vpop.permute.xlu0 %13951  ;;  %v13890_v25 = vpop.permute.xlu1 %13889 }
 0xadf   : > { %v14255_v61 = vsel %vm1214_vm5, %v14247_v5, %v13952_v6  ;;  %v14240_v38 = vsel %vm1340_vm13, %v14232_v57, %v13890_v25  ;;  %v25361_v5 = vld [vmem:[#allocation45_spill] sm:$0xff]  ;;  %v25372_v25 = vcombine.high %v25366_v59, %v25367_v10 }
 0xae0   : > { %14179 = vrot.lane.b32.xlu0 %v25351_v8, %s14942_s16  ;;  %14117 = vrot.lane.b32.xlu1 %v25352_v41, %s14940_s26  ;;  %v25362_v57 = vcombine.low %v25360_v34, %v25361_v5  ;;  %v25370_v56 = vcombine.high %v25360_v34, %v25361_v5 }
 0xae2   : > { %v13956_v39 = vpop.permute.xlu0 %13955  ;;  %v13894_v2 = vpop.permute.xlu1 %13893 }
 0xae3   : > { %v14257_v54 = vsel %vm1214_vm5, %v14249_v1, %v13956_v39  ;;  %v14242_v4 = vsel %vm1340_vm13, %v14234_v46, %v13894_v2 }
 0xae4   : > { %14183 = vrot.lane.b32.xlu0 %v25353_v32, %s14942_s16  ;;  %14121 = vrot.lane.b32.xlu1 %v25354_v55, %s14940_s26 }
 0xae6   : > { %v13960_v63 = vpop.permute.xlu0 %13959  ;;  %v13898_v50 = vpop.permute.xlu1 %13897 }
 0xae7   : > { %v14259_v12 = vsel %vm1214_vm5, %v14251_v58, %v13960_v63  ;;  %v14244_v11 = vsel %vm1340_vm13, %v14236_v35, %v13898_v50  ;;  %v25369_v58 = vcombine.high %v25357_v29, %v25358_v9 }
 0xae8   : > { %14187 = vrot.lane.b32.xlu0 %v25355_v22, %s14942_s16  ;;  %14125 = vrot.lane.b32.xlu1 %v25356_v16, %s14940_s26 }
 0xaea   : > { %v13964_v30 = vpop.permute.xlu0 %13963  ;;  %v13902_v33 = vpop.permute.xlu1 %13901 }
 0xaeb   : > { %v14261_v40 = vsel %vm1214_vm5, %v14253_v23, %v13964_v30  ;;  %v14246_v7 = vsel %vm1340_vm13, %v14238_v26, %v13902_v33  ;;  %v25371_v23 = vcombine.high %v25363_v14, %v25364_v51 }
 0xaec   : > { %14145 = vrot.lane.b32.xlu1 %v25359_v31, %s14941_s29 }
 0xaee   : > { %v13984_v36 = vpop.permute.xlu0 %13983  ;;  %v13922_v47 = vpop.permute.xlu1 %13921 }
 0xaef   : > { %v14263_v49 = vsel %vm9929_vm6, %v14255_v61, %v13984_v36  ;;  %v14248_v42 = vsel %vm9912_vm4, %v14240_v38, %v13922_v47 }
 0xaf0   : > { %14149 = vrot.lane.b32.xlu1 %v25362_v57, %s14941_s29 }
 0xaf2   : > { %v13988_v24 = vpop.permute.xlu0 %13987  ;;  %v13926_v18 = vpop.permute.xlu1 %13925 }
 0xaf3   : > { %v14265_v15 = vsel %vm9929_vm6, %v14257_v54, %v13988_v24  ;;  %v14250_v37 = vsel %vm9912_vm4, %v14242_v4, %v13926_v18 }
 0xaf4   : > { %14153 = vrot.lane.b32.xlu1 %v25365_v20, %s14941_s29 }
 0xaf6   : > { %v13992_v52 = vpop.permute.xlu0 %13991  ;;  %v13930_v1 = vpop.permute.xlu1 %13929 }
 0xaf7   : > { %v14267_v46 = vsel %vm9929_vm6, %v14259_v12, %v13992_v52  ;;  %v14252_v19 = vsel %vm9912_vm4, %v14244_v11, %v13930_v1 }
 0xaf8   : > { %14157 = vrot.lane.b32.xlu1 %v25368_v48, %s14941_s29 }
 0xafa   : > { %v13996_v60 = vpop.permute.xlu0 %13995  ;;  %v13934_v53 = vpop.permute.xlu1 %13933 }
 0xafb   : > { %v14269_v0 = vsel %vm9929_vm6, %v14261_v40, %v13996_v60  ;;  %v14254_v62 = vsel %vm9912_vm4, %v14246_v7, %v13934_v53 }
 0xafc   : > { %14177 = vrot.lane.b32.xlu1 %v25369_v58, %s14942_s16 }
 0xafe   : > { %v14016_v35 = vpop.permute.xlu0 %14015  ;;  %v13954_v21 = vpop.permute.xlu1 %13953 }
 0xaff   : > { %v14271_v17 = vsel %vm9938_vm7, %v14263_v49, %v14016_v35  ;;  %v14256_v13 = vsel %vm1214_vm5, %v14248_v42, %v13954_v21 }
 0xb00   : > { %14181 = vrot.lane.b32.xlu1 %v25370_v56, %s14942_s16 }
 0xb02   : > { %v14020_v28 = vpop.permute.xlu0 %14019  ;;  %v13958_v44 = vpop.permute.xlu1 %13957 }
 0xb03   : > { %v14273_v43 = vsel %vm9938_vm7, %v14265_v15, %v14020_v28  ;;  %v14258_v27 = vsel %vm1214_vm5, %v14250_v37, %v13958_v44 }
 0xb04   : > { %14185 = vrot.lane.b32.xlu1 %v25371_v23, %s14942_s16 }
 0xb06   : > { %v14024_v26 = vpop.permute.xlu0 %14023  ;;  %v13962_v45 = vpop.permute.xlu1 %13961 }
 0xb07   : > { %v14275_v3 = vsel %vm9938_vm7, %v14267_v46, %v14024_v26  ;;  %v14260_v6 = vsel %vm1214_vm5, %v14252_v19, %v13962_v45 }
 0xb08   : > { %14189 = vrot.lane.b32.xlu1 %v25372_v25, %s14942_s16 }
 0xb0a   : > { %v14028_v61 = vpop.permute.xlu0 %14027  ;;  %v13966_v38 = vpop.permute.xlu1 %13965 }
 0xb0b   : > { %v23387_v8 = vsel %vm9938_vm7, %v14269_v0, %v14028_v61  ;;  %v14262_v41 = vsel %vm1214_vm5, %v14254_v62, %v13966_v38 }
 0xb0e   : > { %v14048_v39 = vpop.permute.xlu0 %14047  ;;  %v13986_v2 = vpop.permute.xlu1 %13985 }
 0xb0f   : > { %v14264_v54 = vsel %vm9929_vm6, %v14256_v13, %v13986_v2  ;;  %v14279_v60 = vsel %vm9947_vm8, %v14271_v17, %v14048_v39 }
 0xb12   : > { %v14052_v4 = vpop.permute.xlu0 %14051  ;;  %v13990_v32 = vpop.permute.xlu1 %13989 }
 0xb13   : > { %v14266_v55 = vsel %vm9929_vm6, %v14258_v27, %v13990_v32  ;;  %v14281_v21 = vsel %vm9947_vm8, %v14273_v43, %v14052_v4 }
 0xb16   : > { %v14056_v63 = vpop.permute.xlu0 %14055  ;;  %v13994_v50 = vpop.permute.xlu1 %13993 }
 0xb17   : > { %v14268_v12 = vsel %vm9929_vm6, %v14260_v6, %v13994_v50  ;;  %v14283_v23 = vsel %vm9947_vm8, %v14275_v3, %v14056_v63 }
 0xb1a   : > { %v14060_v11 = vpop.permute.xlu0 %14059  ;;  %v13998_v22 = vpop.permute.xlu1 %13997 }
 0xb1b   : > { %v14270_v16 = vsel %vm9929_vm6, %v14262_v41, %v13998_v22  ;;  %v14285_v38 = vsel %vm9947_vm8, %v23387_v8, %v14060_v11 }
 0xb1e   : > { %v14080_v30 = vpop.permute.xlu0 %14079  ;;  %v14018_v33 = vpop.permute.xlu1 %14017 }
 0xb1f   : > { %v23395_v40 = vsel %vm9938_vm7, %v14264_v54, %v14018_v33  ;;  %v14287_v53 = vsel %vm9956_vm9, %v14279_v60, %v14080_v30 }
 0xb22   : > { %v14084_v7 = vpop.permute.xlu0 %14083  ;;  %v14022_v29 = vpop.permute.xlu1 %14021 }
 0xb23   : > { %v23398_v9 = vsel %vm9938_vm7, %v14266_v55, %v14022_v29  ;;  %v14289_v56 = vsel %vm9956_vm9, %v14281_v21, %v14084_v7 }
 0xb26   : > { %v14088_v31 = vpop.permute.xlu0 %14087  ;;  %v14026_v36 = vpop.permute.xlu1 %14025 }
 0xb27   : > { %v23401_v47 = vsel %vm9938_vm7, %v14268_v12, %v14026_v36  ;;  %v14291_v45 = vsel %vm9956_vm9, %v14283_v23, %v14088_v31 }
 0xb2a   : > { %v14092_v49 = vpop.permute.xlu0 %14091  ;;  %v14030_v42 = vpop.permute.xlu1 %14029 }
 0xb2b   : > { %v23404_v34 = vsel %vm9938_vm7, %v14270_v16, %v14030_v42  ;;  %v14293_v39 = vsel %vm9956_vm9, %v14285_v38, %v14092_v49 }
 0xb2e   : > { %v14112_v5 = vpop.permute.xlu0 %14111  ;;  %v14050_v57 = vpop.permute.xlu1 %14049 }
 0xb2f   : > { %v14295_v0 = vsel %vm9965_vm10, %v14287_v53, %v14112_v5  ;;  %v14280_v8 = vsel %vm9947_vm8, %v23395_v40, %v14050_v57 }
 0xb32   : > { %v14116_v24 = vpop.permute.xlu0 %14115  ;;  %v14054_v18 = vpop.permute.xlu1 %14053 }
 0xb33   : > { %v14297_v28 = vsel %vm9965_vm10, %v14289_v56, %v14116_v24  ;;  %v14282_v33 = vsel %vm9947_vm8, %v23398_v9, %v14054_v18 }
 0xb36   : > { %v14120_v15 = vpop.permute.xlu0 %14119  ;;  %v14058_v37 = vpop.permute.xlu1 %14057 }
 0xb37   : > { %v14299_v43 = vsel %vm9965_vm10, %v14291_v45, %v14120_v15  ;;  %v14284_v49 = vsel %vm9947_vm8, %v23401_v47, %v14058_v37 }
 0xb3a   : > { %v14124_v14 = vpop.permute.xlu0 %14123  ;;  %v23406_v51 = vpop.permute.xlu1 %14061 }
 0xb3b   : > { %v14301_v3 = vsel %vm9965_vm10, %v14293_v39, %v14124_v14  ;;  %v14286_v18 = vsel %vm9947_vm8, %v23404_v34, %v23406_v51 }
 0xb3e   : > { %v14144_v20 = vpop.permute.xlu0 %14143  ;;  %v14082_v52 = vpop.permute.xlu1 %14081 }
 0xb3f   : > { %v14303_v62 = vsel %vm9974_vm11, %v14295_v0, %v14144_v20  ;;  %v14288_v11 = vsel %vm9956_vm9, %v14280_v8, %v14082_v52 }
 0xb42   : > { %v14148_v1 = vpop.permute.xlu0 %14147  ;;  %v14086_v46 = vpop.permute.xlu1 %14085 }
 0xb43   : > { %v14305_v17 = vsel %vm9974_vm11, %v14297_v28, %v14148_v1  ;;  %v14290_v29 = vsel %vm9956_vm9, %v14282_v33, %v14086_v46 }
 0xb46   : > { %v14152_v19 = vpop.permute.xlu0 %14151  ;;  %v14090_v59 = vpop.permute.xlu1 %14089 }
 0xb47   : > { %v14307_v6 = vsel %vm9974_vm11, %v14299_v43, %v14152_v19  ;;  %v14292_v5 = vsel %vm9956_vm9, %v14284_v49, %v14090_v59 }
 0xb4a   : > { %v14156_v10 = vpop.permute.xlu0 %14155  ;;  %v14094_v48 = vpop.permute.xlu1 %14093 }
 0xb4b   : > { %v14309_v2 = vsel %vm9974_vm11, %v14301_v3, %v14156_v10  ;;  %v14294_v15 = vsel %vm9956_vm9, %v14286_v18, %v14094_v48 }
 0xb4e   : > { %v14176_v58 = vpop.permute.xlu0 %14175  ;;  %v14114_v35 = vpop.permute.xlu1 %14113 }
 0xb4f   : > { %v14311_v13 = vsel %vm9983_vm12, %v14303_v62, %v14176_v58  ;;  %v14296_v22 = vsel %vm9965_vm10, %v14288_v11, %v14114_v35 }
 0xb50   : > { %14566 = vst [vmem:[%s20613_s24 + $0x1] ss:$2 sm:$0xff] %v14311_v13 }
 0xb52   : > { %v14180_v44 = vpop.permute.xlu0 %14179  ;;  %v14118_v27 = vpop.permute.xlu1 %14117 }
 0xb53   : > { %v14313_v26 = vsel %vm9983_vm12, %v14305_v17, %v14180_v44  ;;  %v14298_v40 = vsel %vm9965_vm10, %v14290_v29, %v14118_v27 }
 0xb54   : > { %14568 = vst [vmem:[%s20613_s24 + $0x21] ss:$2 sm:$0xff] %v14313_v26 }
 0xb56   : > { %v14184_v25 = vpop.permute.xlu0 %14183  ;;  %v14122_v61 = vpop.permute.xlu1 %14121 }
 0xb57   : > { %v14315_v41 = vsel %vm9983_vm12, %v14307_v6, %v14184_v25  ;;  %v14300_v9 = vsel %vm9965_vm10, %v14292_v5, %v14122_v61 }
 0xb58   : > { %14570 = vst [vmem:[%s20613_s24 + $0x41] ss:$2 sm:$0xff] %v14315_v41 }
 0xb5a   : > { %v14188_v54 = vpop.permute.xlu0 %14187  ;;  %v14126_v4 = vpop.permute.xlu1 %14125 }
 0xb5b   : > { %v14317_v32 = vsel %vm9983_vm12, %v14309_v2, %v14188_v54  ;;  %v14302_v37 = vsel %vm9965_vm10, %v14294_v15, %v14126_v4 }
 0xb5c   : > { %14572 = vst [vmem:[%s20613_s24 + $0x61] ss:$2 sm:$0xff] %v14317_v32 }
 0xb5e   : > { %v14146_v55 = vpop.permute.xlu1 %14145 }
 0xb5f   : > { %v14304_v16 = vsel %vm9974_vm11, %v14296_v22, %v14146_v55 }
 0xb62   : > { %v14150_v63 = vpop.permute.xlu1 %14149 }
 0xb63   : > { %v14306_v31 = vsel %vm9974_vm11, %v14298_v40, %v14150_v63 }
 0xb66   : > { %v14154_v50 = vpop.permute.xlu1 %14153 }
 0xb67   : > { %v14308_v57 = vsel %vm9974_vm11, %v14300_v9, %v14154_v50 }
 0xb6a   : > { %v14158_v12 = vpop.permute.xlu1 %14157 }
 0xb6b   : > { %v14310_v14 = vsel %vm9974_vm11, %v14302_v37, %v14158_v12 }
 0xb6e   : > { %v14178_v30 = vpop.permute.xlu1 %14177 }
 0xb6f   : > { %v14312_v7 = vsel %vm9983_vm12, %v14304_v16, %v14178_v30 }
 0xb70   : > { %14567 = vst [vmem:[%s20613_s24 + $0x11] ss:$2 sm:$0xff] %v14312_v7 }
 0xb72   : > { %v14182_v36 = vpop.permute.xlu1 %14181 }
 0xb73   : > { %v14314_v42 = vsel %vm9983_vm12, %v14306_v31, %v14182_v36 }
 0xb74   : > { %14569 = vst [vmem:[%s20613_s24 + $0x31] ss:$2 sm:$0xff] %v14314_v42 }
 0xb76   : > { %v14186_v24 = vpop.permute.xlu1 %14185 }
 0xb77   : > { %v14316_v47 = vsel %vm9983_vm12, %v14308_v57, %v14186_v24 }
 0xb78   : > { %14571 = vst [vmem:[%s20613_s24 + $0x51] ss:$2 sm:$0xff] %v14316_v47 }
 0xb7a   : > { %v14190_v20 = vpop.permute.xlu1 %14189 }
 0xb7b   : > { %v14318_v34 = vsel %vm9983_vm12, %v14310_v14, %v14190_v20 }
 0xb7c   : > { %14573 = vst [vmem:[%s20613_s24 + $0x71] ss:$2 sm:$0xff] %v14318_v34 }
 0xb7d   : > { %14831 = shalt.err (!%p14828_p6)
}
 0xb7e   : > { %s14832_s7 = scalar_lea.hbm %s23464_s20, 2048  ;;  %s14836_s14 = scalar_lea.hbm %s23523_s5, 4096 }
 0xb7f   : > { %p14833_p9 = scmp.ne.s32.totalorder %s23464_s20, %s14832_s7  ;;  %p14837_p7 = scmp.lt.s32.totalorder %s23464_s20, %s23523_s5 }
 0xb80   : > { %p14838_p2 = scmp.lt.s32.totalorder %s14836_s14, %s14832_s7 }
 0xb81   : > { %p14834_p4 = pnand %p14833_p9, %p15071_p12 }
 0xb82   : > { %p14839_p11 = por %p14838_p2, %p14837_p7 }
 0xb83   : > { %p14835_p10 = pneg %p14834_p4 }
 0xb85   : > { %p14840_p0 = pnand %p14839_p11, %p14835_p10 }
 0xb87   : > { %14843 = shalt.err (!%p14840_p0)
}
 0xb88   : > { %s14944_s16 = smov 128  }
 0xb89   : > { %14599 = dma.vmem_to_hbm [thread:$0]  (%p15071_p12), %s23467_s22, 2048, %s23464_s20, %s14336_s21, %s14944_s16, %s14944_s16, %s14932_s13  }
 0xb8a PF: > { %s14366_s6 = sand.u32 1, %s14886_s18   ;;  %p25373_p1 = scmp.ge.s32.totalorder %s14906_s23, 2 }
 0xb8b   : > { %s14367_s24 = scalar_lea.sflag [#allocation4], %s14366_s6 }
 0xb8c   : > { %p14616_p3 = pnand %p25373_p1, %p15075_p13 }
 0xb8e   : > { %p14617_p5 = pneg %p14616_p3 }
 0xb90   : > { %14881 = dma.done.wait (%p14617_p5), %s14367_s24, 2048  }
 0xb91   : > { %14883 = vsyncadd (%p14617_p5), %s14367_s24, 4294965248  ;;  %s25_s23 = sadd.s32 1, %s14906_s23   ;;  %s25374_s10 = sld [smem:[#allocation15_spill]] }
 0xb92   : > { %p22_p8 = scmp.ge.s32.totalorder %s25_s23, 4   ;;  %s25375_s20 = sld [smem:[#allocation18_spill]] }
 0xb93   : > { %s25376_s21 = sld [smem:[#allocation16_spill]]  ;;  %s25378_s18 = smov %s14890_s19 }
 0xb94   : > { %s25377_s22 = sld [smem:[#allocation17_spill]]  ;;  %24 = sbr.rel (!%p22_p8) target bundleno = 11 (0xb), region = 130 }
 0xb97   : > { %s25379_s19 = smov %s25374_s10 }
 0xb99   :  { %14372 = vsyncpa [#allocation3], 1 }
 0xb9a   :  { %14374 = vsyncpa [#allocation3 + $0x1], 1 }
 0xb9b   :  { %14375 = vsyncpa [#allocation6], 1 }
 0xb9c   :  { %14377 = vsyncpa [#allocation6 + $0x1], 1 }
 0xb9d   :  { %14378 = vsyncpa [#allocation9], 1 }
 0xb9e   :  { %14379 = vsyncpa [#allocation4], 1 }
 0xb9f   :  { %14381 = vsyncpa [#allocation4 + $0x1], 1 }

</bundles_post_ra>
